<compile_context>
chip_gen: v7x
topology: tpu7x:2x2x1
jax: 0.10.0
libtpu: 0.0.40
codegen_flags: <defaults>
</compile_context>

<pallas_src>
import functools

import jax
import jax.numpy as jnp
from jax.experimental import pallas as pl
from jax.experimental.pallas import tpu as pltpu

FEAT_C = 2048          # ResNet50 backbone output channels
ATT_HID = FEAT_C // 4  # 512, hidden dim of the attention 1x1-conv MLP
EMB_DIM = 128          # embedding_dim (small, TPU-friendly multiple of 128)
PATCH = 32             # backbone total stride (ResNet50 downsamples by 32)


# ----------------------------------------------------------------------------
# Generation gating (bf16 elementwise path, tile / VMEM budgets).
# ----------------------------------------------------------------------------
def _tpu_generation():
    try:
        kind = jax.devices()[0].device_kind.lower()
    except Exception:
        return "unknown"
    if "v5" in kind:                       # v5e / v5p: keep f32 elementwise path
        return "v5e"
    if "v7" in kind:
        return "v7x"
    if "v6" in kind or "trillium" in kind:
        return "v6e"
    return "unknown"


# gen -> (use_bf16_gate, max_rows, vmem_limit_bytes, vmem_budget_bytes, prefer_split)
_GEN_CONFIG = {
    "v5e":     (False, 1024, 96 << 20, 80 << 20, False),
    "v6e":     (True,  1024, 96 << 20, 80 << 20, False),
    "v7x":     (True,   512, 48 << 20, 40 << 20, True),
    "unknown": (True,   512, 48 << 20, 40 << 20, False),
}


def _resident_spec(shape):
    """Full-array block whose index never changes -> stays resident in VMEM."""
    nd = len(shape)
    return pl.BlockSpec(shape, lambda i, _nd=nd: (0,) * _nd)


def _pick_tile_b(b, hw, feat_c, *, max_rows, vmem_budget, use_bf16_gate,
                 prefer_split):
    """VMEM-aware whole-image batch tile.  rows per step = tile_b * 2 * hw
    (query + reference stacked).  Output layout needs tile_b % 8 == 0 or
    tile_b == b."""
    # Resident bf16 weights, double-buffered by the pipeline.
    weight_bytes = 2 * 2 * (feat_c * ATT_HID + ATT_HID * feat_c
                            + feat_c * EMB_DIM + 2 * EMB_DIM * EMB_DIM)
    per_row = (2 * feat_c * 2               # double-buffered bf16 input rows
               + feat_c * (4 + 4 + 2)       # att logits f32 + att + adapted bf16
               + ATT_HID * (4 + 2)          # a1 f32 + bf16 copy
               + EMB_DIM * 4)               # projected rows f32
    if not use_bf16_gate:
        per_row += feat_c * 4               # v5e: f32 upcast of the feature map

    def fits(t):
        return weight_bytes + t * 2 * hw * per_row <= vmem_budget

    divisors = [t for t in range(1, b + 1) if b % t == 0]
    layout_legal = [t for t in divisors if t % 8 == 0 or t == b]
    legal = [t for t in layout_legal if fits(t)]
    if not legal:
        # TODO(synk): extreme HW*B cases would need an hw-split reduction grid;
        # fall back to the smallest layout-legal tile instead of tile_b = b.
        return min(layout_legal)
    capped = [t for t in legal if t * 2 * hw <= max_rows]
    if not capped:
        capped = [min(legal)]
    if prefer_split and b >= 2:
        split = [t for t in capped if t <= b // 2]
        if split:                            # give v7x's 2nd TensorCore work
            capped = split
    return max(capped)                       # biggest tile that fits the budget


# ----------------------------------------------------------------------------
# Fused kernel: encoder tail (attention gate + projection + pool) for the
# stacked query/reference rows, then the similarity MLP, all in one grid step.
# ----------------------------------------------------------------------------
def _matcher_kernel(f_ref, w1_ref, b1_ref, w2_ref, b2_ref, wp_ref, bp_ref,
                    sw1_ref, sb1_ref, sw2_ref, sb2_ref, out_ref,
                    *, tile_b, hw, use_bf16_gate):
    rows = tile_b * 2 * hw
    feat_c = f_ref.shape[-1]
    f_bf = f_ref[...].reshape(rows, feat_c)                    # bf16 (rows, C)

    # AdaptiveFeatureExtractor: x * Sigmoid(Conv1x1(ReLU(Conv1x1(x))))
    a1 = jnp.maximum(
        jnp.dot(f_bf, w1_ref[...], preferred_element_type=jnp.float32)
        + b1_ref[...], 0.0)                                    # (rows, C//4) f32
    logits = (jnp.dot(a1.astype(jnp.bfloat16), w2_ref[...],
                      preferred_element_type=jnp.float32) + b2_ref[...])
    # sigmoid = exp (EUP) + approx reciprocal (EUP) -> keeps the VPU slots free
    att = pl.reciprocal(1.0 + jnp.exp(-logits), approx=True)   # (rows, C) f32
    if use_bf16_gate:
        adapted_bf = f_bf * att.astype(jnp.bfloat16)           # bf16 VALU (v6e/v7x)
    else:
        adapted_bf = (f_bf.astype(jnp.float32) * att).astype(jnp.bfloat16)  # v5e

    # projection: Conv1x1 -> ReLU -> AdaptiveAvgPool2d(1)
    p = jnp.maximum(
        jnp.dot(adapted_bf, wp_ref[...], preferred_element_type=jnp.float32)
        + bp_ref[...], 0.0)                                    # (rows, E) f32
    # hw is a multiple of 8 here; otherwise this reshape would force a relayout.
    emb = jnp.mean(p.reshape(tile_b, 2, hw, p.shape[-1]), axis=2)  # (tb, 2, E)
    q_emb = emb[:, 0, :]
    r_emb = emb[:, 1, :]
    e = q_emb.shape[-1]

    # similarity_net Linear(2E, E): split into two E x E matmuls so the
    # embeddings never need a lane-axis concat (torch.cat([q, r], dim=1) order).
    h = jnp.maximum(
        jnp.dot(q_emb.astype(jnp.bfloat16), sw1_ref[:e, :],
                preferred_element_type=jnp.float32)
        + jnp.dot(r_emb.astype(jnp.bfloat16), sw1_ref[e:, :],
                  preferred_element_type=jnp.float32)
        + sb1_ref[...], 0.0)                                   # (tile_b, E)
    # Linear(E, 1): VPU multiply + lane reduction (skip an N=1 MXU matmul).
    logit = jnp.sum(h * sw2_ref[...], axis=-1, keepdims=True) + sb2_ref[...]
    out_ref[...] = jax.nn.sigmoid(logit)                       # (tile_b, 1)


def symbol_matcher_fused(f_pair, enc_params, sim_params):
    """f_pair: (B, 2, HW, FEAT_C) bf16 channel-last features, [:,0]=query, [:,1]=ref."""
    b, two, hw, feat_c = f_pair.shape
    assert two == 2
    w1, b1, w2, b2, wp, bp = enc_params
    sw1, sb1, sw2, sb2 = sim_params
    # Stream matmul weights as bf16; biases / the (1,E) head stay f32.
    w1b, w2b, wpb, sw1b = (t.astype(jnp.bfloat16) for t in (w1, w2, wp, sw1))
    emb = wp.shape[-1]

    gen = _tpu_generation()
    use_bf16_gate, max_rows, vmem_limit, vmem_budget, prefer_split = _GEN_CONFIG[gen]
    tile_b = _pick_tile_b(b, hw, feat_c, max_rows=max_rows,
                          vmem_budget=vmem_budget,
                          use_bf16_gate=use_bf16_gate,
                          prefer_split=prefer_split)

    kernel = functools.partial(_matcher_kernel, tile_b=tile_b, hw=hw,
                               use_bf16_gate=use_bf16_gate)

    rows_total = b * 2 * hw
    flops = (2 * rows_total * (feat_c * ATT_HID + ATT_HID * feat_c + feat_c * emb)
             + 2 * b * (2 * emb * emb)
             + 4 * rows_total * feat_c)                         # gate / bias / relu
    bytes_accessed = (rows_total * feat_c * 2
                      + sum(int(t.size) * 2 for t in (w1b, w2b, wpb, sw1b))
                      + sum(int(t.size) * 4 for t in (b1, b2, bp, sb1, sw2, sb2))
                      + b * 4)
    cost = pl.CostEstimate(flops=int(flops),
                           transcendentals=int(rows_total * feat_c + b),
                           bytes_accessed=int(bytes_accessed))

    return pl.pallas_call(
        kernel,
        out_shape=jax.ShapeDtypeStruct((b, 1), jnp.float32),
        grid=(b // tile_b,),
        in_specs=[
            pl.BlockSpec((tile_b, 2, hw, feat_c), lambda i: (i, 0, 0, 0)),
            _resident_spec(w1b.shape), _resident_spec(b1.shape),
            _resident_spec(w2b.shape), _resident_spec(b2.shape),
            _resident_spec(wpb.shape), _resident_spec(bp.shape),
            _resident_spec(sw1b.shape), _resident_spec(sb1.shape),
            _resident_spec(sw2.shape), _resident_spec(sb2.shape),
        ],
        out_specs=pl.BlockSpec((tile_b, 1), lambda i: (i, 0)),
        compiler_params=pltpu.CompilerParams(
            dimension_semantics=("parallel",),   # shard batch tiles on v7x 2 TCs
            vmem_limit_bytes=vmem_limit),
        cost_estimate=cost,
    )(f_pair, w1b, b1, w2b, b2, wpb, bp, sw1b, sb1, sw2, sb2)


# ----------------------------------------------------------------------------
# Backbone stand-in (plain-JAX glue).
# TODO(synk): the pretrained torchvision ResNet50 backbone (children()[:-2])
# cannot be reproduced in-script; replaced by a deterministic stride-32
# patchify + bf16 linear + ReLU stem with the same (B, H/32, W/32, 2048)
# feature geometry, emitted channel-last in bf16 for the fused kernel.
# ----------------------------------------------------------------------------
def backbone_proxy(x_nchw, patch_w_bf16, patch_b):
    b, c, h, w = x_nchw.shape
    hp, wp_ = h // PATCH, w // PATCH
    x = x_nchw.reshape(b, c, hp, PATCH, wp_, PATCH)
    x = x.transpose(0, 2, 4, 1, 3, 5).reshape(b, hp * wp_, c * PATCH * PATCH)
    feat = jnp.maximum(
        jnp.einsum("bnp,pc->bnc", x.astype(jnp.bfloat16), patch_w_bf16,
                   preferred_element_type=jnp.float32) + patch_b, 0.0)
    return feat.astype(jnp.bfloat16)              # (B, HW, FEAT_C)


# ----------------------------------------------------------------------------
# Full SymbolMatcher.forward(query, reference)
# ----------------------------------------------------------------------------
def symbol_matcher_forward(query, reference, params):
    b = query.shape[0]
    pw = params["patch_w"].astype(jnp.bfloat16)
    # One backbone pass over the stacked (2B, ...) batch; pairs stay adjacent
    # (q0, r0, q1, r1, ...) so the fused kernel sees (B, 2, HW, C) tiles.
    x_pair = jnp.stack([query, reference], axis=1)             # (B, 2, 3, H, W)
    x_flat = x_pair.reshape((2 * b,) + query.shape[1:])
    feat = backbone_proxy(x_flat, pw, params["patch_b"])       # (2B, HW, C)
    f_pair = feat.reshape(b, 2, feat.shape[1], feat.shape[2])  # (B, 2, HW, C)
    return symbol_matcher_fused(f_pair, params["encoder"], params["similarity"])


# ----------------------------------------------------------------------------
# Deterministic parameter init (shapes follow the PyTorch module __init__).
# ----------------------------------------------------------------------------
def init_params(key, embedding_dim=EMB_DIM):
    ks = jax.random.split(key, 12)

    def dense(k, fan_in, shape):
        return (jax.random.normal(k, shape, jnp.float32)
                / jnp.sqrt(jnp.float32(fan_in)))

    patch_dim = 3 * PATCH * PATCH
    return {
        "patch_w": dense(ks[0], patch_dim, (patch_dim, FEAT_C)),
        "patch_b": jnp.zeros((1, FEAT_C), jnp.float32),
        "encoder": (
            dense(ks[2], FEAT_C, (FEAT_C, ATT_HID)),        # attention Conv 1x1
            dense(ks[3], FEAT_C, (1, ATT_HID)),
            dense(ks[4], ATT_HID, (ATT_HID, FEAT_C)),       # attention Conv 1x1
            dense(ks[5], ATT_HID, (1, FEAT_C)),
            dense(ks[6], FEAT_C, (FEAT_C, embedding_dim)),  # projection Conv
            dense(ks[7], FEAT_C, (1, embedding_dim)),
        ),
        "similarity": (
            dense(ks[8], 2 * embedding_dim, (2 * embedding_dim, embedding_dim)),
            dense(ks[9], 2 * embedding_dim, (1, embedding_dim)),
            dense(ks[10], embedding_dim, (1, embedding_dim)),  # Linear(E,1) row vec
            dense(ks[11], embedding_dim, (1, 1)),
        ),
    }


if __name__ == "__main__":
    root = jax.random.PRNGKey(0)
    k_params, k_q, k_r = jax.random.split(root, 3)

    B, IMG = 2, 128
    params = init_params(k_params)
    query = jax.random.normal(k_q, (B, 3, IMG, IMG), jnp.float32)
    reference = jax.random.normal(k_r, (B, 3, IMG, IMG), jnp.float32)

    out = jax.jit(symbol_matcher_forward)(query, reference, params)
    out = jax.block_until_ready(out)
    assert out.shape == (B, 1), out.shape
    assert bool(jnp.all((out >= 0.0) & (out <= 1.0)))
    print("KERNEL_OK")
</pallas_src>

<mosaic_0001>
module attributes {stable_mosaic.version = 11 : i64} {
  func.func @_matcher_kernel(%arg0: i32, %arg1: memref<2x2x16x2048xbf16, #tpu.memory_space<vmem>>, %arg2: memref<2048x512xbf16, #tpu.memory_space<vmem>>, %arg3: memref<1x512xf32, #tpu.memory_space<vmem>>, %arg4: memref<512x2048xbf16, #tpu.memory_space<vmem>>, %arg5: memref<1x2048xf32, #tpu.memory_space<vmem>>, %arg6: memref<2048x128xbf16, #tpu.memory_space<vmem>>, %arg7: memref<1x128xf32, #tpu.memory_space<vmem>>, %arg8: memref<256x128xbf16, #tpu.memory_space<vmem>>, %arg9: memref<1x128xf32, #tpu.memory_space<vmem>>, %arg10: memref<1x128xf32, #tpu.memory_space<vmem>>, %arg11: memref<1x1xf32, #tpu.memory_space<vmem>>, %arg12: memref<2x1xf32, #tpu.memory_space<vmem>>) attributes {dimension_semantics = [#tpu.dimension_semantics<parallel>], iteration_bounds = array<i64: 1>, scalar_prefetch = 0 : i64, scratch_operands = 0 : i64, tpu.core_type = #tpu.core_type<tc>, window_params = [{transform_indices = @transform_0, window_bounds = array<i64: 2, 2, 16, 2048>}, {pipeline_mode = #tpu.pipeline_mode<synchronous>, transform_indices = @transform_1, window_bounds = array<i64: 2048, 512>}, {pipeline_mode = #tpu.pipeline_mode<synchronous>, transform_indices = @transform_2, window_bounds = array<i64: 1, 512>}, {pipeline_mode = #tpu.pipeline_mode<synchronous>, transform_indices = @transform_3, window_bounds = array<i64: 512, 2048>}, {pipeline_mode = #tpu.pipeline_mode<synchronous>, transform_indices = @transform_4, window_bounds = array<i64: 1, 2048>}, {pipeline_mode = #tpu.pipeline_mode<synchronous>, transform_indices = @transform_5, window_bounds = array<i64: 2048, 128>}, {pipeline_mode = #tpu.pipeline_mode<synchronous>, transform_indices = @transform_6, window_bounds = array<i64: 1, 128>}, {pipeline_mode = #tpu.pipeline_mode<synchronous>, transform_indices = @transform_7, window_bounds = array<i64: 256, 128>}, {pipeline_mode = #tpu.pipeline_mode<synchronous>, transform_indices = @transform_8, window_bounds = array<i64: 1, 128>}, {pipeline_mode = #tpu.pipeline_mode<synchronous>, transform_indices = @transform_9, window_bounds = array<i64: 1, 128>}, {pipeline_mode = #tpu.pipeline_mode<synchronous>, transform_indices = @transform_10, window_bounds = array<i64: 1, 1>}, {transform_indices = @transform_11, window_bounds = array<i64: 2, 1>}]} {
    %c0 = arith.constant 0 : index
    %c0_0 = arith.constant 0 : index
    %c0_1 = arith.constant 0 : index
    %c0_2 = arith.constant 0 : index
    %0 = vector.load %arg1[%c0, %c0_0, %c0_1, %c0_2] : memref<2x2x16x2048xbf16, #tpu.memory_space<vmem>>, vector<2x2x16x2048xbf16>
    %1 = vector.shape_cast %0 : vector<2x2x16x2048xbf16> to vector<64x2048xbf16>
    %c0_3 = arith.constant 0 : index
    %c0_4 = arith.constant 0 : index
    %2 = vector.load %arg2[%c0_3, %c0_4] : memref<2048x512xbf16, #tpu.memory_space<vmem>>, vector<2048x512xbf16>
    %cst = arith.constant dense<0.000000e+00> : vector<64x512xf32>
    %3 = tpu.matmul %1, %2, %cst {dimension_numbers = #tpu.dot_dimension_numbers<[1], [0], [0], [1], [0, 0, 1, 1], [], []>} : vector<64x2048xbf16>, vector<2048x512xbf16>, vector<64x512xf32> -> vector<64x512xf32>
    %c0_5 = arith.constant 0 : index
    %c0_6 = arith.constant 0 : index
    %4 = vector.load %arg3[%c0_5, %c0_6] : memref<1x512xf32, #tpu.memory_space<vmem>>, vector<1x512xf32>
    %5 = vector.broadcast %4 : vector<1x512xf32> to vector<64x512xf32>
    %6 = arith.addf %3, %5 : vector<64x512xf32>
    %cst_7 = arith.constant 0.000000e+00 : f32
    %7 = vector.broadcast %cst_7 : f32 to vector<64x512xf32>
    %8 = arith.maximumf %6, %7 : vector<64x512xf32>
    %9 = arith.truncf %8 : vector<64x512xf32> to vector<64x512xbf16>
    %c0_8 = arith.constant 0 : index
    %c0_9 = arith.constant 0 : index
    %10 = vector.load %arg4[%c0_8, %c0_9] : memref<512x2048xbf16, #tpu.memory_space<vmem>>, vector<512x2048xbf16>
    %cst_10 = arith.constant dense<0.000000e+00> : vector<64x2048xf32>
    %11 = tpu.matmul %9, %10, %cst_10 {dimension_numbers = #tpu.dot_dimension_numbers<[1], [0], [0], [1], [0, 0, 1, 1], [], []>} : vector<64x512xbf16>, vector<512x2048xbf16>, vector<64x2048xf32> -> vector<64x2048xf32>
    %c0_11 = arith.constant 0 : index
    %c0_12 = arith.constant 0 : index
    %12 = vector.load %arg5[%c0_11, %c0_12] : memref<1x2048xf32, #tpu.memory_space<vmem>>, vector<1x2048xf32>
    %13 = vector.broadcast %12 : vector<1x2048xf32> to vector<64x2048xf32>
    %14 = arith.addf %11, %13 : vector<64x2048xf32>
    %cst_13 = arith.constant 0.000000e+00 : f32
    %15 = vector.broadcast %cst_13 : f32 to vector<64x2048xf32>
    %16 = arith.subf %15, %14 : vector<64x2048xf32>
    %17 = math.exp %16 : vector<64x2048xf32>
    %cst_14 = arith.constant 1.000000e+00 : f32
    %18 = vector.broadcast %cst_14 : f32 to vector<64x2048xf32>
    %19 = arith.addf %18, %17 : vector<64x2048xf32>
    %20 = tpu.reciprocal %19 {approx = true} : vector<64x2048xf32> -> vector<64x2048xf32>
    %21 = arith.truncf %20 : vector<64x2048xf32> to vector<64x2048xbf16>
    %22 = arith.mulf %1, %21 : vector<64x2048xbf16>
    %c0_15 = arith.constant 0 : index
    %c0_16 = arith.constant 0 : index
    %23 = vector.load %arg6[%c0_15, %c0_16] : memref<2048x128xbf16, #tpu.memory_space<vmem>>, vector<2048x128xbf16>
    %cst_17 = arith.constant dense<0.000000e+00> : vector<64x128xf32>
    %24 = tpu.matmul %22, %23, %cst_17 {dimension_numbers = #tpu.dot_dimension_numbers<[1], [0], [0], [1], [0, 0, 1, 1], [], []>} : vector<64x2048xbf16>, vector<2048x128xbf16>, vector<64x128xf32> -> vector<64x128xf32>
    %c0_18 = arith.constant 0 : index
    %c0_19 = arith.constant 0 : index
    %25 = vector.load %arg7[%c0_18, %c0_19] : memref<1x128xf32, #tpu.memory_space<vmem>>, vector<1x128xf32>
    %26 = vector.broadcast %25 : vector<1x128xf32> to vector<64x128xf32>
    %27 = arith.addf %24, %26 : vector<64x128xf32>
    %cst_20 = arith.constant 0.000000e+00 : f32
    %28 = vector.broadcast %cst_20 : f32 to vector<64x128xf32>
    %29 = arith.maximumf %27, %28 : vector<64x128xf32>
    %30 = vector.shape_cast %29 : vector<64x128xf32> to vector<2x2x16x128xf32>
    %cst_21 = arith.constant dense<0.000000e+00> : vector<2x2x128xf32>
    %31 = vector.multi_reduction <add>, %30, %cst_21 [2] : vector<2x2x16x128xf32> to vector<2x2x128xf32>
    %cst_22 = arith.constant 1.600000e+01 : f32
    %32 = vector.broadcast %cst_22 : f32 to vector<2x2x128xf32>
    %33 = arith.divf %31, %32 : vector<2x2x128xf32>
    %34 = vector.extract_strided_slice %33 {offsets = [0, 0, 0], sizes = [2, 1, 128], strides = [1, 1, 1]} : vector<2x2x128xf32> to vector<2x1x128xf32>
    %35 = vector.shape_cast %34 : vector<2x1x128xf32> to vector<2x128xf32>
    %36 = vector.extract_strided_slice %33 {offsets = [0, 1, 0], sizes = [2, 1, 128], strides = [1, 1, 1]} : vector<2x2x128xf32> to vector<2x1x128xf32>
    %37 = vector.shape_cast %36 : vector<2x1x128xf32> to vector<2x128xf32>
    %38 = arith.truncf %35 : vector<2x128xf32> to vector<2x128xbf16>
    %c0_23 = arith.constant 0 : index
    %c0_24 = arith.constant 0 : index
    %39 = vector.load %arg8[%c0_23, %c0_24] : memref<256x128xbf16, #tpu.memory_space<vmem>>, vector<128x128xbf16>
    %cst_25 = arith.constant dense<0.000000e+00> : vector<2x128xf32>
    %40 = tpu.matmul %38, %39, %cst_25 {dimension_numbers = #tpu.dot_dimension_numbers<[1], [0], [0], [1], [0, 0, 1, 1], [], []>} : vector<2x128xbf16>, vector<128x128xbf16>, vector<2x128xf32> -> vector<2x128xf32>
    %41 = arith.truncf %37 : vector<2x128xf32> to vector<2x128xbf16>
    %c128 = arith.constant 128 : index
    %c0_26 = arith.constant 0 : index
    %42 = vector.load %arg8[%c128, %c0_26] : memref<256x128xbf16, #tpu.memory_space<vmem>>, vector<128x128xbf16>
    %cst_27 = arith.constant dense<0.000000e+00> : vector<2x128xf32>
    %43 = tpu.matmul %41, %42, %cst_27 {dimension_numbers = #tpu.dot_dimension_numbers<[1], [0], [0], [1], [0, 0, 1, 1], [], []>} : vector<2x128xbf16>, vector<128x128xbf16>, vector<2x128xf32> -> vector<2x128xf32>
    %44 = arith.addf %40, %43 : vector<2x128xf32>
    %c0_28 = arith.constant 0 : index
    %c0_29 = arith.constant 0 : index
    %45 = vector.load %arg9[%c0_28, %c0_29] : memref<1x128xf32, #tpu.memory_space<vmem>>, vector<1x128xf32>
    %46 = vector.broadcast %45 : vector<1x128xf32> to vector<2x128xf32>
    %47 = arith.addf %44, %46 : vector<2x128xf32>
    %cst_30 = arith.constant 0.000000e+00 : f32
    %48 = vector.broadcast %cst_30 : f32 to vector<2x128xf32>
    %49 = arith.maximumf %47, %48 : vector<2x128xf32>
    %c0_31 = arith.constant 0 : index
    %c0_32 = arith.constant 0 : index
    %50 = vector.load %arg10[%c0_31, %c0_32] : memref<1x128xf32, #tpu.memory_space<vmem>>, vector<1x128xf32>
    %51 = vector.broadcast %50 : vector<1x128xf32> to vector<2x128xf32>
    %52 = arith.mulf %49, %51 : vector<2x128xf32>
    %cst_33 = arith.constant dense<0.000000e+00> : vector<2xf32>
    %53 = vector.multi_reduction <add>, %52, %cst_33 [1] : vector<2x128xf32> to vector<2xf32>
    %54 = vector.shape_cast %53 : vector<2xf32> to vector<2x1xf32>
    %c0_34 = arith.constant 0 : index
    %c0_35 = arith.constant 0 : index
    %55 = vector.load %arg11[%c0_34, %c0_35] : memref<1x1xf32, #tpu.memory_space<vmem>>, vector<1x1xf32>
    %56 = vector.broadcast %55 : vector<1x1xf32> to vector<2x1xf32>
    %57 = arith.addf %54, %56 : vector<2x1xf32>
    %58 = arith.negf %57 : vector<2x1xf32>
    %59 = math.exp %58 : vector<2x1xf32>
    %cst_36 = arith.constant 1.000000e+00 : f32
    %60 = vector.broadcast %cst_36 : f32 to vector<2x1xf32>
    %61 = arith.addf %60, %59 : vector<2x1xf32>
    %62 = arith.divf %60, %61 : vector<2x1xf32>
    %c0_37 = arith.constant 0 : index
    %c0_38 = arith.constant 0 : index
    %63 = vector.load %arg12[%c0_37, %c0_38] : memref<2x1xf32, #tpu.memory_space<vmem>>, vector<2x1xf32>
    tpu.vector_store %arg12[%c0_37, %c0_38], %62 {strides = array<i32>} : memref<2x1xf32, #tpu.memory_space<vmem>>, vector<2x1xf32>,
    return
  }
  func.func @transform_0(%arg0: i32) -> (i32, i32, i32, i32) {
    %c0_i32 = arith.constant 0 : i32
    %c0_i32_0 = arith.constant 0 : i32
    %c0_i32_1 = arith.constant 0 : i32
    %c0_i32_2 = arith.constant 0 : i32
    return %arg0, %c0_i32, %c0_i32_0, %c0_i32_1 : i32, i32, i32, i32
  }
  func.func @transform_1(%arg0: i32) -> (i32, i32) {
    %c0_i32 = arith.constant 0 : i32
    %c0_i32_0 = arith.constant 0 : i32
    %c0_i32_1 = arith.constant 0 : i32
    return %c0_i32, %c0_i32_0 : i32, i32
  }
  func.func @transform_2(%arg0: i32) -> (i32, i32) {
    %c0_i32 = arith.constant 0 : i32
    %c0_i32_0 = arith.constant 0 : i32
    %c0_i32_1 = arith.constant 0 : i32
    return %c0_i32, %c0_i32_0 : i32, i32
  }
  func.func @transform_3(%arg0: i32) -> (i32, i32) {
    %c0_i32 = arith.constant 0 : i32
    %c0_i32_0 = arith.constant 0 : i32
    %c0_i32_1 = arith.constant 0 : i32
    return %c0_i32, %c0_i32_0 : i32, i32
  }
  func.func @transform_4(%arg0: i32) -> (i32, i32) {
    %c0_i32 = arith.constant 0 : i32
    %c0_i32_0 = arith.constant 0 : i32
    %c0_i32_1 = arith.constant 0 : i32
    return %c0_i32, %c0_i32_0 : i32, i32
  }
  func.func @transform_5(%arg0: i32) -> (i32, i32) {
    %c0_i32 = arith.constant 0 : i32
    %c0_i32_0 = arith.constant 0 : i32
    %c0_i32_1 = arith.constant 0 : i32
    return %c0_i32, %c0_i32_0 : i32, i32
  }
  func.func @transform_6(%arg0: i32) -> (i32, i32) {
    %c0_i32 = arith.constant 0 : i32
    %c0_i32_0 = arith.constant 0 : i32
    %c0_i32_1 = arith.constant 0 : i32
    return %c0_i32, %c0_i32_0 : i32, i32
  }
  func.func @transform_7(%arg0: i32) -> (i32, i32) {
    %c0_i32 = arith.constant 0 : i32
    %c0_i32_0 = arith.constant 0 : i32
    %c0_i32_1 = arith.constant 0 : i32
    return %c0_i32, %c0_i32_0 : i32, i32
  }
  func.func @transform_8(%arg0: i32) -> (i32, i32) {
    %c0_i32 = arith.constant 0 : i32
    %c0_i32_0 = arith.constant 0 : i32
    %c0_i32_1 = arith.constant 0 : i32
    return %c0_i32, %c0_i32_0 : i32, i32
  }
  func.func @transform_9(%arg0: i32) -> (i32, i32) {
    %c0_i32 = arith.constant 0 : i32
    %c0_i32_0 = arith.constant 0 : i32
    %c0_i32_1 = arith.constant 0 : i32
    return %c0_i32, %c0_i32_0 : i32, i32
  }
  func.func @transform_10(%arg0: i32) -> (i32, i32) {
    %c0_i32 = arith.constant 0 : i32
    %c0_i32_0 = arith.constant 0 : i32
    %c0_i32_1 = arith.constant 0 : i32
    return %c0_i32, %c0_i32_0 : i32, i32
  }
  func.func @transform_11(%arg0: i32) -> (i32, i32) {
    %c0_i32 = arith.constant 0 : i32
    %c0_i32_0 = arith.constant 0 : i32
    return %arg0, %c0_i32 : i32, i32
  }
}

</mosaic_0001>

<bundles_post_ra>
// kernel: symbol_matcher_forward.1
= control target key start
LH: loop header
LB: loop body
LE: loop exit
PB: predicated region body
PF: predicated region fallthrough
CT: control target
= control target key end

     0   :  { %vm16142_vm0 = vmmov 0   ;;  %vm12099_vm1 = vcmask 1041409   ;;  %vm12303_vm2 = vcmask 1041408   ;;  %vm12321_vm3 = vcmask 1024   ;;  %s22085_s1 = inlined_call_operand.vmem [shape: bf16[2048,512], index: 1, kind: input, shape index: {}]   ;;  %s22086_s0 = inlined_call_operand.vmem [shape: bf16[2,2,16,2048], index: 0, kind: input, shape index: {}]   ;;  %s22087_s3 = inlined_call_operand.vmem [shape: bf16[512,2048], index: 3, kind: input, shape index: {}]   ;;  %s22088_s2 = inlined_call_operand.vmem [shape: f32[1,512], index: 2, kind: input, shape index: {}]   ;;  %s22089_s4 = inlined_call_operand.vmem [shape: f32[1,2048], index: 4, kind: input, shape index: {}]   ;;  %s22090_s5 = inlined_call_operand.vmem [shape: bf16[2048,128], index: 5, kind: input, shape index: {}]   ;;  %s22091_s6 = inlined_call_operand.vmem [shape: f32[1,128], index: 6, kind: input, shape index: {}]   ;;  %s22092_s7 = inlined_call_operand.vmem [shape: bf16[256,128], index: 7, kind: input, shape index: {}]   ;;  %s22093_s10 = inlined_call_operand.<no memory space> [shape: f32[1,1], index: 10, kind: input, shape index: {}]   ;;  %s22094_s8 = inlined_call_operand.vmem [shape: f32[1,128], index: 8, kind: input, shape index: {}]   ;;  %s22095_s9 = inlined_call_operand.vmem [shape: f32[1,128], index: 9, kind: input, shape index: {}]   ;;  %s22096_s11 = inlined_call_operand.vmem [shape: f32[2,1], index: 11, kind: output, shape index: {}]  }
   0x1   :  { %v14648_v0 = vld [vmem:[%s22085_s1 + $0x4] ss:$16 sps:$4 sm:$0xff]   ;;  %v14650_v1 = vld [vmem:[%s22085_s1 + $0xc] ss:$16 sps:$4 sm:$0xff]   ;;  %v14652_v2 = vld [vmem:[%s22085_s1] ss:$16 sps:$4 sm:$0xff]  }
   0x2   :  { %3519 = vmatprep.subr.bf16.mxu0 %v14648_v0  ;;  %v14653_v3 = vld [vmem:[%s22085_s1 + $0x8] ss:$16 sps:$4 sm:$0xff]   ;;  %4103 = vmatprep.subr.bf16.mxu1 %v14650_v1  ;;  %v14654_v4 = vld [vmem:[%s22085_s1 + $0x24] ss:$16 sps:$4 sm:$0xff]   ;;  %v14656_v5 = vld [vmem:[%s22085_s1 + $0x2c] ss:$16 sps:$4 sm:$0xff]  }
   0x3   :  { %3520 = vmatpush1.bf16.msra.mxu0 %v14652_v2  ;;  %4104 = vmatpush1.bf16.msra.mxu1 %v14653_v3  ;;  %v14658_v6 = vld [vmem:[%s22085_s1 + $0x20] ss:$16 sps:$4 sm:$0xff]   ;;  %v14659_v7 = vld [vmem:[%s22085_s1 + $0x28] ss:$16 sps:$4 sm:$0xff]   ;;  %v14660_v8 = vld [vmem:[%s22085_s1 + $0x44] ss:$16 sps:$4 sm:$0xff]  }
   0x4   :  { %3521 = vmatprep.subr.bf16.mxu0 %v14654_v4  ;;  %4105 = vmatprep.subr.bf16.mxu1 %v14656_v5  ;;  %v14662_v9 = vld [vmem:[%s22085_s1 + $0x4c] ss:$16 sps:$4 sm:$0xff]   ;;  %v14664_v10 = vld [vmem:[%s22085_s1 + $0x40] ss:$16 sps:$4 sm:$0xff]   ;;  %v14665_v11 = vld [vmem:[%s22085_s1 + $0x48] ss:$16 sps:$4 sm:$0xff]  }
   0x5   :  { %v14666_v12 = vld [vmem:[%s22085_s1 + $0x64] ss:$16 sps:$4 sm:$0xff]   ;;  %v14668_v13 = vld [vmem:[%s22085_s1 + $0x6c] ss:$16 sps:$4 sm:$0xff]   ;;  %v14670_v14 = vld [vmem:[%s22085_s1 + $0x60] ss:$16 sps:$4 sm:$0xff]  }
   0x6   :  { %v14671_v15 = vld [vmem:[%s22085_s1 + $0x68] ss:$16 sps:$4 sm:$0xff]   ;;  %v14672_v16 = vld [vmem:[%s22085_s1 + $0x84] ss:$16 sps:$4 sm:$0xff]   ;;  %v14674_v17 = vld [vmem:[%s22085_s1 + $0x8c] ss:$16 sps:$4 sm:$0xff]  }
   0x7   :  { %3522 = vmatpush1.bf16.msra.mxu0 %v14658_v6  ;;  %4106 = vmatpush1.bf16.msra.mxu1 %v14659_v7  ;;  %v14676_v18 = vld [vmem:[%s22085_s1 + $0x80] ss:$16 sps:$4 sm:$0xff]   ;;  %v14677_v19 = vld [vmem:[%s22085_s1 + $0x88] ss:$16 sps:$4 sm:$0xff]   ;;  %v14678_v20 = vld [vmem:[%s22085_s1 + $0xa4] ss:$16 sps:$4 sm:$0xff]  }
   0x8   :  { %3523 = vmatprep.subr.bf16.mxu0 %v14660_v8  ;;  %4107 = vmatprep.subr.bf16.mxu1 %v14662_v9  ;;  %v14680_v21 = vld [vmem:[%s22085_s1 + $0xac] ss:$16 sps:$4 sm:$0xff]   ;;  %v14682_v22 = vld [vmem:[%s22085_s1 + $0xa0] ss:$16 sps:$4 sm:$0xff]   ;;  %v14683_v23 = vld [vmem:[%s22085_s1 + $0xa8] ss:$16 sps:$4 sm:$0xff]  }
   0x9   :  { %v14684_v24 = vld [vmem:[%s22085_s1 + $0xc4] ss:$16 sps:$4 sm:$0xff]   ;;  %v14686_v25 = vld [vmem:[%s22085_s1 + $0xcc] ss:$16 sps:$4 sm:$0xff]   ;;  %v14688_v26 = vld [vmem:[%s22085_s1 + $0xc0] ss:$16 sps:$4 sm:$0xff]  }
   0xa   :  { %v14689_v27 = vld [vmem:[%s22085_s1 + $0xc8] ss:$16 sps:$4 sm:$0xff]   ;;  %v14690_v28 = vld [vmem:[%s22085_s1 + $0xe4] ss:$16 sps:$4 sm:$0xff]   ;;  %v14692_v29 = vld [vmem:[%s22085_s1 + $0xec] ss:$16 sps:$4 sm:$0xff]  }
   0xb   :  { %3524 = vmatpush1.bf16.msra.mxu0 %v14664_v10  ;;  %4108 = vmatpush1.bf16.msra.mxu1 %v14665_v11  ;;  %v14694_v30 = vld [vmem:[%s22085_s1 + $0xe0] ss:$16 sps:$4 sm:$0xff]   ;;  %v14695_v31 = vld [vmem:[%s22085_s1 + $0xe8] ss:$16 sps:$4 sm:$0xff]   ;;  %v14696_v32 = vld [vmem:[%s22085_s1 + $0x104] ss:$16 sps:$4 sm:$0xff]  }
   0xc   :  { %3525 = vmatprep.subr.bf16.mxu0 %v14666_v12  ;;  %4109 = vmatprep.subr.bf16.mxu1 %v14668_v13  ;;  %v14698_v33 = vld [vmem:[%s22085_s1 + $0x10c] ss:$16 sps:$4 sm:$0xff]   ;;  %v14700_v34 = vld [vmem:[%s22085_s1 + $0x100] ss:$16 sps:$4 sm:$0xff]   ;;  %v14701_v35 = vld [vmem:[%s22085_s1 + $0x108] ss:$16 sps:$4 sm:$0xff]  }
   0xd   :  { %v14702_v36 = vld [vmem:[%s22085_s1 + $0x124] ss:$16 sps:$4 sm:$0xff]   ;;  %v14704_v37 = vld [vmem:[%s22085_s1 + $0x12c] ss:$16 sps:$4 sm:$0xff]   ;;  %v14706_v38 = vld [vmem:[%s22085_s1 + $0x120] ss:$16 sps:$4 sm:$0xff]  }
   0xe   :  { %v14707_v39 = vld [vmem:[%s22085_s1 + $0x128] ss:$16 sps:$4 sm:$0xff]   ;;  %v14708_v40 = vld [vmem:[%s22085_s1 + $0x144] ss:$16 sps:$4 sm:$0xff]   ;;  %v14710_v41 = vld [vmem:[%s22085_s1 + $0x14c] ss:$16 sps:$4 sm:$0xff]  }
   0xf   :  { %3526 = vmatpush1.bf16.msra.mxu0 %v14670_v14  ;;  %4110 = vmatpush1.bf16.msra.mxu1 %v14671_v15  ;;  %v14712_v42 = vld [vmem:[%s22085_s1 + $0x140] ss:$16 sps:$4 sm:$0xff]   ;;  %v14713_v43 = vld [vmem:[%s22085_s1 + $0x148] ss:$16 sps:$4 sm:$0xff]   ;;  %v14714_v44 = vld [vmem:[%s22085_s1 + $0x164] ss:$16 sps:$4 sm:$0xff]  }
  0x10   :  { %3527 = vmatprep.subr.bf16.mxu0 %v14672_v16  ;;  %4111 = vmatprep.subr.bf16.mxu1 %v14674_v17  ;;  %v14716_v45 = vld [vmem:[%s22085_s1 + $0x16c] ss:$16 sps:$4 sm:$0xff]   ;;  %v41_v46 = vld [vmem:[%s22086_s0] sm:$0xff]  ;;  %v14719_v49 = vld [vmem:[%s22085_s1 + $0x168] ss:$16 sps:$4 sm:$0xff]  }
  0x11   :  { %v49_v47 = vld [vmem:[%s22086_s0 + $0x40] sm:$0xff]  ;;  %v14722_v52 = vld [vmem:[%s22085_s1 + $0x18c] ss:$16 sps:$4 sm:$0xff]   ;;  %v14725_v54 = vld [vmem:[%s22085_s1 + $0x188] ss:$16 sps:$4 sm:$0xff]  }
  0x12   :  { %v14718_v48 = vld [vmem:[%s22085_s1 + $0x160] ss:$16 sps:$4 sm:$0xff]   ;;  %v12328_v50 = vcombine.high %v41_v46, %v49_v47  ;;  %v14720_v51 = vld [vmem:[%s22085_s1 + $0x184] ss:$16 sps:$4 sm:$0xff]   ;;  %v14728_v56 = vld [vmem:[%s22085_s1 + $0x1ac] ss:$16 sps:$4 sm:$0xff]   ;;  %v12327_v5 = vcombine.low %v41_v46, %v49_v47 }
  0x13   :  { %3528 = vmatpush1.bf16.msra.mxu0 %v14676_v18  ;;  %4112 = vmatpush1.bf16.msra.mxu1 %v14677_v19  ;;  %v14724_v53 = vld [vmem:[%s22085_s1 + $0x180] ss:$16 sps:$4 sm:$0xff]   ;;  %v14726_v55 = vld [vmem:[%s22085_s1 + $0x1a4] ss:$16 sps:$4 sm:$0xff]   ;;  %v14731_v58 = vld [vmem:[%s22085_s1 + $0x1a8] ss:$16 sps:$4 sm:$0xff]  }
  0x14   :  { %3529 = vmatprep.subr.bf16.mxu0 %v14678_v20  ;;  %4113 = vmatprep.subr.bf16.mxu1 %v14680_v21  ;;  %v14730_v57 = vld [vmem:[%s22085_s1 + $0x1a0] ss:$16 sps:$4 sm:$0xff]   ;;  %v14732_v59 = vld [vmem:[%s22085_s1 + $0x1c4] ss:$16 sps:$4 sm:$0xff]   ;;  %v14734_v60 = vld [vmem:[%s22085_s1 + $0x1cc] ss:$16 sps:$4 sm:$0xff]  }
  0x15   :  { %3551 = vmatprep.mubr.bf16.mxu0 %v12328_v50  ;;  %4135 = vmatprep.mubr.bf16.mxu1 %v12328_v50  ;;  %v14736_v61 = vld [vmem:[%s22085_s1 + $0x1c0] ss:$16 sps:$4 sm:$0xff]   ;;  %v14737_v62 = vld [vmem:[%s22085_s1 + $0x1c8] ss:$16 sps:$4 sm:$0xff]   ;;  %v14738_v63 = vld [vmem:[%s22085_s1 + $0x1e4] ss:$16 sps:$4 sm:$0xff]  }
  0x16   :  { %v14740_v0 = vld [vmem:[%s22085_s1 + $0x1ec] ss:$16 sps:$4 sm:$0xff]   ;;  %v14742_v1 = vld [vmem:[%s22085_s1 + $0x1e0] ss:$16 sps:$4 sm:$0xff]   ;;  %v14743_v2 = vld [vmem:[%s22085_s1 + $0x1e8] ss:$16 sps:$4 sm:$0xff]  }
  0x17   :  { %3530 = vmatpush1.bf16.msra.mxu0 %v14682_v22  ;;  %4114 = vmatpush1.bf16.msra.mxu1 %v14683_v23  ;;  %v14746_v3 = vld [vmem:[%s22085_s1 + $0x204] ss:$16 sps:$4 sm:$0xff]   ;;  %v14749_v4 = vld [vmem:[%s22085_s1 + $0x20c] ss:$16 sps:$4 sm:$0xff]   ;;  %v14744_v6 = vld [vmem:[%s22085_s1 + $0x200] ss:$16 sps:$4 sm:$0xff]  }
  0x18   :  { %3531 = vmatprep.subr.bf16.mxu0 %v14684_v24  ;;  %4115 = vmatprep.subr.bf16.mxu1 %v14686_v25  ;;  %v14747_v7 = vld [vmem:[%s22085_s1 + $0x208] ss:$16 sps:$4 sm:$0xff]   ;;  %v14752_v8 = vld [vmem:[%s22085_s1 + $0x224] ss:$16 sps:$4 sm:$0xff]   ;;  %v14755_v9 = vld [vmem:[%s22085_s1 + $0x22c] ss:$16 sps:$4 sm:$0xff]  }
  0x19   :  { %v14750_v10 = vld [vmem:[%s22085_s1 + $0x220] ss:$16 sps:$4 sm:$0xff]   ;;  %v14753_v11 = vld [vmem:[%s22085_s1 + $0x228] ss:$16 sps:$4 sm:$0xff]   ;;  %v14758_v12 = vld [vmem:[%s22085_s1 + $0x244] ss:$16 sps:$4 sm:$0xff]  }
  0x1a   :  { %v14761_v13 = vld [vmem:[%s22085_s1 + $0x24c] ss:$16 sps:$4 sm:$0xff]   ;;  %v57_v14 = vld [vmem:[%s22086_s0 + $0x80] sm:$0xff]  ;;  %v14759_v17 = vld [vmem:[%s22085_s1 + $0x248] ss:$16 sps:$4 sm:$0xff]  }
  0x1b   :  { %3532 = vmatpush1.bf16.msra.mxu0 %v14688_v26  ;;  %4116 = vmatpush1.bf16.msra.mxu1 %v14689_v27  ;;  %v65_v15 = vld [vmem:[%s22086_s0 + $0xc0] sm:$0xff]  ;;  %v14767_v21 = vld [vmem:[%s22085_s1 + $0x26c] ss:$16 sps:$4 sm:$0xff]   ;;  %v14765_v23 = vld [vmem:[%s22085_s1 + $0x268] ss:$16 sps:$4 sm:$0xff]  }
  0x1c   :  { %3533 = vmatprep.subr.bf16.mxu0 %v14690_v28  ;;  %4117 = vmatprep.subr.bf16.mxu1 %v14692_v29  ;;  %v14756_v16 = vld [vmem:[%s22085_s1 + $0x240] ss:$16 sps:$4 sm:$0xff]   ;;  %v12344_v18 = vcombine.high %v57_v14, %v65_v15  ;;  %v12343_v19 = vcombine.low %v57_v14, %v65_v15  ;;  %v14764_v20 = vld [vmem:[%s22085_s1 + $0x264] ss:$16 sps:$4 sm:$0xff]   ;;  %v14773_v27 = vld [vmem:[%s22085_s1 + $0x28c] ss:$16 sps:$4 sm:$0xff]  }
  0x1d   :  { %v14762_v22 = vld [vmem:[%s22085_s1 + $0x260] ss:$16 sps:$4 sm:$0xff]   ;;  %v14770_v26 = vld [vmem:[%s22085_s1 + $0x284] ss:$16 sps:$4 sm:$0xff]   ;;  %v14791_v47 = vld [vmem:[%s22085_s1 + $0x2ec] ss:$16 sps:$4 sm:$0xff]  }
  0x1e   :  { %v73_v24 = vld [vmem:[%s22086_s0 + $0x100] sm:$0xff]  ;;  %v14789_v50 = vld [vmem:[%s22085_s1 + $0x2e8] ss:$16 sps:$4 sm:$0xff]  }
  0x1f   :  { %3534 = vmatpush1.bf16.msra.mxu0 %v14694_v30  ;;  %4118 = vmatpush1.bf16.msra.mxu1 %v14695_v31  ;;  %v81_v25 = vld [vmem:[%s22086_s0 + $0x140] sm:$0xff]  ;;  %v14771_v31 = vld [vmem:[%s22085_s1 + $0x288] ss:$16 sps:$4 sm:$0xff]  }
  0x20   :  { %3535 = vmatprep.subr.bf16.mxu0 %v14696_v32  ;;  %4119 = vmatprep.subr.bf16.mxu1 %v14698_v33  ;;  %v12360_v28 = vcombine.high %v73_v24, %v81_v25  ;;  %v12359_v29 = vcombine.low %v73_v24, %v81_v25  ;;  %v14768_v30 = vld [vmem:[%s22085_s1 + $0x280] ss:$16 sps:$4 sm:$0xff]   ;;  %v14776_v32 = vld [vmem:[%s22085_s1 + $0x2a4] ss:$16 sps:$4 sm:$0xff]   ;;  %v14779_v33 = vld [vmem:[%s22085_s1 + $0x2ac] ss:$16 sps:$4 sm:$0xff]  }
  0x21   :  { %v14788_v46 = vld [vmem:[%s22085_s1 + $0x2e4] ss:$16 sps:$4 sm:$0xff]   ;;  %v14831_v14 = vld [vmem:[%s22085_s1 + $0x3c8] ss:$16 sps:$4 sm:$0xff]  }
  0x22   :  { %v14836_v15 = vld [vmem:[%s22085_s1 + $0x3e4] ss:$16 sps:$4 sm:$0xff]   ;;  %v58_v24 = vld [vmem:[%s22086_s0 + $0x88] sm:$0xff] }
  0x23   :  { %3536 = vmatpush1.bf16.msra.mxu0 %v14700_v34  ;;  %4120 = vmatpush1.bf16.msra.mxu1 %v14701_v35  ;;  %v89_v34 = vld [vmem:[%s22086_s0 + $0x180] sm:$0xff]  ;;  %v66_v25 = vld [vmem:[%s22086_s0 + $0xc8] sm:$0xff] }
  0x24   :  { %3537 = vmatprep.subr.bf16.mxu0 %v14702_v36  ;;  %4121 = vmatprep.subr.bf16.mxu1 %v14704_v37  ;;  %v97_v35 = vld [vmem:[%s22086_s0 + $0x1c0] sm:$0xff]  ;;  %v14777_v37 = vld [vmem:[%s22085_s1 + $0x2a8] ss:$16 sps:$4 sm:$0xff]  }
  0x25   :  { %v14774_v36 = vld [vmem:[%s22085_s1 + $0x2a0] ss:$16 sps:$4 sm:$0xff]  }
  0x27   :  { %3538 = vmatpush1.bf16.msra.mxu0 %v14706_v38  ;;  %4122 = vmatpush1.bf16.msra.mxu1 %v14707_v39  ;;  %v12376_v38 = vcombine.high %v89_v34, %v97_v35  ;;  %v14782_v39 = vld [vmem:[%s22085_s1 + $0x2c4] ss:$16 sps:$4 sm:$0xff]  }
  0x28   :  { %3539 = vmatprep.subr.bf16.mxu0 %v14708_v40  ;;  %4123 = vmatprep.subr.bf16.mxu1 %v14710_v41  ;;  %v14785_v40 = vld [vmem:[%s22085_s1 + $0x2cc] ss:$16 sps:$4 sm:$0xff]   ;;  %v14780_v41 = vld [vmem:[%s22085_s1 + $0x2c0] ss:$16 sps:$4 sm:$0xff]  }
  0x2b   :  { %3540 = vmatpush1.bf16.msra.mxu0 %v14712_v42  ;;  %4124 = vmatpush1.bf16.msra.mxu1 %v14713_v43  ;;  %v14783_v42 = vld [vmem:[%s22085_s1 + $0x2c8] ss:$16 sps:$4 sm:$0xff]   ;;  %v12375_v43 = vcombine.low %v89_v34, %v97_v35  ;;  %v12345_v34 = vcombine.low %v58_v24, %v66_v25 }
  0x2c   :  { %3541 = vmatprep.subr.bf16.mxu0 %v14714_v44  ;;  %4125 = vmatprep.subr.bf16.mxu1 %v14716_v45  ;;  %v16506_v44 = vld [vmem:[%s22086_s0 + $0x8] sm:$0xff] }
  0x2d   :  { %v16511_v45 = vld [vmem:[%s22086_s0 + $0x48] sm:$0xff] }
  0x2e   :  { %v82_v35 = vld [vmem:[%s22086_s0 + $0x148] sm:$0xff] }
  0x2f   :  { %3542 = vmatpush1.bf16.msra.mxu0 %v14718_v48  ;;  %4126 = vmatpush1.bf16.msra.mxu1 %v14719_v49  ;;  %v12330_v48 = vcombine.high %v16506_v44, %v16511_v45  ;;  %v14786_v49 = vld [vmem:[%s22085_s1 + $0x2e0] ss:$16 sps:$4 sm:$0xff]  }
  0x30   :  { %3543 = vmatprep.subr.bf16.mxu0 %v14720_v51  ;;  %4127 = vmatprep.subr.bf16.mxu1 %v14722_v52  ;;  %v14794_v51 = vld [vmem:[%s22085_s1 + $0x304] ss:$16 sps:$4 sm:$0xff]   ;;  %v14797_v52 = vld [vmem:[%s22085_s1 + $0x30c] ss:$16 sps:$4 sm:$0xff]  }
  0x33   :  { %3544 = vmatpush1.bf16.msra.mxu0 %v14724_v53  ;;  %4128 = vmatpush1.bf16.msra.mxu1 %v14725_v54  ;;  %v14792_v53 = vld [vmem:[%s22085_s1 + $0x300] ss:$16 sps:$4 sm:$0xff]   ;;  %v14795_v54 = vld [vmem:[%s22085_s1 + $0x308] ss:$16 sps:$4 sm:$0xff]  }
  0x34   :  { %3545 = vmatprep.subr.bf16.mxu0 %v14726_v55  ;;  %4129 = vmatprep.subr.bf16.mxu1 %v14728_v56  ;;  %v14800_v55 = vld [vmem:[%s22085_s1 + $0x324] ss:$16 sps:$4 sm:$0xff]   ;;  %v14803_v56 = vld [vmem:[%s22085_s1 + $0x32c] ss:$16 sps:$4 sm:$0xff]  }
  0x37   :  { %3546 = vmatpush1.bf16.msra.mxu0 %v14730_v57  ;;  %4130 = vmatpush1.bf16.msra.mxu1 %v14731_v58  ;;  %v14798_v57 = vld [vmem:[%s22085_s1 + $0x320] ss:$16 sps:$4 sm:$0xff]   ;;  %v14801_v58 = vld [vmem:[%s22085_s1 + $0x328] ss:$16 sps:$4 sm:$0xff]  }
  0x38   :  { %3547 = vmatprep.subr.bf16.mxu0 %v14732_v59  ;;  %4131 = vmatprep.subr.bf16.mxu1 %v14734_v60  ;;  %v14806_v59 = vld [vmem:[%s22085_s1 + $0x344] ss:$16 sps:$4 sm:$0xff]   ;;  %v14809_v60 = vld [vmem:[%s22085_s1 + $0x34c] ss:$16 sps:$4 sm:$0xff]  }
  0x3b   :  { %3548 = vmatpush1.bf16.msra.mxu0 %v14736_v61  ;;  %4132 = vmatpush1.bf16.msra.mxu1 %v14737_v62  ;;  %v14804_v61 = vld [vmem:[%s22085_s1 + $0x340] ss:$16 sps:$4 sm:$0xff]   ;;  %v14807_v62 = vld [vmem:[%s22085_s1 + $0x348] ss:$16 sps:$4 sm:$0xff]  }
  0x3c   :  { %3549 = vmatprep.subr.bf16.mxu0 %v14738_v63  ;;  %4133 = vmatprep.subr.bf16.mxu1 %v14740_v0  ;;  %v14812_v63 = vld [vmem:[%s22085_s1 + $0x364] ss:$16 sps:$4 sm:$0xff]   ;;  %v14815_v0 = vld [vmem:[%s22085_s1 + $0x36c] ss:$16 sps:$4 sm:$0xff]  }
  0x3f   :  { %3550 = vmatpush1.bf16.msra.mxu0 %v14742_v1  ;;  %4134 = vmatpush1.bf16.msra.mxu1 %v14743_v2  ;;  %v14810_v1 = vld [vmem:[%s22085_s1 + $0x360] ss:$16 sps:$4 sm:$0xff]   ;;  %v14813_v2 = vld [vmem:[%s22085_s1 + $0x368] ss:$16 sps:$4 sm:$0xff]  }
  0x40   :  { %3592 = vmatprep.subr.bf16.mxu0 %v14746_v3  ;;  %4176 = vmatprep.subr.bf16.mxu1 %v14749_v4  ;;  %v14818_v3 = vld [vmem:[%s22085_s1 + $0x384] ss:$16 sps:$4 sm:$0xff]   ;;  %v14821_v4 = vld [vmem:[%s22085_s1 + $0x38c] ss:$16 sps:$4 sm:$0xff]  }
  0x42   :  { %3552 = vmatmul.mubr.bf16.vlgmr.msra.gmra.mrb[0].mxu0 %v12327_v5  ;;  %4136 = vmatmul.mubr.bf16.vlgmr.msra.gmra.mrb[0].mxu1 %v12327_v5  ;;  %v14816_v5 = vld [vmem:[%s22085_s1 + $0x380] ss:$16 sps:$4 sm:$0xff]  }
  0x43   :  { %3593 = vmatpush1.bf16.msra.mxu0 %v14744_v6  ;;  %4177 = vmatpush1.bf16.msra.mxu1 %v14747_v7  ;;  %v14819_v6 = vld [vmem:[%s22085_s1 + $0x388] ss:$16 sps:$4 sm:$0xff]   ;;  %v14824_v7 = vld [vmem:[%s22085_s1 + $0x3a4] ss:$16 sps:$4 sm:$0xff]  }
  0x44   :  { %3594 = vmatprep.subr.bf16.mxu0 %v14752_v8  ;;  %4178 = vmatprep.subr.bf16.mxu1 %v14755_v9  ;;  %v14827_v8 = vld [vmem:[%s22085_s1 + $0x3ac] ss:$16 sps:$4 sm:$0xff]   ;;  %v14822_v9 = vld [vmem:[%s22085_s1 + $0x3a0] ss:$16 sps:$4 sm:$0xff]  }
  0x45   :  { %3561 = vmatprep.mubr.bf16.mxu0 %v12344_v18  ;;  %4145 = vmatprep.mubr.bf16.mxu1 %v12344_v18  ;;  %v14837_v18 = vld [vmem:[%s22085_s1 + $0x3e8] ss:$16 sps:$4 sm:$0xff]  }
  0x47   :  { %3595 = vmatpush1.bf16.msra.mxu0 %v14750_v10  ;;  %4179 = vmatpush1.bf16.msra.mxu1 %v14753_v11  ;;  %v14825_v10 = vld [vmem:[%s22085_s1 + $0x3a8] ss:$16 sps:$4 sm:$0xff]   ;;  %v14830_v11 = vld [vmem:[%s22085_s1 + $0x3c4] ss:$16 sps:$4 sm:$0xff]  }
  0x48   :  { %3596 = vmatprep.subr.bf16.mxu0 %v14758_v12  ;;  %4180 = vmatprep.subr.bf16.mxu1 %v14761_v13  ;;  %v14833_v12 = vld [vmem:[%s22085_s1 + $0x3cc] ss:$16 sps:$4 sm:$0xff]   ;;  %v14828_v13 = vld [vmem:[%s22085_s1 + $0x3c0] ss:$16 sps:$4 sm:$0xff]  }
  0x4a   :  { %3562 = vmatmul.mubr.bf16.gmra.mrb[4].mxu0 %v12343_v19  ;;  %4146 = vmatmul.mubr.bf16.gmra.mrb[4].mxu1 %v12343_v19  ;;  %v14842_v19 = vld [vmem:[%s22085_s1 + $0x404] ss:$16 sps:$4 sm:$0xff]  }
  0x4b   :  { %3597 = vmatpush1.bf16.msra.mxu0 %v14756_v16  ;;  %4181 = vmatpush1.bf16.msra.mxu1 %v14759_v17  ;;  %v14839_v16 = vld [vmem:[%s22085_s1 + $0x3ec] ss:$16 sps:$4 sm:$0xff]   ;;  %v14834_v17 = vld [vmem:[%s22085_s1 + $0x3e0] ss:$16 sps:$4 sm:$0xff]  }
  0x4c   :  { %3598 = vmatprep.subr.bf16.mxu0 %v14764_v20  ;;  %4182 = vmatprep.subr.bf16.mxu1 %v14767_v21  ;;  %v14845_v20 = vld [vmem:[%s22085_s1 + $0x40c] ss:$16 sps:$4 sm:$0xff]   ;;  %v14840_v21 = vld [vmem:[%s22085_s1 + $0x400] ss:$16 sps:$4 sm:$0xff]  }
  0x4d   :  { %3571 = vmatprep.mubr.bf16.mxu0 %v12360_v28  ;;  %4155 = vmatprep.mubr.bf16.mxu1 %v12360_v28  ;;  %v12346_v28 = vcombine.high %v58_v24, %v66_v25  ;;  %v14923_v24 = vld [vmem:[%s22085_s1 + $0x5ac] ss:$16 sps:$4 sm:$0xff]   ;;  %v14918_v25 = vld [vmem:[%s22085_s1 + $0x5a0] ss:$16 sps:$4 sm:$0xff]  }
  0x4f   :  { %3599 = vmatpush1.bf16.msra.mxu0 %v14762_v22  ;;  %4183 = vmatpush1.bf16.msra.mxu1 %v14765_v23  ;;  %v12329_v22 = vcombine.low %v16506_v44, %v16511_v45  ;;  %v14843_v23 = vld [vmem:[%s22085_s1 + $0x408] ss:$16 sps:$4 sm:$0xff]   ;;  %v14869_v44 = vld [vmem:[%s22085_s1 + $0x48c] ss:$16 sps:$4 sm:$0xff]  }
  0x50   :  { %3600 = vmatprep.subr.bf16.mxu0 %v14770_v26  ;;  %4184 = vmatprep.subr.bf16.mxu1 %v14773_v27  ;;  %v14848_v26 = vld [vmem:[%s22085_s1 + $0x424] ss:$16 sps:$4 sm:$0xff]   ;;  %v14851_v27 = vld [vmem:[%s22085_s1 + $0x42c] ss:$16 sps:$4 sm:$0xff]  }
  0x51   :  { %v90_v45 = vld [vmem:[%s22086_s0 + $0x188] sm:$0xff] }
  0x52   :  { %3572 = vmatmul.mubr.bf16.gmra.mrb[8].mxu0 %v12359_v29  ;;  %4156 = vmatmul.mubr.bf16.gmra.mrb[8].mxu1 %v12359_v29  ;;  %v14846_v29 = vld [vmem:[%s22085_s1 + $0x420] ss:$16 sps:$4 sm:$0xff]  }
  0x53   :  { %3601 = vmatpush1.bf16.msra.mxu0 %v14768_v30  ;;  %4185 = vmatpush1.bf16.msra.mxu1 %v14771_v31  ;;  %v14849_v30 = vld [vmem:[%s22085_s1 + $0x428] ss:$16 sps:$4 sm:$0xff]   ;;  %v14854_v31 = vld [vmem:[%s22085_s1 + $0x444] ss:$16 sps:$4 sm:$0xff]  }
  0x54   :  { %3602 = vmatprep.subr.bf16.mxu0 %v14776_v32  ;;  %4186 = vmatprep.subr.bf16.mxu1 %v14779_v33  ;;  %v14857_v32 = vld [vmem:[%s22085_s1 + $0x44c] ss:$16 sps:$4 sm:$0xff]  }
  0x55   :  { %3581 = vmatprep.mubr.bf16.mxu0 %v12376_v38  ;;  %4165 = vmatprep.mubr.bf16.mxu1 %v12376_v38  ;;  %v74_v33 = vld [vmem:[%s22086_s0 + $0x108] sm:$0xff]  ;;  %v14860_v38 = vld [vmem:[%s22085_s1 + $0x464] ss:$16 sps:$4 sm:$0xff]  }
  0x57   :  { %3603 = vmatpush1.bf16.msra.mxu0 %v14774_v36  ;;  %4187 = vmatpush1.bf16.msra.mxu1 %v14777_v37  ;;  %v14852_v36 = vld [vmem:[%s22085_s1 + $0x440] ss:$16 sps:$4 sm:$0xff]   ;;  %v14855_v37 = vld [vmem:[%s22085_s1 + $0x448] ss:$16 sps:$4 sm:$0xff]  }
  0x58   :  { %3604 = vmatprep.subr.bf16.mxu0 %v14782_v39  ;;  %4188 = vmatprep.subr.bf16.mxu1 %v14785_v40  ;;  %v14863_v39 = vld [vmem:[%s22085_s1 + $0x46c] ss:$16 sps:$4 sm:$0xff]   ;;  %v12362_v40 = vcombine.high %v74_v33, %v82_v35 }
  0x5a   :  { %3582 = vmatmul.mubr.bf16.gmra.mrb[12].mxu0 %v12375_v43  ;;  %4166 = vmatmul.mubr.bf16.gmra.mrb[12].mxu1 %v12375_v43  ;;  %v14866_v43 = vld [vmem:[%s22085_s1 + $0x484] ss:$16 sps:$4 sm:$0xff]  }
  0x5b   :  { %3605 = vmatpush1.bf16.msra.mxu0 %v14780_v41  ;;  %4189 = vmatpush1.bf16.msra.mxu1 %v14783_v42  ;;  %v14858_v41 = vld [vmem:[%s22085_s1 + $0x460] ss:$16 sps:$4 sm:$0xff]   ;;  %v14861_v42 = vld [vmem:[%s22085_s1 + $0x468] ss:$16 sps:$4 sm:$0xff]  }
  0x5c   :  { %3606 = vmatprep.subr.bf16.mxu0 %v14788_v46  ;;  %4190 = vmatprep.subr.bf16.mxu1 %v14791_v47  ;;  %v12361_v46 = vcombine.low %v74_v33, %v82_v35  ;;  %v98_v47 = vld [vmem:[%s22086_s0 + $0x1c8] sm:$0xff]  ;;  %v14930_v33 = vld [vmem:[%s22085_s1 + $0x5e0] ss:$16 sps:$4 sm:$0xff]   ;;  %v14938_v35 = vld [vmem:[%s22085_s1 + $0x604] ss:$16 sps:$4 sm:$0xff]  }
  0x5d   :  { %3624 = vmatprep.mubr.bf16.mxu0 %v12330_v48  ;;  %4208 = vmatprep.mubr.bf16.mxu1 %v12330_v48  ;;  %v14864_v48 = vld [vmem:[%s22085_s1 + $0x480] ss:$16 sps:$4 sm:$0xff]  }
  0x5f   :  { %3607 = vmatpush1.bf16.msra.mxu0 %v14786_v49  ;;  %4191 = vmatpush1.bf16.msra.mxu1 %v14789_v50  ;;  %v14867_v49 = vld [vmem:[%s22085_s1 + $0x488] ss:$16 sps:$4 sm:$0xff]   ;;  %v14872_v50 = vld [vmem:[%s22085_s1 + $0x4a4] ss:$16 sps:$4 sm:$0xff]  }
  0x60   :  { %3608 = vmatprep.subr.bf16.mxu0 %v14794_v51  ;;  %4192 = vmatprep.subr.bf16.mxu1 %v14797_v52  ;;  %v14875_v51 = vld [vmem:[%s22085_s1 + $0x4ac] ss:$16 sps:$4 sm:$0xff]   ;;  %v12378_v52 = vcombine.high %v90_v45, %v98_v47 }
  0x63   :  { %3609 = vmatpush1.bf16.msra.mxu0 %v14792_v53  ;;  %4193 = vmatpush1.bf16.msra.mxu1 %v14795_v54  ;;  %v14870_v53 = vld [vmem:[%s22085_s1 + $0x4a0] ss:$16 sps:$4 sm:$0xff]   ;;  %v14873_v54 = vld [vmem:[%s22085_s1 + $0x4a8] ss:$16 sps:$4 sm:$0xff]  }
  0x64   :  { %3610 = vmatprep.subr.bf16.mxu0 %v14800_v55  ;;  %4194 = vmatprep.subr.bf16.mxu1 %v14803_v56  ;;  %v14878_v55 = vld [vmem:[%s22085_s1 + $0x4c4] ss:$16 sps:$4 sm:$0xff]   ;;  %v14881_v56 = vld [vmem:[%s22085_s1 + $0x4cc] ss:$16 sps:$4 sm:$0xff]  }
  0x67   :  { %3611 = vmatpush1.bf16.msra.mxu0 %v14798_v57  ;;  %4195 = vmatpush1.bf16.msra.mxu1 %v14801_v58  ;;  %v16724_v57 = vld [vmem:[%s22086_s0 + $0x10] sm:$0xff]  ;;  %v12377_v58 = vcombine.low %v90_v45, %v98_v47 }
  0x68   :  { %3612 = vmatprep.subr.bf16.mxu0 %v14806_v59  ;;  %4196 = vmatprep.subr.bf16.mxu1 %v14809_v60  ;;  %v16729_v59 = vld [vmem:[%s22086_s0 + $0x50] sm:$0xff] }
  0x69   :  { %v14876_v60 = vld [vmem:[%s22085_s1 + $0x4c0] ss:$16 sps:$4 sm:$0xff]   ;;  %v14950_v47 = vld [vmem:[%s22085_s1 + $0x644] ss:$16 sps:$4 sm:$0xff]  }
  0x6a   :  { %v14942_v45 = vld [vmem:[%s22085_s1 + $0x620] ss:$16 sps:$4 sm:$0xff]  }
  0x6b   :  { %3613 = vmatpush1.bf16.msra.mxu0 %v14804_v61  ;;  %4197 = vmatpush1.bf16.msra.mxu1 %v14807_v62  ;;  %v14879_v61 = vld [vmem:[%s22085_s1 + $0x4c8] ss:$16 sps:$4 sm:$0xff]   ;;  %v14884_v62 = vld [vmem:[%s22085_s1 + $0x4e4] ss:$16 sps:$4 sm:$0xff]  }
  0x6c   :  { %3614 = vmatprep.subr.bf16.mxu0 %v14812_v63  ;;  %4198 = vmatprep.subr.bf16.mxu1 %v14815_v0  ;;  %v14887_v63 = vld [vmem:[%s22085_s1 + $0x4ec] ss:$16 sps:$4 sm:$0xff]   ;;  %v12332_v0 = vcombine.high %v16724_v57, %v16729_v59 }
  0x6f   :  { %3615 = vmatpush1.bf16.msra.mxu0 %v14810_v1  ;;  %4199 = vmatpush1.bf16.msra.mxu1 %v14813_v2  ;;  %v14882_v1 = vld [vmem:[%s22085_s1 + $0x4e0] ss:$16 sps:$4 sm:$0xff]   ;;  %v14885_v2 = vld [vmem:[%s22085_s1 + $0x4e8] ss:$16 sps:$4 sm:$0xff]  }
  0x70   :  { %3616 = vmatprep.subr.bf16.mxu0 %v14818_v3  ;;  %4200 = vmatprep.subr.bf16.mxu1 %v14821_v4  ;;  %v14890_v3 = vld [vmem:[%s22085_s1 + $0x504] ss:$16 sps:$4 sm:$0xff]   ;;  %v14893_v4 = vld [vmem:[%s22085_s1 + $0x50c] ss:$16 sps:$4 sm:$0xff]  }
  0x73   :  { %3617 = vmatpush1.bf16.msra.mxu0 %v14816_v5  ;;  %4201 = vmatpush1.bf16.msra.mxu1 %v14819_v6  ;;  %v14888_v5 = vld [vmem:[%s22085_s1 + $0x500] ss:$16 sps:$4 sm:$0xff]   ;;  %v14891_v6 = vld [vmem:[%s22085_s1 + $0x508] ss:$16 sps:$4 sm:$0xff]  }
  0x74   :  { %3618 = vmatprep.subr.bf16.mxu0 %v14824_v7  ;;  %4202 = vmatprep.subr.bf16.mxu1 %v14827_v8  ;;  %v14896_v7 = vld [vmem:[%s22085_s1 + $0x524] ss:$16 sps:$4 sm:$0xff]   ;;  %v14899_v8 = vld [vmem:[%s22085_s1 + $0x52c] ss:$16 sps:$4 sm:$0xff]  }
  0x77   :  { %3619 = vmatpush1.bf16.msra.mxu0 %v14822_v9  ;;  %4203 = vmatpush1.bf16.msra.mxu1 %v14825_v10  ;;  %v14894_v9 = vld [vmem:[%s22085_s1 + $0x520] ss:$16 sps:$4 sm:$0xff]   ;;  %v14897_v10 = vld [vmem:[%s22085_s1 + $0x528] ss:$16 sps:$4 sm:$0xff]  }
  0x78   :  { %3620 = vmatprep.subr.bf16.mxu0 %v14830_v11  ;;  %4204 = vmatprep.subr.bf16.mxu1 %v14833_v12  ;;  %v14902_v11 = vld [vmem:[%s22085_s1 + $0x544] ss:$16 sps:$4 sm:$0xff]   ;;  %v14905_v12 = vld [vmem:[%s22085_s1 + $0x54c] ss:$16 sps:$4 sm:$0xff]  }
  0x7b   :  { %3621 = vmatpush1.bf16.msra.mxu0 %v14828_v13  ;;  %4205 = vmatpush1.bf16.msra.mxu1 %v14831_v14  ;;  %v14900_v13 = vld [vmem:[%s22085_s1 + $0x540] ss:$16 sps:$4 sm:$0xff]   ;;  %v14903_v14 = vld [vmem:[%s22085_s1 + $0x548] ss:$16 sps:$4 sm:$0xff]  }
  0x7c   :  { %3622 = vmatprep.subr.bf16.mxu0 %v14836_v15  ;;  %4206 = vmatprep.subr.bf16.mxu1 %v14839_v16  ;;  %v14908_v15 = vld [vmem:[%s22085_s1 + $0x564] ss:$16 sps:$4 sm:$0xff]   ;;  %v14911_v16 = vld [vmem:[%s22085_s1 + $0x56c] ss:$16 sps:$4 sm:$0xff]  }
  0x7f   :  { %3623 = vmatpush1.bf16.msra.mxu0 %v14834_v17  ;;  %4207 = vmatpush1.bf16.msra.mxu1 %v14837_v18  ;;  %v14906_v17 = vld [vmem:[%s22085_s1 + $0x560] ss:$16 sps:$4 sm:$0xff]   ;;  %v14909_v18 = vld [vmem:[%s22085_s1 + $0x568] ss:$16 sps:$4 sm:$0xff]  }
  0x80   :  { %3665 = vmatprep.subr.bf16.mxu0 %v14842_v19  ;;  %4249 = vmatprep.subr.bf16.mxu1 %v14845_v20  ;;  %v14914_v19 = vld [vmem:[%s22085_s1 + $0x584] ss:$16 sps:$4 sm:$0xff]   ;;  %v14917_v20 = vld [vmem:[%s22085_s1 + $0x58c] ss:$16 sps:$4 sm:$0xff]  }
  0x82   :  { %3625 = vmatmul.mubr.bf16.vlgmr.msra.gmra.mrb[0].mxu0 %v12329_v22  ;;  %4209 = vmatmul.mubr.bf16.vlgmr.msra.gmra.mrb[0].mxu1 %v12329_v22  ;;  %v14915_v22 = vld [vmem:[%s22085_s1 + $0x588] ss:$16 sps:$4 sm:$0xff]  }
  0x83   :  { %3666 = vmatpush1.bf16.msra.mxu0 %v14840_v21  ;;  %4250 = vmatpush1.bf16.msra.mxu1 %v14843_v23  ;;  %v14912_v21 = vld [vmem:[%s22085_s1 + $0x580] ss:$16 sps:$4 sm:$0xff]   ;;  %v14920_v23 = vld [vmem:[%s22085_s1 + $0x5a4] ss:$16 sps:$4 sm:$0xff]  }
  0x84   :  { %3667 = vmatprep.subr.bf16.mxu0 %v14848_v26  ;;  %4251 = vmatprep.subr.bf16.mxu1 %v14851_v27  ;;  %v14921_v26 = vld [vmem:[%s22085_s1 + $0x5a8] ss:$16 sps:$4 sm:$0xff]   ;;  %v14926_v27 = vld [vmem:[%s22085_s1 + $0x5c4] ss:$16 sps:$4 sm:$0xff]  }
  0x85   :  { %3634 = vmatprep.mubr.bf16.mxu0 %v12346_v28  ;;  %4218 = vmatprep.mubr.bf16.mxu1 %v12346_v28  ;;  %v14929_v28 = vld [vmem:[%s22085_s1 + $0x5cc] ss:$16 sps:$4 sm:$0xff]  }
  0x87   :  { %3668 = vmatpush1.bf16.msra.mxu0 %v14846_v29  ;;  %4252 = vmatpush1.bf16.msra.mxu1 %v14849_v30  ;;  %v14924_v29 = vld [vmem:[%s22085_s1 + $0x5c0] ss:$16 sps:$4 sm:$0xff]   ;;  %v14927_v30 = vld [vmem:[%s22085_s1 + $0x5c8] ss:$16 sps:$4 sm:$0xff]  }
  0x88   :  { %3669 = vmatprep.subr.bf16.mxu0 %v14854_v31  ;;  %4253 = vmatprep.subr.bf16.mxu1 %v14857_v32  ;;  %v14932_v31 = vld [vmem:[%s22085_s1 + $0x5e4] ss:$16 sps:$4 sm:$0xff]   ;;  %v14935_v32 = vld [vmem:[%s22085_s1 + $0x5ec] ss:$16 sps:$4 sm:$0xff]  }
  0x8a   :  { %3635 = vmatmul.mubr.bf16.gmra.mrb[4].mxu0 %v12345_v34  ;;  %4219 = vmatmul.mubr.bf16.gmra.mrb[4].mxu1 %v12345_v34  ;;  %v14933_v34 = vld [vmem:[%s22085_s1 + $0x5e8] ss:$16 sps:$4 sm:$0xff]  }
  0x8b   :  { %3670 = vmatpush1.bf16.msra.mxu0 %v14852_v36  ;;  %4254 = vmatpush1.bf16.msra.mxu1 %v14855_v37  ;;  %v14941_v36 = vld [vmem:[%s22085_s1 + $0x60c] ss:$16 sps:$4 sm:$0xff]   ;;  %v59_v37 = vld [vmem:[%s22086_s0 + $0x90] sm:$0xff] }
  0x8c   :  { %3671 = vmatprep.subr.bf16.mxu0 %v14860_v38  ;;  %4255 = vmatprep.subr.bf16.mxu1 %v14863_v39  ;;  %v12331_v38 = vcombine.low %v16724_v57, %v16729_v59  ;;  %v67_v39 = vld [vmem:[%s22086_s0 + $0xd0] sm:$0xff] }
  0x8d   :  { %3644 = vmatprep.mubr.bf16.mxu0 %v12362_v40  ;;  %4228 = vmatprep.mubr.bf16.mxu1 %v12362_v40  ;;  %v14936_v40 = vld [vmem:[%s22085_s1 + $0x600] ss:$16 sps:$4 sm:$0xff]   ;;  %v14962_v59 = vld [vmem:[%s22085_s1 + $0x684] ss:$16 sps:$4 sm:$0xff]  }
  0x8e   :  { %v14954_v57 = vld [vmem:[%s22085_s1 + $0x660] ss:$16 sps:$4 sm:$0xff]  }
  0x8f   :  { %3672 = vmatpush1.bf16.msra.mxu0 %v14858_v41  ;;  %4256 = vmatpush1.bf16.msra.mxu1 %v14861_v42  ;;  %v14939_v41 = vld [vmem:[%s22085_s1 + $0x608] ss:$16 sps:$4 sm:$0xff]   ;;  %v14944_v42 = vld [vmem:[%s22085_s1 + $0x624] ss:$16 sps:$4 sm:$0xff]  }
  0x90   :  { %3673 = vmatprep.subr.bf16.mxu0 %v14866_v43  ;;  %4257 = vmatprep.subr.bf16.mxu1 %v14869_v44  ;;  %v14947_v43 = vld [vmem:[%s22085_s1 + $0x62c] ss:$16 sps:$4 sm:$0xff]   ;;  %v12348_v44 = vcombine.high %v59_v37, %v67_v39 }
  0x92   :  { %3645 = vmatmul.mubr.bf16.gmra.mrb[8].mxu0 %v12361_v46  ;;  %4229 = vmatmul.mubr.bf16.gmra.mrb[8].mxu1 %v12361_v46  ;;  %v14945_v46 = vld [vmem:[%s22085_s1 + $0x628] ss:$16 sps:$4 sm:$0xff]  }
  0x93   :  { %3674 = vmatpush1.bf16.msra.mxu0 %v14864_v48  ;;  %4258 = vmatpush1.bf16.msra.mxu1 %v14867_v49  ;;  %v14953_v48 = vld [vmem:[%s22085_s1 + $0x64c] ss:$16 sps:$4 sm:$0xff]   ;;  %v75_v49 = vld [vmem:[%s22086_s0 + $0x110] sm:$0xff] }
  0x94   :  { %3675 = vmatprep.subr.bf16.mxu0 %v14872_v50  ;;  %4259 = vmatprep.subr.bf16.mxu1 %v14875_v51  ;;  %v12347_v50 = vcombine.low %v59_v37, %v67_v39  ;;  %v83_v51 = vld [vmem:[%s22086_s0 + $0x150] sm:$0xff] }
  0x95   :  { %3654 = vmatprep.mubr.bf16.mxu0 %v12378_v52  ;;  %4238 = vmatprep.mubr.bf16.mxu1 %v12378_v52  ;;  %v14948_v52 = vld [vmem:[%s22085_s1 + $0x640] ss:$16 sps:$4 sm:$0xff]   ;;  %v15016_v39 = vld [vmem:[%s22085_s1 + $0x7a4] ss:$16 sps:$4 sm:$0xff]  }
  0x96   :  { %v15008_v37 = vld [vmem:[%s22085_s1 + $0x780] ss:$16 sps:$4 sm:$0xff]  }
  0x97   :  { %3676 = vmatpush1.bf16.msra.mxu0 %v14870_v53  ;;  %4260 = vmatpush1.bf16.msra.mxu1 %v14873_v54  ;;  %v14951_v53 = vld [vmem:[%s22085_s1 + $0x648] ss:$16 sps:$4 sm:$0xff]   ;;  %v14956_v54 = vld [vmem:[%s22085_s1 + $0x664] ss:$16 sps:$4 sm:$0xff]  }
  0x98   :  { %3677 = vmatprep.subr.bf16.mxu0 %v14878_v55  ;;  %4261 = vmatprep.subr.bf16.mxu1 %v14881_v56  ;;  %v14959_v55 = vld [vmem:[%s22085_s1 + $0x66c] ss:$16 sps:$4 sm:$0xff]   ;;  %v12364_v56 = vcombine.high %v75_v49, %v83_v51 }
  0x9a   :  { %3655 = vmatmul.mubr.bf16.gmra.mrb[12].mxu0 %v12377_v58  ;;  %4239 = vmatmul.mubr.bf16.gmra.mrb[12].mxu1 %v12377_v58  ;;  %v14957_v58 = vld [vmem:[%s22085_s1 + $0x668] ss:$16 sps:$4 sm:$0xff]  }
  0x9b   :  { %3678 = vmatpush1.bf16.msra.mxu0 %v14876_v60  ;;  %4262 = vmatpush1.bf16.msra.mxu1 %v14879_v61  ;;  %v14965_v60 = vld [vmem:[%s22085_s1 + $0x68c] ss:$16 sps:$4 sm:$0xff]   ;;  %v14960_v61 = vld [vmem:[%s22085_s1 + $0x680] ss:$16 sps:$4 sm:$0xff]  }
  0x9c   :  { %3679 = vmatprep.subr.bf16.mxu0 %v14884_v62  ;;  %4263 = vmatprep.subr.bf16.mxu1 %v14887_v63  ;;  %v14963_v62 = vld [vmem:[%s22085_s1 + $0x688] ss:$16 sps:$4 sm:$0xff]   ;;  %v12363_v63 = vcombine.low %v75_v49, %v83_v51  ;;  %v15026_v49 = vld [vmem:[%s22085_s1 + $0x7e0] ss:$16 sps:$4 sm:$0xff]   ;;  %v15034_v51 = vld [vmem:[%s22085_s1 + $0x804] ss:$16 sps:$4 sm:$0xff]  }
  0x9d   :  { %3697 = vmatprep.mubr.bf16.mxu0 %v12332_v0  ;;  %4281 = vmatprep.mubr.bf16.mxu1 %v12332_v0  ;;  %v91_v0 = vld [vmem:[%s22086_s0 + $0x190] sm:$0xff] }
  0x9f   :  { %3680 = vmatpush1.bf16.msra.mxu0 %v14882_v1  ;;  %4264 = vmatpush1.bf16.msra.mxu1 %v14885_v2  ;;  %v99_v1 = vld [vmem:[%s22086_s0 + $0x1d0] sm:$0xff] }
  0xa0   :  { %3681 = vmatprep.subr.bf16.mxu0 %v14890_v3  ;;  %4265 = vmatprep.subr.bf16.mxu1 %v14893_v4  ;;  %v14968_v2 = vld [vmem:[%s22085_s1 + $0x6a4] ss:$16 sps:$4 sm:$0xff]   ;;  %v14971_v3 = vld [vmem:[%s22085_s1 + $0x6ac] ss:$16 sps:$4 sm:$0xff]   ;;  %v12380_v4 = vcombine.high %v91_v0, %v99_v1 }
  0xa3   :  { %3682 = vmatpush1.bf16.msra.mxu0 %v14888_v5  ;;  %4266 = vmatpush1.bf16.msra.mxu1 %v14891_v6  ;;  %v14966_v5 = vld [vmem:[%s22085_s1 + $0x6a0] ss:$16 sps:$4 sm:$0xff]   ;;  %v14969_v6 = vld [vmem:[%s22085_s1 + $0x6a8] ss:$16 sps:$4 sm:$0xff]  }
  0xa4   :  { %3683 = vmatprep.subr.bf16.mxu0 %v14896_v7  ;;  %4267 = vmatprep.subr.bf16.mxu1 %v14899_v8  ;;  %v14974_v7 = vld [vmem:[%s22085_s1 + $0x6c4] ss:$16 sps:$4 sm:$0xff]   ;;  %v14977_v8 = vld [vmem:[%s22085_s1 + $0x6cc] ss:$16 sps:$4 sm:$0xff]  }
  0xa7   :  { %3684 = vmatpush1.bf16.msra.mxu0 %v14894_v9  ;;  %4268 = vmatpush1.bf16.msra.mxu1 %v14897_v10  ;;  %v16948_v9 = vld [vmem:[%s22086_s0 + $0x18] sm:$0xff]  ;;  %v12379_v10 = vcombine.low %v91_v0, %v99_v1  ;;  %v15044_v1 = vld [vmem:[%s22085_s1 + $0x840] ss:$16 sps:$4 sm:$0xff]  }
  0xa8   :  { %3685 = vmatprep.subr.bf16.mxu0 %v14902_v11  ;;  %4269 = vmatprep.subr.bf16.mxu1 %v14905_v12  ;;  %v16953_v11 = vld [vmem:[%s22086_s0 + $0x58] sm:$0xff]  ;;  %v14972_v12 = vld [vmem:[%s22085_s1 + $0x6c0] ss:$16 sps:$4 sm:$0xff]  }
  0xa9   :  { %v15049_v0 = vld [vmem:[%s22085_s1 + $0x84c] ss:$16 sps:$4 sm:$0xff]  }
  0xab   :  { %3686 = vmatpush1.bf16.msra.mxu0 %v14900_v13  ;;  %4270 = vmatpush1.bf16.msra.mxu1 %v14903_v14  ;;  %v14975_v13 = vld [vmem:[%s22085_s1 + $0x6c8] ss:$16 sps:$4 sm:$0xff]   ;;  %v14980_v14 = vld [vmem:[%s22085_s1 + $0x6e4] ss:$16 sps:$4 sm:$0xff]  }
  0xac   :  { %3687 = vmatprep.subr.bf16.mxu0 %v14908_v15  ;;  %4271 = vmatprep.subr.bf16.mxu1 %v14911_v16  ;;  %v14983_v15 = vld [vmem:[%s22085_s1 + $0x6ec] ss:$16 sps:$4 sm:$0xff]   ;;  %v12334_v16 = vcombine.high %v16948_v9, %v16953_v11 }
  0xaf   :  { %3688 = vmatpush1.bf16.msra.mxu0 %v14906_v17  ;;  %4272 = vmatpush1.bf16.msra.mxu1 %v14909_v18  ;;  %v14978_v17 = vld [vmem:[%s22085_s1 + $0x6e0] ss:$16 sps:$4 sm:$0xff]   ;;  %v14981_v18 = vld [vmem:[%s22085_s1 + $0x6e8] ss:$16 sps:$4 sm:$0xff]  }
  0xb0   :  { %3689 = vmatprep.subr.bf16.mxu0 %v14914_v19  ;;  %4273 = vmatprep.subr.bf16.mxu1 %v14917_v20  ;;  %v14986_v19 = vld [vmem:[%s22085_s1 + $0x704] ss:$16 sps:$4 sm:$0xff]   ;;  %v14989_v20 = vld [vmem:[%s22085_s1 + $0x70c] ss:$16 sps:$4 sm:$0xff]  }
  0xb3   :  { %3690 = vmatpush1.bf16.msra.mxu0 %v14912_v21  ;;  %4274 = vmatpush1.bf16.msra.mxu1 %v14915_v22  ;;  %v14984_v21 = vld [vmem:[%s22085_s1 + $0x700] ss:$16 sps:$4 sm:$0xff]   ;;  %v14987_v22 = vld [vmem:[%s22085_s1 + $0x708] ss:$16 sps:$4 sm:$0xff]  }
  0xb4   :  { %3691 = vmatprep.subr.bf16.mxu0 %v14920_v23  ;;  %4275 = vmatprep.subr.bf16.mxu1 %v14923_v24  ;;  %v14992_v23 = vld [vmem:[%s22085_s1 + $0x724] ss:$16 sps:$4 sm:$0xff]   ;;  %v14995_v24 = vld [vmem:[%s22085_s1 + $0x72c] ss:$16 sps:$4 sm:$0xff]  }
  0xb7   :  { %3692 = vmatpush1.bf16.msra.mxu0 %v14918_v25  ;;  %4276 = vmatpush1.bf16.msra.mxu1 %v14921_v26  ;;  %v14990_v25 = vld [vmem:[%s22085_s1 + $0x720] ss:$16 sps:$4 sm:$0xff]   ;;  %v14993_v26 = vld [vmem:[%s22085_s1 + $0x728] ss:$16 sps:$4 sm:$0xff]  }
  0xb8   :  { %3693 = vmatprep.subr.bf16.mxu0 %v14926_v27  ;;  %4277 = vmatprep.subr.bf16.mxu1 %v14929_v28  ;;  %v14998_v27 = vld [vmem:[%s22085_s1 + $0x744] ss:$16 sps:$4 sm:$0xff]   ;;  %v15001_v28 = vld [vmem:[%s22085_s1 + $0x74c] ss:$16 sps:$4 sm:$0xff]  }
  0xbb   :  { %3694 = vmatpush1.bf16.msra.mxu0 %v14924_v29  ;;  %4278 = vmatpush1.bf16.msra.mxu1 %v14927_v30  ;;  %v14996_v29 = vld [vmem:[%s22085_s1 + $0x740] ss:$16 sps:$4 sm:$0xff]   ;;  %v14999_v30 = vld [vmem:[%s22085_s1 + $0x748] ss:$16 sps:$4 sm:$0xff]  }
  0xbc   :  { %3695 = vmatprep.subr.bf16.mxu0 %v14932_v31  ;;  %4279 = vmatprep.subr.bf16.mxu1 %v14935_v32  ;;  %v15004_v31 = vld [vmem:[%s22085_s1 + $0x764] ss:$16 sps:$4 sm:$0xff]   ;;  %v15007_v32 = vld [vmem:[%s22085_s1 + $0x76c] ss:$16 sps:$4 sm:$0xff]  }
  0xbf   :  { %3696 = vmatpush1.bf16.msra.mxu0 %v14930_v33  ;;  %4280 = vmatpush1.bf16.msra.mxu1 %v14933_v34  ;;  %v15002_v33 = vld [vmem:[%s22085_s1 + $0x760] ss:$16 sps:$4 sm:$0xff]   ;;  %v15005_v34 = vld [vmem:[%s22085_s1 + $0x768] ss:$16 sps:$4 sm:$0xff]  }
  0xc0   :  { %3738 = vmatprep.subr.bf16.mxu0 %v14938_v35  ;;  %4322 = vmatprep.subr.bf16.mxu1 %v14941_v36  ;;  %v15010_v35 = vld [vmem:[%s22085_s1 + $0x784] ss:$16 sps:$4 sm:$0xff]   ;;  %v15013_v36 = vld [vmem:[%s22085_s1 + $0x78c] ss:$16 sps:$4 sm:$0xff]  }
  0xc2   :  { %3698 = vmatmul.mubr.bf16.vlgmr.msra.gmra.mrb[0].mxu0 %v12331_v38  ;;  %4282 = vmatmul.mubr.bf16.vlgmr.msra.gmra.mrb[0].mxu1 %v12331_v38  ;;  %v15011_v38 = vld [vmem:[%s22085_s1 + $0x788] ss:$16 sps:$4 sm:$0xff]  }
  0xc3   :  { %3739 = vmatpush1.bf16.msra.mxu0 %v14936_v40  ;;  %4323 = vmatpush1.bf16.msra.mxu1 %v14939_v41  ;;  %v15019_v40 = vld [vmem:[%s22085_s1 + $0x7ac] ss:$16 sps:$4 sm:$0xff]   ;;  %v15014_v41 = vld [vmem:[%s22085_s1 + $0x7a0] ss:$16 sps:$4 sm:$0xff]  }
  0xc4   :  { %3740 = vmatprep.subr.bf16.mxu0 %v14944_v42  ;;  %4324 = vmatprep.subr.bf16.mxu1 %v14947_v43  ;;  %v15017_v42 = vld [vmem:[%s22085_s1 + $0x7a8] ss:$16 sps:$4 sm:$0xff]   ;;  %v15022_v43 = vld [vmem:[%s22085_s1 + $0x7c4] ss:$16 sps:$4 sm:$0xff]  }
  0xc5   :  { %3707 = vmatprep.mubr.bf16.mxu0 %v12348_v44  ;;  %4291 = vmatprep.mubr.bf16.mxu1 %v12348_v44  ;;  %v15025_v44 = vld [vmem:[%s22085_s1 + $0x7cc] ss:$16 sps:$4 sm:$0xff]  }
  0xc7   :  { %3741 = vmatpush1.bf16.msra.mxu0 %v14942_v45  ;;  %4325 = vmatpush1.bf16.msra.mxu1 %v14945_v46  ;;  %v15020_v45 = vld [vmem:[%s22085_s1 + $0x7c0] ss:$16 sps:$4 sm:$0xff]   ;;  %v15023_v46 = vld [vmem:[%s22085_s1 + $0x7c8] ss:$16 sps:$4 sm:$0xff]  }
  0xc8   :  { %3742 = vmatprep.subr.bf16.mxu0 %v14950_v47  ;;  %4326 = vmatprep.subr.bf16.mxu1 %v14953_v48  ;;  %v15028_v47 = vld [vmem:[%s22085_s1 + $0x7e4] ss:$16 sps:$4 sm:$0xff]   ;;  %v15031_v48 = vld [vmem:[%s22085_s1 + $0x7ec] ss:$16 sps:$4 sm:$0xff]  }
  0xca   :  { %3708 = vmatmul.mubr.bf16.gmra.mrb[4].mxu0 %v12347_v50  ;;  %4292 = vmatmul.mubr.bf16.gmra.mrb[4].mxu1 %v12347_v50  ;;  %v15029_v50 = vld [vmem:[%s22085_s1 + $0x7e8] ss:$16 sps:$4 sm:$0xff]  }
  0xcb   :  { %3743 = vmatpush1.bf16.msra.mxu0 %v14948_v52  ;;  %4327 = vmatpush1.bf16.msra.mxu1 %v14951_v53  ;;  %v15037_v52 = vld [vmem:[%s22085_s1 + $0x80c] ss:$16 sps:$4 sm:$0xff]   ;;  %v15032_v53 = vld [vmem:[%s22085_s1 + $0x800] ss:$16 sps:$4 sm:$0xff]  }
  0xcc   :  { %3744 = vmatprep.subr.bf16.mxu0 %v14956_v54  ;;  %4328 = vmatprep.subr.bf16.mxu1 %v14959_v55  ;;  %v12333_v54 = vcombine.low %v16948_v9, %v16953_v11  ;;  %v60_v55 = vld [vmem:[%s22086_s0 + $0x98] sm:$0xff]  ;;  %v15050_v9 = vld [vmem:[%s22085_s1 + $0x860] ss:$16 sps:$4 sm:$0xff]   ;;  %v15058_v11 = vld [vmem:[%s22085_s1 + $0x884] ss:$16 sps:$4 sm:$0xff]  }
  0xcd   :  { %3717 = vmatprep.mubr.bf16.mxu0 %v12364_v56  ;;  %4301 = vmatprep.mubr.bf16.mxu1 %v12364_v56  ;;  %v68_v56 = vld [vmem:[%s22086_s0 + $0xd8] sm:$0xff] }
  0xcf   :  { %3745 = vmatpush1.bf16.msra.mxu0 %v14954_v57  ;;  %4329 = vmatpush1.bf16.msra.mxu1 %v14957_v58  ;;  %v15035_v57 = vld [vmem:[%s22085_s1 + $0x808] ss:$16 sps:$4 sm:$0xff]   ;;  %v15040_v58 = vld [vmem:[%s22085_s1 + $0x824] ss:$16 sps:$4 sm:$0xff]  }
  0xd0   :  { %3746 = vmatprep.subr.bf16.mxu0 %v14962_v59  ;;  %4330 = vmatprep.subr.bf16.mxu1 %v14965_v60  ;;  %v15043_v59 = vld [vmem:[%s22085_s1 + $0x82c] ss:$16 sps:$4 sm:$0xff]   ;;  %v12350_v60 = vcombine.high %v60_v55, %v68_v56 }
  0xd2   :  { %3718 = vmatmul.mubr.bf16.gmra.mrb[8].mxu0 %v12363_v63  ;;  %4302 = vmatmul.mubr.bf16.gmra.mrb[8].mxu1 %v12363_v63  ;;  %v15046_v63 = vld [vmem:[%s22085_s1 + $0x844] ss:$16 sps:$4 sm:$0xff]  }
  0xd3   :  { %3747 = vmatpush1.bf16.msra.mxu0 %v14960_v61  ;;  %4331 = vmatpush1.bf16.msra.mxu1 %v14963_v62  ;;  %v15038_v61 = vld [vmem:[%s22085_s1 + $0x820] ss:$16 sps:$4 sm:$0xff]   ;;  %v15041_v62 = vld [vmem:[%s22085_s1 + $0x828] ss:$16 sps:$4 sm:$0xff]  }
  0xd4   :  { %3748 = vmatprep.subr.bf16.mxu0 %v14968_v2  ;;  %4332 = vmatprep.subr.bf16.mxu1 %v14971_v3  ;;  %v15047_v2 = vld [vmem:[%s22085_s1 + $0x848] ss:$16 sps:$4 sm:$0xff]   ;;  %v12349_v3 = vcombine.low %v60_v55, %v68_v56  ;;  %v15112_v55 = vld [vmem:[%s22085_s1 + $0x9a4] ss:$16 sps:$4 sm:$0xff]   ;;  %v15115_v56 = vld [vmem:[%s22085_s1 + $0x9ac] ss:$16 sps:$4 sm:$0xff]  }
  0xd5   :  { %3727 = vmatprep.mubr.bf16.mxu0 %v12380_v4  ;;  %4311 = vmatprep.mubr.bf16.mxu1 %v12380_v4  ;;  %v76_v4 = vld [vmem:[%s22086_s0 + $0x118] sm:$0xff] }
  0xd7   :  { %3749 = vmatpush1.bf16.msra.mxu0 %v14966_v5  ;;  %4333 = vmatpush1.bf16.msra.mxu1 %v14969_v6  ;;  %v84_v5 = vld [vmem:[%s22086_s0 + $0x158] sm:$0xff]  ;;  %v15052_v6 = vld [vmem:[%s22085_s1 + $0x864] ss:$16 sps:$4 sm:$0xff]  }
  0xd8   :  { %3750 = vmatprep.subr.bf16.mxu0 %v14974_v7  ;;  %4334 = vmatprep.subr.bf16.mxu1 %v14977_v8  ;;  %v15055_v7 = vld [vmem:[%s22085_s1 + $0x86c] ss:$16 sps:$4 sm:$0xff]   ;;  %v12366_v8 = vcombine.high %v76_v4, %v84_v5 }
  0xda   :  { %3728 = vmatmul.mubr.bf16.gmra.mrb[12].mxu0 %v12379_v10  ;;  %4312 = vmatmul.mubr.bf16.gmra.mrb[12].mxu1 %v12379_v10  ;;  %v15053_v10 = vld [vmem:[%s22085_s1 + $0x868] ss:$16 sps:$4 sm:$0xff]  }
  0xdb   :  { %3751 = vmatpush1.bf16.msra.mxu0 %v14972_v12  ;;  %4335 = vmatpush1.bf16.msra.mxu1 %v14975_v13  ;;  %v15061_v12 = vld [vmem:[%s22085_s1 + $0x88c] ss:$16 sps:$4 sm:$0xff]  }
  0xdc   :  { %3752 = vmatprep.subr.bf16.mxu0 %v14980_v14  ;;  %4336 = vmatprep.subr.bf16.mxu1 %v14983_v15  ;;  %v92_v13 = vld [vmem:[%s22086_s0 + $0x198] sm:$0xff]  ;;  %v12365_v14 = vcombine.low %v76_v4, %v84_v5  ;;  %v61_v5 = vld [vmem:[%s22086_s0 + $0xa0] sm:$0xff] }
  0xdd   :  { %3770 = vmatprep.mubr.bf16.mxu0 %v12334_v16  ;;  %4354 = vmatprep.mubr.bf16.mxu1 %v12334_v16  ;;  %v100_v15 = vld [vmem:[%s22086_s0 + $0x1d8] sm:$0xff]  ;;  %v15056_v16 = vld [vmem:[%s22085_s1 + $0x880] ss:$16 sps:$4 sm:$0xff]  }
  0xde   :  { %v15133_v4 = vld [vmem:[%s22085_s1 + $0xa0c] ss:$16 sps:$4 sm:$0xff]  }
  0xdf   :  { %3753 = vmatpush1.bf16.msra.mxu0 %v14978_v17  ;;  %4337 = vmatpush1.bf16.msra.mxu1 %v14981_v18  ;;  %v15059_v17 = vld [vmem:[%s22085_s1 + $0x888] ss:$16 sps:$4 sm:$0xff]   ;;  %v15064_v18 = vld [vmem:[%s22085_s1 + $0x8a4] ss:$16 sps:$4 sm:$0xff]  }
  0xe0   :  { %3754 = vmatprep.subr.bf16.mxu0 %v14986_v19  ;;  %4338 = vmatprep.subr.bf16.mxu1 %v14989_v20  ;;  %v15067_v19 = vld [vmem:[%s22085_s1 + $0x8ac] ss:$16 sps:$4 sm:$0xff]   ;;  %v12382_v20 = vcombine.high %v92_v13, %v100_v15 }
  0xe3   :  { %3755 = vmatpush1.bf16.msra.mxu0 %v14984_v21  ;;  %4339 = vmatpush1.bf16.msra.mxu1 %v14987_v22  ;;  %v15062_v21 = vld [vmem:[%s22085_s1 + $0x8a0] ss:$16 sps:$4 sm:$0xff]   ;;  %v15065_v22 = vld [vmem:[%s22085_s1 + $0x8a8] ss:$16 sps:$4 sm:$0xff]  }
  0xe4   :  { %3756 = vmatprep.subr.bf16.mxu0 %v14992_v23  ;;  %4340 = vmatprep.subr.bf16.mxu1 %v14995_v24  ;;  %v15070_v23 = vld [vmem:[%s22085_s1 + $0x8c4] ss:$16 sps:$4 sm:$0xff]   ;;  %v15073_v24 = vld [vmem:[%s22085_s1 + $0x8cc] ss:$16 sps:$4 sm:$0xff]  }
  0xe7   :  { %3757 = vmatpush1.bf16.msra.mxu0 %v14990_v25  ;;  %4341 = vmatpush1.bf16.msra.mxu1 %v14993_v26  ;;  %v17172_v25 = vld [vmem:[%s22086_s0 + $0x20] sm:$0xff]  ;;  %v12381_v26 = vcombine.low %v92_v13, %v100_v15  ;;  %v15137_v13 = vld [vmem:[%s22085_s1 + $0xa28] ss:$16 sps:$4 sm:$0xff]  }
  0xe8   :  { %3758 = vmatprep.subr.bf16.mxu0 %v14998_v27  ;;  %4342 = vmatprep.subr.bf16.mxu1 %v15001_v28  ;;  %v17177_v27 = vld [vmem:[%s22086_s0 + $0x60] sm:$0xff] }
  0xe9   :  { %v15068_v28 = vld [vmem:[%s22085_s1 + $0x8c0] ss:$16 sps:$4 sm:$0xff]   ;;  %v15142_v15 = vld [vmem:[%s22085_s1 + $0xa44] ss:$16 sps:$4 sm:$0xff]  }
  0xeb   :  { %3759 = vmatpush1.bf16.msra.mxu0 %v14996_v29  ;;  %4343 = vmatpush1.bf16.msra.mxu1 %v14999_v30  ;;  %v15071_v29 = vld [vmem:[%s22085_s1 + $0x8c8] ss:$16 sps:$4 sm:$0xff]   ;;  %v15076_v30 = vld [vmem:[%s22085_s1 + $0x8e4] ss:$16 sps:$4 sm:$0xff]  }
  0xec   :  { %3760 = vmatprep.subr.bf16.mxu0 %v15004_v31  ;;  %4344 = vmatprep.subr.bf16.mxu1 %v15007_v32  ;;  %v15079_v31 = vld [vmem:[%s22085_s1 + $0x8ec] ss:$16 sps:$4 sm:$0xff]   ;;  %v12336_v32 = vcombine.high %v17172_v25, %v17177_v27 }
  0xef   :  { %3761 = vmatpush1.bf16.msra.mxu0 %v15002_v33  ;;  %4345 = vmatpush1.bf16.msra.mxu1 %v15005_v34  ;;  %v15074_v33 = vld [vmem:[%s22085_s1 + $0x8e0] ss:$16 sps:$4 sm:$0xff]   ;;  %v15077_v34 = vld [vmem:[%s22085_s1 + $0x8e8] ss:$16 sps:$4 sm:$0xff]  }
  0xf0   :  { %3762 = vmatprep.subr.bf16.mxu0 %v15010_v35  ;;  %4346 = vmatprep.subr.bf16.mxu1 %v15013_v36  ;;  %v15082_v35 = vld [vmem:[%s22085_s1 + $0x904] ss:$16 sps:$4 sm:$0xff]   ;;  %v15085_v36 = vld [vmem:[%s22085_s1 + $0x90c] ss:$16 sps:$4 sm:$0xff]  }
  0xf3   :  { %3763 = vmatpush1.bf16.msra.mxu0 %v15008_v37  ;;  %4347 = vmatpush1.bf16.msra.mxu1 %v15011_v38  ;;  %v15080_v37 = vld [vmem:[%s22085_s1 + $0x900] ss:$16 sps:$4 sm:$0xff]   ;;  %v15083_v38 = vld [vmem:[%s22085_s1 + $0x908] ss:$16 sps:$4 sm:$0xff]  }
  0xf4   :  { %3764 = vmatprep.subr.bf16.mxu0 %v15016_v39  ;;  %4348 = vmatprep.subr.bf16.mxu1 %v15019_v40  ;;  %v15088_v39 = vld [vmem:[%s22085_s1 + $0x924] ss:$16 sps:$4 sm:$0xff]   ;;  %v15091_v40 = vld [vmem:[%s22085_s1 + $0x92c] ss:$16 sps:$4 sm:$0xff]  }
  0xf7   :  { %3765 = vmatpush1.bf16.msra.mxu0 %v15014_v41  ;;  %4349 = vmatpush1.bf16.msra.mxu1 %v15017_v42  ;;  %v15086_v41 = vld [vmem:[%s22085_s1 + $0x920] ss:$16 sps:$4 sm:$0xff]   ;;  %v15089_v42 = vld [vmem:[%s22085_s1 + $0x928] ss:$16 sps:$4 sm:$0xff]  }
  0xf8   :  { %3766 = vmatprep.subr.bf16.mxu0 %v15022_v43  ;;  %4350 = vmatprep.subr.bf16.mxu1 %v15025_v44  ;;  %v15094_v43 = vld [vmem:[%s22085_s1 + $0x944] ss:$16 sps:$4 sm:$0xff]   ;;  %v15097_v44 = vld [vmem:[%s22085_s1 + $0x94c] ss:$16 sps:$4 sm:$0xff]  }
  0xfb   :  { %3767 = vmatpush1.bf16.msra.mxu0 %v15020_v45  ;;  %4351 = vmatpush1.bf16.msra.mxu1 %v15023_v46  ;;  %v15092_v45 = vld [vmem:[%s22085_s1 + $0x940] ss:$16 sps:$4 sm:$0xff]   ;;  %v15095_v46 = vld [vmem:[%s22085_s1 + $0x948] ss:$16 sps:$4 sm:$0xff]  }
  0xfc   :  { %3768 = vmatprep.subr.bf16.mxu0 %v15028_v47  ;;  %4352 = vmatprep.subr.bf16.mxu1 %v15031_v48  ;;  %v15100_v47 = vld [vmem:[%s22085_s1 + $0x964] ss:$16 sps:$4 sm:$0xff]   ;;  %v15103_v48 = vld [vmem:[%s22085_s1 + $0x96c] ss:$16 sps:$4 sm:$0xff]  }
  0xff   :  { %3769 = vmatpush1.bf16.msra.mxu0 %v15026_v49  ;;  %4353 = vmatpush1.bf16.msra.mxu1 %v15029_v50  ;;  %v15098_v49 = vld [vmem:[%s22085_s1 + $0x960] ss:$16 sps:$4 sm:$0xff]   ;;  %v15101_v50 = vld [vmem:[%s22085_s1 + $0x968] ss:$16 sps:$4 sm:$0xff]  }
 0x100   :  { %3811 = vmatprep.subr.bf16.mxu0 %v15034_v51  ;;  %4395 = vmatprep.subr.bf16.mxu1 %v15037_v52  ;;  %v15106_v51 = vld [vmem:[%s22085_s1 + $0x984] ss:$16 sps:$4 sm:$0xff]   ;;  %v15109_v52 = vld [vmem:[%s22085_s1 + $0x98c] ss:$16 sps:$4 sm:$0xff]  }
 0x102   :  { %3771 = vmatmul.mubr.bf16.vlgmr.msra.gmra.mrb[0].mxu0 %v12333_v54  ;;  %4355 = vmatmul.mubr.bf16.vlgmr.msra.gmra.mrb[0].mxu1 %v12333_v54  ;;  %v15107_v54 = vld [vmem:[%s22085_s1 + $0x988] ss:$16 sps:$4 sm:$0xff]  }
 0x103   :  { %3812 = vmatpush1.bf16.msra.mxu0 %v15032_v53  ;;  %4396 = vmatpush1.bf16.msra.mxu1 %v15035_v57  ;;  %v15104_v53 = vld [vmem:[%s22085_s1 + $0x980] ss:$16 sps:$4 sm:$0xff]  }
 0x104   :  { %3813 = vmatprep.subr.bf16.mxu0 %v15040_v58  ;;  %4397 = vmatprep.subr.bf16.mxu1 %v15043_v59  ;;  %v15110_v57 = vld [vmem:[%s22085_s1 + $0x9a0] ss:$16 sps:$4 sm:$0xff]   ;;  %v15113_v58 = vld [vmem:[%s22085_s1 + $0x9a8] ss:$16 sps:$4 sm:$0xff]   ;;  %v15118_v59 = vld [vmem:[%s22085_s1 + $0x9c4] ss:$16 sps:$4 sm:$0xff]  }
 0x105   :  { %3780 = vmatprep.mubr.bf16.mxu0 %v12350_v60  ;;  %4364 = vmatprep.mubr.bf16.mxu1 %v12350_v60  ;;  %v15121_v60 = vld [vmem:[%s22085_s1 + $0x9cc] ss:$16 sps:$4 sm:$0xff]  }
 0x107   :  { %3814 = vmatpush1.bf16.msra.mxu0 %v15038_v61  ;;  %4398 = vmatpush1.bf16.msra.mxu1 %v15041_v62  ;;  %v15116_v61 = vld [vmem:[%s22085_s1 + $0x9c0] ss:$16 sps:$4 sm:$0xff]   ;;  %v15119_v62 = vld [vmem:[%s22085_s1 + $0x9c8] ss:$16 sps:$4 sm:$0xff]  }
 0x108   :  { %3815 = vmatprep.subr.bf16.mxu0 %v15046_v63  ;;  %4399 = vmatprep.subr.bf16.mxu1 %v15049_v0  ;;  %v15124_v63 = vld [vmem:[%s22085_s1 + $0x9e4] ss:$16 sps:$4 sm:$0xff]   ;;  %v15127_v0 = vld [vmem:[%s22085_s1 + $0x9ec] ss:$16 sps:$4 sm:$0xff]  }
 0x10a   :  { %3781 = vmatmul.mubr.bf16.gmra.mrb[4].mxu0 %v12349_v3  ;;  %4365 = vmatmul.mubr.bf16.gmra.mrb[4].mxu1 %v12349_v3  ;;  %v15130_v3 = vld [vmem:[%s22085_s1 + $0xa04] ss:$16 sps:$4 sm:$0xff]  }
 0x10b   :  { %3816 = vmatpush1.bf16.msra.mxu0 %v15044_v1  ;;  %4400 = vmatpush1.bf16.msra.mxu1 %v15047_v2  ;;  %v15122_v1 = vld [vmem:[%s22085_s1 + $0x9e0] ss:$16 sps:$4 sm:$0xff]   ;;  %v15125_v2 = vld [vmem:[%s22085_s1 + $0x9e8] ss:$16 sps:$4 sm:$0xff]  }
 0x10c   :  { %3817 = vmatprep.subr.bf16.mxu0 %v15052_v6  ;;  %4401 = vmatprep.subr.bf16.mxu1 %v15055_v7  ;;  %v69_v6 = vld [vmem:[%s22086_s0 + $0xe0] sm:$0xff]  ;;  %v12335_v7 = vcombine.low %v17172_v25, %v17177_v27  ;;  %v15149_v25 = vld [vmem:[%s22085_s1 + $0xa68] ss:$16 sps:$4 sm:$0xff]  }
 0x10d   :  { %3790 = vmatprep.mubr.bf16.mxu0 %v12366_v8  ;;  %4374 = vmatprep.mubr.bf16.mxu1 %v12366_v8  ;;  %v15128_v8 = vld [vmem:[%s22085_s1 + $0xa00] ss:$16 sps:$4 sm:$0xff]   ;;  %v15154_v27 = vld [vmem:[%s22085_s1 + $0xa84] ss:$16 sps:$4 sm:$0xff]  }
 0x10f   :  { %3818 = vmatpush1.bf16.msra.mxu0 %v15050_v9  ;;  %4402 = vmatpush1.bf16.msra.mxu1 %v15053_v10  ;;  %v15131_v9 = vld [vmem:[%s22085_s1 + $0xa08] ss:$16 sps:$4 sm:$0xff]   ;;  %v15136_v10 = vld [vmem:[%s22085_s1 + $0xa24] ss:$16 sps:$4 sm:$0xff]  }
 0x110   :  { %3819 = vmatprep.subr.bf16.mxu0 %v15058_v11  ;;  %4403 = vmatprep.subr.bf16.mxu1 %v15061_v12  ;;  %v15139_v11 = vld [vmem:[%s22085_s1 + $0xa2c] ss:$16 sps:$4 sm:$0xff]   ;;  %v15134_v12 = vld [vmem:[%s22085_s1 + $0xa20] ss:$16 sps:$4 sm:$0xff]  }
 0x112   :  { %3791 = vmatmul.mubr.bf16.gmra.mrb[8].mxu0 %v12365_v14  ;;  %4375 = vmatmul.mubr.bf16.gmra.mrb[8].mxu1 %v12365_v14  ;;  %v12352_v14 = vcombine.high %v61_v5, %v69_v6 }
 0x113   :  { %3820 = vmatpush1.bf16.msra.mxu0 %v15056_v16  ;;  %4404 = vmatpush1.bf16.msra.mxu1 %v15059_v17  ;;  %v15145_v16 = vld [vmem:[%s22085_s1 + $0xa4c] ss:$16 sps:$4 sm:$0xff]   ;;  %v77_v17 = vld [vmem:[%s22086_s0 + $0x120] sm:$0xff] }
 0x114   :  { %3821 = vmatprep.subr.bf16.mxu0 %v15064_v18  ;;  %4405 = vmatprep.subr.bf16.mxu1 %v15067_v19  ;;  %v85_v18 = vld [vmem:[%s22086_s0 + $0x160] sm:$0xff]  ;;  %v12351_v19 = vcombine.low %v61_v5, %v69_v6  ;;  %v15203_v6 = vld [vmem:[%s22085_s1 + $0xb88] ss:$16 sps:$4 sm:$0xff]  }
 0x115   :  { %3800 = vmatprep.mubr.bf16.mxu0 %v12382_v20  ;;  %4384 = vmatprep.mubr.bf16.mxu1 %v12382_v20  ;;  %v15140_v20 = vld [vmem:[%s22085_s1 + $0xa40] ss:$16 sps:$4 sm:$0xff]  }
 0x116   :  { %v15200_v5 = vld [vmem:[%s22085_s1 + $0xb80] ss:$16 sps:$4 sm:$0xff]  }
 0x117   :  { %3822 = vmatpush1.bf16.msra.mxu0 %v15062_v21  ;;  %4406 = vmatpush1.bf16.msra.mxu1 %v15065_v22  ;;  %v15143_v21 = vld [vmem:[%s22085_s1 + $0xa48] ss:$16 sps:$4 sm:$0xff]   ;;  %v15148_v22 = vld [vmem:[%s22085_s1 + $0xa64] ss:$16 sps:$4 sm:$0xff]  }
 0x118   :  { %3823 = vmatprep.subr.bf16.mxu0 %v15070_v23  ;;  %4407 = vmatprep.subr.bf16.mxu1 %v15073_v24  ;;  %v15151_v23 = vld [vmem:[%s22085_s1 + $0xa6c] ss:$16 sps:$4 sm:$0xff]   ;;  %v15146_v24 = vld [vmem:[%s22085_s1 + $0xa60] ss:$16 sps:$4 sm:$0xff]  }
 0x11a   :  { %3801 = vmatmul.mubr.bf16.gmra.mrb[12].mxu0 %v12381_v26  ;;  %4385 = vmatmul.mubr.bf16.gmra.mrb[12].mxu1 %v12381_v26  ;;  %v12368_v26 = vcombine.high %v77_v17, %v85_v18 }
 0x11b   :  { %3824 = vmatpush1.bf16.msra.mxu0 %v15068_v28  ;;  %4408 = vmatpush1.bf16.msra.mxu1 %v15071_v29  ;;  %v15157_v28 = vld [vmem:[%s22085_s1 + $0xa8c] ss:$16 sps:$4 sm:$0xff]   ;;  %v93_v29 = vld [vmem:[%s22086_s0 + $0x1a0] sm:$0xff] }
 0x11c   :  { %3825 = vmatprep.subr.bf16.mxu0 %v15076_v30  ;;  %4409 = vmatprep.subr.bf16.mxu1 %v15079_v31  ;;  %v101_v30 = vld [vmem:[%s22086_s0 + $0x1e0] sm:$0xff]  ;;  %v12367_v31 = vcombine.low %v77_v17, %v85_v18  ;;  %v15221_v18 = vld [vmem:[%s22085_s1 + $0xbe8] ss:$16 sps:$4 sm:$0xff]  }
 0x11d   :  { %3843 = vmatprep.mubr.bf16.mxu0 %v12336_v32  ;;  %4427 = vmatprep.mubr.bf16.mxu1 %v12336_v32  ;;  %v15152_v32 = vld [vmem:[%s22085_s1 + $0xa80] ss:$16 sps:$4 sm:$0xff]  }
 0x11e   :  { %v15218_v17 = vld [vmem:[%s22085_s1 + $0xbe0] ss:$16 sps:$4 sm:$0xff]  }
 0x11f   :  { %3826 = vmatpush1.bf16.msra.mxu0 %v15074_v33  ;;  %4410 = vmatpush1.bf16.msra.mxu1 %v15077_v34  ;;  %v15155_v33 = vld [vmem:[%s22085_s1 + $0xa88] ss:$16 sps:$4 sm:$0xff]   ;;  %v15160_v34 = vld [vmem:[%s22085_s1 + $0xaa4] ss:$16 sps:$4 sm:$0xff]  }
 0x120   :  { %3827 = vmatprep.subr.bf16.mxu0 %v15082_v35  ;;  %4411 = vmatprep.subr.bf16.mxu1 %v15085_v36  ;;  %v15163_v35 = vld [vmem:[%s22085_s1 + $0xaac] ss:$16 sps:$4 sm:$0xff]   ;;  %v15158_v36 = vld [vmem:[%s22085_s1 + $0xaa0] ss:$16 sps:$4 sm:$0xff]  }
 0x123   :  { %3828 = vmatpush1.bf16.msra.mxu0 %v15080_v37  ;;  %4412 = vmatpush1.bf16.msra.mxu1 %v15083_v38  ;;  %v15161_v37 = vld [vmem:[%s22085_s1 + $0xaa8] ss:$16 sps:$4 sm:$0xff]   ;;  %v12384_v38 = vcombine.high %v93_v29, %v101_v30 }
 0x124   :  { %3829 = vmatprep.subr.bf16.mxu0 %v15088_v39  ;;  %4413 = vmatprep.subr.bf16.mxu1 %v15091_v40  ;;  %v15166_v39 = vld [vmem:[%s22085_s1 + $0xac4] ss:$16 sps:$4 sm:$0xff]   ;;  %v15169_v40 = vld [vmem:[%s22085_s1 + $0xacc] ss:$16 sps:$4 sm:$0xff]  }
 0x127   :  { %3830 = vmatpush1.bf16.msra.mxu0 %v15086_v41  ;;  %4414 = vmatpush1.bf16.msra.mxu1 %v15089_v42  ;;  %v17396_v41 = vld [vmem:[%s22086_s0 + $0x28] sm:$0xff] }
 0x128   :  { %3831 = vmatprep.subr.bf16.mxu0 %v15094_v43  ;;  %4415 = vmatprep.subr.bf16.mxu1 %v15097_v44  ;;  %v17401_v42 = vld [vmem:[%s22086_s0 + $0x68] sm:$0xff]  ;;  %v12383_v43 = vcombine.low %v93_v29, %v101_v30  ;;  %v15164_v44 = vld [vmem:[%s22085_s1 + $0xac0] ss:$16 sps:$4 sm:$0xff]  }
 0x129   :  { %v15230_v29 = vld [vmem:[%s22085_s1 + $0xc20] ss:$16 sps:$4 sm:$0xff]   ;;  %v15233_v30 = vld [vmem:[%s22085_s1 + $0xc28] ss:$16 sps:$4 sm:$0xff]  }
 0x12b   :  { %3832 = vmatpush1.bf16.msra.mxu0 %v15092_v45  ;;  %4416 = vmatpush1.bf16.msra.mxu1 %v15095_v46  ;;  %v15167_v45 = vld [vmem:[%s22085_s1 + $0xac8] ss:$16 sps:$4 sm:$0xff]   ;;  %v15172_v46 = vld [vmem:[%s22085_s1 + $0xae4] ss:$16 sps:$4 sm:$0xff]  }
 0x12c   :  { %3833 = vmatprep.subr.bf16.mxu0 %v15100_v47  ;;  %4417 = vmatprep.subr.bf16.mxu1 %v15103_v48  ;;  %v15175_v47 = vld [vmem:[%s22085_s1 + $0xaec] ss:$16 sps:$4 sm:$0xff]   ;;  %v12338_v48 = vcombine.high %v17396_v41, %v17401_v42 }
 0x12f   :  { %3834 = vmatpush1.bf16.msra.mxu0 %v15098_v49  ;;  %4418 = vmatpush1.bf16.msra.mxu1 %v15101_v50  ;;  %v15170_v49 = vld [vmem:[%s22085_s1 + $0xae0] ss:$16 sps:$4 sm:$0xff]   ;;  %v15173_v50 = vld [vmem:[%s22085_s1 + $0xae8] ss:$16 sps:$4 sm:$0xff]  }
 0x130   :  { %3835 = vmatprep.subr.bf16.mxu0 %v15106_v51  ;;  %4419 = vmatprep.subr.bf16.mxu1 %v15109_v52  ;;  %v15178_v51 = vld [vmem:[%s22085_s1 + $0xb04] ss:$16 sps:$4 sm:$0xff]   ;;  %v15181_v52 = vld [vmem:[%s22085_s1 + $0xb0c] ss:$16 sps:$4 sm:$0xff]  }
 0x133   :  { %3836 = vmatpush1.bf16.msra.mxu0 %v15104_v53  ;;  %4420 = vmatpush1.bf16.msra.mxu1 %v15107_v54  ;;  %v15176_v53 = vld [vmem:[%s22085_s1 + $0xb00] ss:$16 sps:$4 sm:$0xff]   ;;  %v15179_v54 = vld [vmem:[%s22085_s1 + $0xb08] ss:$16 sps:$4 sm:$0xff]  }
 0x134   :  { %3837 = vmatprep.subr.bf16.mxu0 %v15112_v55  ;;  %4421 = vmatprep.subr.bf16.mxu1 %v15115_v56  ;;  %v15184_v55 = vld [vmem:[%s22085_s1 + $0xb24] ss:$16 sps:$4 sm:$0xff]   ;;  %v15187_v56 = vld [vmem:[%s22085_s1 + $0xb2c] ss:$16 sps:$4 sm:$0xff]  }
 0x137   :  { %3838 = vmatpush1.bf16.msra.mxu0 %v15110_v57  ;;  %4422 = vmatpush1.bf16.msra.mxu1 %v15113_v58  ;;  %v15182_v57 = vld [vmem:[%s22085_s1 + $0xb20] ss:$16 sps:$4 sm:$0xff]   ;;  %v15185_v58 = vld [vmem:[%s22085_s1 + $0xb28] ss:$16 sps:$4 sm:$0xff]  }
 0x138   :  { %3839 = vmatprep.subr.bf16.mxu0 %v15118_v59  ;;  %4423 = vmatprep.subr.bf16.mxu1 %v15121_v60  ;;  %v15190_v59 = vld [vmem:[%s22085_s1 + $0xb44] ss:$16 sps:$4 sm:$0xff]   ;;  %v15193_v60 = vld [vmem:[%s22085_s1 + $0xb4c] ss:$16 sps:$4 sm:$0xff]  }
 0x13b   :  { %3840 = vmatpush1.bf16.msra.mxu0 %v15116_v61  ;;  %4424 = vmatpush1.bf16.msra.mxu1 %v15119_v62  ;;  %v15188_v61 = vld [vmem:[%s22085_s1 + $0xb40] ss:$16 sps:$4 sm:$0xff]   ;;  %v15191_v62 = vld [vmem:[%s22085_s1 + $0xb48] ss:$16 sps:$4 sm:$0xff]  }
 0x13c   :  { %3841 = vmatprep.subr.bf16.mxu0 %v15124_v63  ;;  %4425 = vmatprep.subr.bf16.mxu1 %v15127_v0  ;;  %v15196_v63 = vld [vmem:[%s22085_s1 + $0xb64] ss:$16 sps:$4 sm:$0xff]   ;;  %v15199_v0 = vld [vmem:[%s22085_s1 + $0xb6c] ss:$16 sps:$4 sm:$0xff]  }
 0x13f   :  { %3842 = vmatpush1.bf16.msra.mxu0 %v15122_v1  ;;  %4426 = vmatpush1.bf16.msra.mxu1 %v15125_v2  ;;  %v15194_v1 = vld [vmem:[%s22085_s1 + $0xb60] ss:$16 sps:$4 sm:$0xff]   ;;  %v15197_v2 = vld [vmem:[%s22085_s1 + $0xb68] ss:$16 sps:$4 sm:$0xff]  }
 0x140   :  { %3884 = vmatprep.subr.bf16.mxu0 %v15130_v3  ;;  %4468 = vmatprep.subr.bf16.mxu1 %v15133_v4  ;;  %v15202_v3 = vld [vmem:[%s22085_s1 + $0xb84] ss:$16 sps:$4 sm:$0xff]   ;;  %v15205_v4 = vld [vmem:[%s22085_s1 + $0xb8c] ss:$16 sps:$4 sm:$0xff]  }
 0x142   :  { %3844 = vmatmul.mubr.bf16.vlgmr.msra.gmra.mrb[0].mxu0 %v12335_v7  ;;  %4428 = vmatmul.mubr.bf16.vlgmr.msra.gmra.mrb[0].mxu1 %v12335_v7  ;;  %v15208_v7 = vld [vmem:[%s22085_s1 + $0xba4] ss:$16 sps:$4 sm:$0xff]  }
 0x143   :  { %3885 = vmatpush1.bf16.msra.mxu0 %v15128_v8  ;;  %4469 = vmatpush1.bf16.msra.mxu1 %v15131_v9  ;;  %v15211_v8 = vld [vmem:[%s22085_s1 + $0xbac] ss:$16 sps:$4 sm:$0xff]   ;;  %v15206_v9 = vld [vmem:[%s22085_s1 + $0xba0] ss:$16 sps:$4 sm:$0xff]  }
 0x144   :  { %3886 = vmatprep.subr.bf16.mxu0 %v15136_v10  ;;  %4470 = vmatprep.subr.bf16.mxu1 %v15139_v11  ;;  %v15209_v10 = vld [vmem:[%s22085_s1 + $0xba8] ss:$16 sps:$4 sm:$0xff]   ;;  %v15214_v11 = vld [vmem:[%s22085_s1 + $0xbc4] ss:$16 sps:$4 sm:$0xff]  }
 0x145   :  { %3853 = vmatprep.mubr.bf16.mxu0 %v12352_v14  ;;  %4437 = vmatprep.mubr.bf16.mxu1 %v12352_v14  ;;  %v15215_v14 = vld [vmem:[%s22085_s1 + $0xbc8] ss:$16 sps:$4 sm:$0xff]  }
 0x147   :  { %3887 = vmatpush1.bf16.msra.mxu0 %v15134_v12  ;;  %4471 = vmatpush1.bf16.msra.mxu1 %v15137_v13  ;;  %v15217_v12 = vld [vmem:[%s22085_s1 + $0xbcc] ss:$16 sps:$4 sm:$0xff]   ;;  %v15212_v13 = vld [vmem:[%s22085_s1 + $0xbc0] ss:$16 sps:$4 sm:$0xff]  }
 0x148   :  { %3888 = vmatprep.subr.bf16.mxu0 %v15142_v15  ;;  %4472 = vmatprep.subr.bf16.mxu1 %v15145_v16  ;;  %v15220_v15 = vld [vmem:[%s22085_s1 + $0xbe4] ss:$16 sps:$4 sm:$0xff]   ;;  %v15223_v16 = vld [vmem:[%s22085_s1 + $0xbec] ss:$16 sps:$4 sm:$0xff]  }
 0x14a   :  { %3854 = vmatmul.mubr.bf16.gmra.mrb[4].mxu0 %v12351_v19  ;;  %4438 = vmatmul.mubr.bf16.gmra.mrb[4].mxu1 %v12351_v19  ;;  %v15226_v19 = vld [vmem:[%s22085_s1 + $0xc04] ss:$16 sps:$4 sm:$0xff]  }
 0x14b   :  { %3889 = vmatpush1.bf16.msra.mxu0 %v15140_v20  ;;  %4473 = vmatpush1.bf16.msra.mxu1 %v15143_v21  ;;  %v15229_v20 = vld [vmem:[%s22085_s1 + $0xc0c] ss:$16 sps:$4 sm:$0xff]   ;;  %v12337_v21 = vcombine.low %v17396_v41, %v17401_v42  ;;  %v15242_v41 = vld [vmem:[%s22085_s1 + $0xc60] ss:$16 sps:$4 sm:$0xff]   ;;  %v15245_v42 = vld [vmem:[%s22085_s1 + $0xc68] ss:$16 sps:$4 sm:$0xff]  }
 0x14c   :  { %3890 = vmatprep.subr.bf16.mxu0 %v15148_v22  ;;  %4474 = vmatprep.subr.bf16.mxu1 %v15151_v23  ;;  %v62_v22 = vld [vmem:[%s22086_s0 + $0xa8] sm:$0xff] }
 0x14d   :  { %3863 = vmatprep.mubr.bf16.mxu0 %v12368_v26  ;;  %4447 = vmatprep.mubr.bf16.mxu1 %v12368_v26  ;;  %v70_v23 = vld [vmem:[%s22086_s0 + $0xe8] sm:$0xff]  ;;  %v15232_v26 = vld [vmem:[%s22085_s1 + $0xc24] ss:$16 sps:$4 sm:$0xff]  }
 0x14f   :  { %3891 = vmatpush1.bf16.msra.mxu0 %v15146_v24  ;;  %4475 = vmatpush1.bf16.msra.mxu1 %v15149_v25  ;;  %v15224_v24 = vld [vmem:[%s22085_s1 + $0xc00] ss:$16 sps:$4 sm:$0xff]   ;;  %v15227_v25 = vld [vmem:[%s22085_s1 + $0xc08] ss:$16 sps:$4 sm:$0xff]  }
 0x150   :  { %3892 = vmatprep.subr.bf16.mxu0 %v15154_v27  ;;  %4476 = vmatprep.subr.bf16.mxu1 %v15157_v28  ;;  %v15235_v27 = vld [vmem:[%s22085_s1 + $0xc2c] ss:$16 sps:$4 sm:$0xff]   ;;  %v12354_v28 = vcombine.high %v62_v22, %v70_v23 }
 0x152   :  { %3864 = vmatmul.mubr.bf16.gmra.mrb[8].mxu0 %v12367_v31  ;;  %4448 = vmatmul.mubr.bf16.gmra.mrb[8].mxu1 %v12367_v31  ;;  %v15238_v31 = vld [vmem:[%s22085_s1 + $0xc44] ss:$16 sps:$4 sm:$0xff]  }
 0x153   :  { %3893 = vmatpush1.bf16.msra.mxu0 %v15152_v32  ;;  %4477 = vmatpush1.bf16.msra.mxu1 %v15155_v33  ;;  %v15241_v32 = vld [vmem:[%s22085_s1 + $0xc4c] ss:$16 sps:$4 sm:$0xff]   ;;  %v12353_v33 = vcombine.low %v62_v22, %v70_v23  ;;  %v15299_v22 = vld [vmem:[%s22085_s1 + $0xd88] ss:$16 sps:$4 sm:$0xff]   ;;  %v15304_v23 = vld [vmem:[%s22085_s1 + $0xda4] ss:$16 sps:$4 sm:$0xff]  }
 0x154   :  { %3894 = vmatprep.subr.bf16.mxu0 %v15160_v34  ;;  %4478 = vmatprep.subr.bf16.mxu1 %v15163_v35  ;;  %v78_v34 = vld [vmem:[%s22086_s0 + $0x128] sm:$0xff] }
 0x155   :  { %3873 = vmatprep.mubr.bf16.mxu0 %v12384_v38  ;;  %4457 = vmatprep.mubr.bf16.mxu1 %v12384_v38  ;;  %v86_v35 = vld [vmem:[%s22086_s0 + $0x168] sm:$0xff]  ;;  %v15244_v38 = vld [vmem:[%s22085_s1 + $0xc64] ss:$16 sps:$4 sm:$0xff]  }
 0x157   :  { %3895 = vmatpush1.bf16.msra.mxu0 %v15158_v36  ;;  %4479 = vmatpush1.bf16.msra.mxu1 %v15161_v37  ;;  %v15236_v36 = vld [vmem:[%s22085_s1 + $0xc40] ss:$16 sps:$4 sm:$0xff]   ;;  %v15239_v37 = vld [vmem:[%s22085_s1 + $0xc48] ss:$16 sps:$4 sm:$0xff]  }
 0x158   :  { %3896 = vmatprep.subr.bf16.mxu0 %v15166_v39  ;;  %4480 = vmatprep.subr.bf16.mxu1 %v15169_v40  ;;  %v15247_v39 = vld [vmem:[%s22085_s1 + $0xc6c] ss:$16 sps:$4 sm:$0xff]   ;;  %v12370_v40 = vcombine.high %v78_v34, %v86_v35 }
 0x15a   :  { %3874 = vmatmul.mubr.bf16.gmra.mrb[12].mxu0 %v12383_v43  ;;  %4458 = vmatmul.mubr.bf16.gmra.mrb[12].mxu1 %v12383_v43  ;;  %v15250_v43 = vld [vmem:[%s22085_s1 + $0xc84] ss:$16 sps:$4 sm:$0xff]  }
 0x15b   :  { %3897 = vmatpush1.bf16.msra.mxu0 %v15164_v44  ;;  %4481 = vmatpush1.bf16.msra.mxu1 %v15167_v45  ;;  %v15253_v44 = vld [vmem:[%s22085_s1 + $0xc8c] ss:$16 sps:$4 sm:$0xff]   ;;  %v12369_v45 = vcombine.low %v78_v34, %v86_v35  ;;  %v15317_v34 = vld [vmem:[%s22085_s1 + $0xde8] ss:$16 sps:$4 sm:$0xff]   ;;  %v15322_v35 = vld [vmem:[%s22085_s1 + $0xe04] ss:$16 sps:$4 sm:$0xff]  }
 0x15c   :  { %3898 = vmatprep.subr.bf16.mxu0 %v15172_v46  ;;  %4482 = vmatprep.subr.bf16.mxu1 %v15175_v47  ;;  %v94_v46 = vld [vmem:[%s22086_s0 + $0x1a8] sm:$0xff] }
 0x15d   :  { %3916 = vmatprep.mubr.bf16.mxu0 %v12338_v48  ;;  %4500 = vmatprep.mubr.bf16.mxu1 %v12338_v48  ;;  %v102_v47 = vld [vmem:[%s22086_s0 + $0x1e8] sm:$0xff]  ;;  %v15248_v48 = vld [vmem:[%s22085_s1 + $0xc80] ss:$16 sps:$4 sm:$0xff]  }
 0x15f   :  { %3899 = vmatpush1.bf16.msra.mxu0 %v15170_v49  ;;  %4483 = vmatpush1.bf16.msra.mxu1 %v15173_v50  ;;  %v15251_v49 = vld [vmem:[%s22085_s1 + $0xc88] ss:$16 sps:$4 sm:$0xff]   ;;  %v15256_v50 = vld [vmem:[%s22085_s1 + $0xca4] ss:$16 sps:$4 sm:$0xff]  }
 0x160   :  { %3900 = vmatprep.subr.bf16.mxu0 %v15178_v51  ;;  %4484 = vmatprep.subr.bf16.mxu1 %v15181_v52  ;;  %v15259_v51 = vld [vmem:[%s22085_s1 + $0xcac] ss:$16 sps:$4 sm:$0xff]   ;;  %v12386_v52 = vcombine.high %v94_v46, %v102_v47 }
 0x163   :  { %3901 = vmatpush1.bf16.msra.mxu0 %v15176_v53  ;;  %4485 = vmatpush1.bf16.msra.mxu1 %v15179_v54  ;;  %v15254_v53 = vld [vmem:[%s22085_s1 + $0xca0] ss:$16 sps:$4 sm:$0xff]   ;;  %v15257_v54 = vld [vmem:[%s22085_s1 + $0xca8] ss:$16 sps:$4 sm:$0xff]  }
 0x164   :  { %3902 = vmatprep.subr.bf16.mxu0 %v15184_v55  ;;  %4486 = vmatprep.subr.bf16.mxu1 %v15187_v56  ;;  %v15262_v55 = vld [vmem:[%s22085_s1 + $0xcc4] ss:$16 sps:$4 sm:$0xff]   ;;  %v15265_v56 = vld [vmem:[%s22085_s1 + $0xccc] ss:$16 sps:$4 sm:$0xff]  }
 0x167   :  { %3903 = vmatpush1.bf16.msra.mxu0 %v15182_v57  ;;  %4487 = vmatpush1.bf16.msra.mxu1 %v15185_v58  ;;  %v12385_v57 = vcombine.low %v94_v46, %v102_v47  ;;  %v17620_v58 = vld [vmem:[%s22086_s0 + $0x30] sm:$0xff]  ;;  %v15329_v46 = vld [vmem:[%s22085_s1 + $0xe28] ss:$16 sps:$4 sm:$0xff]  }
 0x168   :  { %3904 = vmatprep.subr.bf16.mxu0 %v15190_v59  ;;  %4488 = vmatprep.subr.bf16.mxu1 %v15193_v60  ;;  %v17625_v59 = vld [vmem:[%s22086_s0 + $0x70] sm:$0xff] }
 0x169   :  { %v15260_v60 = vld [vmem:[%s22085_s1 + $0xcc0] ss:$16 sps:$4 sm:$0xff]   ;;  %v15334_v47 = vld [vmem:[%s22085_s1 + $0xe44] ss:$16 sps:$4 sm:$0xff]  }
 0x16b   :  { %3905 = vmatpush1.bf16.msra.mxu0 %v15188_v61  ;;  %4489 = vmatpush1.bf16.msra.mxu1 %v15191_v62  ;;  %v15263_v61 = vld [vmem:[%s22085_s1 + $0xcc8] ss:$16 sps:$4 sm:$0xff]   ;;  %v15268_v62 = vld [vmem:[%s22085_s1 + $0xce4] ss:$16 sps:$4 sm:$0xff]  }
 0x16c   :  { %3906 = vmatprep.subr.bf16.mxu0 %v15196_v63  ;;  %4490 = vmatprep.subr.bf16.mxu1 %v15199_v0  ;;  %v15271_v63 = vld [vmem:[%s22085_s1 + $0xcec] ss:$16 sps:$4 sm:$0xff]   ;;  %v12340_v0 = vcombine.high %v17620_v58, %v17625_v59 }
 0x16f   :  { %3907 = vmatpush1.bf16.msra.mxu0 %v15194_v1  ;;  %4491 = vmatpush1.bf16.msra.mxu1 %v15197_v2  ;;  %v15266_v1 = vld [vmem:[%s22085_s1 + $0xce0] ss:$16 sps:$4 sm:$0xff]   ;;  %v15269_v2 = vld [vmem:[%s22085_s1 + $0xce8] ss:$16 sps:$4 sm:$0xff]  }
 0x170   :  { %3908 = vmatprep.subr.bf16.mxu0 %v15202_v3  ;;  %4492 = vmatprep.subr.bf16.mxu1 %v15205_v4  ;;  %v15274_v3 = vld [vmem:[%s22085_s1 + $0xd04] ss:$16 sps:$4 sm:$0xff]   ;;  %v15277_v4 = vld [vmem:[%s22085_s1 + $0xd0c] ss:$16 sps:$4 sm:$0xff]  }
 0x173   :  { %3909 = vmatpush1.bf16.msra.mxu0 %v15200_v5  ;;  %4493 = vmatpush1.bf16.msra.mxu1 %v15203_v6  ;;  %v15272_v5 = vld [vmem:[%s22085_s1 + $0xd00] ss:$16 sps:$4 sm:$0xff]   ;;  %v15275_v6 = vld [vmem:[%s22085_s1 + $0xd08] ss:$16 sps:$4 sm:$0xff]  }
 0x174   :  { %3910 = vmatprep.subr.bf16.mxu0 %v15208_v7  ;;  %4494 = vmatprep.subr.bf16.mxu1 %v15211_v8  ;;  %v15280_v7 = vld [vmem:[%s22085_s1 + $0xd24] ss:$16 sps:$4 sm:$0xff]   ;;  %v15283_v8 = vld [vmem:[%s22085_s1 + $0xd2c] ss:$16 sps:$4 sm:$0xff]  }
 0x177   :  { %3911 = vmatpush1.bf16.msra.mxu0 %v15206_v9  ;;  %4495 = vmatpush1.bf16.msra.mxu1 %v15209_v10  ;;  %v15278_v9 = vld [vmem:[%s22085_s1 + $0xd20] ss:$16 sps:$4 sm:$0xff]   ;;  %v15281_v10 = vld [vmem:[%s22085_s1 + $0xd28] ss:$16 sps:$4 sm:$0xff]  }
 0x178   :  { %3912 = vmatprep.subr.bf16.mxu0 %v15214_v11  ;;  %4496 = vmatprep.subr.bf16.mxu1 %v15217_v12  ;;  %v15286_v11 = vld [vmem:[%s22085_s1 + $0xd44] ss:$16 sps:$4 sm:$0xff]   ;;  %v15289_v12 = vld [vmem:[%s22085_s1 + $0xd4c] ss:$16 sps:$4 sm:$0xff]  }
 0x17b   :  { %3913 = vmatpush1.bf16.msra.mxu0 %v15212_v13  ;;  %4497 = vmatpush1.bf16.msra.mxu1 %v15215_v14  ;;  %v15284_v13 = vld [vmem:[%s22085_s1 + $0xd40] ss:$16 sps:$4 sm:$0xff]   ;;  %v15287_v14 = vld [vmem:[%s22085_s1 + $0xd48] ss:$16 sps:$4 sm:$0xff]  }
 0x17c   :  { %3914 = vmatprep.subr.bf16.mxu0 %v15220_v15  ;;  %4498 = vmatprep.subr.bf16.mxu1 %v15223_v16  ;;  %v15292_v15 = vld [vmem:[%s22085_s1 + $0xd64] ss:$16 sps:$4 sm:$0xff]   ;;  %v15295_v16 = vld [vmem:[%s22085_s1 + $0xd6c] ss:$16 sps:$4 sm:$0xff]  }
 0x17f   :  { %3915 = vmatpush1.bf16.msra.mxu0 %v15218_v17  ;;  %4499 = vmatpush1.bf16.msra.mxu1 %v15221_v18  ;;  %v15290_v17 = vld [vmem:[%s22085_s1 + $0xd60] ss:$16 sps:$4 sm:$0xff]   ;;  %v15293_v18 = vld [vmem:[%s22085_s1 + $0xd68] ss:$16 sps:$4 sm:$0xff]  }
 0x180   :  { %3957 = vmatprep.subr.bf16.mxu0 %v15226_v19  ;;  %4541 = vmatprep.subr.bf16.mxu1 %v15229_v20  ;;  %v15298_v19 = vld [vmem:[%s22085_s1 + $0xd84] ss:$16 sps:$4 sm:$0xff]   ;;  %v15301_v20 = vld [vmem:[%s22085_s1 + $0xd8c] ss:$16 sps:$4 sm:$0xff]  }
 0x182   :  { %3917 = vmatmul.mubr.bf16.vlgmr.msra.gmra.mrb[0].mxu0 %v12337_v21  ;;  %4501 = vmatmul.mubr.bf16.vlgmr.msra.gmra.mrb[0].mxu1 %v12337_v21  ;;  %v15296_v21 = vld [vmem:[%s22085_s1 + $0xd80] ss:$16 sps:$4 sm:$0xff]  }
 0x183   :  { %3958 = vmatpush1.bf16.msra.mxu0 %v15224_v24  ;;  %4542 = vmatpush1.bf16.msra.mxu1 %v15227_v25  ;;  %v15307_v24 = vld [vmem:[%s22085_s1 + $0xdac] ss:$16 sps:$4 sm:$0xff]   ;;  %v15302_v25 = vld [vmem:[%s22085_s1 + $0xda0] ss:$16 sps:$4 sm:$0xff]  }
 0x184   :  { %3959 = vmatprep.subr.bf16.mxu0 %v15232_v26  ;;  %4543 = vmatprep.subr.bf16.mxu1 %v15235_v27  ;;  %v15305_v26 = vld [vmem:[%s22085_s1 + $0xda8] ss:$16 sps:$4 sm:$0xff]   ;;  %v15310_v27 = vld [vmem:[%s22085_s1 + $0xdc4] ss:$16 sps:$4 sm:$0xff]  }
 0x185   :  { %3926 = vmatprep.mubr.bf16.mxu0 %v12354_v28  ;;  %4510 = vmatprep.mubr.bf16.mxu1 %v12354_v28  ;;  %v15313_v28 = vld [vmem:[%s22085_s1 + $0xdcc] ss:$16 sps:$4 sm:$0xff]  }
 0x187   :  { %3960 = vmatpush1.bf16.msra.mxu0 %v15230_v29  ;;  %4544 = vmatpush1.bf16.msra.mxu1 %v15233_v30  ;;  %v15308_v29 = vld [vmem:[%s22085_s1 + $0xdc0] ss:$16 sps:$4 sm:$0xff]   ;;  %v15311_v30 = vld [vmem:[%s22085_s1 + $0xdc8] ss:$16 sps:$4 sm:$0xff]  }
 0x188   :  { %3961 = vmatprep.subr.bf16.mxu0 %v15238_v31  ;;  %4545 = vmatprep.subr.bf16.mxu1 %v15241_v32  ;;  %v15316_v31 = vld [vmem:[%s22085_s1 + $0xde4] ss:$16 sps:$4 sm:$0xff]   ;;  %v15319_v32 = vld [vmem:[%s22085_s1 + $0xdec] ss:$16 sps:$4 sm:$0xff]  }
 0x18a   :  { %3927 = vmatmul.mubr.bf16.gmra.mrb[4].mxu0 %v12353_v33  ;;  %4511 = vmatmul.mubr.bf16.gmra.mrb[4].mxu1 %v12353_v33  ;;  %v15314_v33 = vld [vmem:[%s22085_s1 + $0xde0] ss:$16 sps:$4 sm:$0xff]  }
 0x18b   :  { %3962 = vmatpush1.bf16.msra.mxu0 %v15236_v36  ;;  %4546 = vmatpush1.bf16.msra.mxu1 %v15239_v37  ;;  %v15325_v36 = vld [vmem:[%s22085_s1 + $0xe0c] ss:$16 sps:$4 sm:$0xff]   ;;  %v12339_v37 = vcombine.low %v17620_v58, %v17625_v59  ;;  %v15341_v58 = vld [vmem:[%s22085_s1 + $0xe68] ss:$16 sps:$4 sm:$0xff]   ;;  %v15346_v59 = vld [vmem:[%s22085_s1 + $0xe84] ss:$16 sps:$4 sm:$0xff]  }
 0x18c   :  { %3963 = vmatprep.subr.bf16.mxu0 %v15244_v38  ;;  %4547 = vmatprep.subr.bf16.mxu1 %v15247_v39  ;;  %v63_v38 = vld [vmem:[%s22086_s0 + $0xb0] sm:$0xff] }
 0x18d   :  { %3936 = vmatprep.mubr.bf16.mxu0 %v12370_v40  ;;  %4520 = vmatprep.mubr.bf16.mxu1 %v12370_v40  ;;  %v71_v39 = vld [vmem:[%s22086_s0 + $0xf0] sm:$0xff] }
 0x18e   :  { %v15320_v40 = vld [vmem:[%s22085_s1 + $0xe00] ss:$16 sps:$4 sm:$0xff]  }
 0x18f   :  { %3964 = vmatpush1.bf16.msra.mxu0 %v15242_v41  ;;  %4548 = vmatpush1.bf16.msra.mxu1 %v15245_v42  ;;  %v15323_v41 = vld [vmem:[%s22085_s1 + $0xe08] ss:$16 sps:$4 sm:$0xff]   ;;  %v15328_v42 = vld [vmem:[%s22085_s1 + $0xe24] ss:$16 sps:$4 sm:$0xff]  }
 0x190   :  { %3965 = vmatprep.subr.bf16.mxu0 %v15250_v43  ;;  %4549 = vmatprep.subr.bf16.mxu1 %v15253_v44  ;;  %v15331_v43 = vld [vmem:[%s22085_s1 + $0xe2c] ss:$16 sps:$4 sm:$0xff]   ;;  %v12356_v44 = vcombine.high %v63_v38, %v71_v39 }
 0x192   :  { %3937 = vmatmul.mubr.bf16.gmra.mrb[8].mxu0 %v12369_v45  ;;  %4521 = vmatmul.mubr.bf16.gmra.mrb[8].mxu1 %v12369_v45  ;;  %v15326_v45 = vld [vmem:[%s22085_s1 + $0xe20] ss:$16 sps:$4 sm:$0xff]  }
 0x193   :  { %3966 = vmatpush1.bf16.msra.mxu0 %v15248_v48  ;;  %4550 = vmatpush1.bf16.msra.mxu1 %v15251_v49  ;;  %v15337_v48 = vld [vmem:[%s22085_s1 + $0xe4c] ss:$16 sps:$4 sm:$0xff]   ;;  %v12355_v49 = vcombine.low %v63_v38, %v71_v39  ;;  %v15395_v38 = vld [vmem:[%s22085_s1 + $0xf88] ss:$16 sps:$4 sm:$0xff]   ;;  %v15400_v39 = vld [vmem:[%s22085_s1 + $0xfa4] ss:$16 sps:$4 sm:$0xff]  }
 0x194   :  { %3967 = vmatprep.subr.bf16.mxu0 %v15256_v50  ;;  %4551 = vmatprep.subr.bf16.mxu1 %v15259_v51  ;;  %v79_v50 = vld [vmem:[%s22086_s0 + $0x130] sm:$0xff] }
 0x195   :  { %3946 = vmatprep.mubr.bf16.mxu0 %v12386_v52  ;;  %4530 = vmatprep.mubr.bf16.mxu1 %v12386_v52  ;;  %v87_v51 = vld [vmem:[%s22086_s0 + $0x170] sm:$0xff] }
 0x196   :  { %v15332_v52 = vld [vmem:[%s22085_s1 + $0xe40] ss:$16 sps:$4 sm:$0xff]  }
 0x197   :  { %3968 = vmatpush1.bf16.msra.mxu0 %v15254_v53  ;;  %4552 = vmatpush1.bf16.msra.mxu1 %v15257_v54  ;;  %v15335_v53 = vld [vmem:[%s22085_s1 + $0xe48] ss:$16 sps:$4 sm:$0xff]   ;;  %v15340_v54 = vld [vmem:[%s22085_s1 + $0xe64] ss:$16 sps:$4 sm:$0xff]  }
 0x198   :  { %3969 = vmatprep.subr.bf16.mxu0 %v15262_v55  ;;  %4553 = vmatprep.subr.bf16.mxu1 %v15265_v56  ;;  %v15343_v55 = vld [vmem:[%s22085_s1 + $0xe6c] ss:$16 sps:$4 sm:$0xff]   ;;  %v12372_v56 = vcombine.high %v79_v50, %v87_v51 }
 0x19a   :  { %3947 = vmatmul.mubr.bf16.gmra.mrb[12].mxu0 %v12385_v57  ;;  %4531 = vmatmul.mubr.bf16.gmra.mrb[12].mxu1 %v12385_v57  ;;  %v15338_v57 = vld [vmem:[%s22085_s1 + $0xe60] ss:$16 sps:$4 sm:$0xff]  }
 0x19b   :  { %3970 = vmatpush1.bf16.msra.mxu0 %v15260_v60  ;;  %4554 = vmatpush1.bf16.msra.mxu1 %v15263_v61  ;;  %v15349_v60 = vld [vmem:[%s22085_s1 + $0xe8c] ss:$16 sps:$4 sm:$0xff]   ;;  %v12371_v61 = vcombine.low %v79_v50, %v87_v51  ;;  %v4743_v50 = vld [vmem:[%s22087_s3 + $0x40] sm:$0xff] }
 0x19c   :  { %3971 = vmatprep.subr.bf16.mxu0 %v15268_v62  ;;  %4555 = vmatprep.subr.bf16.mxu1 %v15271_v63  ;;  %v95_v62 = vld [vmem:[%s22086_s0 + $0x1b0] sm:$0xff]  ;;  %v4736_v51 = vld [vmem:[%s22087_s3 + $0x8] sm:$0xff] }
 0x19d   :  { %3989 = vmatprep.mubr.bf16.mxu0 %v12340_v0  ;;  %4573 = vmatprep.mubr.bf16.mxu1 %v12340_v0  ;;  %v103_v63 = vld [vmem:[%s22086_s0 + $0x1f0] sm:$0xff] }
 0x19e   :  { %v15344_v0 = vld [vmem:[%s22085_s1 + $0xe80] ss:$16 sps:$4 sm:$0xff]  }
 0x19f   :  { %3972 = vmatpush1.bf16.msra.mxu0 %v15266_v1  ;;  %4556 = vmatpush1.bf16.msra.mxu1 %v15269_v2  ;;  %v15347_v1 = vld [vmem:[%s22085_s1 + $0xe88] ss:$16 sps:$4 sm:$0xff]   ;;  %v15352_v2 = vld [vmem:[%s22085_s1 + $0xea4] ss:$16 sps:$4 sm:$0xff]  }
 0x1a0   :  { %3973 = vmatprep.subr.bf16.mxu0 %v15274_v3  ;;  %4557 = vmatprep.subr.bf16.mxu1 %v15277_v4  ;;  %v15355_v3 = vld [vmem:[%s22085_s1 + $0xeac] ss:$16 sps:$4 sm:$0xff]   ;;  %v12388_v4 = vcombine.high %v95_v62, %v103_v63 }
 0x1a3   :  { %3974 = vmatpush1.bf16.msra.mxu0 %v15272_v5  ;;  %4558 = vmatpush1.bf16.msra.mxu1 %v15275_v6  ;;  %v15350_v5 = vld [vmem:[%s22085_s1 + $0xea0] ss:$16 sps:$4 sm:$0xff]   ;;  %v15353_v6 = vld [vmem:[%s22085_s1 + $0xea8] ss:$16 sps:$4 sm:$0xff]  }
 0x1a4   :  { %3975 = vmatprep.subr.bf16.mxu0 %v15280_v7  ;;  %4559 = vmatprep.subr.bf16.mxu1 %v15283_v8  ;;  %v15358_v7 = vld [vmem:[%s22085_s1 + $0xec4] ss:$16 sps:$4 sm:$0xff]   ;;  %v15361_v8 = vld [vmem:[%s22085_s1 + $0xecc] ss:$16 sps:$4 sm:$0xff]  }
 0x1a7   :  { %3976 = vmatpush1.bf16.msra.mxu0 %v15278_v9  ;;  %4560 = vmatpush1.bf16.msra.mxu1 %v15281_v10  ;;  %v12387_v9 = vcombine.low %v95_v62, %v103_v63  ;;  %v17844_v10 = vld [vmem:[%s22086_s0 + $0x38] sm:$0xff]  ;;  %v4752_v62 = vld [vmem:[%s22087_s3 + $0x88] sm:$0xff] }
 0x1a8   :  { %3977 = vmatprep.subr.bf16.mxu0 %v15286_v11  ;;  %4561 = vmatprep.subr.bf16.mxu1 %v15289_v12  ;;  %v17849_v11 = vld [vmem:[%s22086_s0 + $0x78] sm:$0xff]  ;;  %v15356_v12 = vld [vmem:[%s22085_s1 + $0xec0] ss:$16 sps:$4 sm:$0xff]   ;;  %v4760_v63 = vld [vmem:[%s22087_s3 + $0xc8] sm:$0xff] }
 0x1ab   :  { %3978 = vmatpush1.bf16.msra.mxu0 %v15284_v13  ;;  %4562 = vmatpush1.bf16.msra.mxu1 %v15287_v14  ;;  %v15359_v13 = vld [vmem:[%s22085_s1 + $0xec8] ss:$16 sps:$4 sm:$0xff]   ;;  %v15364_v14 = vld [vmem:[%s22085_s1 + $0xee4] ss:$16 sps:$4 sm:$0xff]  }
 0x1ac   :  { %3979 = vmatprep.subr.bf16.mxu0 %v15292_v15  ;;  %4563 = vmatprep.subr.bf16.mxu1 %v15295_v16  ;;  %v15367_v15 = vld [vmem:[%s22085_s1 + $0xeec] ss:$16 sps:$4 sm:$0xff]   ;;  %v12342_v16 = vcombine.high %v17844_v10, %v17849_v11 }
 0x1af   :  { %3980 = vmatpush1.bf16.msra.mxu0 %v15290_v17  ;;  %4564 = vmatpush1.bf16.msra.mxu1 %v15293_v18  ;;  %v15362_v17 = vld [vmem:[%s22085_s1 + $0xee0] ss:$16 sps:$4 sm:$0xff]   ;;  %v15365_v18 = vld [vmem:[%s22085_s1 + $0xee8] ss:$16 sps:$4 sm:$0xff]  }
 0x1b0   :  { %3981 = vmatprep.subr.bf16.mxu0 %v15298_v19  ;;  %4565 = vmatprep.subr.bf16.mxu1 %v15301_v20  ;;  %v15370_v19 = vld [vmem:[%s22085_s1 + $0xf04] ss:$16 sps:$4 sm:$0xff]   ;;  %v15373_v20 = vld [vmem:[%s22085_s1 + $0xf0c] ss:$16 sps:$4 sm:$0xff]  }
 0x1b3   :  { %3982 = vmatpush1.bf16.msra.mxu0 %v15296_v21  ;;  %4566 = vmatpush1.bf16.msra.mxu1 %v15299_v22  ;;  %v15368_v21 = vld [vmem:[%s22085_s1 + $0xf00] ss:$16 sps:$4 sm:$0xff]   ;;  %v15371_v22 = vld [vmem:[%s22085_s1 + $0xf08] ss:$16 sps:$4 sm:$0xff]  }
 0x1b4   :  { %3983 = vmatprep.subr.bf16.mxu0 %v15304_v23  ;;  %4567 = vmatprep.subr.bf16.mxu1 %v15307_v24  ;;  %v15376_v23 = vld [vmem:[%s22085_s1 + $0xf24] ss:$16 sps:$4 sm:$0xff]   ;;  %v15379_v24 = vld [vmem:[%s22085_s1 + $0xf2c] ss:$16 sps:$4 sm:$0xff]  }
 0x1b7   :  { %3984 = vmatpush1.bf16.msra.mxu0 %v15302_v25  ;;  %4568 = vmatpush1.bf16.msra.mxu1 %v15305_v26  ;;  %v15374_v25 = vld [vmem:[%s22085_s1 + $0xf20] ss:$16 sps:$4 sm:$0xff]   ;;  %v15377_v26 = vld [vmem:[%s22085_s1 + $0xf28] ss:$16 sps:$4 sm:$0xff]  }
 0x1b8   :  { %3985 = vmatprep.subr.bf16.mxu0 %v15310_v27  ;;  %4569 = vmatprep.subr.bf16.mxu1 %v15313_v28  ;;  %v15382_v27 = vld [vmem:[%s22085_s1 + $0xf44] ss:$16 sps:$4 sm:$0xff]   ;;  %v15385_v28 = vld [vmem:[%s22085_s1 + $0xf4c] ss:$16 sps:$4 sm:$0xff]  }
 0x1bb   :  { %3986 = vmatpush1.bf16.msra.mxu0 %v15308_v29  ;;  %4570 = vmatpush1.bf16.msra.mxu1 %v15311_v30  ;;  %v15380_v29 = vld [vmem:[%s22085_s1 + $0xf40] ss:$16 sps:$4 sm:$0xff]   ;;  %v15383_v30 = vld [vmem:[%s22085_s1 + $0xf48] ss:$16 sps:$4 sm:$0xff]  }
 0x1bc   :  { %3987 = vmatprep.subr.bf16.mxu0 %v15316_v31  ;;  %4571 = vmatprep.subr.bf16.mxu1 %v15319_v32  ;;  %v15388_v31 = vld [vmem:[%s22085_s1 + $0xf64] ss:$16 sps:$4 sm:$0xff]   ;;  %v15391_v32 = vld [vmem:[%s22085_s1 + $0xf6c] ss:$16 sps:$4 sm:$0xff]  }
 0x1bf   :  { %3988 = vmatpush1.bf16.msra.mxu0 %v15314_v33  ;;  %4572 = vmatpush1.bf16.msra.mxu1 %v15317_v34  ;;  %v15386_v33 = vld [vmem:[%s22085_s1 + $0xf60] ss:$16 sps:$4 sm:$0xff]   ;;  %v15389_v34 = vld [vmem:[%s22085_s1 + $0xf68] ss:$16 sps:$4 sm:$0xff]  }
 0x1c0   :  { %4030 = vmatprep.subr.bf16.mxu0 %v15322_v35  ;;  %4614 = vmatprep.subr.bf16.mxu1 %v15325_v36  ;;  %v15394_v35 = vld [vmem:[%s22085_s1 + $0xf84] ss:$16 sps:$4 sm:$0xff]   ;;  %v15397_v36 = vld [vmem:[%s22085_s1 + $0xf8c] ss:$16 sps:$4 sm:$0xff]  }
 0x1c2   :  { %3990 = vmatmul.mubr.bf16.vlgmr.msra.gmra.mrb[0].mxu0 %v12339_v37  ;;  %4574 = vmatmul.mubr.bf16.vlgmr.msra.gmra.mrb[0].mxu1 %v12339_v37  ;;  %v15392_v37 = vld [vmem:[%s22085_s1 + $0xf80] ss:$16 sps:$4 sm:$0xff]  }
 0x1c3   :  { %4031 = vmatpush1.bf16.msra.mxu0 %v15320_v40  ;;  %4615 = vmatpush1.bf16.msra.mxu1 %v15323_v41  ;;  %v15403_v40 = vld [vmem:[%s22085_s1 + $0xfac] ss:$16 sps:$4 sm:$0xff]   ;;  %v15398_v41 = vld [vmem:[%s22085_s1 + $0xfa0] ss:$16 sps:$4 sm:$0xff]  }
 0x1c4   :  { %4032 = vmatprep.subr.bf16.mxu0 %v15328_v42  ;;  %4616 = vmatprep.subr.bf16.mxu1 %v15331_v43  ;;  %v15401_v42 = vld [vmem:[%s22085_s1 + $0xfa8] ss:$16 sps:$4 sm:$0xff]   ;;  %v15406_v43 = vld [vmem:[%s22085_s1 + $0xfc4] ss:$16 sps:$4 sm:$0xff]  }
 0x1c5   :  { %3999 = vmatprep.mubr.bf16.mxu0 %v12356_v44  ;;  %4583 = vmatprep.mubr.bf16.mxu1 %v12356_v44  ;;  %v15409_v44 = vld [vmem:[%s22085_s1 + $0xfcc] ss:$16 sps:$4 sm:$0xff]  }
 0x1c7   :  { %4033 = vmatpush1.bf16.msra.mxu0 %v15326_v45  ;;  %4617 = vmatpush1.bf16.msra.mxu1 %v15329_v46  ;;  %v15404_v45 = vld [vmem:[%s22085_s1 + $0xfc0] ss:$16 sps:$4 sm:$0xff]   ;;  %v15407_v46 = vld [vmem:[%s22085_s1 + $0xfc8] ss:$16 sps:$4 sm:$0xff]  }
 0x1c8   :  { %4034 = vmatprep.subr.bf16.mxu0 %v15334_v47  ;;  %4618 = vmatprep.subr.bf16.mxu1 %v15337_v48  ;;  %v15412_v47 = vld [vmem:[%s22085_s1 + $0xfe4] ss:$16 sps:$4 sm:$0xff]   ;;  %v15415_v48 = vld [vmem:[%s22085_s1 + $0xfec] ss:$16 sps:$4 sm:$0xff]  }
 0x1ca   :  { %4000 = vmatmul.mubr.bf16.gmra.mrb[4].mxu0 %v12355_v49  ;;  %4584 = vmatmul.mubr.bf16.gmra.mrb[4].mxu1 %v12355_v49  ;;  %v4735_v49 = vld [vmem:[%s22087_s3] sm:$0xff] }
 0x1cb   :  { %4035 = vmatpush1.bf16.msra.mxu0 %v15332_v52  ;;  %4619 = vmatpush1.bf16.msra.mxu1 %v15335_v53  ;;  %v4744_v52 = vld [vmem:[%s22087_s3 + $0x48] sm:$0xff]  ;;  %v15410_v53 = vld [vmem:[%s22085_s1 + $0xfe0] ss:$16 sps:$4 sm:$0xff]  }
 0x1cc   :  { %4036 = vmatprep.subr.bf16.mxu0 %v15340_v54  ;;  %4620 = vmatprep.subr.bf16.mxu1 %v15343_v55  ;;  %v15413_v54 = vld [vmem:[%s22085_s1 + $0xfe8] ss:$16 sps:$4 sm:$0xff]  }
 0x1cd   :  { %4009 = vmatprep.mubr.bf16.mxu0 %v12372_v56  ;;  %4593 = vmatprep.mubr.bf16.mxu1 %v12372_v56  ;;  %v64_v55 = vld [vmem:[%s22086_s0 + $0xb8] sm:$0xff] }
 0x1ce   :  { %v72_v56 = vld [vmem:[%s22086_s0 + $0xf8] sm:$0xff] }
 0x1cf   :  { %4037 = vmatpush1.bf16.msra.mxu0 %v15338_v57  ;;  %4621 = vmatpush1.bf16.msra.mxu1 %v15341_v58  ;;  %v12904_v57 = vcombine.high %v4735_v49, %v4743_v50  ;;  %v12906_v58 = vcombine.high %v4736_v51, %v4744_v52 }
 0x1d0   :  { %4038 = vmatprep.subr.bf16.mxu0 %v15346_v59  ;;  %4622 = vmatprep.subr.bf16.mxu1 %v15349_v60  ;;  %v4751_v59 = vld [vmem:[%s22087_s3 + $0x80] sm:$0xff]  ;;  %v12341_v60 = vcombine.low %v17844_v10, %v17849_v11  ;;  %v88_v10 = vld [vmem:[%s22086_s0 + $0x178] sm:$0xff] }
 0x1d2   :  { %4010 = vmatmul.mubr.bf16.gmra.mrb[8].mxu0 %v12371_v61  ;;  %4594 = vmatmul.mubr.bf16.gmra.mrb[8].mxu1 %v12371_v61  ;;  %v4759_v61 = vld [vmem:[%s22087_s3 + $0xc0] sm:$0xff] }
 0x1d3   :  { %4039 = vmatpush1.bf16.msra.mxu0 %v15344_v0  ;;  %4623 = vmatpush1.bf16.msra.mxu1 %v15347_v1  ;;  %v12358_v0 = vcombine.high %v64_v55, %v72_v56  ;;  %v12903_v1 = vcombine.low %v4735_v49, %v4743_v50  ;;  %v12919_v11 = vcombine.low %v4751_v59, %v4759_v61 }
 0x1d4   :  { %4040 = vmatprep.subr.bf16.mxu0 %v15352_v2  ;;  %4624 = vmatprep.subr.bf16.mxu1 %v15355_v3  ;;  %v12905_v2 = vcombine.low %v4736_v51, %v4744_v52  ;;  %v12920_v3 = vcombine.high %v4751_v59, %v4759_v61 }
 0x1d5   :  { %4019 = vmatprep.mubr.bf16.mxu0 %v12388_v4  ;;  %4603 = vmatprep.mubr.bf16.mxu1 %v12388_v4  ;;  %v12922_v4 = vcombine.high %v4752_v62, %v4760_v63 }
 0x1d7   :  { %4041 = vmatpush1.bf16.msra.mxu0 %v15350_v5  ;;  %4625 = vmatpush1.bf16.msra.mxu1 %v15353_v6  ;;  %v4767_v5 = vld [vmem:[%s22087_s3 + $0x100] sm:$0xff] }
 0x1d8   :  { %4042 = vmatprep.subr.bf16.mxu0 %v15358_v7  ;;  %4626 = vmatprep.subr.bf16.mxu1 %v15361_v8  ;;  %v4775_v6 = vld [vmem:[%s22087_s3 + $0x140] sm:$0xff]  ;;  %v4768_v7 = vld [vmem:[%s22087_s3 + $0x108] sm:$0xff] }
 0x1d9   :  { %v4776_v8 = vld [vmem:[%s22087_s3 + $0x148] sm:$0xff] }
 0x1da   :  { %4020 = vmatmul.mubr.bf16.gmra.mrb[12].mxu0 %v12387_v9  ;;  %4604 = vmatmul.mubr.bf16.gmra.mrb[12].mxu1 %v12387_v9  ;;  %v80_v9 = vld [vmem:[%s22086_s0 + $0x138] sm:$0xff] }
 0x1db   :  { %4043 = vmatpush1.bf16.msra.mxu0 %v15356_v12  ;;  %4627 = vmatpush1.bf16.msra.mxu1 %v15359_v13  ;;  %v12921_v12 = vcombine.low %v4752_v62, %v4760_v63  ;;  %v12936_v13 = vcombine.high %v4767_v5, %v4775_v6  ;;  %v4863_v62 = vld [vmem:[%s22087_s3 + $0x400] sm:$0xff] }
 0x1dc   :  { %4044 = vmatprep.subr.bf16.mxu0 %v15364_v14  ;;  %4628 = vmatprep.subr.bf16.mxu1 %v15367_v15  ;;  %v12938_v14 = vcombine.high %v4768_v7, %v4776_v8  ;;  %v4783_v15 = vld [vmem:[%s22087_s3 + $0x180] sm:$0xff] }
 0x1dd   :  { %4062 = vmatprep.mubr.bf16.mxu0 %v12342_v16  ;;  %4646 = vmatprep.mubr.bf16.mxu1 %v12342_v16  ;;  %v12357_v16 = vcombine.low %v64_v55, %v72_v56  ;;  %v4855_v55 = vld [vmem:[%s22087_s3 + $0x3c0] sm:$0xff]  ;;  %v4848_v56 = vld [vmem:[%s22087_s3 + $0x388] sm:$0xff] }
 0x1de   :  { %v4871_v63 = vld [vmem:[%s22087_s3 + $0x440] sm:$0xff] }
 0x1df   :  { %4045 = vmatpush1.bf16.msra.mxu0 %v15362_v17  ;;  %4629 = vmatpush1.bf16.msra.mxu1 %v15365_v18  ;;  %v4791_v17 = vld [vmem:[%s22087_s3 + $0x1c0] sm:$0xff]  ;;  %v4784_v18 = vld [vmem:[%s22087_s3 + $0x188] sm:$0xff] }
 0x1e0   :  { %4046 = vmatprep.subr.bf16.mxu0 %v15370_v19  ;;  %4630 = vmatprep.subr.bf16.mxu1 %v15373_v20  ;;  %v4792_v19 = vld [vmem:[%s22087_s3 + $0x1c8] sm:$0xff]  ;;  %v12374_v20 = vcombine.high %v80_v9, %v88_v10 }
 0x1e3   :  { %4047 = vmatpush1.bf16.msra.mxu0 %v15368_v21  ;;  %4631 = vmatpush1.bf16.msra.mxu1 %v15371_v22  ;;  %v12935_v21 = vcombine.low %v4767_v5, %v4775_v6  ;;  %v12937_v22 = vcombine.low %v4768_v7, %v4776_v8  ;;  %v4879_v6 = vld [vmem:[%s22087_s3 + $0x480] sm:$0xff]  ;;  %v4880_v8 = vld [vmem:[%s22087_s3 + $0x488] sm:$0xff] }
 0x1e4   :  { %4048 = vmatprep.subr.bf16.mxu0 %v15376_v23  ;;  %4632 = vmatprep.subr.bf16.mxu1 %v15379_v24  ;;  %v12952_v23 = vcombine.high %v4783_v15, %v4791_v17  ;;  %v12954_v24 = vcombine.high %v4784_v18, %v4792_v19  ;;  %v4887_v7 = vld [vmem:[%s22087_s3 + $0x4c0] sm:$0xff] }
 0x1e7   :  { %4049 = vmatpush1.bf16.msra.mxu0 %v15374_v25  ;;  %4633 = vmatpush1.bf16.msra.mxu1 %v15377_v26  ;;  %v4799_v25 = vld [vmem:[%s22087_s3 + $0x200] sm:$0xff] }
 0x1e8   :  { %4050 = vmatprep.subr.bf16.mxu0 %v15382_v27  ;;  %4634 = vmatprep.subr.bf16.mxu1 %v15385_v28  ;;  %v4807_v26 = vld [vmem:[%s22087_s3 + $0x240] sm:$0xff]  ;;  %v4800_v27 = vld [vmem:[%s22087_s3 + $0x208] sm:$0xff] }
 0x1e9   :  { %v4808_v28 = vld [vmem:[%s22087_s3 + $0x248] sm:$0xff] }
 0x1eb   :  { %4051 = vmatpush1.bf16.msra.mxu0 %v15380_v29  ;;  %4635 = vmatpush1.bf16.msra.mxu1 %v15383_v30  ;;  %v96_v29 = vld [vmem:[%s22086_s0 + $0x1b8] sm:$0xff] }
 0x1ec   :  { %4052 = vmatprep.subr.bf16.mxu0 %v15388_v31  ;;  %4636 = vmatprep.subr.bf16.mxu1 %v15391_v32  ;;  %v104_v30 = vld [vmem:[%s22086_s0 + $0x1f8] sm:$0xff]  ;;  %v12951_v31 = vcombine.low %v4783_v15, %v4791_v17  ;;  %v12953_v32 = vcombine.low %v4784_v18, %v4792_v19  ;;  %v4903_v15 = vld [vmem:[%s22087_s3 + $0x540] sm:$0xff]  ;;  %v4904_v17 = vld [vmem:[%s22087_s3 + $0x548] sm:$0xff]  ;;  %v13047_v18 = vcombine.low %v4879_v6, %v4887_v7 }
 0x1ef   :  { %4053 = vmatpush1.bf16.msra.mxu0 %v15386_v33  ;;  %4637 = vmatpush1.bf16.msra.mxu1 %v15389_v34  ;;  %v12968_v33 = vcombine.high %v4799_v25, %v4807_v26  ;;  %v12970_v34 = vcombine.high %v4800_v27, %v4808_v28 }
 0x1f0   :  { %4054 = vmatprep.subr.bf16.mxu0 %v15394_v35  ;;  %4638 = vmatprep.subr.bf16.mxu1 %v15397_v36  ;;  %v4815_v35 = vld [vmem:[%s22087_s3 + $0x280] sm:$0xff]  ;;  %v12373_v36 = vcombine.low %v80_v9, %v88_v10  ;;  %v4888_v9 = vld [vmem:[%s22087_s3 + $0x4c8] sm:$0xff]  ;;  %v13031_v10 = vcombine.low %v4863_v62, %v4871_v63 }
 0x1f1   :  { %v13049_v19 = vcombine.low %v4880_v8, %v4888_v9 }
 0x1f3   :  { %4055 = vmatpush1.bf16.msra.mxu0 %v15392_v37  ;;  %4639 = vmatpush1.bf16.msra.mxu1 %v15395_v38  ;;  %v4823_v37 = vld [vmem:[%s22087_s3 + $0x2c0] sm:$0xff]  ;;  %v4816_v38 = vld [vmem:[%s22087_s3 + $0x288] sm:$0xff] }
 0x1f4   :  { %4056 = vmatprep.subr.bf16.mxu0 %v15400_v39  ;;  %4640 = vmatprep.subr.bf16.mxu1 %v15403_v40  ;;  %v4824_v39 = vld [vmem:[%s22087_s3 + $0x2c8] sm:$0xff]  ;;  %v12390_v40 = vcombine.high %v96_v29, %v104_v30  ;;  %v12983_v49 = vcombine.low %v4815_v35, %v4823_v37 }
 0x1f5   :  { %v12985_v50 = vcombine.low %v4816_v38, %v4824_v39 }
 0x1f7   :  { %4057 = vmatpush1.bf16.msra.mxu0 %v15398_v41  ;;  %4641 = vmatpush1.bf16.msra.mxu1 %v15401_v42  ;;  %v12967_v41 = vcombine.low %v4799_v25, %v4807_v26  ;;  %v12969_v42 = vcombine.low %v4800_v27, %v4808_v28  ;;  %v4920_v25 = vld [vmem:[%s22087_s3 + $0x5c8] sm:$0xff] }
 0x1f8   :  { %4058 = vmatprep.subr.bf16.mxu0 %v15406_v43  ;;  %4642 = vmatprep.subr.bf16.mxu1 %v15409_v44  ;;  %v12984_v43 = vcombine.high %v4815_v35, %v4823_v37  ;;  %v12986_v44 = vcombine.high %v4816_v38, %v4824_v39  ;;  %v4943_v38 = vld [vmem:[%s22087_s3 + $0x680] sm:$0xff] }
 0x1f9   :  { %v4951_v39 = vld [vmem:[%s22087_s3 + $0x6c0] sm:$0xff] }
 0x1fb   :  { %4059 = vmatpush1.bf16.msra.mxu0 %v15404_v45  ;;  %4643 = vmatpush1.bf16.msra.mxu1 %v15407_v46  ;;  %v4831_v45 = vld [vmem:[%s22087_s3 + $0x300] sm:$0xff] }
 0x1fc   :  { %4060 = vmatprep.subr.bf16.mxu0 %v15412_v47  ;;  %4644 = vmatprep.subr.bf16.mxu1 %v15415_v48  ;;  %v4839_v46 = vld [vmem:[%s22087_s3 + $0x340] sm:$0xff]  ;;  %v4832_v47 = vld [vmem:[%s22087_s3 + $0x308] sm:$0xff] }
 0x1fd   :  { %v4840_v48 = vld [vmem:[%s22087_s3 + $0x348] sm:$0xff]  ;;  %v13000_v51 = vcombine.high %v4831_v45, %v4839_v46 }
 0x1fe   :  { %v13002_v52 = vcombine.high %v4832_v47, %v4840_v48  ;;  %v13001_v59 = vcombine.low %v4832_v47, %v4840_v48  ;;  %v4959_v48 = vld [vmem:[%s22087_s3 + $0x700] sm:$0xff] }
 0x1ff   :  { %4061 = vmatpush1.bf16.msra.mxu0 %v15410_v53  ;;  %4645 = vmatpush1.bf16.msra.mxu1 %v15413_v54  ;;  %v4847_v53 = vld [vmem:[%s22087_s3 + $0x380] sm:$0xff]  ;;  %v12389_v54 = vcombine.low %v96_v29, %v104_v30 }
 0x200   :  { %7891 = vmatprep.subr.bf16.mxu0 %v12904_v57  ;;  %8037 = vmatprep.subr.bf16.mxu1 %v12906_v58  ;;  %v4856_v57 = vld [vmem:[%s22087_s3 + $0x3c8] sm:$0xff]  ;;  %v12999_v58 = vcombine.low %v4831_v45, %v4839_v46  ;;  %v4927_v30 = vld [vmem:[%s22087_s3 + $0x600] sm:$0xff]  ;;  %v13111_v46 = vcombine.low %v4943_v38, %v4951_v39 }
 0x201   :  { %v13018_v61 = vcombine.high %v4848_v56, %v4856_v57 }
 0x202   :  { %4063 = vmatmul.mubr.bf16.vlgmr.msra.gmra.mrb[0].mxu0 %v12341_v60  ;;  %4647 = vmatmul.mubr.bf16.vlgmr.msra.gmra.mrb[0].mxu1 %v12341_v60  ;;  %v13016_v60 = vcombine.high %v4847_v53, %v4855_v55 }
 0x203   :  { %4072 = vmatprep.mubr.bf16.mxu0 %v12358_v0  ;;  %4656 = vmatprep.mubr.bf16.mxu1 %v12358_v0  ;;  %v4864_v0 = vld [vmem:[%s22087_s3 + $0x408] sm:$0xff] }
 0x204   :  { %7892 = vmatpush1.bf16.msra.mxu0 %v12903_v1  ;;  %8038 = vmatpush1.bf16.msra.mxu1 %v12905_v2  ;;  %v4872_v1 = vld [vmem:[%s22087_s3 + $0x448] sm:$0xff]  ;;  %v13015_v2 = vcombine.low %v4847_v53, %v4855_v55 }
 0x205   :  { %7893 = vmatprep.subr.bf16.mxu0 %v12920_v3  ;;  %8039 = vmatprep.subr.bf16.mxu1 %v12922_v4  ;;  %v13017_v3 = vcombine.low %v4848_v56, %v4856_v57  ;;  %v13032_v4 = vcombine.high %v4863_v62, %v4871_v63  ;;  %v13034_v5 = vcombine.high %v4864_v0, %v4872_v1  ;;  %v4975_v56 = vld [vmem:[%s22087_s3 + $0x780] sm:$0xff] }
 0x206   :  { %v4983_v57 = vld [vmem:[%s22087_s3 + $0x7c0] sm:$0xff] }
 0x208   :  { %7894 = vmatpush1.bf16.msra.mxu0 %v12919_v11  ;;  %8040 = vmatpush1.bf16.msra.mxu1 %v12921_v12  ;;  %v13033_v11 = vcombine.low %v4864_v0, %v4872_v1  ;;  %v13048_v12 = vcombine.high %v4879_v6, %v4887_v7  ;;  %v18182_v0 = vld [vmem:[%s22087_s3 + $0x800] sm:$0xff] }
 0x209   :  { %7895 = vmatprep.subr.bf16.mxu0 %v12936_v13  ;;  %8041 = vmatprep.subr.bf16.mxu1 %v12938_v14  ;;  %v13050_v13 = vcombine.high %v4880_v8, %v4888_v9  ;;  %v4895_v14 = vld [vmem:[%s22087_s3 + $0x500] sm:$0xff]  ;;  %v619_v8 = vlaneseq }
 0x20a   :  { %4073 = vmatmul.mubr.bf16.gmra.mrb[4].mxu0 %v12357_v16  ;;  %4657 = vmatmul.mubr.bf16.gmra.mrb[4].mxu1 %v12357_v16  ;;  %v4896_v16 = vld [vmem:[%s22087_s3 + $0x508] sm:$0xff]  ;;  %v13063_v26 = vcombine.low %v4895_v14, %v4903_v15  ;;  %v18187_v1 = vld [vmem:[%s22087_s3 + $0x840] sm:$0xff] }
 0x20b   :  { %4082 = vmatprep.mubr.bf16.mxu0 %v12374_v20  ;;  %4666 = vmatprep.mubr.bf16.mxu1 %v12374_v20  ;;  %v13064_v20 = vcombine.high %v4895_v14, %v4903_v15  ;;  %v13065_v27 = vcombine.low %v4896_v16, %v4904_v17  ;;  %v18207_v9 = vshrl.u32 %v619_v8, 7 }
 0x20c   :  { %7896 = vmatpush1.bf16.msra.mxu0 %v12935_v21  ;;  %8042 = vmatpush1.bf16.msra.mxu1 %v12937_v22  ;;  %v13066_v21 = vcombine.high %v4896_v16, %v4904_v17  ;;  %v4911_v22 = vld [vmem:[%s22087_s3 + $0x580] sm:$0xff] }
 0x20d   :  { %7897 = vmatprep.subr.bf16.mxu0 %v12952_v23  ;;  %8043 = vmatprep.subr.bf16.mxu1 %v12954_v24  ;;  %v4919_v23 = vld [vmem:[%s22087_s3 + $0x5c0] sm:$0xff]  ;;  %v4912_v24 = vld [vmem:[%s22087_s3 + $0x588] sm:$0xff]  ;;  %22146 = vst [vmem:[#allocation3_spill] sm:$0xff] %v18207_v9  ;;  %v18222_v14 = vsub.s32 3, %v18207_v9 }
 0x20e   :  { %v13080_v28 = vcombine.high %v4911_v22, %v4919_v23  ;;  %v13082_v29 = vcombine.high %v4912_v24, %v4920_v25  ;;  %v13081_v35 = vcombine.low %v4912_v24, %v4920_v25 }
 0x20f   :  { %22150 = vst [vmem:[#allocation7_spill] sm:$0xff] %v18222_v14 }
 0x210   :  { %7898 = vmatpush1.bf16.msra.mxu0 %v12951_v31  ;;  %8044 = vmatpush1.bf16.msra.mxu1 %v12953_v32  ;;  %v4935_v31 = vld [vmem:[%s22087_s3 + $0x640] sm:$0xff]  ;;  %v4928_v32 = vld [vmem:[%s22087_s3 + $0x608] sm:$0xff] }
 0x211   :  { %7899 = vmatprep.subr.bf16.mxu0 %v12968_v33  ;;  %8045 = vmatprep.subr.bf16.mxu1 %v12970_v34  ;;  %v4936_v33 = vld [vmem:[%s22087_s3 + $0x648] sm:$0xff]  ;;  %v13079_v34 = vcombine.low %v4911_v22, %v4919_v23 }
 0x212   :  { %4083 = vmatmul.mubr.bf16.gmra.mrb[8].mxu0 %v12373_v36  ;;  %4667 = vmatmul.mubr.bf16.gmra.mrb[8].mxu1 %v12373_v36  ;;  %v13096_v36 = vcombine.high %v4927_v30, %v4935_v31  ;;  %v13098_v37 = vcombine.high %v4928_v32, %v4936_v33 }
 0x213   :  { %4092 = vmatprep.mubr.bf16.mxu0 %v12390_v40  ;;  %4676 = vmatprep.mubr.bf16.mxu1 %v12390_v40  ;;  %v4944_v40 = vld [vmem:[%s22087_s3 + $0x688] sm:$0xff] }
 0x214   :  { %7900 = vmatpush1.bf16.msra.mxu0 %v12967_v41  ;;  %8046 = vmatpush1.bf16.msra.mxu1 %v12969_v42  ;;  %v4952_v41 = vld [vmem:[%s22087_s3 + $0x6c8] sm:$0xff]  ;;  %v13095_v42 = vcombine.low %v4927_v30, %v4935_v31 }
 0x215   :  { %7901 = vmatprep.subr.bf16.mxu0 %v12984_v43  ;;  %8047 = vmatprep.subr.bf16.mxu1 %v12986_v44  ;;  %v13097_v43 = vcombine.low %v4928_v32, %v4936_v33  ;;  %v13112_v44 = vcombine.high %v4943_v38, %v4951_v39  ;;  %v13114_v45 = vcombine.high %v4944_v40, %v4952_v41 }
 0x216   :  { %v13113_v47 = vcombine.low %v4944_v40, %v4952_v41  ;;  %v18257_v41 = vld [vmem:[%s22087_s3 + $0x888] sm:$0xff] }
 0x218   :  { %7902 = vmatpush1.bf16.msra.mxu0 %v12983_v49  ;;  %8048 = vmatpush1.bf16.msra.mxu1 %v12985_v50  ;;  %v4967_v49 = vld [vmem:[%s22087_s3 + $0x740] sm:$0xff]  ;;  %v4960_v50 = vld [vmem:[%s22087_s3 + $0x708] sm:$0xff] }
 0x219   :  { %7903 = vmatprep.subr.bf16.mxu0 %v13000_v51  ;;  %8049 = vmatprep.subr.bf16.mxu1 %v13002_v52  ;;  %v13128_v51 = vcombine.high %v4959_v48, %v4967_v49  ;;  %v4968_v52 = vld [vmem:[%s22087_s3 + $0x748] sm:$0xff]  ;;  %v13127_v53 = vcombine.low %v4959_v48, %v4967_v49  ;;  %v18272_v48 = vld [vmem:[%s22087_s3 + $0x940] sm:$0xff] }
 0x21a   :  { %4093 = vmatmul.mubr.bf16.gmra.mrb[12].mxu0 %v12389_v54  ;;  %4677 = vmatmul.mubr.bf16.gmra.mrb[12].mxu1 %v12389_v54  ;;  %v13129_v54 = vcombine.low %v4960_v50, %v4968_v52  ;;  %v13130_v55 = vcombine.high %v4960_v50, %v4968_v52 }
 0x21c   :  { %7904 = vmatpush1.bf16.msra.mxu0 %v12999_v58  ;;  %8050 = vmatpush1.bf16.msra.mxu1 %v13001_v59  ;;  %v4976_v58 = vld [vmem:[%s22087_s3 + $0x788] sm:$0xff]  ;;  %v13144_v59 = vcombine.high %v4975_v56, %v4983_v57 }
 0x21d   :  { %7905 = vmatprep.subr.bf16.mxu0 %v13016_v60  ;;  %8051 = vmatprep.subr.bf16.mxu1 %v13018_v61  ;;  %v4984_v60 = vld [vmem:[%s22087_s3 + $0x7c8] sm:$0xff]  ;;  %v13143_v61 = vcombine.low %v4975_v56, %v4983_v57 }
 0x21e   :  { %v13145_v62 = vcombine.low %v4976_v58, %v4984_v60  ;;  %v13146_v63 = vcombine.high %v4976_v58, %v4984_v60  ;;  %v18291_v58 = vld [vmem:[%s22087_s3 + $0x908] sm:$0xff] }
 0x220   :  { %7906 = vmatpush1.bf16.msra.mxu0 %v13015_v2  ;;  %8052 = vmatpush1.bf16.msra.mxu1 %v13017_v3  ;;  %v18192_v2 = vld [vmem:[%s22087_s3 + $0x808] sm:$0xff]  ;;  %v13160_v3 = vcombine.high %v18182_v0, %v18187_v1 }
 0x221   :  { %7907 = vmatprep.subr.bf16.mxu0 %v13032_v4  ;;  %8053 = vmatprep.subr.bf16.mxu1 %v13034_v5  ;;  %v18199_v4 = vld [vmem:[%s22087_s3 + $0x848] sm:$0xff]  ;;  %v13159_v5 = vcombine.low %v18182_v0, %v18187_v1 }
 0x222   :  { %v13161_v6 = vcombine.low %v18192_v2, %v18199_v4  ;;  %v13162_v7 = vcombine.high %v18192_v2, %v18199_v4  ;;  %v18339_v2 = vld [vmem:[%s22087_s3 + $0x988] sm:$0xff] }
 0x223   :  { %v18344_v4 = vld [vmem:[%s22087_s3 + $0x9c8] sm:$0xff] }
 0x224   :  { %7908 = vmatpush1.bf16.msra.mxu0 %v13031_v10  ;;  %8054 = vmatpush1.bf16.msra.mxu1 %v13033_v11  ;;  %v18210_v10 = vsub.s32 0, %v18207_v9  ;;  %v18213_v11 = vsub.s32 2, %v18207_v9 }
 0x225   :  { %7909 = vmatprep.subr.bf16.mxu0 %v13048_v12  ;;  %8055 = vmatprep.subr.bf16.mxu1 %v13050_v13  ;;  %v617_v12 = vld [vmem:[%s22088_s2] sm:$0xf]  ;;  %v18219_v13 = vsub.s32 1, %v18207_v9 }
 0x226   :  { %22147 = vst [vmem:[#allocation4_spill] sm:$0xff] %v18210_v10  ;;  %22148 = vst [vmem:[#allocation5_spill] sm:$0xff] %v18213_v11  ;;  %v18225_v15 = vrot.slane %v617_v12, %v18210_v10  ;;  %v18228_v16 = vrot.slane %v617_v12, %v18213_v11 }
 0x227   :  { %22149 = vst [vmem:[#allocation6_spill] sm:$0xff] %v18219_v13  ;;  %v18231_v17 = vrot.slane %v617_v12, %v18219_v13 }
 0x228   :  { %7910 = vmatpush1.bf16.msra.mxu0 %v13047_v18  ;;  %8056 = vmatpush1.bf16.msra.mxu1 %v13049_v19  ;;  %v18234_v18 = vrot.slane %v617_v12, %v18222_v14 }
 0x229   :  { %7911 = vmatprep.subr.bf16.mxu0 %v13064_v20  ;;  %8057 = vmatprep.subr.bf16.mxu1 %v13066_v21 }
 0x22c   :  { %7912 = vmatpush1.bf16.msra.mxu0 %v13063_v26  ;;  %8058 = vmatpush1.bf16.msra.mxu1 %v13065_v27 }
 0x22d   :  { %7913 = vmatprep.subr.bf16.mxu0 %v13080_v28  ;;  %8059 = vmatprep.subr.bf16.mxu1 %v13082_v29 }
 0x230   :  { %7914 = vmatpush1.bf16.msra.mxu0 %v13079_v34  ;;  %8060 = vmatpush1.bf16.msra.mxu1 %v13081_v35  ;;  %v18247_v35 = vld [vmem:[%s22087_s3 + $0x880] sm:$0xff] }
 0x231   :  { %7915 = vmatprep.subr.bf16.mxu0 %v13096_v36  ;;  %8061 = vmatprep.subr.bf16.mxu1 %v13098_v37  ;;  %v18252_v36 = vld [vmem:[%s22087_s3 + $0x8c0] sm:$0xff] }
 0x232   :  { %v13175_v56 = vcombine.low %v18247_v35, %v18252_v36 }
 0x234   :  { %7916 = vmatpush1.bf16.msra.mxu0 %v13095_v42  ;;  %8062 = vmatpush1.bf16.msra.mxu1 %v13097_v43  ;;  %v18262_v42 = vld [vmem:[%s22087_s3 + $0x8c8] sm:$0xff] }
 0x235   :  { %7917 = vmatprep.subr.bf16.mxu0 %v13112_v44  ;;  %8063 = vmatprep.subr.bf16.mxu1 %v13114_v45  ;;  %v13177_v57 = vcombine.low %v18257_v41, %v18262_v42 }
 0x238   :  { %7918 = vmatpush1.bf16.msra.mxu0 %v13111_v46  ;;  %8064 = vmatpush1.bf16.msra.mxu1 %v13113_v47  ;;  %v18267_v47 = vld [vmem:[%s22087_s3 + $0x900] sm:$0xff] }
 0x239   :  { %7919 = vmatprep.subr.bf16.mxu0 %v13128_v51  ;;  %8065 = vmatprep.subr.bf16.mxu1 %v13130_v55  ;;  %v13176_v51 = vcombine.high %v18247_v35, %v18252_v36 }
 0x23c   :  { %7920 = vmatpush1.bf16.msra.mxu0 %v13127_v53  ;;  %8066 = vmatpush1.bf16.msra.mxu1 %v13129_v54 }
 0x23d   :  { %7921 = vmatprep.subr.bf16.mxu0 %v13144_v59  ;;  %8067 = vmatprep.subr.bf16.mxu1 %v13146_v63  ;;  %v18296_v59 = vld [vmem:[%s22087_s3 + $0x948] sm:$0xff] }
 0x240   :  { %7922 = vmatpush1.bf16.msra.mxu0 %v13143_v61  ;;  %8068 = vmatpush1.bf16.msra.mxu1 %v13145_v62 }
 0x241   :  { %7964 = vmatprep.subr.bf16.mxu0 %v13160_v3  ;;  %8110 = vmatprep.subr.bf16.mxu1 %v13162_v7  ;;  %v13178_v3 = vcombine.high %v18257_v41, %v18262_v42  ;;  %v13192_v7 = vcombine.high %v18267_v47, %v18272_v48  ;;  %v18362_v41 = vld [vmem:[%s22087_s3 + $0xa40] sm:$0xff] }
 0x2d5   :  { %v4064_v19 = vpop.f32.mrb[0].mxu0  ;;  %v4648_v20 = vpop.f32.mrb[0].mxu1 }
 0x2d6   :  { %v14134_v21 = vadd.f32 %v4064_v19, %v18225_v15  ;;  %v14150_v22 = vadd.f32 %v4648_v20, %v18228_v16  ;;  %v4066_v23 = vpop.f32.mrb[1].mxu0  ;;  %v4650_v24 = vpop.f32.mrb[1].mxu1 }
 0x2d7   :  { %v14135_v25 = vadd.f32 %v4066_v23, %v18231_v17  ;;  %v14151_v26 = vadd.f32 %v4650_v24, %v18234_v18  ;;  %v4068_v27 = vpop.f32.mrb[2].mxu0  ;;  %v4652_v28 = vpop.f32.mrb[2].mxu1 }
 0x2d8   :  { %v14136_v29 = vadd.f32 %v4068_v27, %v18225_v15  ;;  %v14152_v30 = vadd.f32 %v4652_v28, %v18228_v16  ;;  %v4070_v31 = vpop.f32.mrb[3].mxu0  ;;  %v4654_v32 = vpop.f32.mrb[3].mxu1  ;;  %v4687_v37 = vmax.f32 %v14134_v21, 0.0  ;;  %v4689_v38 = vmax.f32 %v14150_v22, 0.0 }
 0x2d9   :  { %v14137_v33 = vadd.f32 %v4070_v31, %v18231_v17  ;;  %v14153_v34 = vadd.f32 %v4654_v32, %v18234_v18  ;;  %v4688_v43 = vmax.f32 %v14135_v25, 0.0  ;;  %v4690_v44 = vmax.f32 %v14151_v26, 0.0  ;;  %v18334_v31 = vld [vmem:[%s22087_s3 + $0x9c0] sm:$0xff] }
 0x2da   :  { %v4691_v39 = vmax.f32 %v14136_v29, 0.0  ;;  %v4693_v40 = vmax.f32 %v14152_v30, 0.0  ;;  %v13191_v21 = vcombine.low %v18267_v47, %v18272_v48  ;;  %v13193_v26 = vcombine.low %v18291_v58, %v18296_v59  ;;  %v18329_v30 = vld [vmem:[%s22087_s3 + $0x980] sm:$0xff] }
 0x2db   :  { %v4692_v45 = vmax.f32 %v14137_v33, 0.0  ;;  %v4694_v46 = vmax.f32 %v14153_v34, 0.0  ;;  %v13194_v29 = vcombine.high %v18291_v58, %v18296_v59  ;;  %v13210_v59 = vcombine.high %v18339_v2, %v18344_v4 }
 0x2dc   :  { %v18274_v49 = vpack.c.bf16 %v4691_v39, %v4687_v37  ;;  %v18276_v50 = vpack.c.bf16 %v4693_v40, %v4689_v38  ;;  %v13207_v38 = vcombine.low %v18329_v30, %v18334_v31  ;;  %v13208_v39 = vcombine.high %v18329_v30, %v18334_v31  ;;  %v18357_v40 = vld [vmem:[%s22087_s3 + $0xa00] sm:$0xff] }
 0x2dd   :  { %v18280_v52 = vpack.c.bf16 %v4692_v45, %v4688_v43  ;;  %v18282_v53 = vpack.c.bf16 %v4694_v46, %v4690_v44  ;;  %v4074_v54 = vpop.f32.mrb[4].mxu0  ;;  %v4658_v55 = vpop.f32.mrb[4].mxu1  ;;  %v13209_v46 = vcombine.low %v18339_v2, %v18344_v4 }
 0x2de   :  { %v14138_v60 = vadd.f32 %v4074_v54, %v18225_v15  ;;  %v14154_v61 = vadd.f32 %v4658_v55, %v18228_v16  ;;  %v4076_v62 = vpop.f32.mrb[5].mxu0  ;;  %v4660_v63 = vpop.f32.mrb[5].mxu1 }
 0x2df   :  { %22151 = vst [vmem:[#allocation8_spill] sm:$0xff] %v18282_v53  ;;  %v14139_v8 = vadd.f32 %v4076_v62, %v18231_v17  ;;  %v14155_v12 = vadd.f32 %v4660_v63, %v18234_v18  ;;  %v4078_v19 = vpop.f32.mrb[6].mxu0  ;;  %v4662_v20 = vpop.f32.mrb[6].mxu1  ;;  %7923 = vmatprep.mubr.bf16.mxu0 %v18280_v52  ;;  %8069 = vmatprep.mubr.bf16.mxu1 %v18280_v52 }
 0x2e0   :  { %v14140_v22 = vadd.f32 %v4078_v19, %v18225_v15  ;;  %v14156_v23 = vadd.f32 %v4662_v20, %v18228_v16  ;;  %v4080_v24 = vpop.f32.mrb[7].mxu0  ;;  %v4664_v25 = vpop.f32.mrb[7].mxu1  ;;  %7924 = vmatmul.mubr.bf16.vlgmr.msra.gmra.mrb[16].mxu0 %v18274_v49  ;;  %8070 = vmatmul.mubr.bf16.vlgmr.msra.gmra.mrb[16].mxu1 %v18274_v49  ;;  %v4695_v32 = vmax.f32 %v14138_v60, 0.0  ;;  %v4697_v0 = vmax.f32 %v14154_v61, 0.0 }
 0x2e1   :  { %v14141_v27 = vadd.f32 %v4080_v24, %v18231_v17  ;;  %v14157_v28 = vadd.f32 %v4664_v25, %v18234_v18  ;;  %7965 = vmatpush1.bf16.msra.mxu0 %v13159_v5  ;;  %8111 = vmatpush1.bf16.msra.mxu1 %v13161_v6  ;;  %v4696_v6 = vmax.f32 %v14139_v8, 0.0  ;;  %v4698_v33 = vmax.f32 %v14155_v12, 0.0  ;;  %v18406_v25 = vld [vmem:[%s22087_s3 + $0xa80] sm:$0xff] }
 0x2e2   :  { %v4699_v1 = vmax.f32 %v14140_v22, 0.0  ;;  %v4701_v5 = vmax.f32 %v14156_v23, 0.0  ;;  %7966 = vmatprep.subr.bf16.mxu0 %v13176_v51  ;;  %8112 = vmatprep.subr.bf16.mxu1 %v13178_v3  ;;  %v13224_v3 = vcombine.high %v18357_v40, %v18362_v41  ;;  %v13223_v20 = vcombine.low %v18357_v40, %v18362_v41  ;;  %v18438_v40 = vld [vmem:[%s22087_s3 + $0xb00] sm:$0xff] }
 0x2e3   :  { %v4700_v34 = vmax.f32 %v14141_v27, 0.0  ;;  %v4702_v35 = vmax.f32 %v14157_v28, 0.0  ;;  %v18411_v27 = vld [vmem:[%s22087_s3 + $0xac0] sm:$0xff] }
 0x2e4   :  { %v18346_v36 = vpack.c.bf16 %v4699_v1, %v4695_v32  ;;  %v18348_v37 = vpack.c.bf16 %v4701_v5, %v4697_v0  ;;  %v18416_v32 = vld [vmem:[%s22087_s3 + $0xa88] sm:$0xff]  ;;  %v13240_v4 = vcombine.high %v18406_v25, %v18411_v27  ;;  %v18443_v41 = vld [vmem:[%s22087_s3 + $0xb40] sm:$0xff] }
 0x2e5   :  { %v18364_v42 = vpack.c.bf16 %v4700_v34, %v4696_v6  ;;  %v18366_v43 = vpack.c.bf16 %v4702_v35, %v4698_v33  ;;  %7967 = vmatpush1.bf16.msra.mxu0 %v13175_v56  ;;  %8113 = vmatpush1.bf16.msra.mxu1 %v13177_v57  ;;  %v4084_v44 = vpop.f32.mrb[8].mxu0  ;;  %v4668_v45 = vpop.f32.mrb[8].mxu1  ;;  %v18377_v56 = vld [vmem:[%s22087_s3 + $0xa08] sm:$0xff] }
 0x2e6   :  { %22152 = vst [vmem:[#allocation9_spill] sm:$0xff] %v18346_v36  ;;  %v14142_v51 = vadd.f32 %v4084_v44, %v18225_v15  ;;  %v14158_v54 = vadd.f32 %v4668_v45, %v18228_v16  ;;  %v4086_v55 = vpop.f32.mrb[9].mxu0  ;;  %v4670_v58 = vpop.f32.mrb[9].mxu1  ;;  %7968 = vmatprep.subr.bf16.mxu0 %v13192_v7  ;;  %8114 = vmatprep.subr.bf16.mxu1 %v13194_v29  ;;  %v18382_v57 = vld [vmem:[%s22087_s3 + $0xa48] sm:$0xff] }
 0x2e7   :  { %22153 = vst [vmem:[#allocation10_spill] sm:$0xff] %v18364_v42  ;;  %v14143_v60 = vadd.f32 %v4086_v55, %v18231_v17  ;;  %v14159_v61 = vadd.f32 %v4670_v58, %v18234_v18  ;;  %v4088_v62 = vpop.f32.mrb[10].mxu0  ;;  %v4672_v63 = vpop.f32.mrb[10].mxu1  ;;  %7933 = vmatprep.mubr.bf16.mxu0 %v18364_v42  ;;  %8079 = vmatprep.mubr.bf16.mxu1 %v18364_v42  ;;  %v5080_v0 = vld [vmem:[%s22087_s3 + $0xac8] sm:$0xff] }
 0x2e8   :  { %v14144_v7 = vadd.f32 %v4088_v62, %v18225_v15  ;;  %v14160_v8 = vadd.f32 %v4672_v63, %v18228_v16  ;;  %v4090_v12 = vpop.f32.mrb[11].mxu0  ;;  %v4674_v19 = vpop.f32.mrb[11].mxu1  ;;  %7934 = vmatmul.mubr.bf16.gmra.mrb[20].mxu0 %v18346_v36  ;;  %8080 = vmatmul.mubr.bf16.gmra.mrb[20].mxu1 %v18346_v36  ;;  %v13226_v24 = vcombine.high %v18377_v56, %v18382_v57  ;;  %v4703_v28 = vmax.f32 %v14142_v51, 0.0  ;;  %v5096_v55 = vld [vmem:[%s22087_s3 + $0xb48] sm:$0xff] }
 0x2e9   :  { %v14145_v22 = vadd.f32 %v4090_v12, %v18231_v17  ;;  %v14161_v23 = vadd.f32 %v4674_v19, %v18234_v18  ;;  %7969 = vmatpush1.bf16.msra.mxu0 %v13191_v21  ;;  %8115 = vmatpush1.bf16.msra.mxu1 %v13193_v26  ;;  %v4705_v29 = vmax.f32 %v14158_v54, 0.0  ;;  %v4704_v47 = vmax.f32 %v14143_v60, 0.0  ;;  %v5088_v54 = vld [vmem:[%s22087_s3 + $0xb08] sm:$0xff] }
 0x2ea   :  { %v4707_v30 = vmax.f32 %v14144_v7, 0.0  ;;  %v4709_v31 = vmax.f32 %v14160_v8, 0.0  ;;  %7970 = vmatprep.subr.bf16.mxu0 %v13208_v39  ;;  %8116 = vmatprep.subr.bf16.mxu1 %v13210_v59  ;;  %v4706_v48 = vmax.f32 %v14159_v61, 0.0  ;;  %v13225_v2 = vcombine.low %v18377_v56, %v18382_v57 }
 0x2eb   :  { %v4708_v21 = vmax.f32 %v14145_v22, 0.0  ;;  %v4710_v26 = vmax.f32 %v14161_v23, 0.0  ;;  %v13239_v39 = vcombine.low %v18406_v25, %v18411_v27  ;;  %v13242_v51 = vcombine.high %v18416_v32, %v5080_v0 }
 0x2ec   :  { %v18421_v1 = vpack.c.bf16 %v4707_v30, %v4703_v28  ;;  %v18423_v5 = vpack.c.bf16 %v4709_v31, %v4705_v29  ;;  %v13241_v60 = vcombine.low %v18416_v32, %v5080_v0  ;;  %v13256_v7 = vcombine.high %v18438_v40, %v18443_v41  ;;  %v5103_v29 = vld [vmem:[%s22087_s3 + $0xb80] sm:$0xff]  ;;  %v5104_v31 = vld [vmem:[%s22087_s3 + $0xb88] sm:$0xff] }
 0x2ed   :  { %v18429_v6 = vpack.c.bf16 %v4708_v21, %v4704_v47  ;;  %v18431_v33 = vpack.c.bf16 %v4710_v26, %v4706_v48  ;;  %7971 = vmatpush1.bf16.msra.mxu0 %v13207_v38  ;;  %8117 = vmatpush1.bf16.msra.mxu1 %v13209_v46  ;;  %v4094_v34 = vpop.f32.mrb[12].mxu0  ;;  %v4678_v35 = vpop.f32.mrb[12].mxu1  ;;  %v13258_v19 = vcombine.high %v5088_v54, %v5096_v55  ;;  %v5111_v30 = vld [vmem:[%s22087_s3 + $0xbc0] sm:$0xff]  ;;  %v5112_v47 = vld [vmem:[%s22087_s3 + $0xbc8] sm:$0xff] }
 0x2ee   :  { %22154 = vst [vmem:[#allocation11_spill] sm:$0xff] %v18421_v1  ;;  %v14146_v44 = vadd.f32 %v4094_v34, %v18225_v15  ;;  %v14162_v38 = vadd.f32 %v4678_v35, %v18228_v16  ;;  %v4096_v45 = vpop.f32.mrb[13].mxu0  ;;  %v4680_v46 = vpop.f32.mrb[13].mxu1  ;;  %7972 = vmatprep.subr.bf16.mxu0 %v13224_v3  ;;  %8118 = vmatprep.subr.bf16.mxu1 %v13226_v24  ;;  %v5119_v32 = vld [vmem:[%s22087_s3 + $0xc00] sm:$0xff]  ;;  %v5120_v34 = vld [vmem:[%s22087_s3 + $0xc08] sm:$0xff] }
 0x2ef   :  { %22155 = vst [vmem:[#allocation12_spill] sm:$0xff] %v18429_v6  ;;  %v14147_v58 = vadd.f32 %v4096_v45, %v18231_v17  ;;  %v14163_v59 = vadd.f32 %v4680_v46, %v18234_v18  ;;  %v4098_v56 = vpop.f32.mrb[14].mxu0  ;;  %v4682_v57 = vpop.f32.mrb[14].mxu1  ;;  %7943 = vmatprep.mubr.bf16.mxu0 %v18429_v6  ;;  %8089 = vmatprep.mubr.bf16.mxu1 %v18429_v6  ;;  %v5128_v35 = vld [vmem:[%s22087_s3 + $0xc48] sm:$0xff]  ;;  %v5143_v45 = vld [vmem:[%s22087_s3 + $0xcc0] sm:$0xff] }
 0x2f0   :  { %v14148_v61 = vadd.f32 %v4098_v56, %v18225_v15  ;;  %v14164_v62 = vadd.f32 %v4682_v57, %v18228_v16  ;;  %v4100_v63 = vpop.f32.mrb[15].mxu0  ;;  %v4684_v3 = vpop.f32.mrb[15].mxu1  ;;  %7944 = vmatmul.mubr.bf16.gmra.mrb[24].mxu0 %v18421_v1  ;;  %8090 = vmatmul.mubr.bf16.gmra.mrb[24].mxu1 %v18421_v1  ;;  %v4711_v22 = vmax.f32 %v14146_v44, 0.0  ;;  %v4713_v15 = vmax.f32 %v14162_v38, 0.0  ;;  %v5135_v38 = vld [vmem:[%s22087_s3 + $0xc80] sm:$0xff]  ;;  %v5136_v46 = vld [vmem:[%s22087_s3 + $0xc88] sm:$0xff] }
 0x2f1   :  { %v14149_v8 = vadd.f32 %v4100_v63, %v18231_v17  ;;  %v14165_v12 = vadd.f32 %v4684_v3, %v18234_v18  ;;  %7973 = vmatpush1.bf16.msra.mxu0 %v13223_v20  ;;  %8119 = vmatpush1.bf16.msra.mxu1 %v13225_v2  ;;  %v4712_v24 = vmax.f32 %v14147_v58, 0.0  ;;  %v4714_v25 = vmax.f32 %v14163_v59, 0.0  ;;  %v5151_v56 = vld [vmem:[%s22087_s3 + $0xd00] sm:$0xff] }
 0x2f2   :  { %v4715_v23 = vmax.f32 %v14148_v61, 0.0  ;;  %v4717_v16 = vmax.f32 %v14164_v62, 0.0  ;;  %7974 = vmatprep.subr.bf16.mxu0 %v13240_v4  ;;  %8120 = vmatprep.subr.bf16.mxu1 %v13242_v51  ;;  %v13255_v20 = vcombine.low %v18438_v40, %v18443_v41  ;;  %v13257_v26 = vcombine.low %v5088_v54, %v5096_v55  ;;  %v5127_v4 = vld [vmem:[%s22087_s3 + $0xc40] sm:$0xff]  ;;  %v5144_v51 = vld [vmem:[%s22087_s3 + $0xcc8] sm:$0xff] }
 0x2f3   :  { %v4716_v27 = vmax.f32 %v14149_v8, 0.0  ;;  %v4718_v28 = vmax.f32 %v14165_v12, 0.0  ;;  %v13272_v0 = vcombine.high %v5103_v29, %v5111_v30  ;;  %v13274_v2 = vcombine.high %v5104_v31, %v5112_v47  ;;  %v5159_v57 = vld [vmem:[%s22087_s3 + $0xd40] sm:$0xff]  ;;  %v5160_v61 = vld [vmem:[%s22087_s3 + $0xd48] sm:$0xff] }
 0x2f4   :  { %v18470_v17 = vpack.c.bf16 %v4715_v23, %v4711_v22  ;;  %v18472_v18 = vpack.c.bf16 %v4717_v16, %v4713_v15  ;;  %v13273_v40 = vcombine.low %v5104_v31, %v5112_v47  ;;  %v13288_v41 = vcombine.high %v5119_v32, %v5127_v4  ;;  %v5167_v8 = vld [vmem:[%s22087_s3 + $0xd80] sm:$0xff]  ;;  %v5176_v22 = vld [vmem:[%s22087_s3 + $0xdc8] sm:$0xff] }
 0x2f5   :  { %v18485_v48 = vpack.c.bf16 %v4716_v27, %v4712_v24  ;;  %v18487_v21 = vpack.c.bf16 %v4718_v28, %v4714_v25  ;;  %7975 = vmatpush1.bf16.msra.mxu0 %v13239_v39  ;;  %8121 = vmatpush1.bf16.msra.mxu1 %v13241_v60  ;;  %v13271_v39 = vcombine.low %v5103_v29, %v5111_v30  ;;  %v5152_v60 = vld [vmem:[%s22087_s3 + $0xd08] sm:$0xff]  ;;  %v5175_v12 = vld [vmem:[%s22087_s3 + $0xdc0] sm:$0xff] }
 0x2f6   :  { %22156 = vst [vmem:[#allocation13_spill] sm:$0xff] %v18470_v17  ;;  %7976 = vmatprep.subr.bf16.mxu0 %v13256_v7  ;;  %8122 = vmatprep.subr.bf16.mxu1 %v13258_v19  ;;  %v13290_v44 = vcombine.high %v5120_v34, %v5128_v35  ;;  %v13287_v54 = vcombine.low %v5119_v32, %v5127_v4  ;;  %v5168_v19 = vld [vmem:[%s22087_s3 + $0xd88] sm:$0xff]  ;;  %v5183_v25 = vld [vmem:[%s22087_s3 + $0xe00] sm:$0xff] }
 0x2f7   :  { %22157 = vst [vmem:[#allocation14_spill] sm:$0xff] %v18485_v48  ;;  %7953 = vmatprep.mubr.bf16.mxu0 %v18485_v48  ;;  %8099 = vmatprep.mubr.bf16.mxu1 %v18485_v48  ;;  %v13289_v55 = vcombine.low %v5120_v34, %v5128_v35  ;;  %v13304_v58 = vcombine.high %v5135_v38, %v5143_v45  ;;  %v5191_v27 = vld [vmem:[%s22087_s3 + $0xe40] sm:$0xff]  ;;  %v5184_v28 = vld [vmem:[%s22087_s3 + $0xe08] sm:$0xff] }
 0x2f8   :  { %7954 = vmatmul.mubr.bf16.gmra.mrb[28].mxu0 %v18470_v17  ;;  %8100 = vmatmul.mubr.bf16.gmra.mrb[28].mxu1 %v18470_v17  ;;  %v13306_v59 = vcombine.high %v5136_v46, %v5144_v51  ;;  %v13303_v62 = vcombine.low %v5135_v38, %v5143_v45  ;;  %v13305_v63 = vcombine.low %v5136_v46, %v5144_v51  ;;  %v5192_v29 = vld [vmem:[%s22087_s3 + $0xe48] sm:$0xff]  ;;  %v5207_v32 = vld [vmem:[%s22087_s3 + $0xec0] sm:$0xff] }
 0x2f9   :  { %7977 = vmatpush1.bf16.msra.mxu0 %v13255_v20  ;;  %8123 = vmatpush1.bf16.msra.mxu1 %v13257_v26  ;;  %v13320_v3 = vcombine.high %v5151_v56, %v5159_v57  ;;  %v13322_v7 = vcombine.high %v5152_v60, %v5160_v61  ;;  %v13319_v15 = vcombine.low %v5151_v56, %v5159_v57  ;;  %v5199_v26 = vld [vmem:[%s22087_s3 + $0xe80] sm:$0xff]  ;;  %v5224_v38 = vld [vmem:[%s22087_s3 + $0xf48] sm:$0xff] }
 0x2fa   :  { %7996 = vmatprep.mubr.bf16.mxu0 %v18282_v53  ;;  %8142 = vmatprep.mubr.bf16.mxu1 %v18282_v53  ;;  %v13321_v23 = vcombine.low %v5152_v60, %v5160_v61  ;;  %v13336_v16 = vcombine.high %v5167_v8, %v5175_v12  ;;  %v13338_v24 = vcombine.high %v5168_v19, %v5176_v22  ;;  %v5240_v56 = vld [vmem:[%s22087_s3 + $0xfc8] sm:$0xff] }
 0x2fb   :  { %7978 = vmatprep.subr.bf16.mxu0 %v13272_v0  ;;  %8124 = vmatprep.subr.bf16.mxu1 %v13274_v2  ;;  %v13335_v20 = vcombine.low %v5167_v8, %v5175_v12  ;;  %v13337_v30 = vcombine.low %v5168_v19, %v5176_v22  ;;  %v13352_v31 = vcombine.high %v5183_v25, %v5191_v27  ;;  %v5200_v0 = vld [vmem:[%s22087_s3 + $0xe88] sm:$0xff]  ;;  %v4746_v8 = vld [vmem:[%s22087_s3 + $0x58] sm:$0xff] }
 0x2fc   :  { %v13354_v47 = vcombine.high %v5184_v28, %v5192_v29  ;;  %v5208_v2 = vld [vmem:[%s22087_s3 + $0xec8] sm:$0xff]  ;;  %v13351_v4 = vcombine.low %v5183_v25, %v5191_v27  ;;  %v13353_v34 = vcombine.low %v5184_v28, %v5192_v29  ;;  %v13368_v35 = vcombine.high %v5199_v26, %v5207_v32  ;;  %v4762_v25 = vld [vmem:[%s22087_s3 + $0xd8] sm:$0xff] }
 0x2fd   :  { %7979 = vmatpush1.bf16.msra.mxu0 %v13271_v39  ;;  %8125 = vmatpush1.bf16.msra.mxu1 %v13273_v40  ;;  %v13370_v39 = vcombine.high %v5200_v0, %v5208_v2  ;;  %v5215_v40 = vld [vmem:[%s22087_s3 + $0xf00] sm:$0xff]  ;;  %v13367_v45 = vcombine.low %v5199_v26, %v5207_v32  ;;  %v13369_v46 = vcombine.low %v5200_v0, %v5208_v2  ;;  %v4778_v26 = vld [vmem:[%s22087_s3 + $0x158] sm:$0xff] }
 0x2fe   :  { %7980 = vmatprep.subr.bf16.mxu0 %v13288_v41  ;;  %8126 = vmatprep.subr.bf16.mxu1 %v13290_v44  ;;  %v5223_v41 = vld [vmem:[%s22087_s3 + $0xf40] sm:$0xff]  ;;  %v5216_v44 = vld [vmem:[%s22087_s3 + $0xf08] sm:$0xff] }
 0x2ff   :  { %v13384_v51 = vcombine.high %v5215_v40, %v5223_v41  ;;  %v13383_v57 = vcombine.low %v5215_v40, %v5223_v41  ;;  %v13385_v60 = vcombine.low %v5216_v44, %v5224_v38  ;;  %v4794_v40 = vld [vmem:[%s22087_s3 + $0x1d8] sm:$0xff] }
 0x301   :  { %7981 = vmatpush1.bf16.msra.mxu0 %v13287_v54  ;;  %8127 = vmatpush1.bf16.msra.mxu1 %v13289_v55  ;;  %v13386_v54 = vcombine.high %v5216_v44, %v5224_v38  ;;  %v5231_v55 = vld [vmem:[%s22087_s3 + $0xf80] sm:$0xff] }
 0x302   :  { %7982 = vmatprep.subr.bf16.mxu0 %v13304_v58  ;;  %8128 = vmatprep.subr.bf16.mxu1 %v13306_v59  ;;  %v5239_v58 = vld [vmem:[%s22087_s3 + $0xfc0] sm:$0xff]  ;;  %v5232_v59 = vld [vmem:[%s22087_s3 + $0xf88] sm:$0xff] }
 0x303   :  { %v13400_v61 = vcombine.high %v5231_v55, %v5239_v58  ;;  %v13399_v12 = vcombine.low %v5231_v55, %v5239_v58  ;;  %v13401_v19 = vcombine.low %v5232_v59, %v5240_v56  ;;  %v4810_v55 = vld [vmem:[%s22087_s3 + $0x258] sm:$0xff] }
 0x305   :  { %7983 = vmatpush1.bf16.msra.mxu0 %v13303_v62  ;;  %8129 = vmatpush1.bf16.msra.mxu1 %v13305_v63  ;;  %v13402_v62 = vcombine.high %v5232_v59, %v5240_v56  ;;  %v4737_v63 = vld [vmem:[%s22087_s3 + $0x10] sm:$0xff] }
 0x306   :  { %7984 = vmatprep.subr.bf16.mxu0 %v13320_v3  ;;  %8130 = vmatprep.subr.bf16.mxu1 %v13322_v7  ;;  %v4745_v3 = vld [vmem:[%s22087_s3 + $0x50] sm:$0xff]  ;;  %v4738_v7 = vld [vmem:[%s22087_s3 + $0x18] sm:$0xff] }
 0x307   :  { %v12908_v22 = vcombine.high %v4737_v63, %v4745_v3  ;;  %v12907_v27 = vcombine.low %v4737_v63, %v4745_v3  ;;  %v12909_v28 = vcombine.low %v4738_v7, %v4746_v8  ;;  %v4826_v63 = vld [vmem:[%s22087_s3 + $0x2d8] sm:$0xff] }
 0x309   :  { %7985 = vmatpush1.bf16.msra.mxu0 %v13319_v15  ;;  %8131 = vmatpush1.bf16.msra.mxu1 %v13321_v23  ;;  %v12910_v15 = vcombine.high %v4738_v7, %v4746_v8  ;;  %v4753_v23 = vld [vmem:[%s22087_s3 + $0x90] sm:$0xff] }
 0x30a   :  { %7986 = vmatprep.subr.bf16.mxu0 %v13336_v16  ;;  %8132 = vmatprep.subr.bf16.mxu1 %v13338_v24  ;;  %v4761_v16 = vld [vmem:[%s22087_s3 + $0xd0] sm:$0xff]  ;;  %v4754_v24 = vld [vmem:[%s22087_s3 + $0x98] sm:$0xff] }
 0x30b   :  { %v12924_v29 = vcombine.high %v4753_v23, %v4761_v16  ;;  %v12923_v32 = vcombine.low %v4753_v23, %v4761_v16  ;;  %v12925_v0 = vcombine.low %v4754_v24, %v4762_v25  ;;  %v4842_v23 = vld [vmem:[%s22087_s3 + $0x358] sm:$0xff] }
 0x30d   :  { %7987 = vmatpush1.bf16.msra.mxu0 %v13335_v20  ;;  %8133 = vmatpush1.bf16.msra.mxu1 %v13337_v30  ;;  %v12926_v20 = vcombine.high %v4754_v24, %v4762_v25  ;;  %v4769_v30 = vld [vmem:[%s22087_s3 + $0x110] sm:$0xff] }
 0x30e   :  { %7988 = vmatprep.subr.bf16.mxu0 %v13352_v31  ;;  %8134 = vmatprep.subr.bf16.mxu1 %v13354_v47  ;;  %v4777_v31 = vld [vmem:[%s22087_s3 + $0x150] sm:$0xff]  ;;  %v4770_v47 = vld [vmem:[%s22087_s3 + $0x118] sm:$0xff] }
 0x30f   :  { %v12940_v2 = vcombine.high %v4769_v30, %v4777_v31  ;;  %v12939_v41 = vcombine.low %v4769_v30, %v4777_v31  ;;  %v12941_v44 = vcombine.low %v4770_v47, %v4778_v26  ;;  %v4858_v30 = vld [vmem:[%s22087_s3 + $0x3d8] sm:$0xff] }
 0x311   :  { %7989 = vmatpush1.bf16.msra.mxu0 %v13351_v4  ;;  %8135 = vmatpush1.bf16.msra.mxu1 %v13353_v34  ;;  %v12942_v4 = vcombine.high %v4770_v47, %v4778_v26  ;;  %v4785_v34 = vld [vmem:[%s22087_s3 + $0x190] sm:$0xff] }
 0x312   :  { %7990 = vmatprep.subr.bf16.mxu0 %v13368_v35  ;;  %8136 = vmatprep.subr.bf16.mxu1 %v13370_v39  ;;  %v4793_v35 = vld [vmem:[%s22087_s3 + $0x1d0] sm:$0xff]  ;;  %v4786_v39 = vld [vmem:[%s22087_s3 + $0x198] sm:$0xff] }
 0x313   :  { %v12956_v38 = vcombine.high %v4785_v34, %v4793_v35  ;;  %v12955_v58 = vcombine.low %v4785_v34, %v4793_v35  ;;  %v12957_v59 = vcombine.low %v4786_v39, %v4794_v40  ;;  %v4874_v34 = vld [vmem:[%s22087_s3 + $0x458] sm:$0xff] }
 0x315   :  { %7991 = vmatpush1.bf16.msra.mxu0 %v13367_v45  ;;  %8137 = vmatpush1.bf16.msra.mxu1 %v13369_v46  ;;  %v12958_v45 = vcombine.high %v4786_v39, %v4794_v40  ;;  %v4801_v46 = vld [vmem:[%s22087_s3 + $0x210] sm:$0xff] }
 0x316   :  { %7992 = vmatprep.subr.bf16.mxu0 %v13384_v51  ;;  %8138 = vmatprep.subr.bf16.mxu1 %v13386_v54  ;;  %v4809_v51 = vld [vmem:[%s22087_s3 + $0x250] sm:$0xff]  ;;  %v4802_v54 = vld [vmem:[%s22087_s3 + $0x218] sm:$0xff] }
 0x317   :  { %v12972_v56 = vcombine.high %v4801_v46, %v4809_v51  ;;  %v12971_v3 = vcombine.low %v4801_v46, %v4809_v51  ;;  %v12973_v7 = vcombine.low %v4802_v54, %v4810_v55  ;;  %v4890_v46 = vld [vmem:[%s22087_s3 + $0x4d8] sm:$0xff] }
 0x319   :  { %7993 = vmatpush1.bf16.msra.mxu0 %v13383_v57  ;;  %8139 = vmatpush1.bf16.msra.mxu1 %v13385_v60  ;;  %v12974_v57 = vcombine.high %v4802_v54, %v4810_v55  ;;  %v4817_v60 = vld [vmem:[%s22087_s3 + $0x290] sm:$0xff] }
 0x31a   :  { %7994 = vmatprep.subr.bf16.mxu0 %v13400_v61  ;;  %8140 = vmatprep.subr.bf16.mxu1 %v13402_v62  ;;  %v4825_v61 = vld [vmem:[%s22087_s3 + $0x2d0] sm:$0xff]  ;;  %v4818_v62 = vld [vmem:[%s22087_s3 + $0x298] sm:$0xff] }
 0x31b   :  { %v12988_v8 = vcombine.high %v4817_v60, %v4825_v61  ;;  %v12987_v16 = vcombine.low %v4817_v60, %v4825_v61  ;;  %v12989_v24 = vcombine.low %v4818_v62, %v4826_v63  ;;  %v4906_v60 = vld [vmem:[%s22087_s3 + $0x558] sm:$0xff] }
 0x31d   :  { %7995 = vmatpush1.bf16.msra.mxu0 %v13399_v12  ;;  %8141 = vmatpush1.bf16.msra.mxu1 %v13401_v19  ;;  %v12990_v12 = vcombine.high %v4818_v62, %v4826_v63  ;;  %v4833_v19 = vld [vmem:[%s22087_s3 + $0x310] sm:$0xff] }
 0x31e   :  { %8183 = vmatprep.subr.bf16.mxu0 %v12908_v22  ;;  %8329 = vmatprep.subr.bf16.mxu1 %v12910_v15  ;;  %v4841_v22 = vld [vmem:[%s22087_s3 + $0x350] sm:$0xff]  ;;  %v4834_v15 = vld [vmem:[%s22087_s3 + $0x318] sm:$0xff] }
 0x31f   :  { %v13004_v25 = vcombine.high %v4833_v19, %v4841_v22  ;;  %v13003_v31 = vcombine.low %v4833_v19, %v4841_v22  ;;  %v13005_v47 = vcombine.low %v4834_v15, %v4842_v23  ;;  %v4922_v19 = vld [vmem:[%s22087_s3 + $0x5d8] sm:$0xff] }
 0x320   :  { %7997 = vmatmul.mubr.bf16.vlgmr.msra.gmra.mrb[16].mxu0 %v18276_v50  ;;  %8143 = vmatmul.mubr.bf16.vlgmr.msra.gmra.mrb[16].mxu1 %v18276_v50 }
 0x321   :  { %8006 = vmatprep.mubr.bf16.mxu0 %v18366_v43  ;;  %8152 = vmatprep.mubr.bf16.mxu1 %v18366_v43 }
 0x322   :  { %8184 = vmatpush1.bf16.msra.mxu0 %v12907_v27  ;;  %8330 = vmatpush1.bf16.msra.mxu1 %v12909_v28  ;;  %v13006_v27 = vcombine.high %v4834_v15, %v4842_v23  ;;  %v4849_v28 = vld [vmem:[%s22087_s3 + $0x390] sm:$0xff] }
 0x323   :  { %8185 = vmatprep.subr.bf16.mxu0 %v12924_v29  ;;  %8331 = vmatprep.subr.bf16.mxu1 %v12926_v20  ;;  %v4857_v29 = vld [vmem:[%s22087_s3 + $0x3d0] sm:$0xff]  ;;  %v4850_v20 = vld [vmem:[%s22087_s3 + $0x398] sm:$0xff] }
 0x324   :  { %v13020_v26 = vcombine.high %v4849_v28, %v4857_v29  ;;  %v13019_v35 = vcombine.low %v4849_v28, %v4857_v29  ;;  %v13021_v39 = vcombine.low %v4850_v20, %v4858_v30  ;;  %v4938_v28 = vld [vmem:[%s22087_s3 + $0x658] sm:$0xff] }
 0x326   :  { %8186 = vmatpush1.bf16.msra.mxu0 %v12923_v32  ;;  %8332 = vmatpush1.bf16.msra.mxu1 %v12925_v0  ;;  %v13022_v32 = vcombine.high %v4850_v20, %v4858_v30  ;;  %v4865_v0 = vld [vmem:[%s22087_s3 + $0x410] sm:$0xff] }
 0x327   :  { %8187 = vmatprep.subr.bf16.mxu0 %v12940_v2  ;;  %8333 = vmatprep.subr.bf16.mxu1 %v12942_v4  ;;  %v4873_v2 = vld [vmem:[%s22087_s3 + $0x450] sm:$0xff]  ;;  %v4866_v4 = vld [vmem:[%s22087_s3 + $0x418] sm:$0xff] }
 0x328   :  { %8007 = vmatmul.mubr.bf16.gmra.mrb[20].mxu0 %v18348_v37  ;;  %8153 = vmatmul.mubr.bf16.gmra.mrb[20].mxu1 %v18348_v37  ;;  %v13036_v40 = vcombine.high %v4865_v0, %v4873_v2  ;;  %v13035_v51 = vcombine.low %v4865_v0, %v4873_v2  ;;  %v13037_v54 = vcombine.low %v4866_v4, %v4874_v34  ;;  %v4954_v0 = vld [vmem:[%s22087_s3 + $0x6d8] sm:$0xff] }
 0x329   :  { %8016 = vmatprep.mubr.bf16.mxu0 %v18431_v33  ;;  %8162 = vmatprep.mubr.bf16.mxu1 %v18431_v33 }
 0x32a   :  { %8188 = vmatpush1.bf16.msra.mxu0 %v12939_v41  ;;  %8334 = vmatpush1.bf16.msra.mxu1 %v12941_v44  ;;  %v13038_v41 = vcombine.high %v4866_v4, %v4874_v34  ;;  %v4881_v44 = vld [vmem:[%s22087_s3 + $0x490] sm:$0xff] }
 0x32b   :  { %8189 = vmatprep.subr.bf16.mxu0 %v12956_v38  ;;  %8335 = vmatprep.subr.bf16.mxu1 %v12958_v45  ;;  %v4889_v38 = vld [vmem:[%s22087_s3 + $0x4d0] sm:$0xff]  ;;  %v4882_v45 = vld [vmem:[%s22087_s3 + $0x498] sm:$0xff] }
 0x32c   :  { %v13052_v55 = vcombine.high %v4881_v44, %v4889_v38  ;;  %v13051_v61 = vcombine.low %v4881_v44, %v4889_v38  ;;  %v13053_v62 = vcombine.low %v4882_v45, %v4890_v46  ;;  %v4970_v44 = vld [vmem:[%s22087_s3 + $0x758] sm:$0xff] }
 0x32e   :  { %8190 = vmatpush1.bf16.msra.mxu0 %v12955_v58  ;;  %8336 = vmatpush1.bf16.msra.mxu1 %v12957_v59  ;;  %v13054_v58 = vcombine.high %v4882_v45, %v4890_v46  ;;  %v4897_v59 = vld [vmem:[%s22087_s3 + $0x510] sm:$0xff] }
 0x32f   :  { %8191 = vmatprep.subr.bf16.mxu0 %v12972_v56  ;;  %8337 = vmatprep.subr.bf16.mxu1 %v12974_v57  ;;  %v4905_v56 = vld [vmem:[%s22087_s3 + $0x550] sm:$0xff]  ;;  %v4898_v57 = vld [vmem:[%s22087_s3 + $0x518] sm:$0xff] }
 0x330   :  { %8017 = vmatmul.mubr.bf16.gmra.mrb[24].mxu0 %v18423_v5  ;;  %8163 = vmatmul.mubr.bf16.gmra.mrb[24].mxu1 %v18423_v5  ;;  %v13068_v63 = vcombine.high %v4897_v59, %v4905_v56  ;;  %v13067_v22 = vcombine.low %v4897_v59, %v4905_v56  ;;  %v13069_v15 = vcombine.low %v4898_v57, %v4906_v60  ;;  %v4986_v59 = vld [vmem:[%s22087_s3 + $0x7d8] sm:$0xff] }
 0x331   :  { %8026 = vmatprep.mubr.bf16.mxu0 %v18487_v21  ;;  %8172 = vmatprep.mubr.bf16.mxu1 %v18487_v21 }
 0x332   :  { %8192 = vmatpush1.bf16.msra.mxu0 %v12971_v3  ;;  %8338 = vmatpush1.bf16.msra.mxu1 %v12973_v7  ;;  %v13070_v3 = vcombine.high %v4898_v57, %v4906_v60  ;;  %v4913_v7 = vld [vmem:[%s22087_s3 + $0x590] sm:$0xff] }
 0x333   :  { %8193 = vmatprep.subr.bf16.mxu0 %v12988_v8  ;;  %8339 = vmatprep.subr.bf16.mxu1 %v12990_v12  ;;  %v4921_v8 = vld [vmem:[%s22087_s3 + $0x5d0] sm:$0xff]  ;;  %v4914_v12 = vld [vmem:[%s22087_s3 + $0x598] sm:$0xff] }
 0x334   :  { %v13084_v23 = vcombine.high %v4913_v7, %v4921_v8  ;;  %v13083_v29 = vcombine.low %v4913_v7, %v4921_v8  ;;  %v13085_v20 = vcombine.low %v4914_v12, %v4922_v19  ;;  %v5002_v7 = vld [vmem:[%s22087_s3 + $0x858] sm:$0xff] }
 0x336   :  { %8194 = vmatpush1.bf16.msra.mxu0 %v12987_v16  ;;  %8340 = vmatpush1.bf16.msra.mxu1 %v12989_v24  ;;  %v13086_v16 = vcombine.high %v4914_v12, %v4922_v19  ;;  %v4929_v24 = vld [vmem:[%s22087_s3 + $0x610] sm:$0xff] }
 0x337   :  { %8195 = vmatprep.subr.bf16.mxu0 %v13004_v25  ;;  %8341 = vmatprep.subr.bf16.mxu1 %v13006_v27  ;;  %v4937_v25 = vld [vmem:[%s22087_s3 + $0x650] sm:$0xff]  ;;  %v4930_v27 = vld [vmem:[%s22087_s3 + $0x618] sm:$0xff] }
 0x338   :  { %8027 = vmatmul.mubr.bf16.gmra.mrb[28].mxu0 %v18472_v18  ;;  %8173 = vmatmul.mubr.bf16.gmra.mrb[28].mxu1 %v18472_v18  ;;  %v13100_v30 = vcombine.high %v4929_v24, %v4937_v25  ;;  %v13099_v2 = vcombine.low %v4929_v24, %v4937_v25  ;;  %v13101_v4 = vcombine.low %v4930_v27, %v4938_v28  ;;  %v5018_v24 = vld [vmem:[%s22087_s3 + $0x8d8] sm:$0xff] }
 0x339   :  { %8215 = vmatprep.mubr.bf16.mxu0 %v18280_v52  ;;  %8361 = vmatprep.mubr.bf16.mxu1 %v18280_v52 }
 0x33a   :  { %8196 = vmatpush1.bf16.msra.mxu0 %v13003_v31  ;;  %8342 = vmatpush1.bf16.msra.mxu1 %v13005_v47  ;;  %v13102_v31 = vcombine.high %v4930_v27, %v4938_v28  ;;  %v4945_v47 = vld [vmem:[%s22087_s3 + $0x690] sm:$0xff] }
 0x33b   :  { %8197 = vmatprep.subr.bf16.mxu0 %v13020_v26  ;;  %8343 = vmatprep.subr.bf16.mxu1 %v13022_v32  ;;  %v4953_v26 = vld [vmem:[%s22087_s3 + $0x6d0] sm:$0xff]  ;;  %v4946_v32 = vld [vmem:[%s22087_s3 + $0x698] sm:$0xff] }
 0x33c   :  { %v13116_v34 = vcombine.high %v4945_v47, %v4953_v26  ;;  %v13115_v38 = vcombine.low %v4945_v47, %v4953_v26  ;;  %v13117_v45 = vcombine.low %v4946_v32, %v4954_v0  ;;  %v5034_v47 = vld [vmem:[%s22087_s3 + $0x958] sm:$0xff] }
 0x33e   :  { %8198 = vmatpush1.bf16.msra.mxu0 %v13019_v35  ;;  %8344 = vmatpush1.bf16.msra.mxu1 %v13021_v39  ;;  %v13118_v35 = vcombine.high %v4946_v32, %v4954_v0  ;;  %v4961_v39 = vld [vmem:[%s22087_s3 + $0x710] sm:$0xff] }
 0x33f   :  { %8199 = vmatprep.subr.bf16.mxu0 %v13036_v40  ;;  %8345 = vmatprep.subr.bf16.mxu1 %v13038_v41  ;;  %v4969_v40 = vld [vmem:[%s22087_s3 + $0x750] sm:$0xff]  ;;  %v4962_v41 = vld [vmem:[%s22087_s3 + $0x718] sm:$0xff] }
 0x340   :  { %v13132_v46 = vcombine.high %v4961_v39, %v4969_v40  ;;  %v13131_v56 = vcombine.low %v4961_v39, %v4969_v40  ;;  %v13133_v57 = vcombine.low %v4962_v41, %v4970_v44  ;;  %v5050_v39 = vld [vmem:[%s22087_s3 + $0x9d8] sm:$0xff] }
 0x342   :  { %8200 = vmatpush1.bf16.msra.mxu0 %v13035_v51  ;;  %8346 = vmatpush1.bf16.msra.mxu1 %v13037_v54  ;;  %v13134_v51 = vcombine.high %v4962_v41, %v4970_v44  ;;  %v4977_v54 = vld [vmem:[%s22087_s3 + $0x790] sm:$0xff] }
 0x343   :  { %8201 = vmatprep.subr.bf16.mxu0 %v13052_v55  ;;  %8347 = vmatprep.subr.bf16.mxu1 %v13054_v58  ;;  %v4985_v55 = vld [vmem:[%s22087_s3 + $0x7d0] sm:$0xff]  ;;  %v4978_v58 = vld [vmem:[%s22087_s3 + $0x798] sm:$0xff] }
 0x344   :  { %v13148_v60 = vcombine.high %v4977_v54, %v4985_v55  ;;  %v13147_v8 = vcombine.low %v4977_v54, %v4985_v55  ;;  %v13149_v12 = vcombine.low %v4978_v58, %v4986_v59  ;;  %v5066_v54 = vld [vmem:[%s22087_s3 + $0xa58] sm:$0xff] }
 0x346   :  { %8202 = vmatpush1.bf16.msra.mxu0 %v13051_v61  ;;  %8348 = vmatpush1.bf16.msra.mxu1 %v13053_v62  ;;  %v13150_v61 = vcombine.high %v4978_v58, %v4986_v59  ;;  %v4993_v62 = vld [vmem:[%s22087_s3 + $0x810] sm:$0xff] }
 0x347   :  { %8203 = vmatprep.subr.bf16.mxu0 %v13068_v63  ;;  %8349 = vmatprep.subr.bf16.mxu1 %v13070_v3  ;;  %v5001_v63 = vld [vmem:[%s22087_s3 + $0x850] sm:$0xff]  ;;  %v4994_v3 = vld [vmem:[%s22087_s3 + $0x818] sm:$0xff] }
 0x348   :  { %v13164_v19 = vcombine.high %v4993_v62, %v5001_v63  ;;  %v13163_v25 = vcombine.low %v4993_v62, %v5001_v63  ;;  %v13165_v27 = vcombine.low %v4994_v3, %v5002_v7  ;;  %v5082_v62 = vld [vmem:[%s22087_s3 + $0xad8] sm:$0xff] }
 0x34a   :  { %8204 = vmatpush1.bf16.msra.mxu0 %v13067_v22  ;;  %8350 = vmatpush1.bf16.msra.mxu1 %v13069_v15  ;;  %v13166_v22 = vcombine.high %v4994_v3, %v5002_v7  ;;  %v5009_v15 = vld [vmem:[%s22087_s3 + $0x890] sm:$0xff] }
 0x34b   :  { %8205 = vmatprep.subr.bf16.mxu0 %v13084_v23  ;;  %8351 = vmatprep.subr.bf16.mxu1 %v13086_v16  ;;  %v5017_v23 = vld [vmem:[%s22087_s3 + $0x8d0] sm:$0xff]  ;;  %v5010_v16 = vld [vmem:[%s22087_s3 + $0x898] sm:$0xff] }
 0x34c   :  { %v13180_v28 = vcombine.high %v5009_v15, %v5017_v23  ;;  %v13179_v26 = vcombine.low %v5009_v15, %v5017_v23  ;;  %v13181_v32 = vcombine.low %v5010_v16, %v5018_v24  ;;  %v5098_v15 = vld [vmem:[%s22087_s3 + $0xb58] sm:$0xff] }
 0x34e   :  { %8206 = vmatpush1.bf16.msra.mxu0 %v13083_v29  ;;  %8352 = vmatpush1.bf16.msra.mxu1 %v13085_v20  ;;  %v13182_v29 = vcombine.high %v5010_v16, %v5018_v24  ;;  %v5025_v20 = vld [vmem:[%s22087_s3 + $0x910] sm:$0xff] }
 0x34f   :  { %8207 = vmatprep.subr.bf16.mxu0 %v13100_v30  ;;  %8353 = vmatprep.subr.bf16.mxu1 %v13102_v31  ;;  %v5033_v30 = vld [vmem:[%s22087_s3 + $0x950] sm:$0xff]  ;;  %v5026_v31 = vld [vmem:[%s22087_s3 + $0x918] sm:$0xff] }
 0x350   :  { %v13196_v0 = vcombine.high %v5025_v20, %v5033_v30  ;;  %v13195_v40 = vcombine.low %v5025_v20, %v5033_v30  ;;  %v13197_v41 = vcombine.low %v5026_v31, %v5034_v47  ;;  %v5114_v20 = vld [vmem:[%s22087_s3 + $0xbd8] sm:$0xff] }
 0x352   :  { %8208 = vmatpush1.bf16.msra.mxu0 %v13099_v2  ;;  %8354 = vmatpush1.bf16.msra.mxu1 %v13101_v4  ;;  %v13198_v2 = vcombine.high %v5026_v31, %v5034_v47  ;;  %v5041_v4 = vld [vmem:[%s22087_s3 + $0x990] sm:$0xff] }
 0x353   :  { %8209 = vmatprep.subr.bf16.mxu0 %v13116_v34  ;;  %8355 = vmatprep.subr.bf16.mxu1 %v13118_v35  ;;  %v5049_v34 = vld [vmem:[%s22087_s3 + $0x9d0] sm:$0xff]  ;;  %v5042_v35 = vld [vmem:[%s22087_s3 + $0x998] sm:$0xff] }
 0x354   :  { %v13212_v44 = vcombine.high %v5041_v4, %v5049_v34  ;;  %v13211_v55 = vcombine.low %v5041_v4, %v5049_v34  ;;  %v13213_v58 = vcombine.low %v5042_v35, %v5050_v39  ;;  %v5130_v4 = vld [vmem:[%s22087_s3 + $0xc58] sm:$0xff] }
 0x356   :  { %8210 = vmatpush1.bf16.msra.mxu0 %v13115_v38  ;;  %8356 = vmatpush1.bf16.msra.mxu1 %v13117_v45  ;;  %v13214_v38 = vcombine.high %v5042_v35, %v5050_v39  ;;  %v5057_v45 = vld [vmem:[%s22087_s3 + $0xa10] sm:$0xff] }
 0x357   :  { %8211 = vmatprep.subr.bf16.mxu0 %v13132_v46  ;;  %8357 = vmatprep.subr.bf16.mxu1 %v13134_v51  ;;  %v5065_v46 = vld [vmem:[%s22087_s3 + $0xa50] sm:$0xff]  ;;  %v5058_v51 = vld [vmem:[%s22087_s3 + $0xa18] sm:$0xff] }
 0x358   :  { %v13228_v59 = vcombine.high %v5057_v45, %v5065_v46  ;;  %v13227_v63 = vcombine.low %v5057_v45, %v5065_v46  ;;  %v13229_v3 = vcombine.low %v5058_v51, %v5066_v54  ;;  %v5146_v45 = vld [vmem:[%s22087_s3 + $0xcd8] sm:$0xff] }
 0x35a   :  { %8212 = vmatpush1.bf16.msra.mxu0 %v13131_v56  ;;  %8358 = vmatpush1.bf16.msra.mxu1 %v13133_v57  ;;  %v13230_v56 = vcombine.high %v5058_v51, %v5066_v54  ;;  %v5073_v57 = vld [vmem:[%s22087_s3 + $0xa90] sm:$0xff] }
 0x35b   :  { %8213 = vmatprep.subr.bf16.mxu0 %v13148_v60  ;;  %8359 = vmatprep.subr.bf16.mxu1 %v13150_v61  ;;  %v5081_v60 = vld [vmem:[%s22087_s3 + $0xad0] sm:$0xff]  ;;  %v5074_v61 = vld [vmem:[%s22087_s3 + $0xa98] sm:$0xff] }
 0x35c   :  { %v13244_v7 = vcombine.high %v5073_v57, %v5081_v60  ;;  %v13243_v23 = vcombine.low %v5073_v57, %v5081_v60  ;;  %v13245_v16 = vcombine.low %v5074_v61, %v5082_v62  ;;  %v5162_v57 = vld [vmem:[%s22087_s3 + $0xd58] sm:$0xff] }
 0x35e   :  { %8214 = vmatpush1.bf16.msra.mxu0 %v13147_v8  ;;  %8360 = vmatpush1.bf16.msra.mxu1 %v13149_v12  ;;  %v13246_v8 = vcombine.high %v5074_v61, %v5082_v62  ;;  %v5089_v12 = vld [vmem:[%s22087_s3 + $0xb10] sm:$0xff] }
 0x35f   :  { %8256 = vmatprep.subr.bf16.mxu0 %v13164_v19  ;;  %8402 = vmatprep.subr.bf16.mxu1 %v13166_v22  ;;  %v5097_v19 = vld [vmem:[%s22087_s3 + $0xb50] sm:$0xff]  ;;  %v5090_v22 = vld [vmem:[%s22087_s3 + $0xb18] sm:$0xff] }
 0x360   :  { %v13260_v24 = vcombine.high %v5089_v12, %v5097_v19  ;;  %v13259_v30 = vcombine.low %v5089_v12, %v5097_v19  ;;  %v13261_v31 = vcombine.low %v5090_v22, %v5098_v15  ;;  %v5178_v12 = vld [vmem:[%s22087_s3 + $0xdd8] sm:$0xff] }
 0x361   :  { %8216 = vmatmul.mubr.bf16.vlgmr.msra.gmra.mrb[32].mxu0 %v18274_v49  ;;  %8362 = vmatmul.mubr.bf16.vlgmr.msra.gmra.mrb[32].mxu1 %v18274_v49 }
 0x362   :  { %8225 = vmatprep.mubr.bf16.mxu0 %v18364_v42  ;;  %8257 = vmatpush1.bf16.msra.mxu0 %v13163_v25  ;;  %v13262_v25 = vcombine.high %v5090_v22, %v5098_v15 }
 0x363   :  { %8371 = vmatprep.mubr.bf16.mxu1 %v18364_v42  ;;  %8403 = vmatpush1.bf16.msra.mxu1 %v13165_v27  ;;  %v5105_v27 = vld [vmem:[%s22087_s3 + $0xb90] sm:$0xff] }
 0x364   :  { %8258 = vmatprep.subr.bf16.mxu0 %v13180_v28  ;;  %8404 = vmatprep.subr.bf16.mxu1 %v13182_v29  ;;  %v5113_v28 = vld [vmem:[%s22087_s3 + $0xbd0] sm:$0xff]  ;;  %v5106_v29 = vld [vmem:[%s22087_s3 + $0xb98] sm:$0xff] }
 0x365   :  { %v13276_v47 = vcombine.high %v5105_v27, %v5113_v28  ;;  %v13275_v34 = vcombine.low %v5105_v27, %v5113_v28  ;;  %v13277_v35 = vcombine.low %v5106_v29, %v5114_v20  ;;  %v5194_v27 = vld [vmem:[%s22087_s3 + $0xe58] sm:$0xff] }
 0x366   :  { %8259 = vmatpush1.bf16.msra.mxu0 %v13179_v26  ;;  %v13278_v26 = vcombine.high %v5106_v29, %v5114_v20 }
 0x367   :  { %8405 = vmatpush1.bf16.msra.mxu1 %v13181_v32  ;;  %8260 = vmatprep.subr.bf16.mxu0 %v13196_v0  ;;  %v5121_v32 = vld [vmem:[%s22087_s3 + $0xc10] sm:$0xff] }
 0x368   :  { %8406 = vmatprep.subr.bf16.mxu1 %v13198_v2  ;;  %v5129_v0 = vld [vmem:[%s22087_s3 + $0xc50] sm:$0xff]  ;;  %v5122_v2 = vld [vmem:[%s22087_s3 + $0xc18] sm:$0xff] }
 0x369   :  { %8226 = vmatmul.mubr.bf16.gmra.mrb[36].mxu0 %v18346_v36  ;;  %8372 = vmatmul.mubr.bf16.gmra.mrb[36].mxu1 %v18346_v36  ;;  %v13292_v39 = vcombine.high %v5121_v32, %v5129_v0  ;;  %v13291_v46 = vcombine.low %v5121_v32, %v5129_v0  ;;  %v13293_v51 = vcombine.low %v5122_v2, %v5130_v4  ;;  %v5210_v32 = vld [vmem:[%s22087_s3 + $0xed8] sm:$0xff] }
 0x36a   :  { %8235 = vmatprep.mubr.bf16.mxu0 %v18429_v6  ;;  %8261 = vmatpush1.bf16.msra.mxu0 %v13195_v40  ;;  %v13294_v40 = vcombine.high %v5122_v2, %v5130_v4 }
 0x36b   :  { %8381 = vmatprep.mubr.bf16.mxu1 %v18429_v6  ;;  %8407 = vmatpush1.bf16.msra.mxu1 %v13197_v41  ;;  %v5137_v41 = vld [vmem:[%s22087_s3 + $0xc90] sm:$0xff] }
 0x36c   :  { %8262 = vmatprep.subr.bf16.mxu0 %v13212_v44  ;;  %8408 = vmatprep.subr.bf16.mxu1 %v13214_v38  ;;  %v5145_v44 = vld [vmem:[%s22087_s3 + $0xcd0] sm:$0xff]  ;;  %v5138_v38 = vld [vmem:[%s22087_s3 + $0xc98] sm:$0xff] }
 0x36d   :  { %v13308_v54 = vcombine.high %v5137_v41, %v5145_v44  ;;  %v13307_v60 = vcombine.low %v5137_v41, %v5145_v44  ;;  %v13309_v61 = vcombine.low %v5138_v38, %v5146_v45  ;;  %v5226_v41 = vld [vmem:[%s22087_s3 + $0xf58] sm:$0xff] }
 0x36e   :  { %8263 = vmatpush1.bf16.msra.mxu0 %v13211_v55  ;;  %v13310_v55 = vcombine.high %v5138_v38, %v5146_v45 }
 0x36f   :  { %8409 = vmatpush1.bf16.msra.mxu1 %v13213_v58  ;;  %8264 = vmatprep.subr.bf16.mxu0 %v13228_v59  ;;  %v5153_v58 = vld [vmem:[%s22087_s3 + $0xd10] sm:$0xff] }
 0x370   :  { %8410 = vmatprep.subr.bf16.mxu1 %v13230_v56  ;;  %v5161_v59 = vld [vmem:[%s22087_s3 + $0xd50] sm:$0xff]  ;;  %v5154_v56 = vld [vmem:[%s22087_s3 + $0xd18] sm:$0xff] }
 0x371   :  { %8236 = vmatmul.mubr.bf16.gmra.mrb[40].mxu0 %v18421_v1  ;;  %8382 = vmatmul.mubr.bf16.gmra.mrb[40].mxu1 %v18421_v1  ;;  %v13324_v62 = vcombine.high %v5153_v58, %v5161_v59  ;;  %v13323_v19 = vcombine.low %v5153_v58, %v5161_v59  ;;  %v13325_v22 = vcombine.low %v5154_v56, %v5162_v57  ;;  %v5242_v58 = vld [vmem:[%s22087_s3 + $0xfd8] sm:$0xff] }
 0x372   :  { %8245 = vmatprep.mubr.bf16.mxu0 %v18485_v48  ;;  %8265 = vmatpush1.bf16.msra.mxu0 %v13227_v63  ;;  %v13326_v63 = vcombine.high %v5154_v56, %v5162_v57 }
 0x373   :  { %8391 = vmatprep.mubr.bf16.mxu1 %v18485_v48  ;;  %8411 = vmatpush1.bf16.msra.mxu1 %v13229_v3  ;;  %v5169_v3 = vld [vmem:[%s22087_s3 + $0xd90] sm:$0xff] }
 0x374   :  { %8266 = vmatprep.subr.bf16.mxu0 %v13244_v7  ;;  %8412 = vmatprep.subr.bf16.mxu1 %v13246_v8  ;;  %v5177_v7 = vld [vmem:[%s22087_s3 + $0xdd0] sm:$0xff]  ;;  %v5170_v8 = vld [vmem:[%s22087_s3 + $0xd98] sm:$0xff] }
 0x375   :  { %v13340_v15 = vcombine.high %v5169_v3, %v5177_v7  ;;  %v13339_v28 = vcombine.low %v5169_v3, %v5177_v7  ;;  %v13341_v29 = vcombine.low %v5170_v8, %v5178_v12  ;;  %v4748_v3 = vld [vmem:[%s22087_s3 + $0x68] sm:$0xff] }
 0x376   :  { %8267 = vmatpush1.bf16.msra.mxu0 %v13243_v23  ;;  %v13342_v23 = vcombine.high %v5170_v8, %v5178_v12 }
 0x377   :  { %8413 = vmatpush1.bf16.msra.mxu1 %v13245_v16  ;;  %8268 = vmatprep.subr.bf16.mxu0 %v13260_v24  ;;  %v5185_v16 = vld [vmem:[%s22087_s3 + $0xe10] sm:$0xff] }
 0x378   :  { %8414 = vmatprep.subr.bf16.mxu1 %v13262_v25  ;;  %v5193_v24 = vld [vmem:[%s22087_s3 + $0xe50] sm:$0xff]  ;;  %v5186_v25 = vld [vmem:[%s22087_s3 + $0xe18] sm:$0xff] }
 0x379   :  { %8246 = vmatmul.mubr.bf16.gmra.mrb[44].mxu0 %v18470_v17  ;;  %8392 = vmatmul.mubr.bf16.gmra.mrb[44].mxu1 %v18470_v17  ;;  %v13356_v20 = vcombine.high %v5185_v16, %v5193_v24  ;;  %v13355_v0 = vcombine.low %v5185_v16, %v5193_v24  ;;  %v13357_v2 = vcombine.low %v5186_v25, %v5194_v27  ;;  %v4764_v16 = vld [vmem:[%s22087_s3 + $0xe8] sm:$0xff] }
 0x37a   :  { %8269 = vmatpush1.bf16.msra.mxu0 %v13259_v30  ;;  %8288 = vmatprep.mubr.bf16.mxu0 %v18282_v53  ;;  %v13358_v30 = vcombine.high %v5186_v25, %v5194_v27 }
 0x37b   :  { %8415 = vmatpush1.bf16.msra.mxu1 %v13261_v31  ;;  %8434 = vmatprep.mubr.bf16.mxu1 %v18282_v53  ;;  %v5201_v31 = vld [vmem:[%s22087_s3 + $0xe90] sm:$0xff] }
 0x37c   :  { %8270 = vmatprep.subr.bf16.mxu0 %v13276_v47  ;;  %8416 = vmatprep.subr.bf16.mxu1 %v13278_v26  ;;  %v5209_v47 = vld [vmem:[%s22087_s3 + $0xed0] sm:$0xff]  ;;  %v5202_v26 = vld [vmem:[%s22087_s3 + $0xe98] sm:$0xff] }
 0x37d   :  { %v13372_v4 = vcombine.high %v5201_v31, %v5209_v47  ;;  %v13371_v44 = vcombine.low %v5201_v31, %v5209_v47  ;;  %v13373_v38 = vcombine.low %v5202_v26, %v5210_v32  ;;  %v4780_v31 = vld [vmem:[%s22087_s3 + $0x168] sm:$0xff] }
 0x37e   :  { %8271 = vmatpush1.bf16.msra.mxu0 %v13275_v34  ;;  %v13374_v34 = vcombine.high %v5202_v26, %v5210_v32 }
 0x37f   :  { %8417 = vmatpush1.bf16.msra.mxu1 %v13277_v35  ;;  %8272 = vmatprep.subr.bf16.mxu0 %v13292_v39  ;;  %v5217_v35 = vld [vmem:[%s22087_s3 + $0xf10] sm:$0xff] }
 0x380   :  { %8418 = vmatprep.subr.bf16.mxu1 %v13294_v40  ;;  %v5225_v39 = vld [vmem:[%s22087_s3 + $0xf50] sm:$0xff]  ;;  %v5218_v40 = vld [vmem:[%s22087_s3 + $0xf18] sm:$0xff] }
 0x381   :  { %v13388_v45 = vcombine.high %v5217_v35, %v5225_v39  ;;  %v13387_v59 = vcombine.low %v5217_v35, %v5225_v39  ;;  %v13389_v56 = vcombine.low %v5218_v40, %v5226_v41  ;;  %v4796_v35 = vld [vmem:[%s22087_s3 + $0x1e8] sm:$0xff] }
 0x382   :  { %8273 = vmatpush1.bf16.msra.mxu0 %v13291_v46  ;;  %v13390_v46 = vcombine.high %v5218_v40, %v5226_v41 }
 0x383   :  { %8419 = vmatpush1.bf16.msra.mxu1 %v13293_v51  ;;  %8274 = vmatprep.subr.bf16.mxu0 %v13308_v54  ;;  %v5233_v51 = vld [vmem:[%s22087_s3 + $0xf90] sm:$0xff] }
 0x384   :  { %8420 = vmatprep.subr.bf16.mxu1 %v13310_v55  ;;  %v5241_v54 = vld [vmem:[%s22087_s3 + $0xfd0] sm:$0xff]  ;;  %v5234_v55 = vld [vmem:[%s22087_s3 + $0xf98] sm:$0xff] }
 0x385   :  { %v13404_v57 = vcombine.high %v5233_v51, %v5241_v54  ;;  %v13403_v7 = vcombine.low %v5233_v51, %v5241_v54  ;;  %v13405_v8 = vcombine.low %v5234_v55, %v5242_v58  ;;  %v4812_v51 = vld [vmem:[%s22087_s3 + $0x268] sm:$0xff] }
 0x386   :  { %8275 = vmatpush1.bf16.msra.mxu0 %v13307_v60  ;;  %v13406_v60 = vcombine.high %v5234_v55, %v5242_v58 }
 0x387   :  { %8421 = vmatpush1.bf16.msra.mxu1 %v13309_v61  ;;  %8276 = vmatprep.subr.bf16.mxu0 %v13324_v62  ;;  %v4739_v61 = vld [vmem:[%s22087_s3 + $0x20] sm:$0xff] }
 0x388   :  { %8422 = vmatprep.subr.bf16.mxu1 %v13326_v63  ;;  %v4747_v62 = vld [vmem:[%s22087_s3 + $0x60] sm:$0xff]  ;;  %v4740_v63 = vld [vmem:[%s22087_s3 + $0x28] sm:$0xff] }
 0x389   :  { %v12912_v12 = vcombine.high %v4739_v61, %v4747_v62  ;;  %v12911_v24 = vcombine.low %v4739_v61, %v4747_v62  ;;  %v12913_v25 = vcombine.low %v4740_v63, %v4748_v3  ;;  %v4828_v61 = vld [vmem:[%s22087_s3 + $0x2e8] sm:$0xff] }
 0x38a   :  { %8277 = vmatpush1.bf16.msra.mxu0 %v13323_v19  ;;  %v12914_v19 = vcombine.high %v4740_v63, %v4748_v3 }
 0x38b   :  { %8423 = vmatpush1.bf16.msra.mxu1 %v13325_v22  ;;  %8278 = vmatprep.subr.bf16.mxu0 %v13340_v15  ;;  %v4755_v22 = vld [vmem:[%s22087_s3 + $0xa0] sm:$0xff] }
 0x38c   :  { %8424 = vmatprep.subr.bf16.mxu1 %v13342_v23  ;;  %v4763_v15 = vld [vmem:[%s22087_s3 + $0xe0] sm:$0xff]  ;;  %v4756_v23 = vld [vmem:[%s22087_s3 + $0xa8] sm:$0xff] }
 0x38d   :  { %v12928_v27 = vcombine.high %v4755_v22, %v4763_v15  ;;  %v12927_v47 = vcombine.low %v4755_v22, %v4763_v15  ;;  %v12929_v26 = vcombine.low %v4756_v23, %v4764_v16  ;;  %v4844_v22 = vld [vmem:[%s22087_s3 + $0x368] sm:$0xff] }
 0x38e   :  { %8279 = vmatpush1.bf16.msra.mxu0 %v13339_v28  ;;  %v12930_v28 = vcombine.high %v4756_v23, %v4764_v16 }
 0x38f   :  { %8425 = vmatpush1.bf16.msra.mxu1 %v13341_v29  ;;  %8280 = vmatprep.subr.bf16.mxu0 %v13356_v20  ;;  %v4771_v29 = vld [vmem:[%s22087_s3 + $0x120] sm:$0xff] }
 0x390   :  { %8426 = vmatprep.subr.bf16.mxu1 %v13358_v30  ;;  %v4779_v20 = vld [vmem:[%s22087_s3 + $0x160] sm:$0xff]  ;;  %v4772_v30 = vld [vmem:[%s22087_s3 + $0x128] sm:$0xff] }
 0x391   :  { %v12944_v32 = vcombine.high %v4771_v29, %v4779_v20  ;;  %v12943_v39 = vcombine.low %v4771_v29, %v4779_v20  ;;  %v12945_v40 = vcombine.low %v4772_v30, %v4780_v31  ;;  %v4860_v29 = vld [vmem:[%s22087_s3 + $0x3e8] sm:$0xff] }
 0x392   :  { %8281 = vmatpush1.bf16.msra.mxu0 %v13355_v0  ;;  %v12946_v0 = vcombine.high %v4772_v30, %v4780_v31 }
 0x393   :  { %8427 = vmatpush1.bf16.msra.mxu1 %v13357_v2  ;;  %8282 = vmatprep.subr.bf16.mxu0 %v13372_v4  ;;  %v4787_v2 = vld [vmem:[%s22087_s3 + $0x1a0] sm:$0xff] }
 0x394   :  { %8428 = vmatprep.subr.bf16.mxu1 %v13374_v34  ;;  %v4795_v4 = vld [vmem:[%s22087_s3 + $0x1e0] sm:$0xff]  ;;  %v4788_v34 = vld [vmem:[%s22087_s3 + $0x1a8] sm:$0xff] }
 0x395   :  { %v12960_v41 = vcombine.high %v4787_v2, %v4795_v4  ;;  %v12959_v54 = vcombine.low %v4787_v2, %v4795_v4  ;;  %v12961_v55 = vcombine.low %v4788_v34, %v4796_v35  ;;  %v4876_v2 = vld [vmem:[%s22087_s3 + $0x468] sm:$0xff] }
 0x396   :  { %8283 = vmatpush1.bf16.msra.mxu0 %v13371_v44  ;;  %v12962_v44 = vcombine.high %v4788_v34, %v4796_v35 }
 0x397   :  { %8429 = vmatpush1.bf16.msra.mxu1 %v13373_v38  ;;  %8284 = vmatprep.subr.bf16.mxu0 %v13388_v45  ;;  %v4803_v38 = vld [vmem:[%s22087_s3 + $0x220] sm:$0xff] }
 0x398   :  { %8430 = vmatprep.subr.bf16.mxu1 %v13390_v46  ;;  %v4811_v45 = vld [vmem:[%s22087_s3 + $0x260] sm:$0xff]  ;;  %v4804_v46 = vld [vmem:[%s22087_s3 + $0x228] sm:$0xff] }
 0x399   :  { %v12976_v58 = vcombine.high %v4803_v38, %v4811_v45  ;;  %v12975_v62 = vcombine.low %v4803_v38, %v4811_v45  ;;  %v12977_v63 = vcombine.low %v4804_v46, %v4812_v51  ;;  %v4892_v38 = vld [vmem:[%s22087_s3 + $0x4e8] sm:$0xff] }
 0x39a   :  { %8285 = vmatpush1.bf16.msra.mxu0 %v13387_v59  ;;  %v12978_v59 = vcombine.high %v4804_v46, %v4812_v51 }
 0x39b   :  { %8431 = vmatpush1.bf16.msra.mxu1 %v13389_v56  ;;  %8286 = vmatprep.subr.bf16.mxu0 %v13404_v57  ;;  %v4819_v56 = vld [vmem:[%s22087_s3 + $0x2a0] sm:$0xff] }
 0x39c   :  { %8432 = vmatprep.subr.bf16.mxu1 %v13406_v60  ;;  %v4827_v57 = vld [vmem:[%s22087_s3 + $0x2e0] sm:$0xff]  ;;  %v4820_v60 = vld [vmem:[%s22087_s3 + $0x2a8] sm:$0xff] }
 0x39d   :  { %v12992_v3 = vcombine.high %v4819_v56, %v4827_v57  ;;  %v12991_v15 = vcombine.low %v4819_v56, %v4827_v57  ;;  %v12993_v23 = vcombine.low %v4820_v60, %v4828_v61  ;;  %v4908_v56 = vld [vmem:[%s22087_s3 + $0x568] sm:$0xff] }
 0x39e   :  { %8287 = vmatpush1.bf16.msra.mxu0 %v13403_v7  ;;  %v12994_v7 = vcombine.high %v4820_v60, %v4828_v61 }
 0x39f   :  { %8433 = vmatpush1.bf16.msra.mxu1 %v13405_v8  ;;  %8475 = vmatprep.subr.bf16.mxu0 %v12912_v12  ;;  %v4835_v8 = vld [vmem:[%s22087_s3 + $0x320] sm:$0xff] }
 0x3a0   :  { %8621 = vmatprep.subr.bf16.mxu1 %v12914_v19  ;;  %v4843_v12 = vld [vmem:[%s22087_s3 + $0x360] sm:$0xff]  ;;  %v4836_v19 = vld [vmem:[%s22087_s3 + $0x328] sm:$0xff] }
 0x3a1   :  { %8289 = vmatmul.mubr.bf16.vlgmr.msra.gmra.mrb[32].mxu0 %v18276_v50  ;;  %v13008_v16 = vcombine.high %v4835_v8, %v4843_v12  ;;  %v13007_v20 = vcombine.low %v4835_v8, %v4843_v12  ;;  %v13009_v30 = vcombine.low %v4836_v19, %v4844_v22  ;;  %v4924_v8 = vld [vmem:[%s22087_s3 + $0x5e8] sm:$0xff] }
 0x3a2   :  { %8435 = vmatmul.mubr.bf16.vlgmr.msra.gmra.mrb[32].mxu1 %v18276_v50  ;;  %8298 = vmatprep.mubr.bf16.mxu0 %v18366_v43 }
 0x3a3   :  { %8444 = vmatprep.mubr.bf16.mxu1 %v18366_v43  ;;  %8476 = vmatpush1.bf16.msra.mxu0 %v12911_v24  ;;  %v13010_v24 = vcombine.high %v4836_v19, %v4844_v22 }
 0x3a4   :  { %8622 = vmatpush1.bf16.msra.mxu1 %v12913_v25  ;;  %8477 = vmatprep.subr.bf16.mxu0 %v12928_v27  ;;  %v4851_v25 = vld [vmem:[%s22087_s3 + $0x3a0] sm:$0xff] }
 0x3a5   :  { %8623 = vmatprep.subr.bf16.mxu1 %v12930_v28  ;;  %v4859_v27 = vld [vmem:[%s22087_s3 + $0x3e0] sm:$0xff]  ;;  %v4852_v28 = vld [vmem:[%s22087_s3 + $0x3a8] sm:$0xff] }
 0x3a6   :  { %v13024_v31 = vcombine.high %v4851_v25, %v4859_v27  ;;  %v13023_v4 = vcombine.low %v4851_v25, %v4859_v27  ;;  %v13025_v34 = vcombine.low %v4852_v28, %v4860_v29  ;;  %v4940_v25 = vld [vmem:[%s22087_s3 + $0x668] sm:$0xff] }
 0x3a7   :  { %8478 = vmatpush1.bf16.msra.mxu0 %v12927_v47  ;;  %v13026_v47 = vcombine.high %v4852_v28, %v4860_v29 }
 0x3a8   :  { %8624 = vmatpush1.bf16.msra.mxu1 %v12929_v26  ;;  %8479 = vmatprep.subr.bf16.mxu0 %v12944_v32  ;;  %v4867_v26 = vld [vmem:[%s22087_s3 + $0x420] sm:$0xff] }
 0x3a9   :  { %8299 = vmatmul.mubr.bf16.gmra.mrb[36].mxu0 %v18348_v37  ;;  %8625 = vmatprep.subr.bf16.mxu1 %v12946_v0  ;;  %v4875_v32 = vld [vmem:[%s22087_s3 + $0x460] sm:$0xff]  ;;  %v4868_v0 = vld [vmem:[%s22087_s3 + $0x428] sm:$0xff] }
 0x3aa   :  { %8445 = vmatmul.mubr.bf16.gmra.mrb[36].mxu1 %v18348_v37  ;;  %8308 = vmatprep.mubr.bf16.mxu0 %v18431_v33  ;;  %v13040_v35 = vcombine.high %v4867_v26, %v4875_v32  ;;  %v13039_v45 = vcombine.low %v4867_v26, %v4875_v32  ;;  %v13041_v46 = vcombine.low %v4868_v0, %v4876_v2  ;;  %v4956_v26 = vld [vmem:[%s22087_s3 + $0x6e8] sm:$0xff] }
 0x3ab   :  { %8454 = vmatprep.mubr.bf16.mxu1 %v18431_v33  ;;  %8480 = vmatpush1.bf16.msra.mxu0 %v12943_v39  ;;  %v13042_v39 = vcombine.high %v4868_v0, %v4876_v2 }
 0x3ac   :  { %8626 = vmatpush1.bf16.msra.mxu1 %v12945_v40  ;;  %8481 = vmatprep.subr.bf16.mxu0 %v12960_v41  ;;  %v4883_v40 = vld [vmem:[%s22087_s3 + $0x4a0] sm:$0xff] }
 0x3ad   :  { %8627 = vmatprep.subr.bf16.mxu1 %v12962_v44  ;;  %v4891_v41 = vld [vmem:[%s22087_s3 + $0x4e0] sm:$0xff]  ;;  %v4884_v44 = vld [vmem:[%s22087_s3 + $0x4a8] sm:$0xff] }
 0x3ae   :  { %v13056_v51 = vcombine.high %v4883_v40, %v4891_v41  ;;  %v13055_v57 = vcombine.low %v4883_v40, %v4891_v41  ;;  %v13057_v60 = vcombine.low %v4884_v44, %v4892_v38  ;;  %v4972_v40 = vld [vmem:[%s22087_s3 + $0x768] sm:$0xff] }
 0x3af   :  { %8482 = vmatpush1.bf16.msra.mxu0 %v12959_v54  ;;  %v13058_v54 = vcombine.high %v4884_v44, %v4892_v38 }
 0x3b0   :  { %8628 = vmatpush1.bf16.msra.mxu1 %v12961_v55  ;;  %8483 = vmatprep.subr.bf16.mxu0 %v12976_v58  ;;  %v4899_v55 = vld [vmem:[%s22087_s3 + $0x520] sm:$0xff] }
 0x3b1   :  { %8309 = vmatmul.mubr.bf16.gmra.mrb[40].mxu0 %v18423_v5  ;;  %8629 = vmatprep.subr.bf16.mxu1 %v12978_v59  ;;  %v4907_v58 = vld [vmem:[%s22087_s3 + $0x560] sm:$0xff]  ;;  %v4900_v59 = vld [vmem:[%s22087_s3 + $0x528] sm:$0xff] }
 0x3b2   :  { %8455 = vmatmul.mubr.bf16.gmra.mrb[40].mxu1 %v18423_v5  ;;  %8318 = vmatprep.mubr.bf16.mxu0 %v18487_v21  ;;  %v13072_v61 = vcombine.high %v4899_v55, %v4907_v58  ;;  %v13071_v12 = vcombine.low %v4899_v55, %v4907_v58  ;;  %v13073_v19 = vcombine.low %v4900_v59, %v4908_v56  ;;  %v4988_v55 = vld [vmem:[%s22087_s3 + $0x7e8] sm:$0xff] }
 0x3b3   :  { %8464 = vmatprep.mubr.bf16.mxu1 %v18487_v21  ;;  %8484 = vmatpush1.bf16.msra.mxu0 %v12975_v62  ;;  %v13074_v62 = vcombine.high %v4900_v59, %v4908_v56 }
 0x3b4   :  { %8630 = vmatpush1.bf16.msra.mxu1 %v12977_v63  ;;  %8485 = vmatprep.subr.bf16.mxu0 %v12992_v3  ;;  %v4915_v63 = vld [vmem:[%s22087_s3 + $0x5a0] sm:$0xff] }
 0x3b5   :  { %8631 = vmatprep.subr.bf16.mxu1 %v12994_v7  ;;  %v4923_v3 = vld [vmem:[%s22087_s3 + $0x5e0] sm:$0xff]  ;;  %v4916_v7 = vld [vmem:[%s22087_s3 + $0x5a8] sm:$0xff] }
 0x3b6   :  { %v13088_v22 = vcombine.high %v4915_v63, %v4923_v3  ;;  %v13087_v27 = vcombine.low %v4915_v63, %v4923_v3  ;;  %v13089_v28 = vcombine.low %v4916_v7, %v4924_v8  ;;  %v5004_v63 = vld [vmem:[%s22087_s3 + $0x868] sm:$0xff] }
 0x3b7   :  { %8486 = vmatpush1.bf16.msra.mxu0 %v12991_v15  ;;  %v13090_v15 = vcombine.high %v4916_v7, %v4924_v8 }
 0x3b8   :  { %8632 = vmatpush1.bf16.msra.mxu1 %v12993_v23  ;;  %8487 = vmatprep.subr.bf16.mxu0 %v13008_v16  ;;  %v4931_v23 = vld [vmem:[%s22087_s3 + $0x620] sm:$0xff] }
 0x3b9   :  { %8319 = vmatmul.mubr.bf16.gmra.mrb[44].mxu0 %v18472_v18  ;;  %8633 = vmatprep.subr.bf16.mxu1 %v13010_v24  ;;  %v4939_v16 = vld [vmem:[%s22087_s3 + $0x660] sm:$0xff]  ;;  %v4932_v24 = vld [vmem:[%s22087_s3 + $0x628] sm:$0xff] }
 0x3ba   :  { %8465 = vmatmul.mubr.bf16.gmra.mrb[44].mxu1 %v18472_v18  ;;  %8507 = vmatprep.mubr.bf16.mxu0 %v18280_v52  ;;  %v13104_v29 = vcombine.high %v4931_v23, %v4939_v16  ;;  %v13103_v32 = vcombine.low %v4931_v23, %v4939_v16  ;;  %v13105_v0 = vcombine.low %v4932_v24, %v4940_v25  ;;  %v5020_v23 = vld [vmem:[%s22087_s3 + $0x8e8] sm:$0xff] }
 0x3bb   :  { %8488 = vmatpush1.bf16.msra.mxu0 %v13007_v20  ;;  %8653 = vmatprep.mubr.bf16.mxu1 %v18280_v52  ;;  %v13106_v20 = vcombine.high %v4932_v24, %v4940_v25 }
 0x3bc   :  { %8634 = vmatpush1.bf16.msra.mxu1 %v13009_v30  ;;  %8489 = vmatprep.subr.bf16.mxu0 %v13024_v31  ;;  %v4947_v30 = vld [vmem:[%s22087_s3 + $0x6a0] sm:$0xff] }
 0x3bd   :  { %8635 = vmatprep.subr.bf16.mxu1 %v13026_v47  ;;  %v4955_v31 = vld [vmem:[%s22087_s3 + $0x6e0] sm:$0xff]  ;;  %v4948_v47 = vld [vmem:[%s22087_s3 + $0x6a8] sm:$0xff] }
 0x3be   :  { %v13120_v2 = vcombine.high %v4947_v30, %v4955_v31  ;;  %v13119_v41 = vcombine.low %v4947_v30, %v4955_v31  ;;  %v13121_v44 = vcombine.low %v4948_v47, %v4956_v26  ;;  %v5036_v30 = vld [vmem:[%s22087_s3 + $0x968] sm:$0xff] }
 0x3bf   :  { %8490 = vmatpush1.bf16.msra.mxu0 %v13023_v4  ;;  %v13122_v4 = vcombine.high %v4948_v47, %v4956_v26 }
 0x3c0   :  { %8636 = vmatpush1.bf16.msra.mxu1 %v13025_v34  ;;  %8491 = vmatprep.subr.bf16.mxu0 %v13040_v35  ;;  %v4963_v34 = vld [vmem:[%s22087_s3 + $0x720] sm:$0xff] }
 0x3c1   :  { %8637 = vmatprep.subr.bf16.mxu1 %v13042_v39  ;;  %v4971_v35 = vld [vmem:[%s22087_s3 + $0x760] sm:$0xff]  ;;  %v4964_v39 = vld [vmem:[%s22087_s3 + $0x728] sm:$0xff] }
 0x3c2   :  { %v13136_v38 = vcombine.high %v4963_v34, %v4971_v35  ;;  %v13135_v58 = vcombine.low %v4963_v34, %v4971_v35  ;;  %v13137_v59 = vcombine.low %v4964_v39, %v4972_v40  ;;  %v5052_v34 = vld [vmem:[%s22087_s3 + $0x9e8] sm:$0xff] }
 0x3c3   :  { %8492 = vmatpush1.bf16.msra.mxu0 %v13039_v45  ;;  %v13138_v45 = vcombine.high %v4964_v39, %v4972_v40 }
 0x3c4   :  { %8638 = vmatpush1.bf16.msra.mxu1 %v13041_v46  ;;  %8493 = vmatprep.subr.bf16.mxu0 %v13056_v51  ;;  %v4979_v46 = vld [vmem:[%s22087_s3 + $0x7a0] sm:$0xff] }
 0x3c5   :  { %8639 = vmatprep.subr.bf16.mxu1 %v13058_v54  ;;  %v4987_v51 = vld [vmem:[%s22087_s3 + $0x7e0] sm:$0xff]  ;;  %v4980_v54 = vld [vmem:[%s22087_s3 + $0x7a8] sm:$0xff] }
 0x3c6   :  { %v13152_v56 = vcombine.high %v4979_v46, %v4987_v51  ;;  %v13151_v3 = vcombine.low %v4979_v46, %v4987_v51  ;;  %v13153_v7 = vcombine.low %v4980_v54, %v4988_v55  ;;  %v5068_v46 = vld [vmem:[%s22087_s3 + $0xa68] sm:$0xff] }
 0x3c7   :  { %8494 = vmatpush1.bf16.msra.mxu0 %v13055_v57  ;;  %v13154_v57 = vcombine.high %v4980_v54, %v4988_v55  ;;  %v5247_v54 = vld [vmem:[%s22089_s4] sm:$0xff] }
 0x3c8   :  { %8640 = vmatpush1.bf16.msra.mxu1 %v13057_v60  ;;  %8495 = vmatprep.subr.bf16.mxu0 %v13072_v61  ;;  %v4995_v60 = vld [vmem:[%s22087_s3 + $0x820] sm:$0xff] }
 0x3c9   :  { %8641 = vmatprep.subr.bf16.mxu1 %v13074_v62  ;;  %v5003_v61 = vld [vmem:[%s22087_s3 + $0x860] sm:$0xff]  ;;  %v4996_v62 = vld [vmem:[%s22087_s3 + $0x828] sm:$0xff] }
 0x3ca   :  { %v13168_v8 = vcombine.high %v4995_v60, %v5003_v61  ;;  %v13167_v16 = vcombine.low %v4995_v60, %v5003_v61  ;;  %v13169_v24 = vcombine.low %v4996_v62, %v5004_v63  ;;  %v19289_v55 = vld [vmem:[%s22087_s3 + $0xaa0] sm:$0xff]  ;;  %v19304_v60 = vld [vmem:[%s22087_s3 + $0xae8] sm:$0xff] }
 0x3cb   :  { %8496 = vmatpush1.bf16.msra.mxu0 %v13071_v12  ;;  %v13170_v12 = vcombine.high %v4996_v62, %v5004_v63  ;;  %v19309_v63 = vld [vmem:[%s22087_s3 + $0xb20] sm:$0xff] }
 0x3cc   :  { %8642 = vmatpush1.bf16.msra.mxu1 %v13073_v19  ;;  %8497 = vmatprep.subr.bf16.mxu0 %v13088_v22  ;;  %v5011_v19 = vld [vmem:[%s22087_s3 + $0x8a0] sm:$0xff] }
 0x3cd   :  { %8643 = vmatprep.subr.bf16.mxu1 %v13090_v15  ;;  %v5019_v22 = vld [vmem:[%s22087_s3 + $0x8e0] sm:$0xff]  ;;  %v5012_v15 = vld [vmem:[%s22087_s3 + $0x8a8] sm:$0xff] }
 0x3ce   :  { %v13184_v25 = vcombine.high %v5011_v19, %v5019_v22  ;;  %v13183_v31 = vcombine.low %v5011_v19, %v5019_v22  ;;  %v13185_v47 = vcombine.low %v5012_v15, %v5020_v23  ;;  %v19325_v19 = vrot.slane %v5247_v54, %v18213_v11 }
 0x3cf   :  { %8498 = vmatpush1.bf16.msra.mxu0 %v13087_v27  ;;  %v13186_v27 = vcombine.high %v5012_v15, %v5020_v23  ;;  %v19332_v15 = vld [vmem:[%s22087_s3 + $0xb68] sm:$0xff]  ;;  %v19337_v23 = vld [vmem:[%s22087_s3 + $0xba0] sm:$0xff] }
 0x3d0   :  { %8644 = vmatpush1.bf16.msra.mxu1 %v13089_v28  ;;  %8499 = vmatprep.subr.bf16.mxu0 %v13104_v29  ;;  %v5027_v28 = vld [vmem:[%s22087_s3 + $0x920] sm:$0xff] }
 0x3d1   :  { %8645 = vmatprep.subr.bf16.mxu1 %v13106_v20  ;;  %v5035_v29 = vld [vmem:[%s22087_s3 + $0x960] sm:$0xff]  ;;  %v5028_v20 = vld [vmem:[%s22087_s3 + $0x928] sm:$0xff] }
 0x3d2   :  { %v13200_v26 = vcombine.high %v5027_v28, %v5035_v29  ;;  %v13199_v35 = vcombine.low %v5027_v28, %v5035_v29  ;;  %v13201_v39 = vcombine.low %v5028_v20, %v5036_v30  ;;  %v19357_v29 = vld [vmem:[%s22087_s3 + $0xba8] sm:$0xff] }
 0x3d3   :  { %8500 = vmatpush1.bf16.msra.mxu0 %v13103_v32  ;;  %v13202_v32 = vcombine.high %v5028_v20, %v5036_v30  ;;  %v19362_v20 = vld [vmem:[%s22087_s3 + $0xbe8] sm:$0xff] }
 0x3d4   :  { %8646 = vmatpush1.bf16.msra.mxu1 %v13105_v0  ;;  %8501 = vmatprep.subr.bf16.mxu0 %v13120_v2  ;;  %v5043_v0 = vld [vmem:[%s22087_s3 + $0x9a0] sm:$0xff] }
 0x3d5   :  { %8647 = vmatprep.subr.bf16.mxu1 %v13122_v4  ;;  %v5051_v2 = vld [vmem:[%s22087_s3 + $0x9e0] sm:$0xff]  ;;  %v5044_v4 = vld [vmem:[%s22087_s3 + $0x9a8] sm:$0xff] }
 0x3d6   :  { %v13216_v40 = vcombine.high %v5043_v0, %v5051_v2  ;;  %v13215_v51 = vcombine.low %v5043_v0, %v5051_v2 }
 0x3d7   :  { %8502 = vmatpush1.bf16.msra.mxu0 %v13119_v41  ;;  %v13218_v41 = vcombine.high %v5044_v4, %v5052_v34 }
 0x3d8   :  { %8648 = vmatpush1.bf16.msra.mxu1 %v13121_v44  ;;  %8503 = vmatprep.subr.bf16.mxu0 %v13136_v38  ;;  %v5059_v44 = vld [vmem:[%s22087_s3 + $0xa20] sm:$0xff] }
 0x3d9   :  { %8649 = vmatprep.subr.bf16.mxu1 %v13138_v45  ;;  %v5067_v38 = vld [vmem:[%s22087_s3 + $0xa60] sm:$0xff]  ;;  %v5060_v45 = vld [vmem:[%s22087_s3 + $0xa28] sm:$0xff] }
 0x3da   :  { %v13231_v61 = vcombine.low %v5059_v44, %v5067_v38  ;;  %v13234_v62 = vcombine.high %v5060_v45, %v5068_v46 }
 0x3db   :  { %8504 = vmatpush1.bf16.msra.mxu0 %v13135_v58  ;;  %v19294_v58 = vld [vmem:[%s22087_s3 + $0xae0] sm:$0xff] }
 0x3dc   :  { %8650 = vmatpush1.bf16.msra.mxu1 %v13137_v59  ;;  %8505 = vmatprep.subr.bf16.mxu0 %v13152_v56  ;;  %v13217_v59 = vcombine.low %v5044_v4, %v5052_v34  ;;  %v13232_v56 = vcombine.high %v5059_v44, %v5067_v38  ;;  %v13248_v22 = vcombine.high %v19289_v55, %v19294_v58 }
 0x3dd   :  { %8651 = vmatprep.subr.bf16.mxu1 %v13154_v57  ;;  %v19299_v57 = vld [vmem:[%s22087_s3 + $0xaa8] sm:$0xff] }
 0x3de   :  { %v13249_v28 = vcombine.low %v19299_v57, %v19304_v60  ;;  %v13250_v30 = vcombine.high %v19299_v57, %v19304_v60 }
 0x3df   :  { %8506 = vmatpush1.bf16.msra.mxu0 %v13151_v3  ;;  %v19314_v3 = vld [vmem:[%s22087_s3 + $0xb60] sm:$0xff] }
 0x3e0   :  { %8652 = vmatpush1.bf16.msra.mxu1 %v13153_v7  ;;  %8548 = vmatprep.subr.bf16.mxu0 %v13168_v8  ;;  %v19319_v7 = vld [vmem:[%s22087_s3 + $0xb28] sm:$0xff]  ;;  %v13233_v8 = vcombine.low %v5060_v45, %v5068_v46 }
 0x3e1   :  { %8694 = vmatprep.subr.bf16.mxu1 %v13170_v12  ;;  %v19322_v12 = vrot.slane %v5247_v54, %v18210_v10  ;;  %v13265_v0 = vcombine.low %v19319_v7, %v19332_v15  ;;  %v13266_v2 = vcombine.high %v19319_v7, %v19332_v15 }
 0x3e2   :  { %8508 = vmatmul.mubr.bf16.vlgmr.msra.gmra.mrb[48].mxu0 %v18274_v49 }
 0x3e3   :  { %8654 = vmatmul.mubr.bf16.vlgmr.msra.gmra.mrb[48].mxu1 %v18274_v49  ;;  %8517 = vmatprep.mubr.bf16.mxu0 %v18364_v42 }
 0x3e4   :  { %8549 = vmatpush1.bf16.msra.mxu0 %v13167_v16  ;;  %8663 = vmatprep.mubr.bf16.mxu1 %v18364_v42  ;;  %v19342_v16 = vld [vmem:[%s22087_s3 + $0xbe0] sm:$0xff] }
 0x3e5   :  { %8695 = vmatpush1.bf16.msra.mxu1 %v13169_v24  ;;  %8550 = vmatprep.subr.bf16.mxu0 %v13184_v25  ;;  %v19345_v24 = vrot.slane %v5247_v54, %v18219_v13  ;;  %v19348_v25 = vrot.slane %v5247_v54, %v18222_v14  ;;  %v13280_v4 = vcombine.high %v19337_v23, %v19342_v16 }
 0x3e6   :  { %8696 = vmatprep.subr.bf16.mxu1 %v13186_v27  ;;  %v13247_v27 = vcombine.low %v19289_v55, %v19294_v58 }
 0x3e8   :  { %8551 = vmatpush1.bf16.msra.mxu0 %v13183_v31  ;;  %v13263_v31 = vcombine.low %v19309_v63, %v19314_v3 }
 0x3e9   :  { %8697 = vmatpush1.bf16.msra.mxu1 %v13185_v47  ;;  %8552 = vmatprep.subr.bf16.mxu0 %v13200_v26  ;;  %v13264_v47 = vcombine.high %v19309_v63, %v19314_v3  ;;  %v19373_v26 = vld [vmem:[%s22087_s3 + $0xc20] sm:$0xff] }
 0x3ea   :  { %8518 = vmatmul.mubr.bf16.gmra.mrb[52].mxu0 %v18346_v36  ;;  %8698 = vmatprep.subr.bf16.mxu1 %v13202_v32  ;;  %v19378_v32 = vld [vmem:[%s22087_s3 + $0xc60] sm:$0xff] }
 0x3eb   :  { %8664 = vmatmul.mubr.bf16.gmra.mrb[52].mxu1 %v18346_v36  ;;  %8527 = vmatprep.mubr.bf16.mxu0 %v18429_v6 }
 0x3ec   :  { %8553 = vmatpush1.bf16.msra.mxu0 %v13199_v35  ;;  %8673 = vmatprep.mubr.bf16.mxu1 %v18429_v6  ;;  %v19897_v6 = vld [vmem:[%s22087_s3 + $0x1f8] sm:$0xff] }
 0x3ed   :  { %8699 = vmatpush1.bf16.msra.mxu1 %v13201_v39  ;;  %8554 = vmatprep.subr.bf16.mxu0 %v13216_v40 }
 0x3ee   :  { %8700 = vmatprep.subr.bf16.mxu1 %v13218_v41 }
 0x3f0   :  { %8555 = vmatpush1.bf16.msra.mxu0 %v13215_v51 }
 0x3f1   :  { %8701 = vmatpush1.bf16.msra.mxu1 %v13217_v59  ;;  %8556 = vmatprep.subr.bf16.mxu0 %v13232_v56 }
 0x3f2   :  { %8528 = vmatmul.mubr.bf16.gmra.mrb[56].mxu0 %v18421_v1  ;;  %8702 = vmatprep.subr.bf16.mxu1 %v13234_v62 }
 0x3f3   :  { %8674 = vmatmul.mubr.bf16.gmra.mrb[56].mxu1 %v18421_v1  ;;  %8537 = vmatprep.mubr.bf16.mxu0 %v18485_v48  ;;  %v7998_v34 = vpop.f32.mrb[16].mxu0  ;;  %v8144_v35 = vpop.f32.mrb[16].mxu1 }
 0x3f4   :  { %8557 = vmatpush1.bf16.msra.mxu0 %v13231_v61  ;;  %8683 = vmatprep.mubr.bf16.mxu1 %v18485_v48  ;;  %v14166_v44 = vadd.f32 %v7998_v34, %v19322_v12  ;;  %v14182_v38 = vadd.f32 %v8144_v35, %v19325_v19  ;;  %v8000_v45 = vpop.f32.mrb[17].mxu0  ;;  %v8146_v46 = vpop.f32.mrb[17].mxu1 }
 0x3f5   :  { %8703 = vmatpush1.bf16.msra.mxu1 %v13233_v8  ;;  %v14167_v54 = vadd.f32 %v8000_v45, %v19345_v24  ;;  %v14183_v55 = vadd.f32 %v8146_v46, %v19348_v25  ;;  %8558 = vmatprep.subr.bf16.mxu0 %v13248_v22  ;;  %v8002_v58 = vpop.f32.mrb[18].mxu0  ;;  %v8148_v59 = vpop.f32.mrb[18].mxu1  ;;  %v19409_v8 = vld [vmem:[%s22087_s3 + $0xc28] sm:$0xff] }
 0x3f6   :  { %v9059_v57 = vsub.f32 0.0, %v14166_v44  ;;  %v9061_v60 = vsub.f32 0.0, %v14182_v38  ;;  %8704 = vmatprep.subr.bf16.mxu1 %v13250_v30  ;;  %v14168_v61 = vadd.f32 %v8002_v58, %v19322_v12  ;;  %v14184_v62 = vadd.f32 %v8148_v59, %v19325_v19  ;;  %v8004_v34 = vpop.f32.mrb[19].mxu0  ;;  %v8150_v35 = vpop.f32.mrb[19].mxu1  ;;  %v19416_v30 = vld [vmem:[%s22087_s3 + $0xc68] sm:$0xff]  ;;  %v19421_v44 = vld [vmem:[%s22087_s3 + $0xca0] sm:$0xff] }
 0x3f7   :  { %v9060_v22 = vsub.f32 0.0, %v14167_v54  ;;  %v9062_v45 = vsub.f32 0.0, %v14183_v55  ;;  %v14169_v46 = vadd.f32 %v8004_v34, %v19345_v24  ;;  %v14185_v56 = vadd.f32 %v8150_v35, %v19348_v25  ;;  %v19426_v38 = vld [vmem:[%s22087_s3 + $0xce0] sm:$0xff] }
 0x3f8   :  { %v9187_v54 = vmul.f32 1.442695, %v9059_v57  ;;  %v9191_v55 = vmul.f32 1.442695, %v9061_v60  ;;  %v9075_v58 = vsub.f32 0.0, %v14168_v61  ;;  %v9077_v59 = vsub.f32 0.0, %v14184_v62  ;;  %8559 = vmatpush1.bf16.msra.mxu0 %v13247_v27 }
 0x3f9   :  { %v9189_v34 = vmul.f32 1.442695, %v9060_v22  ;;  %v9193_v35 = vmul.f32 1.442695, %v9062_v45  ;;  %8705 = vmatpush1.bf16.msra.mxu1 %v13249_v28  ;;  %v9076_v51 = vsub.f32 0.0, %v14169_v46  ;;  %v9078_v40 = vsub.f32 0.0, %v14185_v56  ;;  %8560 = vmatprep.subr.bf16.mxu0 %v13264_v47 }
 0x3fa   :  { %15560 = vpow2.f32 %v9187_v54  ;;  %v9219_v39 = vmul.f32 1.442695, %v9075_v58  ;;  %8538 = vmatmul.mubr.bf16.gmra.mrb[60].mxu0 %v18470_v17  ;;  %8706 = vmatprep.subr.bf16.mxu1 %v13266_v2  ;;  %v13297_v41 = vcombine.low %v19409_v8, %v19416_v30  ;;  %v13298_v57 = vcombine.high %v19409_v8, %v19416_v30  ;;  %v19448_v46 = vld [vmem:[%s22087_s3 + $0xca8] sm:$0xff] }
 0x3fb   :  { %15562 = vpow2.f32 %v9191_v55  ;;  %v9223_v60 = vmul.f32 1.442695, %v9077_v59  ;;  %8684 = vmatmul.mubr.bf16.gmra.mrb[60].mxu1 %v18470_v17  ;;  %8580 = vmatprep.mubr.bf16.mxu0 %v18282_v53  ;;  %v8008_v27 = vpop.f32.mrb[20].mxu0  ;;  %v8154_v28 = vpop.f32.mrb[20].mxu1  ;;  %v13312_v2 = vcombine.high %v19421_v44, %v19426_v38  ;;  %v9221_v56 = vmul.f32 1.442695, %v9076_v51 }
 0x3fc   :  { %15564 = vpow2.f32 %v9189_v34  ;;  %8561 = vmatpush1.bf16.msra.mxu0 %v13263_v31  ;;  %8726 = vmatprep.mubr.bf16.mxu1 %v18282_v53  ;;  %v14170_v61 = vadd.f32 %v8008_v27, %v19322_v12  ;;  %v14186_v62 = vadd.f32 %v8154_v28, %v19325_v19  ;;  %v8010_v22 = vpop.f32.mrb[21].mxu0  ;;  %v8156_v45 = vpop.f32.mrb[21].mxu1  ;;  %v19453_v51 = vld [vmem:[%s22087_s3 + $0xce8] sm:$0xff]  ;;  %v9225_v63 = vmul.f32 1.442695, %v9078_v40  ;;  %v19472_v34 = vld [vmem:[%s22087_s3 + $0xd20] sm:$0xff] }
 0x3fd   :  { %15566 = vpow2.f32 %v9193_v35  ;;  %8707 = vmatpush1.bf16.msra.mxu1 %v13265_v0  ;;  %v14171_v3 = vadd.f32 %v8010_v22, %v19345_v24  ;;  %v14187_v31 = vadd.f32 %v8156_v45, %v19348_v25  ;;  %8562 = vmatprep.subr.bf16.mxu0 %v13280_v4  ;;  %v8012_v54 = vpop.f32.mrb[22].mxu0  ;;  %v8158_v55 = vpop.f32.mrb[22].mxu1  ;;  %v22158_v40 = vcombine.high %v19357_v29, %v19362_v20  ;;  %v19477_v4 = vld [vmem:[%s22087_s3 + $0xd60] sm:$0xff]  ;;  %v19484_v28 = vld [vmem:[%s22087_s3 + $0xd28] sm:$0xff] }
 0x3fe   :  { %15568 = vpow2.f32 %v9219_v39  ;;  %v9091_v58 = vsub.f32 0.0, %v14170_v61  ;;  %v9093_v59 = vsub.f32 0.0, %v14186_v62  ;;  %v14172_v7 = vadd.f32 %v8012_v54, %v19322_v12  ;;  %v8014_v15 = vpop.f32.mrb[23].mxu0  ;;  %v19467_v0 = vpop.f32.mrb[23].mxu1  ;;  %v19489_v61 = vld [vmem:[%s22087_s3 + $0xd68] sm:$0xff]  ;;  %v19494_v62 = vld [vmem:[%s22087_s3 + $0xda0] sm:$0xff] }
 0x3ff   :  { %8708 = vmatprep.subr.bf16.mxu1 %v22158_v40  ;;  %15570 = vpow2.f32 %v9223_v60  ;;  %v9092_v39 = vsub.f32 0.0, %v14171_v3  ;;  %v9094_v35 = vsub.f32 0.0, %v14187_v31  ;;  %v22159_v3 = vcombine.low %v19337_v23, %v19342_v16  ;;  %v19502_v31 = vld [vmem:[%s22087_s3 + $0xde0] sm:$0xff]  ;;  %v19515_v16 = vld [vmem:[%s22087_s3 + $0xda8] sm:$0xff] }
 0x400   :  { %15572 = vpow2.f32 %v9221_v56  ;;  %v9251_v60 = vmul.f32 1.442695, %v9091_v58  ;;  %v9255_v22 = vmul.f32 1.442695, %v9093_v59  ;;  %v9107_v45 = vsub.f32 0.0, %v14172_v7  ;;  %v19529_v59 = vld [vmem:[%s22087_s3 + $0xe20] sm:$0xff] }
 0x401   :  { %8563 = vmatpush1.bf16.msra.mxu0 %v22159_v3  ;;  %15574 = vpow2.f32 %v9225_v63  ;;  %v9253_v54 = vmul.f32 1.442695, %v9092_v39  ;;  %v9257_v40 = vmul.f32 1.442695, %v9094_v35  ;;  %v22160_v27 = vcombine.low %v19357_v29, %v19362_v20  ;;  %v19520_v63 = vld [vmem:[%s22087_s3 + $0xde8] sm:$0xff]  ;;  %v19534_v7 = vld [vmem:[%s22087_s3 + $0xe60] sm:$0xff] }
 0x402   :  { %v22161_v56 = vcombine.high %v19373_v26, %v19378_v32  ;;  %v13314_v23 = vcombine.high %v19448_v46, %v19453_v51  ;;  %15576 = vpow2.f32 %v9251_v60  ;;  %v9283_v29 = vmul.f32 1.442695, %v9107_v45 }
 0x403   :  { %8709 = vmatpush1.bf16.msra.mxu1 %v22160_v27  ;;  %v13328_v58 = vcombine.high %v19472_v34, %v19477_v4  ;;  %15578 = vpow2.f32 %v9255_v22  ;;  %v19536_v39 = vpop.f32.mrb[24].mxu0  ;;  %v13330_v27 = vcombine.high %v19484_v28, %v19489_v61  ;;  %v19547_v3 = vadd.f32 %v8158_v55, %v19325_v19 }
 0x404   :  { %8564 = vmatprep.subr.bf16.mxu0 %v22161_v56  ;;  %8710 = vmatprep.subr.bf16.mxu1 %v13298_v57  ;;  %v19538_v57 = vpop.f32.mrb[24].mxu1  ;;  %v15561_v45 = vpop.eup %15560  ;;  %15580 = vpow2.f32 %v9253_v54  ;;  %v22162_v22 = vcombine.low %v19373_v26, %v19378_v32  ;;  %v19563_v54 = vld [vmem:[%s22087_s3 + $0xe28] sm:$0xff]  ;;  %v22163_v11 = vcombine.low %v19421_v44, %v19426_v38  ;;  %v14189_v53 = vadd.f32 %v19467_v0, %v19348_v25 }
 0x405   :  { %v19552_v56 = vpop.f32.mrb[25].mxu0  ;;  %v19554_v20 = vpop.f32.mrb[25].mxu1  ;;  %v19568_v26 = vld [vmem:[%s22087_s3 + $0xe68] sm:$0xff]  ;;  %v9443_v55 = vadd.f32 1.0, %v15561_v45  ;;  %15582 = vpow2.f32 %v9257_v40  ;;  %v19587_v40 = vld [vmem:[%s22087_s3 + $0xea0] sm:$0xff]  ;;  %v22164_v17 = vcombine.low %v19448_v46, %v19453_v51  ;;  %v14174_v0 = vadd.f32 %v19536_v39, %v19322_v12 }
 0x406   :  { %8565 = vmatpush1.bf16.msra.mxu0 %v22162_v22  ;;  %v15563_v32 = vpop.eup %15562  ;;  %v19576_v22 = vpop.f32.mrb[26].mxu0  ;;  %15584 = vpow2.f32 %v9283_v29 }
 0x407   :  { %8711 = vmatpush1.bf16.msra.mxu1 %v13297_v41  ;;  %8566 = vmatprep.subr.bf16.mxu0 %v13312_v2  ;;  %v19578_v47 = vpop.f32.mrb[26].mxu1  ;;  %v19592_v41 = vld [vmem:[%s22087_s3 + $0xee0] sm:$0xff]  ;;  %v15565_v8 = vpop.eup %15564  ;;  %v9445_v30 = vadd.f32 1.0, %v15563_v32  ;;  %v14173_v2 = vadd.f32 %v8014_v15, %v19345_v24  ;;  %15586 = vrcp.f32 %v9443_v55  ;;  %v19608_v15 = vld [vmem:[%s22087_s3 + $0xea8] sm:$0xff] }
 0x408   :  { %8712 = vmatprep.subr.bf16.mxu1 %v13314_v23  ;;  %v19595_v45 = vpop.f32.mrb[27].mxu0  ;;  %v15567_v35 = vpop.eup %15566  ;;  %v9444_v14 = vadd.f32 1.0, %v15565_v8  ;;  %v19613_v23 = vld [vmem:[%s22087_s3 + $0xee8] sm:$0xff]  ;;  %v9109_v8 = vsub.f32 0.0, %v19547_v3  ;;  %v13376_v60 = vcombine.high %v19587_v40, %v19592_v41 }
 0x409   :  { %v19599_v13 = vpop.f32.mrb[27].mxu1  ;;  %v15569_v29 = vpop.eup %15568  ;;  %15588 = vrcp.f32 %v9445_v30  ;;  %v9446_v55 = vadd.f32 1.0, %v15567_v35  ;;  %v9108_v44 = vsub.f32 0.0, %v14173_v2 }
 0x40a   :  { %8567 = vmatpush1.bf16.msra.mxu0 %v22163_v11  ;;  %v15571_v32 = vpop.eup %15570  ;;  %15590 = vrcp.f32 %v9444_v14  ;;  %v9459_v10 = vadd.f32 1.0, %v15569_v29  ;;  %v9287_v2 = vmul.f32 1.442695, %v9109_v8  ;;  %v9110_v14 = vsub.f32 0.0, %v14189_v53 }
 0x40b   :  { %8713 = vmatpush1.bf16.msra.mxu1 %v22164_v17  ;;  %8568 = vmatprep.subr.bf16.mxu0 %v13328_v58  ;;  %v15573_v3 = vpop.eup %15572  ;;  %15592 = vrcp.f32 %v9446_v55  ;;  %v9461_v11 = vadd.f32 1.0, %v15571_v32  ;;  %v8028_v46 = vpop.f32.mrb[28].mxu0  ;;  %v22166_v8 = vcombine.low %v19484_v28, %v19489_v61  ;;  %v14191_v53 = vadd.f32 %v19554_v20, %v19348_v25 }
 0x40c   :  { %8714 = vmatprep.subr.bf16.mxu1 %v13330_v27  ;;  %v15575_v38 = vpop.eup %15574  ;;  %15594 = vrcp.f32 %v9459_v10  ;;  %v9460_v30 = vadd.f32 1.0, %v15573_v3  ;;  %v19632_v17 = vpop.f32.mrb[28].mxu1  ;;  %v14190_v27 = vadd.f32 %v19538_v57, %v19325_v19  ;;  %v22165_v10 = vcombine.low %v19472_v34, %v19477_v4 }
 0x40d   :  { %v15577_v58 = vpop.eup %15576  ;;  %15596 = vrcp.f32 %v9461_v11  ;;  %v9462_v32 = vadd.f32 1.0, %v15575_v38  ;;  %v19641_v29 = vpop.f32.mrb[29].mxu0  ;;  %v14175_v11 = vadd.f32 %v19552_v56, %v19345_v24  ;;  %v22167_v57 = vcombine.high %v19494_v62, %v19502_v31 }
 0x40e   :  { %8569 = vmatpush1.bf16.msra.mxu0 %v22165_v10  ;;  %v19643_v39 = vpop.f32.mrb[29].mxu1  ;;  %v15579_v55 = vpop.eup %15578  ;;  %15598 = vrcp.f32 %v9460_v30  ;;  %v9475_v3 = vadd.f32 1.0, %v15577_v58  ;;  %v9285_v58 = vmul.f32 1.442695, %v9108_v44  ;;  %v22168_v56 = vcombine.high %v19515_v16, %v19520_v63 }
 0x40f   :  { %8715 = vmatpush1.bf16.msra.mxu1 %v22166_v8  ;;  %8570 = vmatprep.subr.bf16.mxu0 %v22167_v57  ;;  %v19653_v34 = vpop.f32.mrb[30].mxu0  ;;  %v19655_v4 = vpop.f32.mrb[30].mxu1  ;;  %15600 = vrcp.f32 %v9462_v32  ;;  %v9477_v30 = vadd.f32 1.0, %v15579_v55  ;;  %v9123_v57 = vsub.f32 0.0, %v14174_v0  ;;  %v14176_v32 = vadd.f32 %v19576_v22, %v19322_v12 }
 0x410   :  { %v15581_v38 = vpop.eup %15580  ;;  %8716 = vmatprep.subr.bf16.mxu1 %v22168_v56  ;;  %v19662_v28 = vpop.f32.mrb[31].mxu0  ;;  %15602 = vrcp.f32 %v9475_v3  ;;  %v9125_v35 = vsub.f32 0.0, %v14190_v27  ;;  %v14192_v20 = vadd.f32 %v19578_v47, %v19325_v19  ;;  %v22169_v56 = vcombine.low %v19494_v62, %v19502_v31 }
 0x411   :  { %v19664_v61 = vpop.f32.mrb[31].mxu1  ;;  %v15583_v10 = vpop.eup %15582  ;;  %v9476_v8 = vadd.f32 1.0, %v15581_v38  ;;  %15604 = vrcp.f32 %v9477_v30  ;;  %v9124_v38 = vsub.f32 0.0, %v14175_v11  ;;  %v14177_v0 = vadd.f32 %v19595_v45, %v19345_v24 }
 0x412   :  { %v15585_v55 = vpop.eup %15584  ;;  %v9478_v44 = vadd.f32 1.0, %v15583_v10  ;;  %8571 = vmatpush1.bf16.msra.mxu0 %v22169_v56  ;;  %v22170_v22 = vcombine.low %v19515_v16, %v19520_v63  ;;  %v22171_v27 = vcombine.high %v19529_v59, %v19534_v7  ;;  %v9289_v62 = vmul.f32 1.442695, %v9110_v14  ;;  %v19693_v16 = vld [vmem:[%s22087_s3 + $0xf20] sm:$0xff]  ;;  %v19706_v10 = vld [vmem:[%s22087_s3 + $0xf28] sm:$0xff] }
 0x413   :  { %v19673_v51 = vpop.eup %15586  ;;  %15606 = vrcp.f32 %v9476_v8  ;;  %v9491_v3 = vadd.f32 1.0, %v15585_v55  ;;  %v9126_v31 = vsub.f32 0.0, %v14191_v53  ;;  %v14193_v30 = vadd.f32 %v19599_v13, %v19348_v25  ;;  %v19698_v63 = vld [vmem:[%s22087_s3 + $0xf60] sm:$0xff]  ;;  %v19711_v8 = vld [vmem:[%s22087_s3 + $0xf68] sm:$0xff] }
 0x414   :  { %8717 = vmatpush1.bf16.msra.mxu1 %v22170_v22  ;;  %8572 = vmatprep.subr.bf16.mxu0 %v22171_v27  ;;  %v19683_v47 = vpop.eup %15588  ;;  %15608 = vrcp.f32 %v9478_v44  ;;  %v22172_v11 = vcombine.high %v19563_v54, %v19568_v26  ;;  %v9315_v14 = vmul.f32 1.442695, %v9123_v57  ;;  %v9139_v53 = vsub.f32 0.0, %v14176_v32 }
 0x415   :  { %v19700_v45 = vpop.eup %15590  ;;  %15610 = vrcp.f32 %v9491_v3  ;;  %v14178_v13 = vadd.f32 %v8028_v46, %v19322_v12  ;;  %v9319_v44 = vmul.f32 1.442695, %v9125_v35  ;;  %v9141_v56 = vsub.f32 0.0, %v14192_v20 }
 0x416   :  { %8718 = vmatprep.subr.bf16.mxu1 %v22172_v11  ;;  %v19713_v55 = vpop.eup %15592  ;;  %15612 = vpow2.f32 %v9287_v2  ;;  %v14194_v57 = vadd.f32 %v19632_v17, %v19325_v19  ;;  %v22173_v46 = vcombine.low %v19529_v59, %v19534_v7  ;;  %v9317_v3 = vmul.f32 1.442695, %v9124_v38 }
 0x417   :  { %v19720_v32 = vpop.eup %15594  ;;  %15614 = vpow2.f32 %v9285_v58  ;;  %v9140_v22 = vsub.f32 0.0, %v14177_v0  ;;  %v22174_v27 = vcombine.low %v19563_v54, %v19568_v26  ;;  %v13392_v35 = vcombine.high %v19693_v16, %v19698_v63  ;;  %v19740_v26 = vld [vmem:[%s22087_s3 + $0xfa0] sm:$0xff]  ;;  %v19752_v0 = vld [vmem:[%s22087_s3 + $0xfa8] sm:$0xff] }
 0x418   :  { %8573 = vmatpush1.bf16.msra.mxu0 %v22173_v46  ;;  %v19730_v17 = vpop.eup %15596  ;;  %15616 = vpow2.f32 %v9289_v62  ;;  %v9321_v59 = vmul.f32 1.442695, %v9126_v31  ;;  %v9142_v7 = vsub.f32 0.0, %v14193_v30  ;;  %v22175_v2 = vcombine.high %v19608_v15, %v19613_v23  ;;  %v19757_v62 = vld [vmem:[%s22087_s3 + $0xfe8] sm:$0xff]  ;;  %v19774_v46 = vld [vmem:[%s22087_s3 + $0x70] sm:$0xff] }
 0x419   :  { %8719 = vmatpush1.bf16.msra.mxu1 %v22174_v27  ;;  %8574 = vmatprep.subr.bf16.mxu0 %v13376_v60  ;;  %v13394_v54 = vcombine.high %v19706_v10, %v19711_v8  ;;  %v19745_v60 = vld [vmem:[%s22087_s3 + $0xfe0] sm:$0xff]  ;;  %v19747_v58 = vpop.eup %15598  ;;  %15618 = vpow2.f32 %v9315_v14  ;;  %v9347_v20 = vmul.f32 1.442695, %v9139_v53  ;;  %v9155_v38 = vsub.f32 0.0, %v14178_v13  ;;  %v19769_v13 = vld [vmem:[%s22087_s3 + $0x30] sm:$0xff]  ;;  %v19814_v27 = vld [vmem:[%s22087_s3 + $0xb8] sm:$0xff] }
 0x41a   :  { %8720 = vmatprep.subr.bf16.mxu1 %v22175_v2  ;;  %v19759_v31 = vpop.eup %15600  ;;  %15620 = vpow2.f32 %v9319_v44  ;;  %v9351_v30 = vmul.f32 1.442695, %v9141_v56  ;;  %v9157_v11 = vsub.f32 0.0, %v14194_v57  ;;  %v22176_v14 = vcombine.low %v19587_v40, %v19592_v41  ;;  %v19793_v57 = vld [vmem:[%s22087_s3 + $0x78] sm:$0xff] }
 0x41b   :  { %v13391_v53 = vcombine.low %v19693_v16, %v19698_v63  ;;  %v19776_v44 = vpop.eup %15602  ;;  %15622 = vpow2.f32 %v9317_v3  ;;  %v9349_v56 = vmul.f32 1.442695, %v9140_v22  ;;  %v22177_v40 = vcombine.low %v19608_v15, %v19613_v23  ;;  %v19788_v63 = vld [vmem:[%s22087_s3 + $0x38] sm:$0xff]  ;;  %v19809_v22 = vld [vmem:[%s22087_s3 + $0xf0] sm:$0xff] }
 0x41c   :  { %8575 = vmatpush1.bf16.msra.mxu0 %v22176_v14  ;;  %v13393_v41 = vcombine.low %v19706_v10, %v19711_v8  ;;  %v13408_v16 = vcombine.high %v19740_v26, %v19745_v60  ;;  %v19795_v3 = vpop.eup %15604  ;;  %15624 = vpow2.f32 %v9321_v59  ;;  %v9353_v15 = vmul.f32 1.442695, %v9142_v7  ;;  %v19804_v8 = vld [vmem:[%s22087_s3 + $0xb0] sm:$0xff] }
 0x41d   :  { %8721 = vmatpush1.bf16.msra.mxu1 %v22177_v40  ;;  %8576 = vmatprep.subr.bf16.mxu0 %v13392_v35  ;;  %v13407_v23 = vcombine.low %v19740_v26, %v19745_v60  ;;  %v13410_v10 = vcombine.high %v19752_v0, %v19757_v62  ;;  %v19816_v35 = vpop.eup %15606  ;;  %15626 = vpow2.f32 %v9347_v20  ;;  %v9379_v59 = vmul.f32 1.442695, %v9155_v38  ;;  %v19830_v26 = vld [vmem:[%s22087_s3 + $0x130] sm:$0xff] }
 0x41e   :  { %8722 = vmatprep.subr.bf16.mxu1 %v13394_v54  ;;  %v13409_v7 = vcombine.low %v19752_v0, %v19757_v62  ;;  %v12916_v2 = vcombine.high %v19769_v13, %v19774_v46  ;;  %v19825_v54 = vld [vmem:[%s22087_s3 + $0xf8] sm:$0xff]  ;;  %v19835_v60 = vld [vmem:[%s22087_s3 + $0x170] sm:$0xff]  ;;  %v19837_v20 = vpop.eup %15608  ;;  %15628 = vpow2.f32 %v9351_v30  ;;  %v9383_v38 = vmul.f32 1.442695, %v9157_v11 }
 0x41f   :  { %v19843_v14 = vpop.eup %15610  ;;  %15630 = vpow2.f32 %v9349_v56  ;;  %v12918_v40 = vcombine.high %v19788_v63, %v19793_v57  ;;  %v12932_v30 = vcombine.high %v19804_v8, %v19809_v22  ;;  %v19854_v11 = vld [vmem:[%s22087_s3 + $0x138] sm:$0xff]  ;;  %v19869_v1 = vadd.f32 %v19641_v29, %v19345_v24 }
 0x420   :  { %8577 = vmatpush1.bf16.msra.mxu0 %v13391_v53  ;;  %v19859_v53 = vld [vmem:[%s22087_s3 + $0x178] sm:$0xff]  ;;  %v15613_v56 = vpop.eup %15612  ;;  %15632 = vpow2.f32 %v9353_v15  ;;  %v19885_v29 = vadd.f32 %v19643_v39, %v19348_v25  ;;  %v19901_v39 = vadd.f32 %v19653_v34, %v19322_v12 }
 0x421   :  { %8723 = vmatpush1.bf16.msra.mxu1 %v13393_v41  ;;  %8578 = vmatprep.subr.bf16.mxu0 %v13408_v16  ;;  %v12934_v16 = vcombine.high %v19814_v27, %v19825_v54  ;;  %v15615_v62 = vpop.eup %15614  ;;  %v9493_v0 = vadd.f32 1.0, %v15613_v56  ;;  %15634 = vpow2.f32 %v9379_v59  ;;  %v19881_v41 = vld [vmem:[%s22087_s3 + $0x1f0] sm:$0xff]  ;;  %v19892_v15 = vld [vmem:[%s22087_s3 + $0x1b8] sm:$0xff]  ;;  %v9156_v12 = vsub.f32 0.0, %v19869_v1 }
 0x422   :  { %8724 = vmatprep.subr.bf16.mxu1 %v13410_v10  ;;  %v19876_v10 = vld [vmem:[%s22087_s3 + $0x1b0] sm:$0xff]  ;;  %v15617_v48 = vpop.eup %15616  ;;  %v9492_v56 = vadd.f32 1.0, %v15615_v62  ;;  %15636 = vpow2.f32 %v9383_v38  ;;  %v12966_v34 = vcombine.high %v19892_v15, %v19897_v6 }
 0x423   :  { %v15619_v62 = vpop.eup %15618  ;;  %15638 = vrcp.f32 %v9493_v0  ;;  %v9494_v38 = vadd.f32 1.0, %v15617_v48  ;;  %v12963_v9 = vcombine.low %v19876_v10, %v19881_v41  ;;  %v12964_v0 = vcombine.high %v19876_v10, %v19881_v41  ;;  %v16082_v10 = vld [vmem:[%s22086_s0 + $0x88] sm:$0xff] }
 0x424   :  { %8579 = vmatpush1.bf16.msra.mxu0 %v13407_v23  ;;  %v12950_v23 = vcombine.high %v19854_v11, %v19859_v53  ;;  %v15621_v59 = vpop.eup %15620  ;;  %15640 = vrcp.f32 %v9492_v56  ;;  %v9507_v36 = vadd.f32 1.0, %v15619_v62  ;;  %v13692_v56 = vpack.c.bf16 %v19700_v45, %v19673_v51 }
 0x425   :  { %8725 = vmatpush1.bf16.msra.mxu1 %v13409_v7  ;;  %8767 = vmatprep.subr.bf16.mxu0 %v12916_v2  ;;  %v15623_v48 = vpop.eup %15622  ;;  %15642 = vrcp.f32 %v9494_v38  ;;  %v9509_v42 = vadd.f32 1.0, %v15621_v59  ;;  %v9171_v62 = vsub.f32 0.0, %v19901_v39  ;;  %v14196_v38 = vadd.f32 %v19655_v4, %v19325_v19 }
 0x426   :  { %8913 = vmatprep.subr.bf16.mxu1 %v12918_v40  ;;  %v15625_v7 = vpop.eup %15624  ;;  %15644 = vrcp.f32 %v9507_v36  ;;  %v9508_v2 = vadd.f32 1.0, %v15623_v48  ;;  %v9158_v40 = vsub.f32 0.0, %v19885_v29  ;;  %v22178_v36 = vcombine.low %v19769_v13, %v19774_v46 }
 0x427   :  { %8581 = vmatmul.mubr.bf16.vlgmr.msra.gmra.mrb[48].mxu0 %v18276_v50  ;;  %v15627_v59 = vpop.eup %15626  ;;  %15646 = vrcp.f32 %v9509_v42  ;;  %v9510_v1 = vadd.f32 1.0, %v15625_v7  ;;  %v14181_v51 = vadd.f32 %v19662_v28, %v19345_v24  ;;  %v22179_v42 = vcombine.low %v19788_v63, %v19793_v57  ;;  %v16076_v28 = vld [vmem:[%s22086_s0] sm:$0xff] }
 0x428   :  { %8727 = vmatmul.mubr.bf16.vlgmr.msra.gmra.mrb[48].mxu1 %v18276_v50  ;;  %8590 = vmatprep.mubr.bf16.mxu0 %v18366_v43  ;;  %v15629_v29 = vpop.eup %15628  ;;  %15648 = vrcp.f32 %v9508_v2  ;;  %v9523_v48 = vadd.f32 1.0, %v15627_v59  ;;  %v13700_v19 = vpack.c.bf16 %v19747_v58, %v19720_v32  ;;  %v14197_v13 = vadd.f32 %v19664_v61, %v19348_v25  ;;  %v16077_v32 = vld [vmem:[%s22086_s0 + $0x40] sm:$0xff]  ;;  %v19985_v59 = vld [vmem:[%s22087_s3 + $0x278] sm:$0xff] }
 0x429   :  { %8736 = vmatprep.mubr.bf16.mxu1 %v18366_v43  ;;  %8768 = vmatpush1.bf16.msra.mxu0 %v22178_v36  ;;  %v15631_v4 = vpop.eup %15630  ;;  %15650 = vrcp.f32 %v9510_v1  ;;  %v9525_v45 = vadd.f32 1.0, %v15629_v29  ;;  %v13693_v46 = vpack.c.bf16 %v19713_v55, %v19683_v47  ;;  %v19939_v63 = vmul.bf16 %v16076_v28, %v13692_v56  ;;  %v20579_v1 = vld [vmem:[%s22087_s3 + $0xd30] sm:$0xff] }
 0x42a   :  { %8914 = vmatpush1.bf16.msra.mxu1 %v22179_v42  ;;  %8769 = vmatprep.subr.bf16.mxu0 %v12932_v30  ;;  %v15633_v39 = vpop.eup %15632  ;;  %15652 = vrcp.f32 %v9523_v48  ;;  %v9524_v24 = vadd.f32 1.0, %v15631_v4  ;;  %v19944_v58 = vmul.bf16 %v16077_v32, %v13700_v19  ;;  %v9381_v47 = vmul.f32 1.442695, %v9156_v12  ;;  %v19962_v12 = vld [vmem:[%s22087_s3 + $0x230] sm:$0xff] }
 0x42b   :  { %8915 = vmatprep.subr.bf16.mxu1 %v12934_v16  ;;  %v19946_v25 = vpop.eup %15634  ;;  %15654 = vrcp.f32 %v9525_v45  ;;  %v9526_v61 = vadd.f32 1.0, %v15633_v39  ;;  %v9173_v55 = vsub.f32 0.0, %v14196_v38  ;;  %v22180_v57 = vcombine.low %v19804_v8, %v19809_v22  ;;  %v20591_v8 = vld [vmem:[%s22087_s3 + $0xd70] sm:$0xff] }
 0x42c   :  { %v19951_v30 = vpop.eup %15636  ;;  %15656 = vrcp.f32 %v9524_v24  ;;  %v9385_v16 = vmul.f32 1.442695, %v9158_v40  ;;  %v9172_v7 = vsub.f32 0.0, %v14181_v51  ;;  %v22181_v2 = vcombine.low %v19814_v27, %v19825_v54  ;;  %v19975_v27 = vld [vmem:[%s22087_s3 + $0x270] sm:$0xff]  ;;  %v19980_v54 = vld [vmem:[%s22087_s3 + $0x238] sm:$0xff]  ;;  %v16080_v24 = vld [vmem:[%s22086_s0 + $0xc0] sm:$0xff] }
 0x42d   :  { %8770 = vmatpush1.bf16.msra.mxu0 %v22180_v57  ;;  %v22182_v56 = vcombine.high %v19830_v26, %v19835_v60  ;;  %v19966_v22 = vpop.eup %15638  ;;  %15658 = vrcp.f32 %v9526_v61  ;;  %v9174_v40 = vsub.f32 0.0, %v14197_v13  ;;  %v9411_v36 = vmul.f32 1.442695, %v9171_v62 }
 0x42e   :  { %8916 = vmatpush1.bf16.msra.mxu1 %v22181_v2  ;;  %v15641_v38 = vpop.eup %15640  ;;  %v12965_v29 = vcombine.low %v19892_v15, %v19897_v6  ;;  %v13708_v48 = vpack.c.bf16 %v19816_v35, %v19776_v44  ;;  %v13709_v51 = vpack.c.bf16 %v19837_v20, %v19795_v3  ;;  %v9415_v19 = vmul.f32 1.442695, %v9173_v55  ;;  %v16079_v44 = vld [vmem:[%s22086_s0 + $0x48] sm:$0xff]  ;;  %v16081_v55 = vld [vmem:[%s22086_s0 + $0x80] sm:$0xff] }
 0x42f   :  { %8771 = vmatprep.subr.bf16.mxu0 %v22182_v56  ;;  %8591 = vmatmul.mubr.bf16.gmra.mrb[52].mxu0 %v18348_v37  ;;  %v15643_v42 = vpop.eup %15642  ;;  %v13716_v3 = vpack.c.bf16 %v15641_v38, %v19843_v14  ;;  %15660 = vpow2.f32 %v9381_v47  ;;  %v9413_v4 = vmul.f32 1.442695, %v9172_v7  ;;  %v12982_v45 = vcombine.high %v19980_v54, %v19985_v59  ;;  %v20029_v14 = vld [vmem:[%s22087_s3 + $0x2b0] sm:$0xff]  ;;  %v22201_v6 = vld [vmem:[#allocation11_spill] sm:$0xff] }
 0x430   :  { %8917 = vmatprep.subr.bf16.mxu1 %v12950_v23  ;;  %v13701_v23 = vpack.c.bf16 %v19759_v31, %v19730_v17  ;;  %8737 = vmatmul.mubr.bf16.gmra.mrb[52].mxu1 %v18348_v37  ;;  %v22183_v17 = vcombine.low %v19830_v26, %v19835_v60  ;;  %v16078_v31 = vld [vmem:[%s22086_s0 + $0x8] sm:$0xff]  ;;  %v20014_v20 = vpop.eup %15644  ;;  %v22184_v26 = vcombine.low %v19854_v11, %v19859_v53  ;;  %15662 = vpow2.f32 %v9385_v16  ;;  %v20039_v53 = vld [vmem:[%s22087_s3 + $0x2f0] sm:$0xff] }
 0x431   :  { %8600 = vmatprep.mubr.bf16.mxu0 %v18431_v33  ;;  %8746 = vmatprep.mubr.bf16.mxu1 %v18431_v33  ;;  %v20006_v62 = vmul.bf16 %v16078_v31, %v13693_v46  ;;  %v12980_v60 = vcombine.high %v19962_v12, %v19975_v27  ;;  %v20031_v13 = vpop.eup %15646  ;;  %v9417_v11 = vmul.f32 1.442695, %v9174_v40  ;;  %v20049_v46 = vld [vmem:[%s22087_s3 + $0x2f8] sm:$0xff]  ;;  %15664 = vpow2.f32 %v9411_v36 }
 0x432   :  { %8772 = vmatpush1.bf16.msra.mxu0 %v22183_v17  ;;  %v20011_v35 = vmul.bf16 %v16079_v44, %v13701_v23  ;;  %8918 = vmatpush1.bf16.msra.mxu1 %v22184_v26  ;;  %v20055_v15 = vpop.eup %15648  ;;  %v20062_v28 = vmul.bf16 %v16080_v24, %v13716_v3  ;;  %v13717_v32 = vpack.c.bf16 %v15643_v42, %v19966_v22  ;;  %15666 = vpow2.f32 %v9415_v19  ;;  %v20097_v22 = vld [vmem:[%s22087_s3 + $0x370] sm:$0xff]  ;;  %v20114_v36 = vld [vmem:[%s22087_s3 + $0x338] sm:$0xff] }
 0x433   :  { %8773 = vmatprep.subr.bf16.mxu0 %v12964_v0  ;;  %8919 = vmatprep.subr.bf16.mxu1 %v12966_v34  ;;  %v20044_v0 = vld [vmem:[%s22087_s3 + $0x2b8] sm:$0xff]  ;;  %v12979_v34 = vcombine.low %v19962_v12, %v19975_v27  ;;  %v20065_v61 = vpop.eup %15650  ;;  %v12981_v47 = vcombine.low %v19980_v54, %v19985_v59  ;;  %v20075_v57 = vmul.bf16 %v16081_v55, %v13708_v48  ;;  %15668 = vpow2.f32 %v9413_v4  ;;  %v20092_v12 = vld [vmem:[%s22087_s3 + $0x330] sm:$0xff]  ;;  %v16083_v27 = vld [vmem:[%s22086_s0 + $0xc8] sm:$0xff] }
 0x434   :  { %22185 = vst [vmem:[#allocation15_spill] sm:$0xff] %v20062_v28  ;;  %v13724_v16 = vpack.c.bf16 %v20055_v15, %v20014_v20  ;;  %v15653_v7 = vpop.eup %15652  ;;  %v12996_v41 = vcombine.high %v20029_v14, %v20039_v53  ;;  %v20086_v2 = vmul.bf16 %v16082_v10, %v13709_v51  ;;  %15670 = vpow2.f32 %v9417_v11  ;;  %v20138_v3 = vld [vmem:[%s22087_s3 + $0x3b0] sm:$0xff]  ;;  %v20150_v4 = vld [vmem:[%s22087_s3 + $0x3b8] sm:$0xff] }
 0x435   :  { %22186 = vst [vmem:[#allocation16_spill] sm:$0xff] %v20075_v57  ;;  %v15655_v56 = vpop.eup %15654  ;;  %v20104_v54 = vmul.bf16 %v16083_v27, %v13717_v32  ;;  %v9539_v38 = vadd.f32 1.0, %v19946_v25  ;;  %v13725_v48 = vpack.c.bf16 %v20065_v61, %v20031_v13  ;;  %v12995_v25 = vcombine.low %v20029_v14, %v20039_v53  ;;  %v20155_v26 = vld [vmem:[%s22087_s3 + $0x3f8] sm:$0xff]  ;;  %v16084_v53 = vld [vmem:[%s22086_s0 + $0x100] sm:$0xff]  ;;  %v16086_v32 = vld [vmem:[%s22086_s0 + $0x108] sm:$0xff] }
 0x436   :  { %8774 = vmatpush1.bf16.msra.mxu0 %v12963_v9  ;;  %8920 = vmatpush1.bf16.msra.mxu1 %v12965_v29  ;;  %v12998_v9 = vcombine.high %v20044_v0, %v20049_v46  ;;  %22187 = vst [vmem:[#allocation17_spill] sm:$0xff] %v20086_v2  ;;  %v15657_v23 = vpop.eup %15656  ;;  %v20119_v29 = vld [vmem:[%s22087_s3 + $0x378] sm:$0xff]  ;;  %v9541_v17 = vadd.f32 1.0, %v19951_v30  ;;  %v12997_v31 = vcombine.low %v20044_v0, %v20049_v46  ;;  %v20145_v30 = vld [vmem:[%s22087_s3 + $0x3f0] sm:$0xff] }
 0x437   :  { %8775 = vmatprep.subr.bf16.mxu0 %v12980_v60  ;;  %8601 = vmatmul.mubr.bf16.gmra.mrb[56].mxu0 %v18423_v5  ;;  %22188 = vst [vmem:[#allocation18_spill] sm:$0xff] %v20104_v54  ;;  %v15659_v51 = vpop.eup %15658  ;;  %v13012_v44 = vcombine.high %v20092_v12, %v20097_v22  ;;  %v13014_v20 = vcombine.high %v20114_v36, %v20119_v29  ;;  %15672 = vrcp.f32 %v9539_v38  ;;  %v20492_v27 = vld [vmem:[%s22087_s3 + $0xc30] sm:$0xff]  ;;  %v20555_v40 = vld [vmem:[%s22087_s3 + $0xcb8] sm:$0xff] }
 0x438   :  { %8921 = vmatprep.subr.bf16.mxu1 %v12982_v45  ;;  %8747 = vmatmul.mubr.bf16.gmra.mrb[56].mxu1 %v18423_v5  ;;  %v13732_v60 = vpack.c.bf16 %v15657_v23, %v15653_v7  ;;  %v13733_v45 = vpack.c.bf16 %v15659_v51, %v15655_v56  ;;  %v13011_v13 = vcombine.low %v20092_v12, %v20097_v22  ;;  %15674 = vrcp.f32 %v9541_v17  ;;  %v4869_v12 = vld [vmem:[%s22087_s3 + $0x430] sm:$0xff]  ;;  %v20568_v42 = vld [vmem:[%s22087_s3 + $0xcf8] sm:$0xff] }
 0x439   :  { %8610 = vmatprep.mubr.bf16.mxu0 %v18487_v21  ;;  %8756 = vmatprep.mubr.bf16.mxu1 %v18487_v21  ;;  %v15661_v14 = vpop.eup %15660  ;;  %v13013_v11 = vcombine.low %v20114_v36, %v20119_v29  ;;  %v20164_v0 = vmul.bf16 %v16084_v53, %v13724_v16  ;;  %v20174_v61 = vmul.bf16 %v16086_v32, %v13725_v48  ;;  %v4877_v22 = vld [vmem:[%s22087_s3 + $0x470] sm:$0xff]  ;;  %v4870_v29 = vld [vmem:[%s22087_s3 + $0x438] sm:$0xff] }
 0x43a   :  { %8776 = vmatpush1.bf16.msra.mxu0 %v12979_v34  ;;  %8922 = vmatpush1.bf16.msra.mxu1 %v12981_v47  ;;  %v15663_v46 = vpop.eup %15662  ;;  %v9540_v15 = vadd.f32 1.0, %v15661_v14  ;;  %v16085_v34 = vld [vmem:[%s22086_s0 + $0x140] sm:$0xff]  ;;  %v16087_v47 = vld [vmem:[%s22086_s0 + $0x148] sm:$0xff]  ;;  %v4878_v48 = vld [vmem:[%s22087_s3 + $0x478] sm:$0xff]  ;;  %v13044_v14 = vcombine.high %v4869_v12, %v4877_v22  ;;  %v22225_v2 = vcombine.low %v20579_v1, %v20591_v8 }
 0x43b   :  { %8777 = vmatprep.subr.bf16.mxu0 %v12996_v41  ;;  %8923 = vmatprep.subr.bf16.mxu1 %v12998_v9  ;;  %22189 = vst [vmem:[#allocation19_spill] sm:$0xff] %v20164_v0  ;;  %v20169_v24 = vmul.bf16 %v16085_v34, %v13732_v60  ;;  %22191 = vst [vmem:[#allocation21_spill] sm:$0xff] %v20174_v61  ;;  %v20179_v55 = vmul.bf16 %v16087_v47, %v13733_v45  ;;  %v15665_v16 = vpop.eup %15664  ;;  %v9542_v7 = vadd.f32 1.0, %v15663_v46  ;;  %v4902_v32 = vld [vmem:[%s22087_s3 + $0x538] sm:$0xff]  ;;  %v20465_v51 = vld [vmem:[%s22087_s3 + $0xbb0] sm:$0xff] }
 0x43c   :  { %v13028_v41 = vcombine.high %v20138_v3, %v20145_v30  ;;  %v13030_v9 = vcombine.high %v20150_v4, %v20155_v26  ;;  %v15667_v10 = vpop.eup %15666  ;;  %15676 = vrcp.f32 %v9540_v15  ;;  %v9555_v56 = vadd.f32 1.0, %v15665_v16  ;;  %v4909_v15 = vld [vmem:[%s22087_s3 + $0x570] sm:$0xff]  ;;  %v4910_v16 = vld [vmem:[%s22087_s3 + $0x578] sm:$0xff] }
 0x43d   :  { %22190 = vst [vmem:[#allocation20_spill] sm:$0xff] %v20169_v24  ;;  %22192 = vst [vmem:[#allocation22_spill] sm:$0xff] %v20179_v55  ;;  %v15669_v38 = vpop.eup %15668  ;;  %15678 = vrcp.f32 %v9542_v7  ;;  %v9557_v36 = vadd.f32 1.0, %v15667_v10  ;;  %v13029_v45 = vcombine.low %v20150_v4, %v20155_v26  ;;  %v4901_v4 = vld [vmem:[%s22087_s3 + $0x530] sm:$0xff]  ;;  %v13045_v53 = vcombine.low %v4870_v29, %v4878_v48 }
 0x43e   :  { %8778 = vmatpush1.bf16.msra.mxu0 %v12995_v25  ;;  %8924 = vmatpush1.bf16.msra.mxu1 %v12997_v31  ;;  %v15671_v17 = vpop.eup %15670  ;;  %15680 = vrcp.f32 %v9555_v56  ;;  %v9556_v31 = vadd.f32 1.0, %v15669_v38  ;;  %v20542_v59 = vld [vmem:[%s22087_s3 + $0xcf0] sm:$0xff] }
 0x43f   :  { %8779 = vmatprep.subr.bf16.mxu0 %v13012_v44  ;;  %8611 = vmatmul.mubr.bf16.gmra.mrb[60].mxu0 %v18472_v18  ;;  %v13027_v44 = vcombine.low %v20138_v3, %v20145_v30  ;;  %15682 = vrcp.f32 %v9557_v36  ;;  %v9558_v60 = vadd.f32 1.0, %v15671_v17  ;;  %v4886_v3 = vld [vmem:[%s22087_s3 + $0x4b8] sm:$0xff] }
 0x440   :  { %8925 = vmatprep.subr.bf16.mxu1 %v13014_v20  ;;  %8757 = vmatmul.mubr.bf16.gmra.mrb[60].mxu1 %v18472_v18  ;;  %v4885_v20 = vld [vmem:[%s22087_s3 + $0x4b0] sm:$0xff]  ;;  %15684 = vrcp.f32 %v9556_v31  ;;  %v4894_v30 = vld [vmem:[%s22087_s3 + $0x4f8] sm:$0xff] }
 0x441   :  { %8799 = vmatprep.mubr.bf16.mxu0 %v18280_v52  ;;  %8945 = vmatprep.mubr.bf16.mxu1 %v18280_v52  ;;  %v13046_v52 = vcombine.high %v4870_v29, %v4878_v48  ;;  %15686 = vrcp.f32 %v9558_v60  ;;  %v15673_v26 = vpop.eup %15672  ;;  %v13062_v34 = vcombine.high %v4886_v3, %v4894_v30  ;;  %v13061_v56 = vcombine.low %v4886_v3, %v4894_v30  ;;  %v4918_v48 = vld [vmem:[%s22087_s3 + $0x5b8] sm:$0xff]  ;;  %v4941_v3 = vld [vmem:[%s22087_s3 + $0x670] sm:$0xff] }
 0x442   :  { %8780 = vmatpush1.bf16.msra.mxu0 %v13011_v13  ;;  %8926 = vmatpush1.bf16.msra.mxu1 %v13013_v11  ;;  %v4893_v13 = vld [vmem:[%s22087_s3 + $0x4f0] sm:$0xff]  ;;  %v13043_v11 = vcombine.low %v4869_v12, %v4877_v22  ;;  %v15675_v47 = vpop.eup %15674  ;;  %v13076_v12 = vcombine.high %v4901_v4, %v4909_v15  ;;  %v13078_v29 = vcombine.high %v4902_v32, %v4910_v16 }
 0x443   :  { %8781 = vmatprep.subr.bf16.mxu0 %v13028_v41  ;;  %8927 = vmatprep.subr.bf16.mxu1 %v13030_v9  ;;  %v13060_v46 = vcombine.high %v4885_v20, %v4893_v13  ;;  %v13059_v41 = vcombine.low %v4885_v20, %v4893_v13  ;;  %v4917_v9 = vld [vmem:[%s22087_s3 + $0x5b0] sm:$0xff]  ;;  %v13075_v60 = vcombine.low %v4901_v4, %v4909_v15  ;;  %v4934_v4 = vld [vmem:[%s22087_s3 + $0x638] sm:$0xff] }
 0x444   :  { %v4925_v22 = vld [vmem:[%s22087_s3 + $0x5f0] sm:$0xff]  ;;  %v13077_v13 = vcombine.low %v4902_v32, %v4910_v16 }
 0x446   :  { %8782 = vmatpush1.bf16.msra.mxu0 %v13027_v44  ;;  %8928 = vmatpush1.bf16.msra.mxu1 %v13029_v45  ;;  %v15677_v7 = vpop.eup %15676  ;;  %v4926_v44 = vld [vmem:[%s22087_s3 + $0x5f8] sm:$0xff]  ;;  %v4933_v45 = vld [vmem:[%s22087_s3 + $0x630] sm:$0xff] }
 0x447   :  { %8783 = vmatprep.subr.bf16.mxu0 %v13044_v14  ;;  %8929 = vmatprep.subr.bf16.mxu1 %v13046_v52  ;;  %v15679_v10 = vpop.eup %15678  ;;  %v13740_v38 = vpack.c.bf16 %v15677_v7, %v15673_v26  ;;  %v13092_v52 = vcombine.high %v4917_v9, %v4925_v22  ;;  %v13093_v16 = vcombine.low %v4918_v48, %v4926_v44  ;;  %v4949_v7 = vld [vmem:[%s22087_s3 + $0x6b0] sm:$0xff] }
 0x448   :  { %v15681_v36 = vpop.eup %15680  ;;  %v13741_v17 = vpack.c.bf16 %v15679_v10, %v15675_v47  ;;  %v13091_v47 = vcombine.low %v4917_v9, %v4925_v22  ;;  %v13108_v9 = vcombine.high %v4933_v45, %v4941_v3  ;;  %v4957_v22 = vld [vmem:[%s22087_s3 + $0x6f0] sm:$0xff] }
 0x449   :  { %v15683_v31 = vpop.eup %15682 }
 0x44a   :  { %8784 = vmatpush1.bf16.msra.mxu0 %v13043_v11  ;;  %8930 = vmatpush1.bf16.msra.mxu1 %v13045_v53  ;;  %v15685_v20 = vpop.eup %15684  ;;  %v13094_v11 = vcombine.high %v4918_v48, %v4926_v44  ;;  %v4942_v53 = vld [vmem:[%s22087_s3 + $0x678] sm:$0xff] }
 0x44b   :  { %8785 = vmatprep.subr.bf16.mxu0 %v13060_v46  ;;  %8931 = vmatprep.subr.bf16.mxu1 %v13062_v34  ;;  %v15687_v14 = vpop.eup %15686  ;;  %v13748_v30 = vpack.c.bf16 %v15685_v20, %v15681_v36  ;;  %v16088_v46 = vld [vmem:[%s22086_s0 + $0x180] sm:$0xff]  ;;  %v4950_v48 = vld [vmem:[%s22087_s3 + $0x6b8] sm:$0xff]  ;;  %v13107_v20 = vcombine.low %v4933_v45, %v4941_v3  ;;  %v13123_v3 = vcombine.low %v4949_v7, %v4957_v22  ;;  %v22200_v36 = vld [vmem:[#allocation12_spill] sm:$0xff] }
 0x44c   :  { %v13749_v26 = vpack.c.bf16 %v15687_v14, %v15683_v31  ;;  %v20264_v15 = vmul.bf16 %v16088_v46, %v13740_v38  ;;  %v16089_v34 = vld [vmem:[%s22086_s0 + $0x1c0] sm:$0xff]  ;;  %v4958_v44 = vld [vmem:[%s22087_s3 + $0x6f8] sm:$0xff]  ;;  %v13109_v14 = vcombine.low %v4934_v4, %v4942_v53  ;;  %v4989_v46 = vld [vmem:[%s22087_s3 + $0x7f0] sm:$0xff] }
 0x44d   :  { %v20269_v32 = vmul.bf16 %v16089_v34, %v13748_v30  ;;  %v13126_v30 = vcombine.high %v4950_v48, %v4958_v44  ;;  %v4974_v45 = vld [vmem:[%s22087_s3 + $0x778] sm:$0xff] }
 0x44e   :  { %8786 = vmatpush1.bf16.msra.mxu0 %v13059_v41  ;;  %8932 = vmatpush1.bf16.msra.mxu1 %v13061_v56  ;;  %22193 = vst [vmem:[#allocation23_spill] sm:$0xff] %v20264_v15  ;;  %v16090_v41 = vld [vmem:[%s22086_s0 + $0x188] sm:$0xff]  ;;  %v20447_v31 = vld [vmem:[%s22087_s3 + $0xb38] sm:$0xff] }
 0x44f   :  { %8787 = vmatprep.subr.bf16.mxu0 %v13076_v12  ;;  %8933 = vmatprep.subr.bf16.mxu1 %v13078_v29  ;;  %22194 = vst [vmem:[#allocation24_spill] sm:$0xff] %v20269_v32  ;;  %v20277_v10 = vmul.bf16 %v16090_v41, %v13741_v17  ;;  %v16091_v56 = vld [vmem:[%s22086_s0 + $0x1c8] sm:$0xff]  ;;  %v13110_v29 = vcombine.high %v4934_v4, %v4942_v53  ;;  %v4981_v4 = vld [vmem:[%s22087_s3 + $0x7b0] sm:$0xff] }
 0x450   :  { %v20282_v12 = vmul.bf16 %v16091_v56, %v13749_v26  ;;  %v13125_v26 = vcombine.low %v4950_v48, %v4958_v44  ;;  %v4997_v41 = vld [vmem:[%s22087_s3 + $0x830] sm:$0xff]  ;;  %v4998_v48 = vld [vmem:[%s22087_s3 + $0x838] sm:$0xff] }
 0x451   :  { %22195 = vst [vmem:[#allocation25_spill] sm:$0xff] %v20277_v10  ;;  %v5006_v44 = vld [vmem:[%s22087_s3 + $0x878] sm:$0xff] }
 0x452   :  { %8788 = vmatpush1.bf16.msra.mxu0 %v13075_v60  ;;  %22196 = vst [vmem:[#allocation26_spill] sm:$0xff] %v20282_v12  ;;  %8934 = vmatpush1.bf16.msra.mxu1 %v13077_v13  ;;  %v4965_v60 = vld [vmem:[%s22087_s3 + $0x730] sm:$0xff]  ;;  %v13124_v13 = vcombine.high %v4949_v7, %v4957_v22 }
 0x453   :  { %8789 = vmatprep.subr.bf16.mxu0 %v13092_v52  ;;  %8935 = vmatprep.subr.bf16.mxu1 %v13094_v11  ;;  %v4973_v52 = vld [vmem:[%s22087_s3 + $0x770] sm:$0xff]  ;;  %v4966_v11 = vld [vmem:[%s22087_s3 + $0x738] sm:$0xff] }
 0x454   :  { %v13140_v53 = vcombine.high %v4965_v60, %v4973_v52  ;;  %v13142_v34 = vcombine.high %v4966_v11, %v4974_v45  ;;  %v13139_v7 = vcombine.low %v4965_v60, %v4973_v52  ;;  %v13141_v56 = vcombine.low %v4966_v11, %v4974_v45  ;;  %v5005_v22 = vld [vmem:[%s22087_s3 + $0x870] sm:$0xff]  ;;  %v5014_v11 = vld [vmem:[%s22087_s3 + $0x8b8] sm:$0xff] }
 0x455   :  { %v13174_v52 = vcombine.high %v4998_v48, %v5006_v44  ;;  %v5022_v45 = vld [vmem:[%s22087_s3 + $0x8f8] sm:$0xff] }
 0x456   :  { %8790 = vmatpush1.bf16.msra.mxu0 %v13091_v47  ;;  %8936 = vmatpush1.bf16.msra.mxu1 %v13093_v16  ;;  %v4982_v47 = vld [vmem:[%s22087_s3 + $0x7b8] sm:$0xff] }
 0x457   :  { %8791 = vmatprep.subr.bf16.mxu0 %v13108_v9  ;;  %8937 = vmatprep.subr.bf16.mxu1 %v13110_v29  ;;  %v4990_v16 = vld [vmem:[%s22087_s3 + $0x7f8] sm:$0xff]  ;;  %v13156_v9 = vcombine.high %v4981_v4, %v4989_v46 }
 0x458   :  { %v13158_v29 = vcombine.high %v4982_v47, %v4990_v16  ;;  %v13157_v60 = vcombine.low %v4982_v47, %v4990_v16  ;;  %v5030_v47 = vld [vmem:[%s22087_s3 + $0x938] sm:$0xff] }
 0x459   :  { %v22197_v16 = vld [vmem:[#allocation10_spill] sm:$0xff] }
 0x45a   :  { %8792 = vmatpush1.bf16.msra.mxu0 %v13107_v20  ;;  %8938 = vmatpush1.bf16.msra.mxu1 %v13109_v14  ;;  %v13155_v20 = vcombine.low %v4981_v4, %v4989_v46  ;;  %v13172_v14 = vcombine.high %v4997_v41, %v5005_v22  ;;  %v5029_v4 = vld [vmem:[%s22087_s3 + $0x930] sm:$0xff] }
 0x45b   :  { %8793 = vmatprep.subr.bf16.mxu0 %v13124_v13  ;;  %8939 = vmatprep.subr.bf16.mxu1 %v13126_v30  ;;  %v5013_v13 = vld [vmem:[%s22087_s3 + $0x8b0] sm:$0xff] }
 0x45c   :  { %v5021_v30 = vld [vmem:[%s22087_s3 + $0x8f0] sm:$0xff] }
 0x45d   :  { %v5037_v46 = vld [vmem:[%s22087_s3 + $0x970] sm:$0xff] }
 0x45e   :  { %8794 = vmatpush1.bf16.msra.mxu0 %v13123_v3  ;;  %8940 = vmatpush1.bf16.msra.mxu1 %v13125_v26  ;;  %v13171_v3 = vcombine.low %v4997_v41, %v5005_v22  ;;  %v13173_v26 = vcombine.low %v4998_v48, %v5006_v44  ;;  %v13187_v41 = vcombine.low %v5013_v13, %v5021_v30  ;;  %v20383_v48 = vld [vmem:[%s22087_s3 + $0x9f8] sm:$0xff] }
 0x45f   :  { %8795 = vmatprep.subr.bf16.mxu0 %v13140_v53  ;;  %8941 = vmatprep.subr.bf16.mxu1 %v13142_v34  ;;  %v13188_v53 = vcombine.high %v5013_v13, %v5021_v30  ;;  %v13190_v34 = vcombine.high %v5014_v11, %v5022_v45  ;;  %v13204_v22 = vcombine.high %v5029_v4, %v5037_v46  ;;  %v22198_v30 = vld [vmem:[#allocation3_spill] sm:$0xff] }
 0x460   :  { %v13203_v13 = vcombine.low %v5029_v4, %v5037_v46  ;;  %v20413_v4 = vld [vmem:[%s22087_s3 + $0xab0] sm:$0xff] }
 0x461   :  { %v20418_v46 = vld [vmem:[%s22087_s3 + $0xaf0] sm:$0xff] }
 0x462   :  { %8796 = vmatpush1.bf16.msra.mxu0 %v13139_v7  ;;  %8942 = vmatpush1.bf16.msra.mxu1 %v13141_v56  ;;  %v5038_v7 = vld [vmem:[%s22087_s3 + $0x978] sm:$0xff]  ;;  %v20368_v56 = vld [vmem:[%s22087_s3 + $0x9b0] sm:$0xff] }
 0x463   :  { %8797 = vmatprep.subr.bf16.mxu0 %v13156_v9  ;;  %8943 = vmatprep.subr.bf16.mxu1 %v13158_v29  ;;  %v20373_v9 = vld [vmem:[%s22087_s3 + $0x9f0] sm:$0xff]  ;;  %v20378_v29 = vld [vmem:[%s22087_s3 + $0x9b8] sm:$0xff]  ;;  %v13206_v44 = vcombine.high %v5030_v47, %v5038_v7 }
 0x464   :  { %v13219_v17 = vcombine.low %v20368_v56, %v20373_v9  ;;  %v13221_v38 = vcombine.low %v20378_v29, %v20383_v48 }
 0x466   :  { %8798 = vmatpush1.bf16.msra.mxu0 %v13155_v20  ;;  %8944 = vmatpush1.bf16.msra.mxu1 %v13157_v60  ;;  %v20388_v20 = vld [vmem:[%s22087_s3 + $0xa30] sm:$0xff] }
 0x467   :  { %8840 = vmatprep.subr.bf16.mxu0 %v13172_v14  ;;  %8986 = vmatprep.subr.bf16.mxu1 %v13174_v52  ;;  %v20393_v60 = vld [vmem:[%s22087_s3 + $0xa70] sm:$0xff]  ;;  %v20398_v14 = vld [vmem:[%s22087_s3 + $0xa38] sm:$0xff] }
 0x468   :  { %v20403_v52 = vld [vmem:[%s22087_s3 + $0xa78] sm:$0xff]  ;;  %v13235_v25 = vcombine.low %v20388_v20, %v20393_v60 }
 0x469   :  { %8800 = vmatmul.mubr.bf16.vlgmr.msra.gmra.mrb[64].mxu0 %v18274_v49  ;;  %8946 = vmatmul.mubr.bf16.vlgmr.msra.gmra.mrb[64].mxu1 %v18274_v49  ;;  %v13189_v49 = vcombine.low %v5014_v11, %v5022_v45  ;;  %v22119_v11 = vsub.s32 4, %v22198_v30  ;;  %v13205_v45 = vcombine.low %v5030_v47, %v5038_v7  ;;  %v20428_v47 = vld [vmem:[%s22087_s3 + $0xaf8] sm:$0xff]  ;;  %v13222_v7 = vcombine.high %v20378_v29, %v20383_v48 }
 0x46a   :  { %8809 = vmatprep.mubr.bf16.mxu0 %v22197_v16  ;;  %8841 = vmatpush1.bf16.msra.mxu0 %v13171_v3  ;;  %v13220_v3 = vcombine.high %v20368_v56, %v20373_v9  ;;  %v20475_v56 = vld [vmem:[%s22087_s3 + $0xbb8] sm:$0xff]  ;;  %v13236_v29 = vcombine.high %v20388_v20, %v20393_v60  ;;  %v13237_v48 = vcombine.low %v20398_v14, %v20403_v52 }
 0x46b   :  { %8955 = vmatprep.mubr.bf16.mxu1 %v22197_v16  ;;  %8987 = vmatpush1.bf16.msra.mxu1 %v13173_v26  ;;  %v22118_v26 = vsub.s32 6, %v22198_v30  ;;  %v22199_v16 = vld [vmem:[#allocation9_spill] sm:$0xff]  ;;  %v13238_v23 = vcombine.high %v20398_v14, %v20403_v52 }
 0x46c   :  { %8842 = vmatprep.subr.bf16.mxu0 %v13188_v53  ;;  %8988 = vmatprep.subr.bf16.mxu1 %v13190_v34  ;;  %v22117_v53 = vsub.s32 5, %v22198_v30  ;;  %v20423_v34 = vld [vmem:[%s22087_s3 + $0xab8] sm:$0xff] }
 0x46d   :  { %v20480_v9 = vld [vmem:[%s22087_s3 + $0xbf8] sm:$0xff]  ;;  %v22204_v24 = vcombine.low %v20423_v34, %v20428_v47 }
 0x46e   :  { %8843 = vmatpush1.bf16.msra.mxu0 %v13187_v41  ;;  %v22120_v41 = vsub.s32 7, %v22198_v30  ;;  %v20517_v52 = vld [vmem:[%s22087_s3 + $0xc38] sm:$0xff] }
 0x46f   :  { %8989 = vmatpush1.bf16.msra.mxu1 %v13189_v49  ;;  %8844 = vmatprep.subr.bf16.mxu0 %v13204_v22  ;;  %v20437_v49 = vld [vmem:[%s22087_s3 + $0xb30] sm:$0xff] }
 0x470   :  { %8990 = vmatprep.subr.bf16.mxu1 %v13206_v44  ;;  %v20442_v22 = vld [vmem:[%s22087_s3 + $0xb70] sm:$0xff]  ;;  %v20452_v44 = vld [vmem:[%s22087_s3 + $0xb78] sm:$0xff] }
 0x471   :  { %8810 = vmatmul.mubr.bf16.gmra.mrb[68].mxu0 %v22199_v16  ;;  %8956 = vmatmul.mubr.bf16.gmra.mrb[68].mxu1 %v22199_v16  ;;  %v20470_v16 = vld [vmem:[%s22087_s3 + $0xbf0] sm:$0xff] }
 0x472   :  { %8819 = vmatprep.mubr.bf16.mxu0 %v22200_v36  ;;  %8845 = vmatpush1.bf16.msra.mxu0 %v13203_v13  ;;  %v20497_v13 = vld [vmem:[%s22087_s3 + $0xc70] sm:$0xff] }
 0x473   :  { %8965 = vmatprep.mubr.bf16.mxu1 %v22200_v36  ;;  %8991 = vmatpush1.bf16.msra.mxu1 %v13205_v45  ;;  %v16092_v36 = vld [vmem:[%s22089_s4] sm:$0xff]  ;;  %v20522_v45 = vld [vmem:[%s22087_s3 + $0xc78] sm:$0xff] }
 0x474   :  { %8846 = vmatprep.subr.bf16.mxu0 %v13220_v3  ;;  %v20504_v20 = vrot.slane %v16092_v36, %v22119_v11  ;;  %v20508_v60 = vrot.slane %v16092_v36, %v22118_v26  ;;  %v20512_v14 = vrot.slane %v16092_v36, %v22117_v53  ;;  %v20527_v3 = vld [vmem:[%s22087_s3 + $0xcb0] sm:$0xff]  ;;  %8992 = vmatprep.subr.bf16.mxu1 %v13222_v7  ;;  %v8290_v39 = vpop.f32.mrb[32].mxu0 }
 0x475   :  { %v20531_v53 = vrot.slane %v16092_v36, %v22120_v41  ;;  %v13252_v11 = vcombine.high %v20413_v4, %v20418_v46  ;;  %v13254_v7 = vcombine.high %v20423_v34, %v20428_v47  ;;  %v8436_v41 = vpop.f32.mrb[32].mxu1  ;;  %v8292_v19 = vpop.f32.mrb[33].mxu0  ;;  %v20645_v47 = vld [vmem:[%s22087_s3 + $0xdf0] sm:$0xff]  ;;  %v22221_v54 = vcombine.low %v20527_v3, %v20542_v59 }
 0x476   :  { %8847 = vmatpush1.bf16.msra.mxu0 %v13219_v17  ;;  %v22202_v17 = vld [vmem:[#allocation14_spill] sm:$0xff]  ;;  %v14214_v36 = vadd.f32 %v8436_v41, %v20508_v60  ;;  %v14199_v26 = vadd.f32 %v8292_v19, %v20512_v14  ;;  %v8294_v30 = vpop.f32.mrb[34].mxu0  ;;  %v22222_v34 = vcombine.low %v20555_v40, %v20568_v42 }
 0x477   :  { %8993 = vmatpush1.bf16.msra.mxu1 %v13221_v38  ;;  %8848 = vmatprep.subr.bf16.mxu0 %v13236_v29  ;;  %v14200_v38 = vadd.f32 %v8294_v30, %v20504_v20  ;;  %v20619_v30 = vld [vmem:[%s22087_s3 + $0xd78] sm:$0xff] }
 0x478   :  { %8994 = vmatprep.subr.bf16.mxu1 %v13238_v23  ;;  %v14198_v23 = vadd.f32 %v8290_v39, %v20504_v20  ;;  %v9065_v41 = vsub.f32 0.0, %v14214_v36  ;;  %v9064_v32 = vsub.f32 0.0, %v14199_v26 }
 0x479   :  { %8820 = vmatmul.mubr.bf16.gmra.mrb[72].mxu0 %v22201_v6  ;;  %8966 = vmatmul.mubr.bf16.gmra.mrb[72].mxu1 %v22201_v6  ;;  %v8438_v6 = vpop.f32.mrb[33].mxu1  ;;  %v9079_v36 = vsub.f32 0.0, %v14200_v38  ;;  %v22207_v38 = vcombine.high %v20447_v31, %v20452_v44 }
 0x47a   :  { %8829 = vmatprep.mubr.bf16.mxu0 %v22202_v17  ;;  %8849 = vmatpush1.bf16.msra.mxu0 %v13235_v25  ;;  %v9063_v12 = vsub.f32 0.0, %v14198_v23  ;;  %v14215_v10 = vadd.f32 %v8438_v6, %v20531_v53  ;;  %v8440_v29 = vpop.f32.mrb[34].mxu1  ;;  %v8296_v25 = vpop.f32.mrb[35].mxu0 }
 0x47b   :  { %8975 = vmatprep.mubr.bf16.mxu1 %v22202_v17  ;;  %8995 = vmatpush1.bf16.msra.mxu1 %v13237_v48  ;;  %v14216_v19 = vadd.f32 %v8440_v29, %v20508_v60  ;;  %v14201_v15 = vadd.f32 %v8296_v25, %v20512_v14  ;;  %v8442_v39 = vpop.f32.mrb[35].mxu1  ;;  %v20614_v48 = vld [vmem:[%s22087_s3 + $0xd38] sm:$0xff]  ;;  %v9197_v29 = vmul.f32 1.442695, %v9064_v32  ;;  %v22203_v25 = vcombine.low %v20413_v4, %v20418_v46  ;;  %v20634_v32 = vld [vmem:[%s22087_s3 + $0xdb0] sm:$0xff] }
 0x47c   :  { %8850 = vmatprep.subr.bf16.mxu0 %v13252_v11  ;;  %8996 = vmatprep.subr.bf16.mxu1 %v13254_v7  ;;  %v9195_v11 = vmul.f32 1.442695, %v9063_v12  ;;  %v9066_v23 = vsub.f32 0.0, %v14215_v10  ;;  %v14217_v26 = vadd.f32 %v8442_v39, %v20531_v53  ;;  %v9199_v7 = vmul.f32 1.442695, %v9065_v41  ;;  %v22206_v46 = vld [vmem:[#allocation13_spill] sm:$0xff] }
 0x47d   :  { %v9081_v6 = vsub.f32 0.0, %v14216_v19  ;;  %v9080_v17 = vsub.f32 0.0, %v14201_v15  ;;  %v9227_v61 = vmul.f32 1.442695, %v9079_v36  ;;  %v22205_v10 = vcombine.high %v20437_v49, %v20442_v22  ;;  %v8446_v19 = vpop.f32.mrb[36].mxu1 }
 0x47e   :  { %8851 = vmatpush1.bf16.msra.mxu0 %v22203_v25  ;;  %15688 = vpow2.f32 %v9195_v11  ;;  %v9201_v55 = vmul.f32 1.442695, %v9066_v23  ;;  %v9082_v12 = vsub.f32 0.0, %v14217_v26  ;;  %v22209_v36 = vcombine.low %v20437_v49, %v20442_v22  ;;  %v20713_v23 = vld [vmem:[%s22087_s3 + $0xeb0] sm:$0xff] }
 0x47f   :  { %8997 = vmatpush1.bf16.msra.mxu1 %v22204_v24  ;;  %8852 = vmatprep.subr.bf16.mxu0 %v22205_v10  ;;  %15690 = vpow2.f32 %v9199_v7  ;;  %v9231_v4 = vmul.f32 1.442695, %v9081_v6  ;;  %v9229_v15 = vmul.f32 1.442695, %v9080_v17  ;;  %v8300_v24 = vpop.f32.mrb[36].mxu0  ;;  %v22208_v17 = vld [vmem:[#allocation8_spill] sm:$0xff]  ;;  %v14218_v26 = vadd.f32 %v8446_v19, %v20508_v60 }
 0x480   :  { %8998 = vmatprep.subr.bf16.mxu1 %v22207_v38  ;;  %15692 = vpow2.f32 %v9197_v29  ;;  %v9233_v39 = vmul.f32 1.442695, %v9082_v12  ;;  %v14202_v41 = vadd.f32 %v8300_v24, %v20504_v20  ;;  %v8302_v11 = vpop.f32.mrb[37].mxu0  ;;  %v8448_v29 = vpop.f32.mrb[37].mxu1  ;;  %v20663_v12 = vld [vmem:[%s22087_s3 + $0xdb8] sm:$0xff]  ;;  %v22210_v49 = vcombine.low %v20447_v31, %v20452_v44  ;;  %v20681_v19 = vld [vmem:[%s22087_s3 + $0xe30] sm:$0xff] }
 0x481   :  { %8830 = vmatmul.mubr.bf16.gmra.mrb[76].mxu0 %v22206_v46  ;;  %8976 = vmatmul.mubr.bf16.gmra.mrb[76].mxu1 %v22206_v46  ;;  %15694 = vpow2.f32 %v9201_v55  ;;  %v14203_v7 = vadd.f32 %v8302_v11, %v20512_v14  ;;  %v8304_v6 = vpop.f32.mrb[38].mxu0  ;;  %v20668_v55 = vld [vmem:[%s22087_s3 + $0xdf8] sm:$0xff]  ;;  %v14219_v10 = vadd.f32 %v8448_v29, %v20531_v53  ;;  %v22211_v46 = vcombine.high %v20465_v51, %v20470_v16  ;;  %v8450_v24 = vpop.f32.mrb[38].mxu1 }
 0x482   :  { %8872 = vmatprep.mubr.bf16.mxu0 %v22208_v17  ;;  %8853 = vmatpush1.bf16.msra.mxu0 %v22209_v36  ;;  %15696 = vpow2.f32 %v9227_v61  ;;  %v9095_v22 = vsub.f32 0.0, %v14202_v41  ;;  %v14204_v38 = vadd.f32 %v8304_v6, %v20504_v20  ;;  %v20686_v61 = vld [vmem:[%s22087_s3 + $0xe70] sm:$0xff]  ;;  %v9097_v31 = vsub.f32 0.0, %v14218_v26  ;;  %v20691_v11 = vpop.f32.mrb[39].mxu1  ;;  %v20698_v29 = vld [vmem:[%s22087_s3 + $0xe38] sm:$0xff] }
 0x483   :  { %9018 = vmatprep.mubr.bf16.mxu1 %v22208_v17  ;;  %8999 = vmatpush1.bf16.msra.mxu1 %v22210_v49  ;;  %v8306_v17 = vpop.f32.mrb[39].mxu0  ;;  %15698 = vpow2.f32 %v9231_v4  ;;  %v9096_v44 = vsub.f32 0.0, %v14203_v7  ;;  %v22212_v41 = vcombine.high %v20475_v56, %v20480_v9  ;;  %v20703_v4 = vld [vmem:[%s22087_s3 + $0xe78] sm:$0xff]  ;;  %v9098_v7 = vsub.f32 0.0, %v14219_v10 }
 0x484   :  { %8854 = vmatprep.subr.bf16.mxu0 %v22211_v46  ;;  %15700 = vpow2.f32 %v9229_v15  ;;  %v9259_v26 = vmul.f32 1.442695, %v9095_v22  ;;  %v9111_v6 = vsub.f32 0.0, %v14204_v38  ;;  %v9263_v49 = vmul.f32 1.442695, %v9097_v31  ;;  %v20718_v15 = vld [vmem:[%s22087_s3 + $0xef0] sm:$0xff] }
 0x485   :  { %9000 = vmatprep.subr.bf16.mxu1 %v22212_v41  ;;  %15702 = vpow2.f32 %v9233_v39  ;;  %v9261_v46 = vmul.f32 1.442695, %v9096_v44  ;;  %v22213_v41 = vcombine.low %v20465_v51, %v20470_v16  ;;  %v9265_v39 = vmul.f32 1.442695, %v9098_v7  ;;  %v8310_v44 = vpop.f32.mrb[40].mxu0 }
 0x486   :  { %15704 = vpow2.f32 %v9259_v26  ;;  %v9291_v22 = vmul.f32 1.442695, %v9111_v6  ;;  %v22214_v51 = vcombine.low %v20475_v56, %v20480_v9  ;;  %v22215_v16 = vcombine.high %v20492_v27, %v20497_v13  ;;  %v20741_v26 = vld [vmem:[%s22087_s3 + $0xeb8] sm:$0xff]  ;;  %v8456_v6 = vpop.f32.mrb[40].mxu1  ;;  %v20774_v56 = vld [vmem:[%s22087_s3 + $0xf70] sm:$0xff] }
 0x487   :  { %8855 = vmatpush1.bf16.msra.mxu0 %v22213_v41  ;;  %15706 = vpow2.f32 %v9263_v49  ;;  %v20729_v38 = vadd.f32 %v8450_v24, %v20508_v60  ;;  %v22216_v31 = vcombine.high %v20517_v52, %v20522_v45  ;;  %v20746_v24 = vld [vmem:[%s22087_s3 + $0xef8] sm:$0xff]  ;;  %v20748_v49 = vpop.f32.mrb[41].mxu0  ;;  %v22217_v36 = vcombine.low %v20492_v27, %v20497_v13  ;;  %v20765_v41 = vpop.f32.mrb[41].mxu1 }
 0x488   :  { %9001 = vmatpush1.bf16.msra.mxu1 %v22214_v51  ;;  %8856 = vmatprep.subr.bf16.mxu0 %v22215_v16  ;;  %v15689_v7 = vpop.eup %15688  ;;  %15708 = vpow2.f32 %v9261_v46  ;;  %v14205_v46 = vadd.f32 %v8306_v17, %v20512_v14  ;;  %v20767_v51 = vpop.f32.mrb[42].mxu0  ;;  %v22218_v17 = vcombine.low %v20517_v52, %v20522_v45  ;;  %v22219_v27 = vcombine.high %v20527_v3, %v20542_v59  ;;  %v20801_v16 = vld [vmem:[%s22087_s3 + $0xf38] sm:$0xff] }
 0x489   :  { %9002 = vmatprep.subr.bf16.mxu1 %v22216_v31  ;;  %v20759_v31 = vld [vmem:[%s22087_s3 + $0xf30] sm:$0xff]  ;;  %v15691_v9 = vpop.eup %15690  ;;  %v9447_v10 = vadd.f32 1.0, %v15689_v7  ;;  %15710 = vpow2.f32 %v9265_v39  ;;  %v20782_v13 = vpop.f32.mrb[42].mxu1  ;;  %v9113_v52 = vsub.f32 0.0, %v20729_v38  ;;  %v22220_v45 = vcombine.high %v20555_v40, %v20568_v42 }
 0x48a   :  { %v15693_v7 = vpop.eup %15692  ;;  %v9449_v39 = vadd.f32 1.0, %v15691_v9  ;;  %15712 = vpow2.f32 %v9291_v22  ;;  %v9112_v0 = vsub.f32 0.0, %v14205_v46  ;;  %v22223_v46 = vcombine.high %v20579_v1, %v20591_v8 }
 0x48b   :  { %8857 = vmatpush1.bf16.msra.mxu0 %v22217_v36  ;;  %v20784_v36 = vpop.f32.mrb[43].mxu0  ;;  %v15695_v9 = vpop.eup %15694  ;;  %15714 = vrcp.f32 %v9447_v10  ;;  %v9448_v22 = vadd.f32 1.0, %v15693_v7  ;;  %v20806_v10 = vld [vmem:[%s22087_s3 + $0xf78] sm:$0xff]  ;;  %v22227_v8 = vcombine.high %v20634_v32, %v20645_v47  ;;  %v22230_v57 = vcombine.low %v20663_v12, %v20668_v55 }
 0x48c   :  { %9003 = vmatpush1.bf16.msra.mxu1 %v22218_v17  ;;  %8858 = vmatprep.subr.bf16.mxu0 %v22219_v27  ;;  %v20794_v17 = vpop.f32.mrb[43].mxu1  ;;  %v15697_v38 = vpop.eup %15696  ;;  %15716 = vrcp.f32 %v9449_v39  ;;  %v9450_v7 = vadd.f32 1.0, %v15695_v9 }
 0x48d   :  { %9004 = vmatprep.subr.bf16.mxu1 %v22220_v45  ;;  %v20810_v45 = vadd.f32 %v20691_v11, %v20531_v53  ;;  %v15699_v27 = vpop.eup %15698  ;;  %15718 = vrcp.f32 %v9448_v22  ;;  %v9463_v25 = vadd.f32 1.0, %v15697_v38  ;;  %v20820_v11 = vadd.f32 %v8310_v44, %v20504_v20  ;;  %v8320_v44 = vpop.f32.mrb[44].mxu0 }
 0x48e   :  { %v15701_v39 = vpop.eup %15700  ;;  %15720 = vrcp.f32 %v9450_v7  ;;  %v9465_v9 = vadd.f32 1.0, %v15699_v27  ;;  %v9295_v22 = vmul.f32 1.442695, %v9113_v52  ;;  %v22224_v27 = vcombine.high %v20614_v48, %v20619_v30 }
 0x48f   :  { %8859 = vmatpush1.bf16.msra.mxu0 %v22221_v54  ;;  %v15703_v59 = vpop.eup %15702  ;;  %15722 = vrcp.f32 %v9463_v25  ;;  %v9464_v3 = vadd.f32 1.0, %v15701_v39  ;;  %v9114_v38 = vsub.f32 0.0, %v20810_v45  ;;  %v14222_v7 = vadd.f32 %v8456_v6, %v20508_v60  ;;  %v20837_v54 = vpop.f32.mrb[45].mxu0 }
 0x490   :  { %9005 = vmatpush1.bf16.msra.mxu1 %v22222_v34  ;;  %8860 = vmatprep.subr.bf16.mxu0 %v22223_v46  ;;  %v15705_v42 = vpop.eup %15704  ;;  %15724 = vrcp.f32 %v9465_v9  ;;  %v9466_v34 = vadd.f32 1.0, %v15703_v59  ;;  %v8466_v46 = vpop.f32.mrb[44].mxu1  ;;  %v9293_v39 = vmul.f32 1.442695, %v9112_v0  ;;  %v9127_v40 = vsub.f32 0.0, %v20820_v11 }
 0x491   :  { %9006 = vmatprep.subr.bf16.mxu1 %v22224_v27  ;;  %v15707_v25 = vpop.eup %15706  ;;  %15726 = vrcp.f32 %v9464_v3  ;;  %v9479_v52 = vadd.f32 1.0, %v15705_v42  ;;  %v14207_v27 = vadd.f32 %v20748_v49, %v20512_v14  ;;  %v20844_v9 = vpop.f32.mrb[45].mxu1  ;;  %v14223_v3 = vadd.f32 %v20765_v41, %v20531_v53 }
 0x492   :  { %v20846_v59 = vpop.f32.mrb[46].mxu0  ;;  %v15709_v45 = vpop.eup %15708  ;;  %15728 = vrcp.f32 %v9466_v34  ;;  %v9481_v6 = vadd.f32 1.0, %v15707_v25  ;;  %v22226_v0 = vcombine.low %v20614_v48, %v20619_v30  ;;  %v14208_v11 = vadd.f32 %v20767_v51, %v20504_v20  ;;  %v20875_v51 = vld [vmem:[%s22087_s3 + $0xfb0] sm:$0xff] }
 0x493   :  { %8861 = vmatpush1.bf16.msra.mxu0 %v22225_v2  ;;  %v20857_v1 = vpop.f32.mrb[46].mxu1  ;;  %v20859_v2 = vpop.f32.mrb[47].mxu0  ;;  %15730 = vrcp.f32 %v9479_v52  ;;  %v9480_v42 = vadd.f32 1.0, %v15709_v45  ;;  %v14224_v41 = vadd.f32 %v20782_v13, %v20508_v60  ;;  %v22228_v48 = vcombine.high %v20663_v12, %v20668_v55 }
 0x494   :  { %9007 = vmatpush1.bf16.msra.mxu1 %v22226_v0  ;;  %8862 = vmatprep.subr.bf16.mxu0 %v22227_v8  ;;  %v15711_v49 = vpop.eup %15710  ;;  %v20868_v30 = vpop.f32.mrb[47].mxu1  ;;  %15732 = vrcp.f32 %v9481_v6  ;;  %v9129_v0 = vsub.f32 0.0, %v14222_v7  ;;  %v14209_v52 = vadd.f32 %v20784_v36, %v20512_v14  ;;  %v9128_v8 = vsub.f32 0.0, %v14207_v27 }
 0x495   :  { %9008 = vmatprep.subr.bf16.mxu1 %v22228_v48  ;;  %v15713_v34 = vpop.eup %15712  ;;  %v9482_v25 = vadd.f32 1.0, %v15711_v49  ;;  %15734 = vrcp.f32 %v9480_v42  ;;  %v14225_v48 = vadd.f32 %v20794_v17, %v20531_v53  ;;  %v22229_v6 = vcombine.low %v20634_v32, %v20645_v47  ;;  %v20896_v32 = vld [vmem:[%s22087_s3 + $0xff0] sm:$0xff] }
 0x496   :  { %v20877_v45 = vpop.eup %15714  ;;  %v9495_v13 = vadd.f32 1.0, %v15713_v34  ;;  %v9297_v36 = vmul.f32 1.442695, %v9114_v38  ;;  %v9130_v49 = vsub.f32 0.0, %v14223_v3  ;;  %v14210_v28 = vadd.f32 %v8320_v44, %v20504_v20  ;;  %v20905_v34 = vld [vmem:[%s22087_s3 + $0xfb8] sm:$0xff] }
 0x497   :  { %8863 = vmatpush1.bf16.msra.mxu0 %v22229_v6  ;;  %v20884_v7 = vpop.eup %15716  ;;  %15736 = vrcp.f32 %v9482_v25  ;;  %v22231_v27 = vcombine.high %v20681_v19, %v20686_v61  ;;  %v9323_v17 = vmul.f32 1.442695, %v9127_v40  ;;  %v9143_v38 = vsub.f32 0.0, %v14208_v11  ;;  %v20910_v40 = vld [vmem:[%s22087_s3 + $0xff8] sm:$0xff] }
 0x498   :  { %9009 = vmatpush1.bf16.msra.mxu1 %v22230_v57  ;;  %v15719_v47 = vpop.eup %15718  ;;  %15738 = vrcp.f32 %v9495_v13  ;;  %v9145_v3 = vsub.f32 0.0, %v14224_v41  ;;  %v22232_v44 = vcombine.high %v20698_v29, %v20703_v4  ;;  %v9327_v57 = vmul.f32 1.442695, %v9129_v0 }
 0x499   :  { %8864 = vmatprep.subr.bf16.mxu0 %v22231_v27  ;;  %v15721_v12 = vpop.eup %15720  ;;  %15740 = vpow2.f32 %v9295_v22  ;;  %v9144_v55 = vsub.f32 0.0, %v14209_v52  ;;  %v14226_v42 = vadd.f32 %v8466_v46, %v20508_v60  ;;  %v9325_v41 = vmul.f32 1.442695, %v9128_v8 }
 0x49a   :  { %9010 = vmatprep.subr.bf16.mxu1 %v22232_v44  ;;  %v15723_v11 = vpop.eup %15722  ;;  %15742 = vpow2.f32 %v9293_v39  ;;  %v9146_v25 = vsub.f32 0.0, %v14225_v48  ;;  %v22233_v22 = vcombine.low %v20681_v19, %v20686_v61  ;;  %v13412_v46 = vcombine.high %v20875_v51, %v20896_v32 }
 0x49b   :  { %v15725_v0 = vpop.eup %15724  ;;  %15744 = vpow2.f32 %v9297_v36  ;;  %v9329_v52 = vmul.f32 1.442695, %v9130_v49  ;;  %v9159_v13 = vsub.f32 0.0, %v14210_v28  ;;  %v22234_v6 = vcombine.low %v20698_v29, %v20703_v4 }
 0x49c   :  { %8865 = vmatpush1.bf16.msra.mxu0 %v22233_v22  ;;  %v22235_v39 = vcombine.high %v20713_v23, %v20718_v15  ;;  %v13411_v8 = vcombine.low %v20875_v51, %v20896_v32  ;;  %v15727_v19 = vpop.eup %15726  ;;  %15746 = vpow2.f32 %v9323_v17  ;;  %v9355_v61 = vmul.f32 1.442695, %v9143_v38  ;;  %v15420_v51 = vld [vmem:[%s22090_s5 + $0x48] sm:$0xff]  }
 0x49d   :  { %9011 = vmatpush1.bf16.msra.mxu1 %v22234_v6  ;;  %v9359_v48 = vmul.f32 1.442695, %v9145_v3  ;;  %v22236_v36 = vcombine.high %v20741_v26, %v20746_v24  ;;  %v13414_v28 = vcombine.high %v20905_v34, %v20910_v40  ;;  %v15729_v29 = vpop.eup %15728  ;;  %15748 = vpow2.f32 %v9327_v57 }
 0x49e   :  { %8866 = vmatprep.subr.bf16.mxu0 %v22235_v39  ;;  %v9357_v4 = vmul.f32 1.442695, %v9144_v55  ;;  %v9161_v49 = vsub.f32 0.0, %v14226_v42  ;;  %v13694_v27 = vpack.c.bf16 %v15719_v47, %v20877_v45  ;;  %v20931_v44 = vpop.eup %15730  ;;  %15750 = vpow2.f32 %v9325_v41  ;;  %v16095_v41 = vld [vmem:[%s22086_s0 + $0x18] sm:$0xff] }
 0x49f   :  { %9012 = vmatprep.subr.bf16.mxu1 %v22236_v36  ;;  %v9361_v22 = vmul.f32 1.442695, %v9146_v25  ;;  %v20935_v17 = vadd.f32 %v20837_v54, %v20512_v14  ;;  %v22237_v38 = vcombine.low %v20713_v23, %v20718_v15  ;;  %v13702_v3 = vpack.c.bf16 %v15727_v19, %v15723_v11  ;;  %v20940_v6 = vpop.eup %15732 }
 0x4a0   :  { %15752 = vpow2.f32 %v9329_v52  ;;  %v9387_v57 = vmul.f32 1.442695, %v9159_v13  ;;  %v20944_v45 = vadd.f32 %v20844_v9, %v20531_v53  ;;  %v22238_v47 = vcombine.low %v20741_v26, %v20746_v24  ;;  %v20953_v15 = vpop.eup %15734  ;;  %v16093_v9 = vld [vmem:[%s22086_s0 + $0x10] sm:$0xff] }
 0x4a1   :  { %8867 = vmatpush1.bf16.msra.mxu0 %v22237_v38  ;;  %v22239_v54 = vcombine.high %v20759_v31, %v20774_v56  ;;  %v13695_v23 = vpack.c.bf16 %v15721_v12, %v20884_v7  ;;  %15754 = vpow2.f32 %v9355_v61  ;;  %v22240_v55 = vcombine.high %v20801_v16, %v20806_v10  ;;  %v16094_v26 = vld [vmem:[%s22086_s0 + $0x50] sm:$0xff]  ;;  %v20968_v12 = vpop.eup %15736  ;;  %v15417_v38 = vld [vmem:[%s22090_s5 + $0xc0] sm:$0xff]  }
 0x4a2   :  { %9013 = vmatpush1.bf16.msra.mxu1 %v22238_v47  ;;  %v20961_v42 = vmul.bf16 %v16093_v9, %v13694_v27  ;;  %v20966_v24 = vmul.bf16 %v16094_v26, %v13702_v3  ;;  %v13703_v7 = vpack.c.bf16 %v15729_v29, %v15725_v0  ;;  %15756 = vpow2.f32 %v9359_v48  ;;  %v20977_v13 = vpop.eup %15738  ;;  %v15416_v0 = vld [vmem:[%s22090_s5 + $0x40] sm:$0xff]   ;;  %v16096_v48 = vld [vmem:[%s22086_s0 + $0x58] sm:$0xff] }
 0x4a3   :  { %8868 = vmatprep.subr.bf16.mxu0 %v22239_v54  ;;  %9014 = vmatprep.subr.bf16.mxu1 %v22240_v55  ;;  %v9391_v11 = vmul.f32 1.442695, %v9161_v49  ;;  %v20973_v25 = vmul.bf16 %v16095_v41, %v13695_v23  ;;  %v13710_v52 = vpack.c.bf16 %v20953_v15, %v20931_v44  ;;  %15758 = vpow2.f32 %v9357_v4  ;;  %v15741_v29 = vpop.eup %15740  ;;  %v15418_v47 = vld [vmem:[%s22090_s5] sm:$0xff]   ;;  %v15423_v41 = vld [vmem:[%s22090_s5 + $0x88] sm:$0xff]   ;;  %v16100_v44 = vld [vmem:[%s22086_s0 + $0xd8] sm:$0xff] }
 0x4a4   :  { %v22241_v39 = vcombine.low %v20759_v31, %v20774_v56  ;;  %v13484_v19 = vcombine.low %v20961_v42, %v20966_v24  ;;  %v13485_v61 = vcombine.high %v20961_v42, %v20966_v24  ;;  %v20992_v36 = vmul.bf16 %v16096_v48, %v13703_v7  ;;  %v15743_v49 = vpop.eup %15742  ;;  %v15486_v42 = vld [vmem:[%s22090_s5 + $0x208] sm:$0xff]  }
 0x4a5   :  { %15760 = vpow2.f32 %v9361_v22  ;;  %v22242_v56 = vcombine.low %v20801_v16, %v20806_v10  ;;  %v13413_v31 = vcombine.low %v20905_v34, %v20910_v40  ;;  %v13711_v4 = vpack.c.bf16 %v20968_v12, %v20940_v6  ;;  %v15745_v10 = vpop.eup %15744  ;;  %v15434_v6 = vld [vmem:[%s22090_s5 + $0x20] sm:$0xff]   ;;  %v15487_v24 = vld [vmem:[%s22090_s5 + $0x288] sm:$0xff]  }
 0x4a6   :  { %8869 = vmatpush1.bf16.msra.mxu0 %v22241_v39  ;;  %v9497_v27 = vadd.f32 1.0, %v15741_v29  ;;  %15762 = vpow2.f32 %v9387_v57  ;;  %v13486_v22 = vcombine.low %v20973_v25, %v20992_v36  ;;  %v13487_v16 = vcombine.high %v20973_v25, %v20992_v36  ;;  %v15747_v3 = vpop.eup %15746  ;;  %v15424_v39 = vld [vmem:[%s22090_s5 + $0x50] sm:$0xff]   ;;  %v15435_v12 = vld [vmem:[%s22090_s5 + $0xa0] sm:$0xff]  }
 0x4a7   :  { %9015 = vmatpush1.bf16.msra.mxu1 %v22242_v56  ;;  %8870 = vmatprep.subr.bf16.mxu0 %v13412_v46  ;;  %v9496_v46 = vadd.f32 1.0, %v15743_v49  ;;  %15764 = vpow2.f32 %v9391_v11  ;;  %v9160_v34 = vsub.f32 0.0, %v20935_v17  ;;  %v14212_v40 = vadd.f32 %v20846_v59, %v20504_v20  ;;  %v15419_v17 = vld [vmem:[%s22090_s5 + $0x80] sm:$0xff]   ;;  %v15749_v54 = vpop.eup %15748  ;;  %v15488_v25 = vld [vmem:[%s22090_s5 + $0x250] sm:$0xff]  }
 0x4a8   :  { %9016 = vmatprep.subr.bf16.mxu1 %v13414_v28  ;;  %15766 = vrcp.f32 %v9497_v27  ;;  %v9498_v28 = vadd.f32 1.0, %v15745_v10  ;;  %v9162_v57 = vsub.f32 0.0, %v20944_v45  ;;  %v9511_v20 = vadd.f32 1.0, %v15747_v3  ;;  %v15751_v32 = vpop.eup %15750  ;;  %v15421_v45 = vld [vmem:[%s22090_s5 + $0xc8] sm:$0xff]   ;;  %v15425_v27 = vld [vmem:[%s22090_s5 + $0xd0] sm:$0xff]   ;;  %v15428_v3 = vld [vmem:[%s22090_s5 + $0x58] sm:$0xff]  }
 0x4a9   :  { %15768 = vrcp.f32 %v9496_v46  ;;  %v14228_v59 = vadd.f32 %v20857_v1, %v20508_v60  ;;  %v9512_v55 = vadd.f32 1.0, %v15751_v32  ;;  %v9389_v9 = vmul.f32 1.442695, %v9160_v34  ;;  %v15422_v60 = vld [vmem:[%s22090_s5 + $0x8] sm:$0xff]   ;;  %v15430_v32 = vld [vmem:[%s22090_s5 + $0x18] sm:$0xff]   ;;  %v15490_v36 = vld [vmem:[%s22090_s5 + $0x210] sm:$0xff]  }
 0x4aa   :  { %8871 = vmatpush1.bf16.msra.mxu0 %v13411_v8  ;;  %15770 = vrcp.f32 %v9498_v28  ;;  %v9513_v8 = vadd.f32 1.0, %v15749_v54  ;;  %v15753_v23 = vpop.eup %15752  ;;  %v9175_v26 = vsub.f32 0.0, %v14212_v40  ;;  %v9393_v11 = vmul.f32 1.442695, %v9162_v57 }
 0x4ab   :  { %9017 = vmatpush1.bf16.msra.mxu1 %v13413_v31  ;;  %13756 = vmatprep.subr.bf16.mxu0 %v15416_v0  ;;  %15772 = vrcp.f32 %v9511_v20  ;;  %v15755_v1 = vpop.eup %15754  ;;  %v9514_v7 = vadd.f32 1.0, %v15753_v23  ;;  %v9177_v29 = vsub.f32 0.0, %v14228_v59  ;;  %v14213_v56 = vadd.f32 %v20859_v2, %v20512_v14  ;;  %v15433_v23 = vld [vmem:[%s22090_s5 + $0xe0] sm:$0xff]  }
 0x4ac   :  { %13796 = vmatprep.subr.bf16.mxu1 %v15417_v38  ;;  %15774 = vrcp.f32 %v9513_v8  ;;  %v15757_v0 = vpop.eup %15756  ;;  %v9527_v48 = vadd.f32 1.0, %v15755_v1  ;;  %v14229_v49 = vadd.f32 %v20868_v30, %v20531_v53  ;;  %v9419_v46 = vmul.f32 1.442695, %v9175_v26  ;;  %v15427_v53 = vld [vmem:[%s22090_s5 + $0x90] sm:$0xff]   ;;  %v15431_v8 = vld [vmem:[%s22090_s5 + $0x98] sm:$0xff]  }
 0x4ad   :  { %8873 = vmatmul.mubr.bf16.vlgmr.msra.gmra.mrb[64].mxu0 %v18276_v50  ;;  %15776 = vrcp.f32 %v9512_v55  ;;  %v9529_v31 = vadd.f32 1.0, %v15757_v0  ;;  %v9423_v34 = vmul.f32 1.442695, %v9177_v29  ;;  %v9176_v40 = vsub.f32 0.0, %v14213_v56  ;;  %v16097_v55 = vld [vmem:[%s22086_s0 + $0x90] sm:$0xff] }
 0x4ae   :  { %9019 = vmatmul.mubr.bf16.vlgmr.msra.gmra.mrb[64].mxu1 %v18276_v50  ;;  %8882 = vmatprep.mubr.bf16.mxu0 %v18366_v43  ;;  %v15759_v50 = vpop.eup %15758  ;;  %15778 = vrcp.f32 %v9514_v7  ;;  %v9178_v57 = vsub.f32 0.0, %v14229_v49  ;;  %v16098_v26 = vld [vmem:[%s22086_s0 + $0xd0] sm:$0xff]  ;;  %v16099_v7 = vld [vmem:[%s22086_s0 + $0x98] sm:$0xff]  ;;  %v15436_v49 = vld [vmem:[%s22090_s5 + $0x68] sm:$0xff]  }
 0x4af   :  { %9028 = vmatprep.mubr.bf16.mxu1 %v18366_v43  ;;  %13757 = vmatpush3.bf16.msra.mxu0 %v15418_v47  ;;  %v15761_v38 = vpop.eup %15760  ;;  %15780 = vrcp.f32 %v9527_v48  ;;  %v9528_v10 = vadd.f32 1.0, %v15759_v50  ;;  %v15426_v43 = vld [vmem:[%s22090_s5 + $0x10] sm:$0xff]   ;;  %v15429_v47 = vld [vmem:[%s22090_s5 + $0xd8] sm:$0xff]  }
 0x4b0   :  { %13797 = vmatpush3.bf16.msra.mxu1 %v15419_v17  ;;  %13758 = vmatprep.subr.bf16.mxu0 %v15420_v51  ;;  %v15763_v14 = vpop.eup %15762  ;;  %15782 = vrcp.f32 %v9529_v31  ;;  %v9530_v2 = vadd.f32 1.0, %v15761_v38  ;;  %v9421_v51 = vmul.f32 1.442695, %v9176_v40  ;;  %v16102_v40 = vld [vmem:[%s22086_s0 + $0x150] sm:$0xff] }
 0x4b1   :  { %13798 = vmatprep.subr.bf16.mxu1 %v15421_v45  ;;  %v21055_v30 = vpop.eup %15764  ;;  %15784 = vrcp.f32 %v9528_v10  ;;  %v9543_v31 = vadd.f32 1.0, %v15763_v14  ;;  %v15438_v14 = vld [vmem:[%s22090_s5 + $0x28] sm:$0xff]  }
 0x4b2   :  { %v15767_v28 = vpop.eup %15766  ;;  %15786 = vrcp.f32 %v9530_v2  ;;  %v15439_v2 = vld [vmem:[%s22090_s5 + $0xa8] sm:$0xff]  }
 0x4b3   :  { %13759 = vmatpush3.bf16.msra.mxu0 %v15422_v60  ;;  %v15769_v17 = vpop.eup %15768  ;;  %15788 = vpow2.f32 %v9389_v9  ;;  %v21090_v9 = vmul.bf16 %v16097_v55, %v13710_v52 }
 0x4b4   :  { %13799 = vmatpush3.bf16.msra.mxu1 %v15423_v41  ;;  %13760 = vmatprep.subr.bf16.mxu0 %v15424_v39  ;;  %v15771_v54 = vpop.eup %15770  ;;  %v13718_v20 = vpack.c.bf16 %v15769_v17, %v20977_v13  ;;  %15790 = vpow2.f32 %v9393_v11  ;;  %v9425_v13 = vmul.f32 1.442695, %v9178_v57  ;;  %v21103_v11 = vmul.bf16 %v16099_v7, %v13711_v4  ;;  %v15442_v57 = vld [vmem:[%s22090_s5 + $0x30] sm:$0xff]   ;;  %v15445_v7 = vld [vmem:[%s22090_s5 + $0xf8] sm:$0xff]  }
 0x4b5   :  { %8883 = vmatmul.mubr.bf16.gmra.mrb[68].mxu0 %v18348_v37  ;;  %13800 = vmatprep.subr.bf16.mxu1 %v15425_v27  ;;  %v21067_v59 = vpop.eup %15772  ;;  %15792 = vpow2.f32 %v9419_v46  ;;  %v15437_v27 = vld [vmem:[%s22090_s5 + $0xe8] sm:$0xff]  }
 0x4b6   :  { %9029 = vmatmul.mubr.bf16.gmra.mrb[68].mxu1 %v18348_v37  ;;  %8892 = vmatprep.mubr.bf16.mxu0 %v18431_v33  ;;  %v13719_v37 = vpack.c.bf16 %v15771_v54, %v15767_v28  ;;  %v21076_v45 = vpop.eup %15774  ;;  %v21095_v60 = vmul.bf16 %v16098_v26, %v13718_v20  ;;  %15794 = vpow2.f32 %v9423_v34  ;;  %v16104_v54 = vld [vmem:[%s22086_s0 + $0x158] sm:$0xff] }
 0x4b7   :  { %9038 = vmatprep.mubr.bf16.mxu1 %v18431_v33  ;;  %13761 = vmatpush3.bf16.msra.mxu0 %v15426_v43  ;;  %v15432_v33 = vld [vmem:[%s22090_s5 + $0x60] sm:$0xff]   ;;  %v15777_v1 = vpop.eup %15776  ;;  %15796 = vpow2.f32 %v9421_v51  ;;  %v9545_v43 = vadd.f32 1.0, %v21055_v30  ;;  %v16101_v30 = vld [vmem:[%s22086_s0 + $0x110] sm:$0xff] }
 0x4b8   :  { %13801 = vmatpush3.bf16.msra.mxu1 %v15427_v53  ;;  %13762 = vmatprep.subr.bf16.mxu0 %v15428_v3  ;;  %v21108_v15 = vmul.bf16 %v16100_v44, %v13719_v37  ;;  %v15779_v52 = vpop.eup %15778  ;;  %v13501_v41 = vcombine.high %v21090_v9, %v21095_v60  ;;  %v13500_v39 = vcombine.low %v21090_v9, %v21095_v60  ;;  %15798 = vpow2.f32 %v9425_v13  ;;  %v15494_v9 = vld [vmem:[%s22090_s5 + $0x218] sm:$0xff]  }
 0x4b9   :  { %13802 = vmatprep.subr.bf16.mxu1 %v15429_v47  ;;  %v13726_v0 = vpack.c.bf16 %v15777_v1, %v21067_v59  ;;  %v15781_v48 = vpop.eup %15780  ;;  %v13727_v56 = vpack.c.bf16 %v15779_v52, %v21076_v45  ;;  %v16103_v47 = vld [vmem:[%s22086_s0 + $0x118] sm:$0xff]  ;;  %15800 = vrcp.f32 %v9543_v31 }
 0x4ba   :  { %v13503_v4 = vcombine.high %v21103_v11, %v21108_v15  ;;  %v13502_v29 = vcombine.low %v21103_v11, %v21108_v15  ;;  %v15783_v50 = vpop.eup %15782  ;;  %15802 = vrcp.f32 %v9545_v43  ;;  %v15453_v43 = vld [vmem:[%s22090_s5 + $0x1c8] sm:$0xff]   ;;  %v15495_v60 = vld [vmem:[%s22090_s5 + $0x298] sm:$0xff]   ;;  %v15496_v11 = vld [vmem:[%s22090_s5 + $0x260] sm:$0xff]  }
 0x4bb   :  { %13763 = vmatpush3.bf16.msra.mxu0 %v15430_v32  ;;  %v15785_v38 = vpop.eup %15784  ;;  %v21152_v34 = vmul.bf16 %v16101_v30, %v13726_v0  ;;  %v21165_v17 = vmul.bf16 %v16103_v47, %v13727_v56  ;;  %v15443_v32 = vld [vmem:[%s22090_s5 + $0xb0] sm:$0xff]   ;;  %v15446_v0 = vld [vmem:[%s22090_s5 + $0x38] sm:$0xff]   ;;  %v22246_v30 = vcombine.low %v20006_v62, %v20011_v35  ;;  %v15455_v47 = vld [vmem:[%s22090_s5 + $0x188] sm:$0xff]  }
 0x4bc   :  { %13803 = vmatpush3.bf16.msra.mxu1 %v15431_v8  ;;  %13764 = vmatprep.subr.bf16.mxu0 %v15432_v33  ;;  %v15787_v10 = vpop.eup %15786  ;;  %v13734_v46 = vpack.c.bf16 %v15785_v38, %v15781_v48  ;;  %v15444_v33 = vld [vmem:[%s22090_s5 + $0x78] sm:$0xff]   ;;  %v15451_v38 = vld [vmem:[%s22090_s5 + $0x180] sm:$0xff]   ;;  %v22271_v15 = vld [vmem:[#allocation4_spill] sm:$0xff] }
 0x4bd   :  { %8893 = vmatmul.mubr.bf16.gmra.mrb[72].mxu0 %v18423_v5  ;;  %13804 = vmatprep.subr.bf16.mxu1 %v15433_v23  ;;  %v13735_v53 = vpack.c.bf16 %v15787_v10, %v15783_v50  ;;  %v15789_v28 = vpop.eup %15788  ;;  %v15447_v56 = vld [vmem:[%s22090_s5 + $0xb8] sm:$0xff]   ;;  %v15448_v50 = vld [vmem:[%s22090_s5 + $0x140] sm:$0xff]   ;;  %v15452_v10 = vld [vmem:[%s22090_s5 + $0x148] sm:$0xff]  }
 0x4be   :  { %9039 = vmatmul.mubr.bf16.gmra.mrb[72].mxu1 %v18423_v5  ;;  %8902 = vmatprep.mubr.bf16.mxu0 %v18487_v21  ;;  %v15440_v5 = vld [vmem:[%s22090_s5 + $0x70] sm:$0xff]   ;;  %v21157_v3 = vmul.bf16 %v16102_v40, %v13734_v46  ;;  %v15791_v59 = vpop.eup %15790  ;;  %v9544_v51 = vadd.f32 1.0, %v15789_v28  ;;  %v22248_v28 = vld [vmem:[#allocation15_spill] sm:$0xff] }
 0x4bf   :  { %9048 = vmatprep.mubr.bf16.mxu1 %v18487_v21  ;;  %13765 = vmatpush3.bf16.msra.mxu0 %v15434_v6  ;;  %v15441_v21 = vld [vmem:[%s22090_s5 + $0xf0] sm:$0xff]   ;;  %v21170_v20 = vmul.bf16 %v16104_v54, %v13735_v53  ;;  %v15793_v45 = vpop.eup %15792  ;;  %v9546_v13 = vadd.f32 1.0, %v15791_v59  ;;  %v22245_v53 = vcombine.low %v19939_v63, %v19944_v58 }
 0x4c0   :  { %13805 = vmatpush3.bf16.msra.mxu1 %v15435_v12  ;;  %13766 = vmatprep.subr.bf16.mxu0 %v15436_v49  ;;  %v13517_v8 = vcombine.high %v21152_v34, %v21157_v3  ;;  %v13516_v37 = vcombine.low %v21152_v34, %v21157_v3  ;;  %v15795_v26 = vpop.eup %15794  ;;  %15804 = vrcp.f32 %v9544_v51  ;;  %v9559_v1 = vadd.f32 1.0, %v15793_v45  ;;  %v22247_v40 = vld [vmem:[#allocation16_spill] sm:$0xff]  ;;  %v22250_v59 = vld [vmem:[#allocation17_spill] sm:$0xff]  ;;  %v22251_v51 = vld [vmem:[#allocation18_spill] sm:$0xff] }
 0x4c1   :  { %13806 = vmatprep.subr.bf16.mxu1 %v15437_v27  ;;  %v13519_v23 = vcombine.high %v21165_v17, %v21170_v20  ;;  %v13518_v55 = vcombine.low %v21165_v17, %v21170_v20  ;;  %v15797_v44 = vpop.eup %15796  ;;  %15806 = vrcp.f32 %v9546_v13  ;;  %v9561_v52 = vadd.f32 1.0, %v15795_v26  ;;  %v15450_v27 = vld [vmem:[%s22090_s5 + $0x100] sm:$0xff]  }
 0x4c2   :  { %v15799_v48 = vpop.eup %15798  ;;  %15808 = vrcp.f32 %v9559_v1  ;;  %v9560_v6 = vadd.f32 1.0, %v15797_v44  ;;  %v22243_v12 = vcombine.high %v19939_v63, %v19944_v58  ;;  %v22244_v49 = vcombine.high %v20006_v62, %v20011_v35  ;;  %v15456_v63 = vld [vmem:[%s22090_s5 + $0x150] sm:$0xff]  }
 0x4c3   :  { %13767 = vmatpush3.bf16.msra.mxu0 %v15438_v14  ;;  %15810 = vrcp.f32 %v9561_v52  ;;  %v9562_v31 = vadd.f32 1.0, %v15799_v48  ;;  %v15801_v46 = vpop.eup %15800  ;;  %v15457_v62 = vld [vmem:[%s22090_s5 + $0x1d0] sm:$0xff]  }
 0x4c4   :  { %13807 = vmatpush3.bf16.msra.mxu1 %v15439_v2  ;;  %13768 = vmatprep.subr.bf16.mxu0 %v15440_v5  ;;  %15812 = vrcp.f32 %v9560_v6  ;;  %v15803_v14 = vpop.eup %15802  ;;  %v15454_v5 = vld [vmem:[%s22090_s5 + $0x108] sm:$0xff]   ;;  %v15459_v1 = vld [vmem:[%s22090_s5 + $0x190] sm:$0xff]  }
 0x4c5   :  { %8903 = vmatmul.mubr.bf16.gmra.mrb[76].mxu0 %v18472_v18  ;;  %13808 = vmatprep.subr.bf16.mxu1 %v15441_v21  ;;  %15814 = vrcp.f32 %v9562_v31  ;;  %v16106_v6 = vld [vmem:[%s22086_s0 + $0x1d0] sm:$0xff]  ;;  %v16107_v31 = vld [vmem:[%s22086_s0 + $0x198] sm:$0xff] }
 0x4c6   :  { %9049 = vmatmul.mubr.bf16.gmra.mrb[76].mxu1 %v18472_v18  ;;  %11530 = vmatprep.mubr.bf16.mxu0 %v22243_v12  ;;  %v15449_v18 = vld [vmem:[%s22090_s5 + $0x1c0] sm:$0xff]  }
 0x4c7   :  { %13769 = vmatpush3.bf16.msra.mxu0 %v15442_v57  ;;  %11595 = vmatprep.mubr.bf16.mxu1 %v22244_v49  ;;  %v22249_v57 = vcombine.high %v22247_v40, %v22248_v28 }
 0x4c8   :  { %13809 = vmatpush3.bf16.msra.mxu1 %v15443_v32  ;;  %13770 = vmatprep.subr.bf16.mxu0 %v15444_v33  ;;  %v22252_v32 = vcombine.high %v22250_v59, %v22251_v51  ;;  %v15458_v33 = vld [vmem:[%s22090_s5 + $0x110] sm:$0xff]  }
 0x4c9   :  { %13810 = vmatprep.subr.bf16.mxu1 %v15445_v7  ;;  %v15460_v7 = vld [vmem:[%s22090_s5 + $0x158] sm:$0xff]  }
 0x4ca   :  { %v15805_v2 = vpop.eup %15804 }
 0x4cb   :  { %13771 = vmatpush3.bf16.msra.mxu0 %v15446_v0  ;;  %v15807_v21 = vpop.eup %15806  ;;  %v13742_v58 = vpack.c.bf16 %v15805_v2, %v15801_v46  ;;  %v16105_v0 = vld [vmem:[%s22086_s0 + $0x190] sm:$0xff] }
 0x4cc   :  { %13811 = vmatpush3.bf16.msra.mxu1 %v15447_v56  ;;  %13836 = vmatprep.subr.bf16.mxu0 %v15448_v50  ;;  %v15809_v54 = vpop.eup %15808  ;;  %v13743_v35 = vpack.c.bf16 %v15807_v21, %v15803_v14  ;;  %v22253_v56 = vcombine.low %v22247_v40, %v22248_v28  ;;  %v15461_v50 = vld [vmem:[%s22090_s5 + $0x1d8] sm:$0xff]   ;;  %v22256_v46 = vld [vmem:[#allocation20_spill] sm:$0xff] }
 0x4cd   :  { %13876 = vmatprep.subr.bf16.mxu1 %v15449_v18  ;;  %v15811_v45 = vpop.eup %15810  ;;  %v21257_v48 = vmul.bf16 %v16105_v0, %v13742_v58  ;;  %v16108_v18 = vld [vmem:[%s22086_s0 + $0x1d8] sm:$0xff]  ;;  %v15466_v58 = vld [vmem:[%s22090_s5 + $0x120] sm:$0xff]   ;;  %v15473_v0 = vld [vmem:[%s22090_s5 + $0x1f0] sm:$0xff]  }
 0x4ce   :  { %11531 = vmatmul.mubr.bf16.vlgmr.msra.gmra.mrb[80].mxu0 %v22245_v53  ;;  %v15813_v13 = vpop.eup %15812  ;;  %v21273_v49 = vmul.bf16 %v16107_v31, %v13743_v35  ;;  %v22258_v53 = vld [vmem:[#allocation21_spill] sm:$0xff]  ;;  %v22263_v35 = vld [vmem:[#allocation23_spill] sm:$0xff] }
 0x4cf   :  { %11596 = vmatmul.mubr.bf16.vlgmr.msra.gmra.mrb[80].mxu1 %v22246_v30  ;;  %11538 = vmatprep.mubr.bf16.mxu0 %v22249_v57  ;;  %v15815_v26 = vpop.eup %15814  ;;  %v13750_v44 = vpack.c.bf16 %v15813_v13, %v15809_v54  ;;  %v15462_v30 = vld [vmem:[%s22090_s5 + $0x118] sm:$0xff]   ;;  %v15467_v54 = vld [vmem:[%s22090_s5 + $0x1a0] sm:$0xff]  }
 0x4d0   :  { %11603 = vmatprep.mubr.bf16.mxu1 %v22252_v32  ;;  %13837 = vmatpush3.bf16.msra.mxu0 %v15450_v27  ;;  %v13751_v52 = vpack.c.bf16 %v15815_v26, %v15811_v45  ;;  %v15463_v57 = vld [vmem:[%s22090_s5 + $0x198] sm:$0xff]   ;;  %v15469_v32 = vld [vmem:[%s22090_s5 + $0x1e8] sm:$0xff]  }
 0x4d1   :  { %13877 = vmatpush3.bf16.msra.mxu1 %v15451_v38  ;;  %13838 = vmatprep.subr.bf16.mxu0 %v15452_v10  ;;  %v21262_v12 = vmul.bf16 %v16106_v6, %v13750_v44  ;;  %v22254_v38 = vcombine.low %v22250_v59, %v22251_v51  ;;  %v22255_v10 = vld [vmem:[#allocation19_spill] sm:$0xff]  ;;  %v22264_v45 = vld [vmem:[#allocation24_spill] sm:$0xff]  ;;  %v22267_v26 = vld [vmem:[#allocation26_spill] sm:$0xff] }
 0x4d2   :  { %13878 = vmatprep.subr.bf16.mxu1 %v15453_v43  ;;  %v21278_v27 = vmul.bf16 %v16108_v18, %v13751_v52  ;;  %v22257_v43 = vcombine.high %v22255_v10, %v22256_v46  ;;  %v15468_v59 = vld [vmem:[%s22090_s5 + $0x168] sm:$0xff]   ;;  %v22261_v51 = vcombine.low %v22255_v10, %v22256_v46  ;;  %v22265_v13 = vcombine.high %v22263_v35, %v22264_v45  ;;  %v15472_v52 = vld [vmem:[%s22090_s5 + $0x170] sm:$0xff]   ;;  %v15477_v18 = vld [vmem:[%s22090_s5 + $0x1f8] sm:$0xff]  }
 0x4d3   :  { %v13533_v14 = vcombine.high %v21257_v48, %v21262_v12  ;;  %v13532_v2 = vcombine.low %v21257_v48, %v21262_v12  ;;  %v15471_v44 = vld [vmem:[%s22090_s5 + $0x1a8] sm:$0xff]   ;;  %v15474_v6 = vld [vmem:[%s22090_s5 + $0x130] sm:$0xff]   ;;  %v22269_v31 = vcombine.low %v22263_v35, %v22264_v45  ;;  %v15478_v10 = vld [vmem:[%s22090_s5 + $0x138] sm:$0xff]  }
 0x4d4   :  { %13839 = vmatpush3.bf16.msra.mxu0 %v15454_v5  ;;  %v22259_v5 = vld [vmem:[#allocation22_spill] sm:$0xff]  ;;  %v13535_v40 = vcombine.high %v21273_v49, %v21278_v27  ;;  %v13534_v28 = vcombine.low %v21273_v49, %v21278_v27 }
 0x4d5   :  { %13879 = vmatpush3.bf16.msra.mxu1 %v15455_v47  ;;  %13840 = vmatprep.subr.bf16.mxu0 %v15456_v63  ;;  %v22260_v21 = vcombine.high %v22258_v53, %v22259_v5  ;;  %v15464_v47 = vld [vmem:[%s22090_s5 + $0x160] sm:$0xff]   ;;  %v15479_v46 = vld [vmem:[%s22090_s5 + $0x1b8] sm:$0xff]  }
 0x4d6   :  { %11539 = vmatmul.mubr.bf16.gmra.mrb[84].mxu0 %v22253_v56  ;;  %13880 = vmatprep.subr.bf16.mxu1 %v15457_v62  ;;  %v15465_v63 = vld [vmem:[%s22090_s5 + $0x1e0] sm:$0xff]   ;;  %v22262_v62 = vcombine.low %v22258_v53, %v22259_v5  ;;  %v15475_v56 = vld [vmem:[%s22090_s5 + $0x1b0] sm:$0xff]   ;;  %v15484_v5 = vld [vmem:[%s22090_s5 + $0x248] sm:$0xff]  }
 0x4d7   :  { %11604 = vmatmul.mubr.bf16.gmra.mrb[84].mxu1 %v22254_v38  ;;  %11546 = vmatprep.mubr.bf16.mxu0 %v22257_v43  ;;  %v15480_v43 = vld [vmem:[%s22090_s5 + $0x240] sm:$0xff]   ;;  %v15510_v49 = vld [vmem:[%s22090_s5 + $0x238] sm:$0xff]  }
 0x4d8   :  { %11611 = vmatprep.mubr.bf16.mxu1 %v22260_v21  ;;  %13841 = vmatpush3.bf16.msra.mxu0 %v15458_v33  ;;  %v22266_v33 = vld [vmem:[#allocation25_spill] sm:$0xff]  ;;  %v15483_v53 = vld [vmem:[%s22090_s5 + $0x280] sm:$0xff]   ;;  %v15485_v21 = vld [vmem:[%s22090_s5 + $0x2c8] sm:$0xff]  }
 0x4d9   :  { %13881 = vmatpush3.bf16.msra.mxu1 %v15459_v1  ;;  %13842 = vmatprep.subr.bf16.mxu0 %v15460_v7  ;;  %v22268_v1 = vcombine.high %v22266_v33, %v22267_v26  ;;  %v15470_v7 = vld [vmem:[%s22090_s5 + $0x128] sm:$0xff]   ;;  %v22270_v38 = vcombine.low %v22266_v33, %v22267_v26 }
 0x4da   :  { %13882 = vmatprep.subr.bf16.mxu1 %v15461_v50  ;;  %v15476_v50 = vld [vmem:[%s22090_s5 + $0x178] sm:$0xff]  }
 0x4dc   :  { %13843 = vmatpush3.bf16.msra.mxu0 %v15462_v30  ;;  %v21441_v30 = vld [vmem:[%s22089_s4 + $0x8] sm:$0xff] }
 0x4dd   :  { %13883 = vmatpush3.bf16.msra.mxu1 %v15463_v57  ;;  %13844 = vmatprep.subr.bf16.mxu0 %v15464_v47  ;;  %v22273_v57 = vld [vmem:[#allocation6_spill] sm:$0xff] }
 0x4de   :  { %11547 = vmatmul.mubr.bf16.gmra.mrb[88].mxu0 %v22261_v51  ;;  %13884 = vmatprep.subr.bf16.mxu1 %v15465_v63  ;;  %v21468_v47 = vrot.slane %v21441_v30, %v22273_v57  ;;  %v22274_v63 = vld [vmem:[#allocation7_spill] sm:$0xff] }
 0x4df   :  { %11612 = vmatmul.mubr.bf16.gmra.mrb[88].mxu1 %v22262_v62  ;;  %11554 = vmatprep.mubr.bf16.mxu0 %v22265_v13  ;;  %v15499_v51 = vld [vmem:[%s22090_s5 + $0x2a0] sm:$0xff]   ;;  %v15501_v13 = vld [vmem:[%s22090_s5 + $0x2e8] sm:$0xff]  }
 0x4e0   :  { %11619 = vmatprep.mubr.bf16.mxu1 %v22268_v1  ;;  %13845 = vmatpush3.bf16.msra.mxu0 %v15466_v58  ;;  %v21472_v58 = vrot.slane %v21441_v30, %v22274_v63 }
 0x4e1   :  { %13885 = vmatpush3.bf16.msra.mxu1 %v15467_v54  ;;  %13846 = vmatprep.subr.bf16.mxu0 %v15468_v59  ;;  %v15498_v54 = vld [vmem:[%s22090_s5 + $0x220] sm:$0xff]  }
 0x4e2   :  { %13886 = vmatprep.subr.bf16.mxu1 %v15469_v32  ;;  %v15500_v32 = vld [vmem:[%s22090_s5 + $0x268] sm:$0xff]  }
 0x4e4   :  { %13847 = vmatpush3.bf16.msra.mxu0 %v15470_v7 }
 0x4e5   :  { %13887 = vmatpush3.bf16.msra.mxu1 %v15471_v44  ;;  %13848 = vmatprep.subr.bf16.mxu0 %v15472_v52 }
 0x4e6   :  { %11555 = vmatmul.mubr.bf16.gmra.mrb[92].mxu0 %v22269_v31  ;;  %13888 = vmatprep.subr.bf16.mxu1 %v15473_v0 }
 0x4e7   :  { %11620 = vmatmul.mubr.bf16.gmra.mrb[92].mxu1 %v22270_v38  ;;  %11660 = vmatprep.mubr.bf16.mxu0 %v13485_v61  ;;  %v15481_v61 = vld [vmem:[%s22090_s5 + $0x2c0] sm:$0xff]  }
 0x4e8   :  { %13849 = vmatpush3.bf16.msra.mxu0 %v15474_v6  ;;  %11725 = vmatprep.mubr.bf16.mxu1 %v13487_v16  ;;  %v15482_v16 = vld [vmem:[%s22090_s5 + $0x200] sm:$0xff]  }
 0x4e9   :  { %13889 = vmatpush3.bf16.msra.mxu1 %v15475_v56  ;;  %13850 = vmatprep.subr.bf16.mxu0 %v15476_v50  ;;  %v15504_v56 = vld [vmem:[%s22090_s5 + $0x270] sm:$0xff]  }
 0x4ea   :  { %13890 = vmatprep.subr.bf16.mxu1 %v15477_v18 }
 0x4ec   :  { %13851 = vmatpush3.bf16.msra.mxu0 %v15478_v10  ;;  %v15505_v10 = vld [vmem:[%s22090_s5 + $0x2f0] sm:$0xff]  }
 0x4ed   :  { %13891 = vmatpush3.bf16.msra.mxu1 %v15479_v46  ;;  %13916 = vmatprep.subr.bf16.mxu0 %v15480_v43 }
 0x4ee   :  { %13956 = vmatprep.subr.bf16.mxu1 %v15481_v61 }
 0x4ef   :  { %11661 = vmatmul.mubr.bf16.vlgmr.msra.gmra.mrb[96].mxu0 %v13484_v19  ;;  %v15489_v19 = vld [vmem:[%s22090_s5 + $0x2d0] sm:$0xff]  }
 0x4f0   :  { %11726 = vmatmul.mubr.bf16.vlgmr.msra.gmra.mrb[96].mxu1 %v13486_v22  ;;  %11668 = vmatprep.mubr.bf16.mxu0 %v13501_v41  ;;  %v15491_v22 = vld [vmem:[%s22090_s5 + $0x290] sm:$0xff]   ;;  %v15492_v41 = vld [vmem:[%s22090_s5 + $0x258] sm:$0xff]  }
 0x4f1   :  { %11733 = vmatprep.mubr.bf16.mxu1 %v13503_v4  ;;  %13917 = vmatpush3.bf16.msra.mxu0 %v15482_v16  ;;  %v15493_v4 = vld [vmem:[%s22090_s5 + $0x2d8] sm:$0xff]  }
 0x4f2   :  { %13957 = vmatpush3.bf16.msra.mxu1 %v15483_v53  ;;  %13918 = vmatprep.subr.bf16.mxu0 %v15484_v5 }
 0x4f3   :  { %13958 = vmatprep.subr.bf16.mxu1 %v15485_v21 }
 0x4f5   :  { %13919 = vmatpush3.bf16.msra.mxu0 %v15486_v42  ;;  %v15506_v42 = vld [vmem:[%s22090_s5 + $0x230] sm:$0xff]  }
 0x4f6   :  { %13959 = vmatpush3.bf16.msra.mxu1 %v15487_v24  ;;  %13920 = vmatprep.subr.bf16.mxu0 %v15488_v25 }
 0x4f7   :  { %11669 = vmatmul.mubr.bf16.gmra.mrb[100].mxu0 %v13500_v39  ;;  %13960 = vmatprep.subr.bf16.mxu1 %v15489_v19  ;;  %v21457_v39 = vrot.slane %v21441_v30, %v22271_v15  ;;  %v15507_v19 = vld [vmem:[%s22090_s5 + $0x2b0] sm:$0xff]  }
 0x4f8   :  { %11734 = vmatmul.mubr.bf16.gmra.mrb[100].mxu1 %v13502_v29  ;;  %11676 = vmatprep.mubr.bf16.mxu0 %v13517_v8  ;;  %v15497_v29 = vld [vmem:[%s22090_s5 + $0x2e0] sm:$0xff]   ;;  %v22272_v8 = vld [vmem:[#allocation5_spill] sm:$0xff] }
 0x4f9   :  { %11741 = vmatprep.mubr.bf16.mxu1 %v13519_v23  ;;  %13921 = vmatpush3.bf16.msra.mxu0 %v15490_v36  ;;  %v21464_v23 = vrot.slane %v21441_v30, %v22272_v8  ;;  %v15508_v36 = vld [vmem:[%s22090_s5 + $0x278] sm:$0xff]  }
 0x4fa   :  { %13961 = vmatpush3.bf16.msra.mxu1 %v15491_v22  ;;  %13922 = vmatprep.subr.bf16.mxu0 %v15492_v41  ;;  %v8582_v59 = vpop.f32.mrb[48].mxu0 }
 0x4fb   :  { %13962 = vmatprep.subr.bf16.mxu1 %v15493_v4  ;;  %v14230_v62 = vadd.f32 %v8582_v59, %v21457_v39  ;;  %v8728_v35 = vpop.f32.mrb[48].mxu1  ;;  %v8584_v45 = vpop.f32.mrb[49].mxu0 }
 0x4fc   :  { %v14246_v34 = vadd.f32 %v8728_v35, %v21464_v23  ;;  %v14231_v3 = vadd.f32 %v8584_v45, %v21468_v47  ;;  %v8586_v33 = vpop.f32.mrb[50].mxu0 }
 0x4fd   :  { %13923 = vmatpush3.bf16.msra.mxu0 %v15494_v9  ;;  %v9067_v26 = vsub.f32 0.0, %v14230_v62  ;;  %v14232_v17 = vadd.f32 %v8586_v33, %v21457_v39 }
 0x4fe   :  { %13963 = vmatpush3.bf16.msra.mxu1 %v15495_v60  ;;  %13924 = vmatprep.subr.bf16.mxu0 %v15496_v11  ;;  %v9069_v7 = vsub.f32 0.0, %v14246_v34  ;;  %v9068_v44 = vsub.f32 0.0, %v14231_v3  ;;  %v15509_v60 = vld [vmem:[%s22090_s5 + $0x2f8] sm:$0xff]  }
 0x4ff   :  { %11677 = vmatmul.mubr.bf16.gmra.mrb[104].mxu0 %v13516_v37  ;;  %13964 = vmatprep.subr.bf16.mxu1 %v15497_v29  ;;  %v8730_v37 = vpop.f32.mrb[49].mxu1  ;;  %v9203_v50 = vmul.f32 1.442695, %v9067_v26  ;;  %v9083_v18 = vsub.f32 0.0, %v14232_v17 }
 0x500   :  { %11742 = vmatmul.mubr.bf16.gmra.mrb[104].mxu1 %v13518_v55  ;;  %11684 = vmatprep.mubr.bf16.mxu0 %v13533_v14  ;;  %v14247_v1 = vadd.f32 %v8730_v37, %v21472_v58  ;;  %v8732_v20 = vpop.f32.mrb[50].mxu1  ;;  %v8588_v55 = vpop.f32.mrb[51].mxu0  ;;  %v15502_v14 = vld [vmem:[%s22090_s5 + $0x228] sm:$0xff]   ;;  %v9207_v46 = vmul.f32 1.442695, %v9069_v7 }
 0x501   :  { %11749 = vmatprep.mubr.bf16.mxu1 %v13535_v40  ;;  %13925 = vmatpush3.bf16.msra.mxu0 %v15498_v54  ;;  %v14248_v52 = vadd.f32 %v8732_v20, %v21464_v23  ;;  %v14233_v0 = vadd.f32 %v8588_v55, %v21468_v47  ;;  %v8734_v6 = vpop.f32.mrb[51].mxu1  ;;  %v15503_v40 = vld [vmem:[%s22090_s5 + $0x2a8] sm:$0xff]   ;;  %v9205_v43 = vmul.f32 1.442695, %v9068_v44  ;;  %15816 = vpow2.f32 %v9203_v50 }
 0x502   :  { %13965 = vmatpush3.bf16.msra.mxu1 %v15499_v51  ;;  %13926 = vmatprep.subr.bf16.mxu0 %v15500_v32  ;;  %v9070_v31 = vsub.f32 0.0, %v14247_v1  ;;  %v14249_v38 = vadd.f32 %v8734_v6, %v21472_v58  ;;  %v9235_v5 = vmul.f32 1.442695, %v9083_v18  ;;  %15818 = vpow2.f32 %v9207_v46  ;;  %v8592_v25 = vpop.f32.mrb[52].mxu0  ;;  %v15511_v51 = vld [vmem:[%s22090_s5 + $0x2b8] sm:$0xff]  }
 0x503   :  { %13966 = vmatprep.subr.bf16.mxu1 %v15501_v13  ;;  %v9085_v61 = vsub.f32 0.0, %v14248_v52  ;;  %v9084_v16 = vsub.f32 0.0, %v14233_v0  ;;  %15820 = vpow2.f32 %v9205_v43  ;;  %v14234_v41 = vadd.f32 %v8592_v25, %v21457_v39  ;;  %v8738_v4 = vpop.f32.mrb[52].mxu1  ;;  %v8594_v9 = vpop.f32.mrb[53].mxu0 }
 0x504   :  { %v9209_v53 = vmul.f32 1.442695, %v9070_v31  ;;  %v9086_v21 = vsub.f32 0.0, %v14249_v38  ;;  %v14250_v15 = vadd.f32 %v8738_v4, %v21464_v23  ;;  %v14235_v48 = vadd.f32 %v8594_v9, %v21468_v47  ;;  %v8740_v12 = vpop.f32.mrb[53].mxu1 }
 0x505   :  { %13927 = vmatpush3.bf16.msra.mxu0 %v15502_v14  ;;  %v9239_v24 = vmul.f32 1.442695, %v9085_v61  ;;  %v9237_v22 = vmul.f32 1.442695, %v9084_v16  ;;  %v9099_v29 = vsub.f32 0.0, %v14234_v41  ;;  %v14251_v8 = vadd.f32 %v8740_v12, %v21472_v58  ;;  %v8742_v63 = vpop.f32.mrb[54].mxu1 }
 0x506   :  { %13967 = vmatpush3.bf16.msra.mxu1 %v15503_v40  ;;  %13928 = vmatprep.subr.bf16.mxu0 %v15504_v56  ;;  %15822 = vpow2.f32 %v9209_v53  ;;  %v9241_v11 = vmul.f32 1.442695, %v9086_v21  ;;  %v9101_v27 = vsub.f32 0.0, %v14250_v15  ;;  %v8744_v59 = vpop.f32.mrb[55].mxu1  ;;  %v14252_v26 = vadd.f32 %v8742_v63, %v21464_v23 }
 0x507   :  { %11685 = vmatmul.mubr.bf16.gmra.mrb[108].mxu0 %v13532_v2  ;;  %13968 = vmatprep.subr.bf16.mxu1 %v15505_v10  ;;  %v8596_v2 = vpop.f32.mrb[54].mxu0  ;;  %15824 = vpow2.f32 %v9235_v5  ;;  %v9267_v32 = vmul.f32 1.442695, %v9099_v29  ;;  %v9102_v62 = vsub.f32 0.0, %v14251_v8  ;;  %v14253_v31 = vadd.f32 %v8744_v59, %v21472_v58 }
 0x508   :  { %11750 = vmatmul.mubr.bf16.gmra.mrb[108].mxu1 %v13534_v28  ;;  %v14236_v57 = vadd.f32 %v8596_v2, %v21457_v39  ;;  %v8598_v54 = vpop.f32.mrb[55].mxu0  ;;  %15826 = vpow2.f32 %v9239_v24  ;;  %v9100_v28 = vsub.f32 0.0, %v14235_v48  ;;  %v9271_v45 = vmul.f32 1.442695, %v9101_v27 }
 0x509   :  { %13929 = vmatpush3.bf16.msra.mxu0 %v15506_v42  ;;  %15828 = vpow2.f32 %v9237_v22  ;;  %v9273_v34 = vmul.f32 1.442695, %v9102_v62  ;;  %v14237_v14 = vadd.f32 %v8598_v54, %v21468_v47  ;;  %v9117_v46 = vsub.f32 0.0, %v14252_v26 }
 0x50a   :  { %13969 = vmatpush3.bf16.msra.mxu1 %v15507_v19  ;;  %13930 = vmatprep.subr.bf16.mxu0 %v15508_v36  ;;  %v9115_v35 = vsub.f32 0.0, %v14236_v57  ;;  %15830 = vpow2.f32 %v9241_v11  ;;  %v9269_v13 = vmul.f32 1.442695, %v9100_v28  ;;  %v8602_v37 = vpop.f32.mrb[56].mxu0  ;;  %v9118_v25 = vsub.f32 0.0, %v14253_v31 }
 0x50b   :  { %13970 = vmatprep.subr.bf16.mxu1 %v15509_v60  ;;  %15832 = vpow2.f32 %v9267_v32  ;;  %v15817_v33 = vpop.eup %15816  ;;  %v8748_v1 = vpop.f32.mrb[56].mxu1  ;;  %v9116_v16 = vsub.f32 0.0, %v14237_v14  ;;  %v14238_v21 = vadd.f32 %v8602_v37, %v21457_v39  ;;  %v9303_v41 = vmul.f32 1.442695, %v9117_v46  ;;  %v15512_v14 = vld [vmem:[%s22090_s5 + $0x340] sm:$0xff]  }
 0x50c   :  { %v9299_v3 = vmul.f32 1.442695, %v9115_v35  ;;  %15834 = vpow2.f32 %v9271_v45  ;;  %v8604_v17 = vpop.f32.mrb[57].mxu0  ;;  %v15819_v20 = vpop.eup %15818  ;;  %v9451_v55 = vadd.f32 1.0, %v15817_v33  ;;  %v14254_v4 = vadd.f32 %v8748_v1, %v21464_v23 }
 0x50d   :  { %13931 = vmatpush3.bf16.msra.mxu0 %v15510_v49  ;;  %15836 = vpow2.f32 %v9269_v13  ;;  %v8750_v7 = vpop.f32.mrb[57].mxu1  ;;  %v8606_v44 = vpop.f32.mrb[58].mxu0  ;;  %v9453_v0 = vadd.f32 1.0, %v15819_v20  ;;  %v9301_v48 = vmul.f32 1.442695, %v9116_v16  ;;  %v14239_v12 = vadd.f32 %v8604_v17, %v21468_v47 }
 0x50e   :  { %13971 = vmatpush3.bf16.msra.mxu1 %v15511_v51  ;;  %15838 = vpow2.f32 %v9273_v34  ;;  %v15821_v52 = vpop.eup %15820  ;;  %v8752_v6 = vpop.f32.mrb[58].mxu1  ;;  %v9131_v63 = vsub.f32 0.0, %v14238_v21  ;;  %v14255_v54 = vadd.f32 %v8750_v7, %v21472_v58  ;;  %v9305_v51 = vmul.f32 1.442695, %v9118_v25  ;;  %13996 = vmatprep.subr.bf16.mxu0 %v15512_v14  ;;  %v15515_v14 = vld [vmem:[%s22090_s5 + $0x380] sm:$0xff]  }
 0x50f   :  { %15840 = vpow2.f32 %v9299_v3  ;;  %v8608_v40 = vpop.f32.mrb[59].mxu0  ;;  %v9452_v50 = vadd.f32 1.0, %v15821_v52  ;;  %v8754_v18 = vpop.f32.mrb[59].mxu1  ;;  %v14240_v32 = vadd.f32 %v8606_v44, %v21457_v39  ;;  %v9133_v13 = vsub.f32 0.0, %v14254_v4 }
 0x510   :  { %v15823_v56 = vpop.eup %15822  ;;  %15842 = vrcp.f32 %v9451_v55  ;;  %v14256_v34 = vadd.f32 %v8752_v6, %v21464_v23  ;;  %v9132_v33 = vsub.f32 0.0, %v14239_v12  ;;  %v14241_v26 = vadd.f32 %v8608_v40, %v21468_v47  ;;  %v16110_v12 = vld [vmem:[%s22086_s0 + $0x60] sm:$0xff] }
 0x511   :  { %v15825_v38 = vpop.eup %15824  ;;  %15844 = vrcp.f32 %v9453_v0  ;;  %v9454_v10 = vadd.f32 1.0, %v15823_v56  ;;  %v9134_v17 = vsub.f32 0.0, %v14255_v54  ;;  %v14257_v20 = vadd.f32 %v8754_v18, %v21472_v58 }
 0x512   :  { %v15827_v43 = vpop.eup %15826  ;;  %15846 = vrcp.f32 %v9452_v50  ;;  %v9467_v61 = vadd.f32 1.0, %v15825_v38  ;;  %v8612_v19 = vpop.f32.mrb[60].mxu0  ;;  %v9331_v44 = vmul.f32 1.442695, %v9131_v63  ;;  %v9147_v52 = vsub.f32 0.0, %v14240_v32  ;;  %v15514_v50 = vld [vmem:[%s22090_s5 + $0x3c0] sm:$0xff]  }
 0x513   :  { %v15829_v53 = vpop.eup %15828  ;;  %15848 = vrcp.f32 %v9454_v10  ;;  %v9469_v5 = vadd.f32 1.0, %v15827_v43  ;;  %v8758_v9 = vpop.f32.mrb[60].mxu1  ;;  %v14242_v55 = vadd.f32 %v8612_v19, %v21457_v39  ;;  %v9335_v6 = vmul.f32 1.442695, %v9133_v13  ;;  %14036 = vmatprep.subr.bf16.mxu1 %v15514_v50  ;;  %v16112_v13 = vld [vmem:[%s22086_s0 + $0x68] sm:$0xff] }
 0x514   :  { %v15831_v42 = vpop.eup %15830  ;;  %15850 = vrcp.f32 %v9467_v61  ;;  %v9468_v24 = vadd.f32 1.0, %v15829_v53  ;;  %v21552_v60 = vpop.f32.mrb[61].mxu0  ;;  %v9149_v56 = vsub.f32 0.0, %v14256_v34  ;;  %v14258_v40 = vadd.f32 %v8758_v9, %v21464_v23 }
 0x515   :  { %v15833_v36 = vpop.eup %15832  ;;  %15852 = vrcp.f32 %v9469_v5  ;;  %v9470_v22 = vadd.f32 1.0, %v15831_v42  ;;  %v21555_v2 = vpop.f32.mrb[61].mxu1  ;;  %v9333_v18 = vmul.f32 1.442695, %v9132_v33  ;;  %v9148_v38 = vsub.f32 0.0, %v14241_v26  ;;  %v15516_v26 = vld [vmem:[%s22090_s5 + $0x348] sm:$0xff]  }
 0x516   :  { %v15835_v11 = vpop.eup %15834  ;;  %15854 = vrcp.f32 %v9468_v24  ;;  %v9483_v15 = vadd.f32 1.0, %v15833_v36  ;;  %v21557_v29 = vpop.f32.mrb[62].mxu0  ;;  %v9337_v46 = vmul.f32 1.442695, %v9134_v17  ;;  %v9150_v43 = vsub.f32 0.0, %v14257_v20 }
 0x517   :  { %v15837_v8 = vpop.eup %15836  ;;  %15856 = vrcp.f32 %v9470_v22  ;;  %v9485_v57 = vadd.f32 1.0, %v15835_v11  ;;  %v21560_v49 = vpop.f32.mrb[62].mxu1  ;;  %v9163_v61 = vsub.f32 0.0, %v14242_v55  ;;  %v9363_v53 = vmul.f32 1.442695, %v9147_v52  ;;  %v15518_v52 = vld [vmem:[%s22090_s5 + $0x3c8] sm:$0xff]  }
 0x518   :  { %v21562_v27 = vpop.f32.mrb[63].mxu0  ;;  %v15839_v28 = vpop.eup %15838  ;;  %15858 = vrcp.f32 %v9483_v15  ;;  %v9484_v59 = vadd.f32 1.0, %v15837_v8  ;;  %v9367_v21 = vmul.f32 1.442695, %v9149_v56  ;;  %v9165_v42 = vsub.f32 0.0, %v14258_v40  ;;  %v16109_v15 = vld [vmem:[%s22086_s0 + $0x20] sm:$0xff] }
 0x519   :  { %v21565_v62 = vpop.f32.mrb[63].mxu1  ;;  %v15841_v35 = vpop.eup %15840  ;;  %15860 = vrcp.f32 %v9485_v57  ;;  %v9486_v45 = vadd.f32 1.0, %v15839_v28  ;;  %v9365_v19 = vmul.f32 1.442695, %v9148_v38  ;;  %v9395_v4 = vmul.f32 1.442695, %v9163_v61 }
 0x51a   :  { %v15843_v3 = vpop.eup %15842  ;;  %15862 = vrcp.f32 %v9484_v59  ;;  %v9499_v37 = vadd.f32 1.0, %v15841_v35  ;;  %v9399_v54 = vmul.f32 1.442695, %v9165_v42  ;;  %v16111_v28 = vld [vmem:[%s22086_s0 + $0x28] sm:$0xff]  ;;  %v15521_v42 = vld [vmem:[%s22090_s5 + $0x310] sm:$0xff]  }
 0x51b   :  { %v15845_v1 = vpop.eup %15844  ;;  %15864 = vrcp.f32 %v9486_v45  ;;  %v15517_v56 = vld [vmem:[%s22090_s5 + $0x308] sm:$0xff]  }
 0x51c   :  { %v15847_v7 = vpop.eup %15846  ;;  %15866 = vrcp.f32 %v9499_v37 }
 0x51d   :  { %v15849_v0 = vpop.eup %15848  ;;  %15868 = vpow2.f32 %v9303_v41  ;;  %v13696_v24 = vpack.c.bf16 %v15847_v7, %v15843_v3  ;;  %v9369_v41 = vmul.f32 1.442695, %v9150_v43  ;;  %v15513_v3 = vld [vmem:[%s22090_s5 + $0x300] sm:$0xff]   ;;  %v15519_v43 = vld [vmem:[%s22090_s5 + $0x388] sm:$0xff]  }
 0x51e   :  { %v15851_v31 = vpop.eup %15850  ;;  %15870 = vpow2.f32 %v9301_v48  ;;  %v13697_v9 = vpack.c.bf16 %v15849_v0, %v15845_v1 }
 0x51f   :  { %v15853_v10 = vpop.eup %15852  ;;  %15872 = vpow2.f32 %v9305_v51  ;;  %v10087_v48 = vmul.bf16 %v16109_v15, %v13696_v24 }
 0x520   :  { %v15855_v16 = vpop.eup %15854  ;;  %15874 = vpow2.f32 %v9331_v44  ;;  %v10088_v59 = vmul.bf16 %v16111_v28, %v13697_v9  ;;  %v15523_v9 = vld [vmem:[%s22090_s5 + $0x390] sm:$0xff]  }
 0x521   :  { %v15857_v5 = vpop.eup %15856  ;;  %15876 = vpow2.f32 %v9335_v6  ;;  %v13704_v36 = vpack.c.bf16 %v15855_v16, %v15851_v31  ;;  %v14243_v31 = vadd.f32 %v21552_v60, %v21468_v47  ;;  %v14244_v16 = vadd.f32 %v21557_v29, %v21457_v39 }
 0x522   :  { %v21578_v25 = vpop.eup %15858  ;;  %15878 = vpow2.f32 %v9333_v18  ;;  %v13705_v57 = vpack.c.bf16 %v15857_v5, %v15853_v10  ;;  %v15520_v18 = vld [vmem:[%s22090_s5 + $0x350] sm:$0xff]   ;;  %v14245_v29 = vadd.f32 %v21562_v27, %v21468_v47 }
 0x523   :  { %v21580_v22 = vpop.eup %15860  ;;  %15880 = vpow2.f32 %v9337_v46  ;;  %v10095_v8 = vmul.bf16 %v16110_v12, %v13704_v36  ;;  %v14259_v46 = vadd.f32 %v21555_v2, %v21472_v58  ;;  %v14260_v2 = vadd.f32 %v21560_v49, %v21464_v23  ;;  %v15524_v36 = vld [vmem:[%s22090_s5 + $0x358] sm:$0xff]  }
 0x524   :  { %v21582_v11 = vpop.eup %15862  ;;  %15882 = vpow2.f32 %v9363_v53  ;;  %v10096_v34 = vmul.bf16 %v16112_v13, %v13705_v57  ;;  %v15522_v53 = vld [vmem:[%s22090_s5 + $0x3d0] sm:$0xff]   ;;  %v9164_v39 = vsub.f32 0.0, %v14243_v31  ;;  %v9179_v27 = vsub.f32 0.0, %v14244_v16  ;;  %v15531_v31 = vld [vmem:[%s22090_s5 + $0x3a0] sm:$0xff]  }
 0x525   :  { %v21590_v63 = vpop.eup %15864  ;;  %15884 = vpow2.f32 %v9367_v21  ;;  %v13712_v51 = vpack.c.bf16 %v21582_v11, %v21578_v25  ;;  %v13488_v35 = vcombine.low %v10087_v48, %v10095_v8  ;;  %v13489_v45 = vcombine.high %v10087_v48, %v10095_v8  ;;  %v15526_v48 = vld [vmem:[%s22090_s5 + $0x3d8] sm:$0xff]   ;;  %v16116_v11 = vld [vmem:[%s22086_s0 + $0xe8] sm:$0xff] }
 0x526   :  { %v21597_v32 = vpop.eup %15866  ;;  %15886 = vpow2.f32 %v9365_v19  ;;  %v13713_v33 = vpack.c.bf16 %v21590_v63, %v21580_v22  ;;  %v13490_v20 = vcombine.low %v10088_v59, %v10096_v34  ;;  %v13491_v55 = vcombine.high %v10088_v59, %v10096_v34  ;;  %v15528_v59 = vld [vmem:[%s22090_s5 + $0x360] sm:$0xff]   ;;  %v15527_v34 = vld [vmem:[%s22090_s5 + $0x398] sm:$0xff]  }
 0x527   :  { %v15869_v37 = vpop.eup %15868  ;;  %15888 = vpow2.f32 %v9369_v41  ;;  %11790 = vmatprep.mubr.bf16.mxu0 %v13489_v45  ;;  %v9166_v49 = vsub.f32 0.0, %v14259_v46  ;;  %v9181_v57 = vsub.f32 0.0, %v14260_v2  ;;  %v9180_v28 = vsub.f32 0.0, %v14245_v29  ;;  %v15535_v2 = vld [vmem:[%s22090_s5 + $0x3a8] sm:$0xff]  }
 0x528   :  { %v15871_v1 = vpop.eup %15870  ;;  %v9501_v17 = vadd.f32 1.0, %v15869_v37  ;;  %15890 = vpow2.f32 %v9395_v4  ;;  %11791 = vmatmul.mubr.bf16.vlgmr.msra.gmra.mrb[112].mxu0 %v13488_v35  ;;  %11855 = vmatprep.mubr.bf16.mxu1 %v13491_v55  ;;  %v14261_v4 = vadd.f32 %v21565_v62, %v21472_v58  ;;  %v15525_v58 = vld [vmem:[%s22090_s5 + $0x318] sm:$0xff]   ;;  %v9427_v37 = vmul.f32 1.442695, %v9179_v27  ;;  %v15529_v55 = vld [vmem:[%s22090_s5 + $0x320] sm:$0xff]   ;;  %v15539_v27 = vld [vmem:[%s22090_s5 + $0x3b0] sm:$0xff]  }
 0x529   :  { %v15873_v7 = vpop.eup %15872  ;;  %v9500_v44 = vadd.f32 1.0, %v15871_v1  ;;  %15892 = vpow2.f32 %v9399_v54  ;;  %13997 = vmatpush3.bf16.msra.mxu0 %v15513_v3  ;;  %11856 = vmatmul.mubr.bf16.vlgmr.msra.gmra.mrb[112].mxu1 %v13490_v20  ;;  %v9397_v54 = vmul.f32 1.442695, %v9164_v39  ;;  %v9401_v45 = vmul.f32 1.442695, %v9166_v49  ;;  %v15540_v49 = vld [vmem:[%s22090_s5 + $0x378] sm:$0xff]  }
 0x52a   :  { %v15875_v0 = vpop.eup %15874  ;;  %15894 = vrcp.f32 %v9501_v17  ;;  %v9502_v6 = vadd.f32 1.0, %v15873_v7  ;;  %13998 = vmatprep.subr.bf16.mxu0 %v15516_v26  ;;  %14037 = vmatpush3.bf16.msra.mxu1 %v15515_v14  ;;  %v9182_v13 = vsub.f32 0.0, %v14261_v4  ;;  %v15530_v26 = vld [vmem:[%s22090_s5 + $0x3e0] sm:$0xff]   ;;  %v9431_v17 = vmul.f32 1.442695, %v9181_v57  ;;  %v16120_v57 = vld [vmem:[%s22086_s0 + $0x168] sm:$0xff] }
 0x52b   :  { %v15877_v40 = vpop.eup %15876  ;;  %15896 = vrcp.f32 %v9500_v44  ;;  %v9515_v50 = vadd.f32 1.0, %v15875_v0  ;;  %14038 = vmatprep.subr.bf16.mxu1 %v15518_v52  ;;  %v9429_v7 = vmul.f32 1.442695, %v9180_v28  ;;  %v15532_v52 = vld [vmem:[%s22090_s5 + $0x368] sm:$0xff]   ;;  %v16117_v4 = vld [vmem:[%s22086_s0 + $0x120] sm:$0xff] }
 0x52c   :  { %v15879_v38 = vpop.eup %15878  ;;  %15898 = vrcp.f32 %v9502_v6  ;;  %v9517_v10 = vadd.f32 1.0, %v15877_v40  ;;  %v9433_v6 = vmul.f32 1.442695, %v9182_v13  ;;  %v16114_v40 = vld [vmem:[%s22086_s0 + $0xe0] sm:$0xff] }
 0x52d   :  { %v15881_v61 = vpop.eup %15880  ;;  %15900 = vrcp.f32 %v9515_v50  ;;  %v9516_v60 = vadd.f32 1.0, %v15879_v38  ;;  %13999 = vmatpush3.bf16.msra.mxu0 %v15517_v56  ;;  %v16115_v38 = vld [vmem:[%s22086_s0 + $0xa8] sm:$0xff] }
 0x52e   :  { %v15883_v5 = vpop.eup %15882  ;;  %15902 = vrcp.f32 %v9517_v10  ;;  %v9518_v21 = vadd.f32 1.0, %v15881_v61  ;;  %14000 = vmatprep.subr.bf16.mxu0 %v15520_v18  ;;  %14039 = vmatpush3.bf16.msra.mxu1 %v15519_v43  ;;  %v10104_v25 = vmul.bf16 %v16115_v38, %v13713_v33 }
 0x52f   :  { %v15885_v24 = vpop.eup %15884  ;;  %15904 = vrcp.f32 %v9516_v60  ;;  %v9531_v19 = vadd.f32 1.0, %v15883_v5  ;;  %14040 = vmatprep.subr.bf16.mxu1 %v15522_v53  ;;  %v15533_v60 = vld [vmem:[%s22090_s5 + $0x328] sm:$0xff]   ;;  %v15536_v5 = vld [vmem:[%s22090_s5 + $0x370] sm:$0xff]  }
 0x530   :  { %v15887_v41 = vpop.eup %15886  ;;  %15906 = vrcp.f32 %v9518_v21  ;;  %v9533_v23 = vadd.f32 1.0, %v15885_v24  ;;  %v15534_v53 = vld [vmem:[%s22090_s5 + $0x3e8] sm:$0xff]   ;;  %v15538_v24 = vld [vmem:[%s22090_s5 + $0x3f0] sm:$0xff]  }
 0x531   :  { %v15889_v15 = vpop.eup %15888  ;;  %15908 = vrcp.f32 %v9531_v19  ;;  %v9532_v47 = vadd.f32 1.0, %v15887_v41  ;;  %14001 = vmatpush3.bf16.msra.mxu0 %v15521_v42 }
 0x532   :  { %v21652_v12 = vpop.eup %15890  ;;  %15910 = vrcp.f32 %v9533_v23  ;;  %v9534_v8 = vadd.f32 1.0, %v15889_v15  ;;  %14002 = vmatprep.subr.bf16.mxu0 %v15524_v36  ;;  %14041 = vmatpush3.bf16.msra.mxu1 %v15523_v9  ;;  %v15537_v36 = vld [vmem:[%s22090_s5 + $0x330] sm:$0xff]   ;;  %v16118_v15 = vld [vmem:[%s22086_s0 + $0x160] sm:$0xff] }
 0x533   :  { %v21657_v62 = vpop.eup %15892  ;;  %15912 = vrcp.f32 %v9532_v47  ;;  %14042 = vmatprep.subr.bf16.mxu1 %v15526_v48  ;;  %v9547_v39 = vadd.f32 1.0, %v21652_v12  ;;  %v16119_v12 = vld [vmem:[%s22086_s0 + $0x128] sm:$0xff] }
 0x534   :  { %v15895_v35 = vpop.eup %15894  ;;  %15914 = vrcp.f32 %v9534_v8  ;;  %v9549_v41 = vadd.f32 1.0, %v21657_v62 }
 0x535   :  { %v15897_v3 = vpop.eup %15896  ;;  %14003 = vmatpush3.bf16.msra.mxu0 %v15525_v58  ;;  %15916 = vpow2.f32 %v9397_v54 }
 0x536   :  { %v15899_v1 = vpop.eup %15898  ;;  %v13720_v20 = vpack.c.bf16 %v15897_v3, %v21597_v32  ;;  %14004 = vmatprep.subr.bf16.mxu0 %v15528_v59  ;;  %15918 = vpow2.f32 %v9401_v45  ;;  %v16113_v32 = vld [vmem:[%s22086_s0 + $0xa0] sm:$0xff]  ;;  %14043 = vmatpush3.bf16.msra.mxu1 %v15527_v34 }
 0x537   :  { %v15901_v14 = vpop.eup %15900  ;;  %v13721_v44 = vpack.c.bf16 %v15899_v1, %v15895_v35  ;;  %v10103_v56 = vmul.bf16 %v16113_v32, %v13712_v51  ;;  %15920 = vpow2.f32 %v9427_v37  ;;  %14044 = vmatprep.subr.bf16.mxu1 %v15530_v26  ;;  %v15541_v35 = vld [vmem:[%s22090_s5 + $0x338] sm:$0xff]  }
 0x538   :  { %v15903_v0 = vpop.eup %15902  ;;  %v10111_v50 = vmul.bf16 %v16114_v40, %v13720_v20  ;;  %15922 = vpow2.f32 %v9431_v17  ;;  %v15542_v37 = vld [vmem:[%s22090_s5 + $0x3f8] sm:$0xff]  }
 0x539   :  { %v15905_v18 = vpop.eup %15904  ;;  %v10112_v51 = vmul.bf16 %v16116_v11, %v13721_v44  ;;  %14005 = vmatpush3.bf16.msra.mxu0 %v15529_v55  ;;  %15924 = vpow2.f32 %v9429_v7  ;;  %v15543_v17 = vld [vmem:[%s22090_s5 + $0x3b8] sm:$0xff]  }
 0x53a   :  { %v15907_v10 = vpop.eup %15906  ;;  %v13505_v46 = vcombine.high %v10103_v56, %v10111_v50  ;;  %v13504_v43 = vcombine.low %v10103_v56, %v10111_v50  ;;  %v13728_v61 = vpack.c.bf16 %v15905_v18, %v15901_v14  ;;  %14006 = vmatprep.subr.bf16.mxu0 %v15532_v52  ;;  %15926 = vpow2.f32 %v9433_v6  ;;  %14045 = vmatpush3.bf16.msra.mxu1 %v15531_v31 }
 0x53b   :  { %v15909_v16 = vpop.eup %15908  ;;  %v13507_v22 = vcombine.high %v10104_v25, %v10112_v51  ;;  %v13506_v63 = vcombine.low %v10104_v25, %v10112_v51  ;;  %v13729_v33 = vpack.c.bf16 %v15907_v10, %v15903_v0  ;;  %14046 = vmatprep.subr.bf16.mxu1 %v15534_v53  ;;  %15928 = vrcp.f32 %v9547_v39  ;;  %v16121_v51 = vld [vmem:[%s22086_s0 + $0x1a0] sm:$0xff] }
 0x53c   :  { %v15911_v21 = vpop.eup %15910  ;;  %11798 = vmatprep.mubr.bf16.mxu0 %v13505_v46  ;;  %v10119_v9 = vmul.bf16 %v16117_v4, %v13728_v61  ;;  %15930 = vrcp.f32 %v9549_v41  ;;  %v16122_v46 = vld [vmem:[%s22086_s0 + $0x1e0] sm:$0xff]  ;;  %v16123_v61 = vld [vmem:[%s22086_s0 + $0x1a8] sm:$0xff] }
 0x53d   :  { %v15913_v42 = vpop.eup %15912  ;;  %11863 = vmatprep.mubr.bf16.mxu1 %v13507_v22  ;;  %11799 = vmatmul.mubr.bf16.gmra.mrb[116].mxu0 %v13504_v43  ;;  %v10120_v8 = vmul.bf16 %v16119_v12, %v13729_v33 }
 0x53e   :  { %v15915_v19 = vpop.eup %15914  ;;  %11864 = vmatmul.mubr.bf16.gmra.mrb[116].mxu1 %v13506_v63  ;;  %v13736_v29 = vpack.c.bf16 %v15913_v42, %v15909_v16  ;;  %14007 = vmatpush3.bf16.msra.mxu0 %v15533_v60  ;;  %v16124_v16 = vld [vmem:[%s22086_s0 + $0x1e8] sm:$0xff] }
 0x53f   :  { %v13737_v23 = vpack.c.bf16 %v15915_v19, %v15911_v21  ;;  %14008 = vmatprep.subr.bf16.mxu0 %v15536_v5  ;;  %14047 = vmatpush3.bf16.msra.mxu1 %v15535_v2  ;;  %v15917_v48 = vpop.eup %15916  ;;  %v22275_v21 = vld [vmem:[#allocation3_spill] sm:$0xff] }
 0x540   :  { %v10127_v47 = vmul.bf16 %v16118_v15, %v13736_v29  ;;  %14048 = vmatprep.subr.bf16.mxu1 %v15538_v24  ;;  %v15919_v62 = vpop.eup %15918  ;;  %v9548_v54 = vadd.f32 1.0, %v15917_v48  ;;  %v22276_v2 = vsub.s32 4, %v22275_v21  ;;  %v22277_v24 = vsub.s32 6, %v22275_v21 }
 0x541   :  { %v10128_v58 = vmul.bf16 %v16120_v57, %v13737_v23  ;;  %v15921_v45 = vpop.eup %15920  ;;  %v9550_v13 = vadd.f32 1.0, %v15919_v62  ;;  %v22278_v39 = vsub.s32 5, %v22275_v21 }
 0x542   :  { %v13521_v28 = vcombine.high %v10119_v9, %v10127_v47  ;;  %v13520_v59 = vcombine.low %v10119_v9, %v10127_v47  ;;  %14009 = vmatpush3.bf16.msra.mxu0 %v15537_v36  ;;  %v15923_v26 = vpop.eup %15922  ;;  %15932 = vrcp.f32 %v9548_v54  ;;  %v9563_v1 = vadd.f32 1.0, %v15921_v45 }
 0x543   :  { %v13523_v34 = vcombine.high %v10120_v8, %v10128_v58  ;;  %v13522_v3 = vcombine.low %v10120_v8, %v10128_v58  ;;  %14010 = vmatprep.subr.bf16.mxu0 %v15540_v49  ;;  %14049 = vmatpush3.bf16.msra.mxu1 %v15539_v27  ;;  %v15925_v20 = vpop.eup %15924  ;;  %15934 = vrcp.f32 %v9550_v13  ;;  %v9565_v55 = vadd.f32 1.0, %v15923_v26 }
 0x544   :  { %11806 = vmatprep.mubr.bf16.mxu0 %v13521_v28  ;;  %v15927_v14 = vpop.eup %15926  ;;  %15936 = vrcp.f32 %v9563_v1  ;;  %v9564_v7 = vadd.f32 1.0, %v15925_v20  ;;  %14050 = vmatprep.subr.bf16.mxu1 %v15542_v37  ;;  %v21758_v42 = vrot.slane %v21441_v30, %v22276_v2  ;;  %v21763_v19 = vrot.slane %v21441_v30, %v22277_v24 }
 0x545   :  { %11871 = vmatprep.mubr.bf16.mxu1 %v13523_v34  ;;  %11807 = vmatmul.mubr.bf16.gmra.mrb[120].mxu0 %v13520_v59  ;;  %15938 = vrcp.f32 %v9565_v55  ;;  %v9566_v44 = vadd.f32 1.0, %v15927_v14  ;;  %v15929_v52 = vpop.eup %15928  ;;  %v21768_v29 = vrot.slane %v21441_v30, %v22278_v39  ;;  %v22279_v36 = vsub.s32 7, %v22275_v21 }
 0x546   :  { %11872 = vmatmul.mubr.bf16.gmra.mrb[120].mxu1 %v13522_v3  ;;  %14011 = vmatpush3.bf16.msra.mxu0 %v15541_v35  ;;  %15940 = vrcp.f32 %v9564_v7  ;;  %v15931_v0 = vpop.eup %15930 }
 0x547   :  { %14051 = vmatpush3.bf16.msra.mxu1 %v15543_v17  ;;  %15942 = vrcp.f32 %v9566_v44  ;;  %v21773_v41 = vrot.slane %v21441_v30, %v22279_v36 }
 0x54c   :  { %v15933_v6 = vpop.eup %15932 }
 0x54d   :  { %v15935_v32 = vpop.eup %15934  ;;  %v13744_v56 = vpack.c.bf16 %v15933_v6, %v15929_v52 }
 0x54e   :  { %v15937_v40 = vpop.eup %15936  ;;  %v13745_v50 = vpack.c.bf16 %v15935_v32, %v15931_v0 }
 0x54f   :  { %v15939_v31 = vpop.eup %15938  ;;  %v10135_v10 = vmul.bf16 %v16121_v51, %v13744_v56 }
 0x550   :  { %v15941_v18 = vpop.eup %15940  ;;  %v10136_v60 = vmul.bf16 %v16123_v61, %v13745_v50 }
 0x551   :  { %v15943_v38 = vpop.eup %15942  ;;  %v13752_v25 = vpack.c.bf16 %v15941_v18, %v15937_v40 }
 0x552   :  { %v13753_v11 = vpack.c.bf16 %v15943_v38, %v15939_v31 }
 0x553   :  { %v10143_v43 = vmul.bf16 %v16122_v46, %v13752_v25 }
 0x554   :  { %v10144_v22 = vmul.bf16 %v16124_v16, %v13753_v11 }
 0x555   :  { %v13537_v63 = vcombine.high %v10135_v10, %v10143_v43  ;;  %v13536_v33 = vcombine.low %v10135_v10, %v10143_v43 }
 0x556   :  { %v13539_v53 = vcombine.high %v10136_v60, %v10144_v22  ;;  %v13538_v5 = vcombine.low %v10136_v60, %v10144_v22 }
 0x557   :  { %11814 = vmatprep.mubr.bf16.mxu0 %v13537_v63 }
 0x558   :  { %11879 = vmatprep.mubr.bf16.mxu1 %v13539_v53  ;;  %11815 = vmatmul.mubr.bf16.gmra.mrb[124].mxu0 %v13536_v33 }
 0x559   :  { %11880 = vmatmul.mubr.bf16.gmra.mrb[124].mxu1 %v13538_v5 }
 0x580   :  { %v8874_v23 = vpop.f32.mrb[64].mxu0 }
 0x581   :  { %v14262_v49 = vadd.f32 %v8874_v23, %v21758_v42  ;;  %v9020_v4 = vpop.f32.mrb[64].mxu1  ;;  %v8876_v9 = vpop.f32.mrb[65].mxu0 }
 0x582   :  { %v14278_v15 = vadd.f32 %v9020_v4, %v21763_v19  ;;  %v14263_v47 = vadd.f32 %v8876_v9, %v21768_v29  ;;  %v9022_v27 = vpop.f32.mrb[65].mxu1  ;;  %v8878_v48 = vpop.f32.mrb[66].mxu0 }
 0x583   :  { %v9071_v12 = vsub.f32 0.0, %v14262_v49  ;;  %v14279_v8 = vadd.f32 %v9022_v27, %v21773_v41  ;;  %v14264_v57 = vadd.f32 %v8878_v48, %v21758_v42  ;;  %v9024_v58 = vpop.f32.mrb[66].mxu1  ;;  %v8880_v62 = vpop.f32.mrb[67].mxu0 }
 0x584   :  { %v9073_v30 = vsub.f32 0.0, %v14278_v15  ;;  %v9072_v54 = vsub.f32 0.0, %v14263_v47  ;;  %v14280_v28 = vadd.f32 %v9024_v58, %v21763_v19  ;;  %v14265_v59 = vadd.f32 %v8880_v62, %v21768_v29  ;;  %v9026_v35 = vpop.f32.mrb[67].mxu1 }
 0x585   :  { %v9211_v45 = vmul.f32 1.442695, %v9071_v12  ;;  %v9074_v13 = vsub.f32 0.0, %v14279_v8  ;;  %v9087_v34 = vsub.f32 0.0, %v14264_v57  ;;  %v14281_v3 = vadd.f32 %v9026_v35, %v21773_v41 }
 0x586   :  { %v9215_v37 = vmul.f32 1.442695, %v9073_v30  ;;  %v9213_v26 = vmul.f32 1.442695, %v9072_v54  ;;  %v9089_v1 = vsub.f32 0.0, %v14280_v28  ;;  %v9088_v17 = vsub.f32 0.0, %v14265_v59 }
 0x587   :  { %15944 = vpow2.f32 %v9211_v45  ;;  %v9217_v20 = vmul.f32 1.442695, %v9074_v13  ;;  %v9243_v55 = vmul.f32 1.442695, %v9087_v34  ;;  %v9090_v14 = vsub.f32 0.0, %v14281_v3 }
 0x588   :  { %15946 = vpow2.f32 %v9215_v37  ;;  %v9247_v7 = vmul.f32 1.442695, %v9089_v1  ;;  %v8884_v44 = vpop.f32.mrb[68].mxu0  ;;  %v9245_v52 = vmul.f32 1.442695, %v9088_v17 }
 0x589   :  { %15948 = vpow2.f32 %v9213_v26  ;;  %v14266_v0 = vadd.f32 %v8884_v44, %v21758_v42  ;;  %v9030_v6 = vpop.f32.mrb[68].mxu1  ;;  %v8886_v32 = vpop.f32.mrb[69].mxu0  ;;  %v9249_v56 = vmul.f32 1.442695, %v9090_v14 }
 0x58a   :  { %15950 = vpow2.f32 %v9217_v20  ;;  %v14282_v40 = vadd.f32 %v9030_v6, %v21763_v19  ;;  %v14267_v50 = vadd.f32 %v8886_v32, %v21768_v29  ;;  %v9032_v31 = vpop.f32.mrb[69].mxu1  ;;  %v8888_v18 = vpop.f32.mrb[70].mxu0 }
 0x58b   :  { %15952 = vpow2.f32 %v9243_v55  ;;  %v9103_v38 = vsub.f32 0.0, %v14266_v0  ;;  %v14283_v25 = vadd.f32 %v9032_v31, %v21773_v41  ;;  %v14268_v11 = vadd.f32 %v8888_v18, %v21758_v42  ;;  %v9034_v51 = vpop.f32.mrb[70].mxu1  ;;  %v8890_v10 = vpop.f32.mrb[71].mxu0 }
 0x58c   :  { %15954 = vpow2.f32 %v9247_v7  ;;  %v9105_v46 = vsub.f32 0.0, %v14282_v40  ;;  %v9104_v43 = vsub.f32 0.0, %v14267_v50  ;;  %v9036_v61 = vpop.f32.mrb[71].mxu1  ;;  %v14284_v53 = vadd.f32 %v9034_v51, %v21763_v19 }
 0x58d   :  { %15956 = vpow2.f32 %v9245_v52  ;;  %v9275_v60 = vmul.f32 1.442695, %v9103_v38  ;;  %v9106_v16 = vsub.f32 0.0, %v14283_v25  ;;  %v9119_v22 = vsub.f32 0.0, %v14268_v11 }
 0x58e   :  { %15958 = vpow2.f32 %v9249_v56  ;;  %v9279_v63 = vmul.f32 1.442695, %v9105_v46  ;;  %v9277_v33 = vmul.f32 1.442695, %v9104_v43  ;;  %v14269_v2 = vadd.f32 %v8890_v10, %v21768_v29 }
 0x58f   :  { %15960 = vpow2.f32 %v9275_v60  ;;  %v9281_v5 = vmul.f32 1.442695, %v9106_v16  ;;  %v9307_v21 = vmul.f32 1.442695, %v9119_v22  ;;  %v14285_v24 = vadd.f32 %v9036_v61, %v21773_v41 }
 0x590   :  { %15962 = vpow2.f32 %v9279_v63  ;;  %v8894_v39 = vpop.f32.mrb[72].mxu0  ;;  %v9121_v15 = vsub.f32 0.0, %v14284_v53  ;;  %v9120_v57 = vsub.f32 0.0, %v14269_v2 }
 0x591   :  { %v15945_v36 = vpop.eup %15944  ;;  %15964 = vpow2.f32 %v9277_v33  ;;  %v9040_v23 = vpop.f32.mrb[72].mxu1  ;;  %v14270_v47 = vadd.f32 %v8894_v39, %v21758_v42  ;;  %v9122_v28 = vsub.f32 0.0, %v14285_v24 }
 0x592   :  { %v8896_v49 = vpop.f32.mrb[73].mxu0  ;;  %v15947_v4 = vpop.eup %15946  ;;  %v9455_v9 = vadd.f32 1.0, %v15945_v36  ;;  %15966 = vpow2.f32 %v9281_v5  ;;  %v14286_v13 = vadd.f32 %v9040_v23, %v21763_v19  ;;  %v9311_v37 = vmul.f32 1.442695, %v9121_v15 }
 0x593   :  { %v9042_v27 = vpop.f32.mrb[73].mxu1  ;;  %v8898_v48 = vpop.f32.mrb[74].mxu0  ;;  %v9457_v8 = vadd.f32 1.0, %v15947_v4  ;;  %15968 = vpow2.f32 %v9307_v21  ;;  %v9135_v26 = vsub.f32 0.0, %v14270_v47  ;;  %v9309_v20 = vmul.f32 1.442695, %v9120_v57 }
 0x594   :  { %v15949_v12 = vpop.eup %15948  ;;  %v9044_v58 = vpop.f32.mrb[74].mxu1  ;;  %15970 = vrcp.f32 %v9455_v9  ;;  %v14271_v55 = vadd.f32 %v8896_v49, %v21768_v29  ;;  %v21794_v44 = vmul.f32 1.442695, %v9122_v28  ;;  %v14287_v52 = vadd.f32 %v9042_v27, %v21773_v41 }
 0x595   :  { %v8900_v62 = vpop.f32.mrb[75].mxu0  ;;  %v15951_v30 = vpop.eup %15950  ;;  %v9456_v54 = vadd.f32 1.0, %v15949_v12  ;;  %15972 = vrcp.f32 %v9457_v8  ;;  %v9137_v56 = vsub.f32 0.0, %v14286_v13  ;;  %v14272_v40 = vadd.f32 %v8898_v48, %v21758_v42 }
 0x596   :  { %v9046_v59 = vpop.f32.mrb[75].mxu1  ;;  %v15953_v35 = vpop.eup %15952  ;;  %v9458_v45 = vadd.f32 1.0, %v15951_v30  ;;  %v9339_v25 = vmul.f32 1.442695, %v9135_v26  ;;  %v14288_v11 = vadd.f32 %v9044_v58, %v21763_v19  ;;  %v9136_v61 = vsub.f32 0.0, %v14271_v55 }
 0x597   :  { %v15955_v34 = vpop.eup %15954  ;;  %15974 = vrcp.f32 %v9456_v54  ;;  %v9471_v3 = vadd.f32 1.0, %v15953_v35  ;;  %v14273_v60 = vadd.f32 %v8900_v62, %v21768_v29  ;;  %v9138_v53 = vsub.f32 0.0, %v14287_v52  ;;  %v21827_v26 = vld [vmem:[%s22091_s6] ss:$0 sm:$0xff] }
 0x598   :  { %v15957_v1 = vpop.eup %15956  ;;  %15976 = vrcp.f32 %v9458_v45  ;;  %v9473_v17 = vadd.f32 1.0, %v15955_v34  ;;  %v8904_v0 = vpop.f32.mrb[76].mxu0  ;;  %v14289_v5 = vadd.f32 %v9046_v59, %v21773_v41  ;;  %v9151_v39 = vsub.f32 0.0, %v14272_v40 }
 0x599   :  { %v15959_v14 = vpop.eup %15958  ;;  %15978 = vrcp.f32 %v9471_v3  ;;  %v9472_v7 = vadd.f32 1.0, %v15957_v1  ;;  %v9050_v50 = vpop.f32.mrb[76].mxu1  ;;  %v14274_v36 = vadd.f32 %v8904_v0, %v21758_v42  ;;  %v9153_v4 = vsub.f32 0.0, %v14288_v11 }
 0x59a   :  { %v15961_v6 = vpop.eup %15960  ;;  %15980 = vrcp.f32 %v9473_v17  ;;  %v9474_v32 = vadd.f32 1.0, %v15959_v14  ;;  %v8906_v31 = vpop.f32.mrb[77].mxu0  ;;  %v14290_v9 = vadd.f32 %v9050_v50, %v21763_v19  ;;  %v9343_v47 = vmul.f32 1.442695, %v9137_v56 }
 0x59b   :  { %v15963_v18 = vpop.eup %15962  ;;  %15982 = vrcp.f32 %v9472_v7  ;;  %v9487_v38 = vadd.f32 1.0, %v15961_v6  ;;  %v9052_v51 = vpop.f32.mrb[77].mxu1  ;;  %v9152_v27 = vsub.f32 0.0, %v14273_v60  ;;  %v9154_v48 = vsub.f32 0.0, %v14289_v5 }
 0x59c   :  { %v8908_v10 = vpop.f32.mrb[78].mxu0  ;;  %v15965_v46 = vpop.eup %15964  ;;  %15984 = vrcp.f32 %v9474_v32  ;;  %v9489_v43 = vadd.f32 1.0, %v15963_v18  ;;  %v9341_v8 = vmul.f32 1.442695, %v9136_v61  ;;  %v9167_v57 = vsub.f32 0.0, %v14274_v36 }
 0x59d   :  { %v9054_v16 = vpop.f32.mrb[78].mxu1  ;;  %v21800_v22 = vpop.f32.mrb[79].mxu0  ;;  %15986 = vrcp.f32 %v9487_v38  ;;  %v9488_v33 = vadd.f32 1.0, %v15965_v46  ;;  %v21814_v58 = vadd.f32 %v8906_v31, %v21768_v29  ;;  %v9345_v30 = vmul.f32 1.442695, %v9138_v53 }
 0x59e   :  { %v15967_v63 = vpop.eup %15966  ;;  %v21803_v21 = vpop.f32.mrb[79].mxu1  ;;  %15988 = vrcp.f32 %v9489_v43  ;;  %v9169_v54 = vsub.f32 0.0, %v14290_v9  ;;  %v21819_v28 = vadd.f32 %v9052_v51, %v21773_v41  ;;  %v9371_v45 = vmul.f32 1.442695, %v9151_v39 }
 0x59f   :  { %v15969_v2 = vpop.eup %15968  ;;  %v9490_v24 = vadd.f32 1.0, %v15967_v63  ;;  %15990 = vrcp.f32 %v9488_v33  ;;  %v9375_v13 = vmul.f32 1.442695, %v9153_v4  ;;  %v21822_v34 = vadd.f32 %v8908_v10, %v21758_v42  ;;  %v16126_v4 = vld [vmem:[%s22086_s0 + $0x70] sm:$0xff] }
 0x5a0   :  { %v21806_v23 = vpop.eup %15970  ;;  %v9503_v49 = vadd.f32 1.0, %v15969_v2  ;;  %v9373_v17 = vmul.f32 1.442695, %v9152_v27  ;;  %v9377_v55 = vmul.f32 1.442695, %v9154_v48  ;;  %v9168_v0 = vsub.f32 0.0, %v21814_v58 }
 0x5a1   :  { %v21809_v15 = vpop.eup %15972  ;;  %15992 = vrcp.f32 %v9490_v24  ;;  %v13772_v59 = vpop.f32.mrb[80].mxu0  ;;  %v9403_v52 = vmul.f32 1.442695, %v9167_v57  ;;  %v9407_v40 = vmul.f32 1.442695, %v9169_v54  ;;  %v9170_v50 = vsub.f32 0.0, %v21819_v28 }
 0x5a2   :  { %v21811_v12 = vpop.eup %15974  ;;  %15994 = vrcp.f32 %v9503_v49  ;;  %v13812_v3 = vpop.f32.mrb[80].mxu1  ;;  %v21842_v38 = vadd.f32 %v21800_v22, %v21768_v29  ;;  %v21852_v61 = vadd.f32 %v21803_v21, %v21773_v41  ;;  %v16125_v41 = vld [vmem:[%s22086_s0 + $0x30] sm:$0xff] }
 0x5a3   :  { %v21816_v62 = vpop.eup %15976  ;;  %15996 = vpow2.f32 %v9311_v37  ;;  %v13773_v37 = vpop.f32.mrb[81].mxu0  ;;  %v13698_v29 = vpack.c.bf16 %v21811_v12, %v21806_v23 }
 0x5a4   :  { %v15979_v35 = vpop.eup %15978  ;;  %15998 = vpow2.f32 %v9309_v20  ;;  %v21833_v20 = vadd.f32 %v9054_v16, %v21763_v19  ;;  %v13813_v14 = vpop.f32.mrb[81].mxu1  ;;  %v9183_v19 = vsub.f32 0.0, %v21822_v34  ;;  %v13699_v24 = vpack.c.bf16 %v21816_v62, %v21809_v15  ;;  %v16127_v15 = vld [vmem:[%s22086_s0 + $0x38] sm:$0xff]  ;;  %v16129_v34 = vld [vmem:[%s22086_s0 + $0xb0] sm:$0xff] }
 0x5a5   :  { %v21829_v1 = vpop.eup %15980  ;;  %16000 = vpow2.f32 %v21794_v44  ;;  %v13775_v7 = vpop.f32.mrb[82].mxu0  ;;  %v13774_v44 = vadd.f32 %v13773_v37, %v13772_v59  ;;  %v10089_v21 = vmul.bf16 %v16125_v41, %v13698_v29  ;;  %v16128_v62 = vld [vmem:[%s22086_s0 + $0x78] sm:$0xff] }
 0x5a6   :  { %v15983_v42 = vpop.eup %15982  ;;  %16002 = vpow2.f32 %v9339_v25  ;;  %v13815_v6 = vpop.f32.mrb[82].mxu1  ;;  %v13814_v25 = vadd.f32 %v13813_v14, %v13812_v3  ;;  %v9185_v51 = vsub.f32 0.0, %v21833_v20  ;;  %v10090_v57 = vmul.bf16 %v16127_v15, %v13699_v24 }
 0x5a7   :  { %v13776_v32 = vpop.f32.mrb[83].mxu0  ;;  %v15985_v56 = vpop.eup %15984  ;;  %16004 = vpow2.f32 %v9343_v47  ;;  %v11533_v10 = vadd.f32 %v13774_v44, %v21827_v26  ;;  %v13706_v53 = vpack.c.bf16 %v15983_v42, %v15979_v35 }
 0x5a8   :  { %v13816_v31 = vpop.f32.mrb[83].mxu1  ;;  %v21837_v18 = vpop.eup %15986  ;;  %16006 = vpow2.f32 %v9341_v8  ;;  %v13777_v46 = vadd.f32 %v13776_v32, %v13775_v7  ;;  %v13707_v39 = vpack.c.bf16 %v15985_v56, %v21829_v1 }
 0x5a9   :  { %v21844_v11 = vpop.eup %15988  ;;  %16008 = vpow2.f32 %v9345_v30  ;;  %v13817_v60 = vadd.f32 %v13816_v31, %v13815_v6  ;;  %v21858_v22 = vadd.f32 %v13814_v25, %v11533_v10  ;;  %v13778_v33 = vpop.f32.mrb[84].mxu0  ;;  %v10097_v9 = vmul.bf16 %v16126_v4, %v13706_v53 }
 0x5aa   :  { %v21848_v43 = vpop.eup %15990  ;;  %16010 = vpow2.f32 %v9371_v45  ;;  %v11536_v63 = vadd.f32 %v13777_v46, %v21827_v26  ;;  %v13818_v2 = vpop.f32.mrb[84].mxu1  ;;  %v10098_v30 = vmul.bf16 %v16128_v62, %v13707_v39  ;;  %v9184_v39 = vsub.f32 0.0, %v21842_v38 }
 0x5ab   :  { %v21856_v16 = vpop.eup %15992  ;;  %16012 = vpow2.f32 %v9375_v13  ;;  %v13779_v36 = vpop.f32.mrb[85].mxu0  ;;  %v13492_v13 = vcombine.low %v10089_v21, %v10097_v9  ;;  %v13493_v3 = vcombine.high %v10089_v21, %v10097_v9 }
 0x5ac   :  { %v21861_v5 = vpop.eup %15994  ;;  %16014 = vpow2.f32 %v9373_v17  ;;  %v21869_v49 = vadd.f32 %v13817_v60, %v11536_v63  ;;  %v13780_v47 = vadd.f32 %v13779_v36, %v13778_v33  ;;  %v13819_v27 = vpop.f32.mrb[85].mxu1  ;;  %v13495_v14 = vcombine.high %v10090_v57, %v10098_v30 }
 0x5ad   :  { %v15997_v23 = vpop.eup %15996  ;;  %16016 = vpow2.f32 %v9377_v55  ;;  %v13781_v48 = vpop.f32.mrb[86].mxu0  ;;  %v13494_v55 = vcombine.low %v10090_v57, %v10098_v30  ;;  %11920 = vmatprep.mubr.bf16.mxu0 %v13493_v3  ;;  %v13820_v6 = vadd.f32 %v13819_v27, %v13818_v2  ;;  %v13714_v60 = vpack.c.bf16 %v21848_v43, %v21837_v18 }
 0x5ae   :  { %v15999_v12 = vpop.eup %15998  ;;  %v9505_v8 = vadd.f32 1.0, %v15997_v23  ;;  %16018 = vpow2.f32 %v9403_v52  ;;  %v13821_v54 = vpop.f32.mrb[86].mxu1  ;;  %v11541_v52 = vadd.f32 %v13780_v47, %v21827_v26  ;;  %11985 = vmatprep.mubr.bf16.mxu1 %v13495_v14  ;;  %11921 = vmatmul.mubr.bf16.vlgmr.msra.gmra.mrb[128].mxu0 %v13492_v13  ;;  %v13715_v2 = vpack.c.bf16 %v21856_v16, %v21844_v11 }
 0x5af   :  { %v13782_v59 = vpop.f32.mrb[87].mxu0  ;;  %v16001_v35 = vpop.eup %16000  ;;  %v9504_v45 = vadd.f32 1.0, %v15999_v12  ;;  %16020 = vpow2.f32 %v9407_v40  ;;  %11986 = vmatmul.mubr.bf16.vlgmr.msra.gmra.mrb[128].mxu1 %v13494_v55  ;;  %v9186_v43 = vsub.f32 0.0, %v21852_v61  ;;  %v9405_v61 = vmul.f32 1.442695, %v9168_v0 }
 0x5b0   :  { %v13822_v37 = vpop.f32.mrb[87].mxu1  ;;  %v16003_v1 = vpop.eup %16002  ;;  %16022 = vrcp.f32 %v9505_v8  ;;  %v9506_v17 = vadd.f32 1.0, %v16001_v35  ;;  %v13783_v40 = vadd.f32 %v13782_v59, %v13781_v48  ;;  %v21881_v10 = vadd.f32 %v13820_v6, %v11541_v52 }
 0x5b1   :  { %v16005_v7 = vpop.eup %16004  ;;  %16024 = vrcp.f32 %v9504_v45  ;;  %v9519_v42 = vadd.f32 1.0, %v16003_v1  ;;  %v13823_v44 = vadd.f32 %v13822_v37, %v13821_v54  ;;  %v13784_v46 = vpop.f32.mrb[88].mxu0  ;;  %v9409_v45 = vmul.f32 1.442695, %v9170_v50 }
 0x5b2   :  { %v16007_v32 = vpop.eup %16006  ;;  %16026 = vrcp.f32 %v9506_v17  ;;  %v9521_v56 = vadd.f32 1.0, %v16005_v7  ;;  %v11544_v33 = vadd.f32 %v13783_v40, %v21827_v26  ;;  %v13824_v53 = vpop.f32.mrb[88].mxu1  ;;  %v9435_v37 = vmul.f32 1.442695, %v9183_v19  ;;  %v16131_v40 = vld [vmem:[%s22086_s0 + $0xb8] sm:$0xff] }
 0x5b3   :  { %v16009_v31 = vpop.eup %16008  ;;  %16028 = vrcp.f32 %v9519_v42  ;;  %v9520_v25 = vadd.f32 1.0, %v16007_v32  ;;  %v13785_v41 = vpop.f32.mrb[89].mxu0  ;;  %v9439_v1 = vmul.f32 1.442695, %v9185_v51  ;;  %v9437_v58 = vmul.f32 1.442695, %v9184_v39 }
 0x5b4   :  { %v16011_v29 = vpop.eup %16010  ;;  %16030 = vrcp.f32 %v9521_v56  ;;  %v9522_v63 = vadd.f32 1.0, %v16009_v31  ;;  %v13786_v36 = vadd.f32 %v13785_v41, %v13784_v46  ;;  %v13825_v23 = vpop.f32.mrb[89].mxu1  ;;  %v21890_v47 = vadd.f32 %v13823_v44, %v11544_v33 }
 0x5b5   :  { %v16013_v21 = vpop.eup %16012  ;;  %16032 = vrcp.f32 %v9520_v25  ;;  %v9535_v24 = vadd.f32 1.0, %v16011_v29  ;;  %v13787_v4 = vpop.f32.mrb[90].mxu0  ;;  %v13826_v8 = vadd.f32 %v13825_v23, %v13824_v53  ;;  %v9441_v0 = vmul.f32 1.442695, %v9186_v43  ;;  %v16132_v29 = vld [vmem:[%s22086_s0 + $0xf8] sm:$0xff] }
 0x5b6   :  { %v16015_v9 = vpop.eup %16014  ;;  %16034 = vrcp.f32 %v9522_v63  ;;  %v9537_v18 = vadd.f32 1.0, %v16013_v21  ;;  %v13827_v27 = vpop.f32.mrb[90].mxu1  ;;  %v11549_v16 = vadd.f32 %v13786_v36, %v21827_v26  ;;  %v10105_v19 = vmul.bf16 %v16129_v34, %v13714_v60 }
 0x5b7   :  { %v13788_v48 = vpop.f32.mrb[91].mxu0  ;;  %v16017_v12 = vpop.eup %16016  ;;  %16036 = vrcp.f32 %v9535_v24  ;;  %v9536_v11 = vadd.f32 1.0, %v16015_v9  ;;  %v10106_v44 = vmul.bf16 %v16131_v40, %v13715_v2 }
 0x5b8   :  { %v13828_v15 = vpop.f32.mrb[91].mxu1  ;;  %v16019_v38 = vpop.eup %16018  ;;  %16038 = vrcp.f32 %v9537_v18  ;;  %v9538_v57 = vadd.f32 1.0, %v16017_v12  ;;  %v13789_v62 = vadd.f32 %v13788_v48, %v13787_v4  ;;  %v21895_v59 = vadd.f32 %v13826_v8, %v11549_v16 }
 0x5b9   :  { %v13829_v30 = vadd.f32 %v13828_v15, %v13827_v27  ;;  %v16021_v54 = vpop.eup %16020  ;;  %16040 = vrcp.f32 %v9536_v11  ;;  %v13790_v17 = vpop.f32.mrb[92].mxu0  ;;  %v9551_v43 = vadd.f32 1.0, %v16019_v38 }
 0x5ba   :  { %v16023_v35 = vpop.eup %16022  ;;  %16042 = vrcp.f32 %v9538_v57  ;;  %v11552_v13 = vadd.f32 %v13789_v62, %v21827_v26  ;;  %v13830_v42 = vpop.f32.mrb[92].mxu1  ;;  %v9553_v11 = vadd.f32 1.0, %v16021_v54  ;;  %v16134_v54 = vld [vmem:[%s22086_s0 + $0x170] sm:$0xff] }
 0x5bb   :  { %v16025_v3 = vpop.eup %16024  ;;  %v13791_v28 = vpop.f32.mrb[93].mxu0  ;;  %16044 = vpow2.f32 %v9405_v61 }
 0x5bc   :  { %v16027_v55 = vpop.eup %16026  ;;  %v13722_v14 = vpack.c.bf16 %v16025_v3, %v21861_v5  ;;  %v21905_v7 = vadd.f32 %v13829_v30, %v11552_v13  ;;  %v13792_v20 = vadd.f32 %v13791_v28, %v13790_v17  ;;  %v13831_v51 = vpop.f32.mrb[93].mxu1  ;;  %16046 = vpow2.f32 %v9409_v45  ;;  %v16130_v5 = vld [vmem:[%s22086_s0 + $0xf0] sm:$0xff]  ;;  %v16135_v17 = vld [vmem:[%s22086_s0 + $0x138] sm:$0xff] }
 0x5bd   :  { %v16029_v50 = vpop.eup %16028  ;;  %v13723_v52 = vpack.c.bf16 %v16027_v55, %v16023_v35  ;;  %v13793_v6 = vpop.f32.mrb[94].mxu0  ;;  %v13832_v31 = vadd.f32 %v13831_v51, %v13830_v42  ;;  %16048 = vpow2.f32 %v9435_v37  ;;  %v16133_v35 = vld [vmem:[%s22086_s0 + $0x130] sm:$0xff] }
 0x5be   :  { %v16031_v32 = vpop.eup %16030  ;;  %v10113_v56 = vmul.bf16 %v16130_v5, %v13722_v14  ;;  %v13833_v25 = vpop.f32.mrb[94].mxu1  ;;  %v11557_v33 = vadd.f32 %v13792_v20, %v21827_v26  ;;  %16050 = vpow2.f32 %v9439_v1 }
 0x5bf   :  { %v13794_v46 = vpop.f32.mrb[95].mxu0  ;;  %v16033_v60 = vpop.eup %16032  ;;  %v10114_v63 = vmul.bf16 %v16132_v29, %v13723_v52  ;;  %16052 = vpow2.f32 %v9437_v58  ;;  %v16136_v58 = vld [vmem:[%s22086_s0 + $0x178] sm:$0xff] }
 0x5c0   :  { %v13795_v53 = vadd.f32 %v13794_v46, %v13793_v6  ;;  %v13834_v41 = vpop.f32.mrb[95].mxu1  ;;  %v16035_v21 = vpop.eup %16034  ;;  %v13509_v24 = vcombine.high %v10105_v19, %v10113_v56  ;;  %v13508_v39 = vcombine.low %v10105_v19, %v10113_v56  ;;  %v13730_v36 = vpack.c.bf16 %v16033_v60, %v16029_v50 }
 0x5c1   :  { %v16037_v2 = vpop.eup %16036  ;;  %v13511_v23 = vcombine.high %v10106_v44, %v10114_v63  ;;  %v13510_v4 = vcombine.low %v10106_v44, %v10114_v63  ;;  %v13731_v9 = vpack.c.bf16 %v16035_v21, %v16031_v32  ;;  %16054 = vpow2.f32 %v9441_v0 }
 0x5c2   :  { %v16039_v18 = vpop.eup %16038  ;;  %11928 = vmatprep.mubr.bf16.mxu0 %v13509_v24  ;;  %v21920_v27 = vadd.f32 %v13832_v31, %v11557_v33  ;;  %v11560_v48 = vadd.f32 %v13795_v53, %v21827_v26  ;;  %v13835_v16 = vadd.f32 %v13834_v41, %v13833_v25  ;;  %v13852_v57 = vpop.f32.mrb[96].mxu0  ;;  %16056 = vrcp.f32 %v9551_v43 }
 0x5c3   :  { %v16041_v12 = vpop.eup %16040  ;;  %11993 = vmatprep.mubr.bf16.mxu1 %v13511_v23  ;;  %11929 = vmatmul.mubr.bf16.gmra.mrb[132].mxu0 %v13508_v39  ;;  %v13892_v61 = vpop.f32.mrb[96].mxu1  ;;  %v10121_v26 = vmul.bf16 %v16133_v35, %v13730_v36  ;;  %16058 = vrcp.f32 %v9553_v11  ;;  %v10122_v55 = vmul.bf16 %v16135_v17, %v13731_v9 }
 0x5c4   :  { %v16043_v8 = vpop.eup %16042  ;;  %11994 = vmatmul.mubr.bf16.gmra.mrb[132].mxu1 %v13510_v4  ;;  %v13738_v15 = vpack.c.bf16 %v16041_v12, %v16037_v2  ;;  %v21923_v30 = vadd.f32 %v13835_v16, %v11560_v48  ;;  %v13853_v38 = vpop.f32.mrb[97].mxu0 }
 0x5c5   :  { %v13739_v62 = vpack.c.bf16 %v16043_v8, %v16039_v18  ;;  %v13854_v13 = vadd.f32 %v13853_v38, %v13852_v57  ;;  %v13893_v3 = vpop.f32.mrb[97].mxu1  ;;  %v13855_v37 = vpop.f32.mrb[98].mxu0 }
 0x5c6   :  { %v10129_v45 = vmul.bf16 %v16134_v54, %v13738_v15  ;;  %v16045_v1 = vpop.eup %16044  ;;  %v13894_v14 = vadd.f32 %v13893_v3, %v13892_v61  ;;  %v13895_v42 = vpop.f32.mrb[98].mxu1 }
 0x5c7   :  { %v10130_v0 = vmul.bf16 %v16136_v58, %v13739_v62  ;;  %v13856_v28 = vpop.f32.mrb[99].mxu0  ;;  %v16047_v50 = vpop.eup %16046  ;;  %v9552_v34 = vadd.f32 1.0, %v16045_v1  ;;  %v11663_v20 = vadd.f32 %v13854_v13, %v21858_v22 }
 0x5c8   :  { %v13525_v19 = vcombine.high %v10121_v26, %v10129_v45  ;;  %v13524_v52 = vcombine.low %v10121_v26, %v10129_v45  ;;  %v13896_v51 = vpop.f32.mrb[99].mxu1  ;;  %v16049_v6 = vpop.eup %16048  ;;  %v9554_v32 = vadd.f32 1.0, %v16047_v50  ;;  %v13857_v40 = vadd.f32 %v13856_v28, %v13855_v37 }
 0x5c9   :  { %v13527_v5 = vcombine.high %v10122_v55, %v10130_v0  ;;  %v13526_v56 = vcombine.low %v10122_v55, %v10130_v0  ;;  %v16051_v44 = vpop.eup %16050  ;;  %16060 = vrcp.f32 %v9552_v34  ;;  %v9567_v31 = vadd.f32 1.0, %v16049_v6 }
 0x5ca   :  { %11936 = vmatprep.mubr.bf16.mxu0 %v13525_v19  ;;  %v21938_v25 = vadd.f32 %v13894_v14, %v11663_v20  ;;  %v13897_v46 = vadd.f32 %v13896_v51, %v13895_v42  ;;  %v16053_v60 = vpop.eup %16052  ;;  %16062 = vrcp.f32 %v9554_v32  ;;  %v9569_v29 = vadd.f32 1.0, %v16051_v44  ;;  %v13858_v53 = vpop.f32.mrb[100].mxu0  ;;  %v16137_v51 = vld [vmem:[%s22086_s0 + $0x1b0] sm:$0xff] }
 0x5cb   :  { %12001 = vmatprep.mubr.bf16.mxu1 %v13527_v5  ;;  %11937 = vmatmul.mubr.bf16.gmra.mrb[136].mxu0 %v13524_v52  ;;  %v11666_v22 = vadd.f32 %v13857_v40, %v21869_v49  ;;  %v16055_v63 = vpop.eup %16054  ;;  %16064 = vrcp.f32 %v9567_v31  ;;  %v9568_v33 = vadd.f32 1.0, %v16053_v60  ;;  %v13898_v24 = vpop.f32.mrb[100].mxu1  ;;  %v16138_v32 = vld [vmem:[%s22086_s0 + $0x1f0] sm:$0xff]  ;;  %v16139_v5 = vld [vmem:[%s22086_s0 + $0x1b8] sm:$0xff] }
 0x5cc   :  { %12002 = vmatmul.mubr.bf16.gmra.mrb[136].mxu1 %v13526_v56  ;;  %16066 = vrcp.f32 %v9569_v29  ;;  %v9570_v41 = vadd.f32 1.0, %v16055_v63  ;;  %v13859_v39 = vpop.f32.mrb[101].mxu0  ;;  %v13899_v2 = vpop.f32.mrb[101].mxu1  ;;  %v16140_v40 = vld [vmem:[%s22086_s0 + $0x1f8] sm:$0xff] }
 0x5cd   :  { %v21941_v21 = vadd.f32 %v13897_v46, %v11666_v22  ;;  %16068 = vrcp.f32 %v9568_v33  ;;  %v13860_v36 = vadd.f32 %v13859_v39, %v13858_v53  ;;  %v13861_v23 = vpop.f32.mrb[102].mxu0  ;;  %v13900_v4 = vadd.f32 %v13899_v2, %v13898_v24  ;;  %v13901_v9 = vpop.f32.mrb[102].mxu1 }
 0x5ce   :  { %16070 = vrcp.f32 %v9570_v41  ;;  %v13862_v18 = vpop.f32.mrb[103].mxu0  ;;  %v16057_v49 = vpop.eup %16056 }
 0x5cf   :  { %v11671_v43 = vadd.f32 %v13860_v36, %v21881_v10  ;;  %v13863_v48 = vadd.f32 %v13862_v18, %v13861_v23  ;;  %v13902_v12 = vpop.f32.mrb[103].mxu1  ;;  %v16059_v11 = vpop.eup %16058 }
 0x5d0   :  { %v13903_v16 = vadd.f32 %v13902_v12, %v13901_v9 }
 0x5d1   :  { %v21944_v8 = vadd.f32 %v13900_v4, %v11671_v43  ;;  %v11674_v15 = vadd.f32 %v13863_v48, %v21890_v47 }
 0x5d2   :  { %v13864_v61 = vpop.f32.mrb[104].mxu0 }
 0x5d3   :  { %v16061_v57 = vpop.eup %16060  ;;  %v21947_v62 = vadd.f32 %v13903_v16, %v11674_v15  ;;  %v13904_v26 = vpop.f32.mrb[104].mxu1 }
 0x5d4   :  { %v16063_v38 = vpop.eup %16062  ;;  %v13746_v35 = vpack.c.bf16 %v16061_v57, %v16057_v49  ;;  %v13865_v54 = vpop.f32.mrb[105].mxu0 }
 0x5d5   :  { %v16065_v45 = vpop.eup %16064  ;;  %v13747_v13 = vpack.c.bf16 %v16063_v38, %v16059_v11  ;;  %v13866_v3 = vadd.f32 %v13865_v54, %v13864_v61  ;;  %v13905_v10 = vpop.f32.mrb[105].mxu1 }
 0x5d6   :  { %v13867_v37 = vpop.f32.mrb[106].mxu0  ;;  %v16067_v1 = vpop.eup %16066  ;;  %v13906_v17 = vadd.f32 %v13905_v10, %v13904_v26  ;;  %v10137_v6 = vmul.bf16 %v16137_v51, %v13746_v35 }
 0x5d7   :  { %v13907_v55 = vpop.f32.mrb[106].mxu1  ;;  %v13868_v58 = vpop.f32.mrb[107].mxu0  ;;  %v11679_v47 = vadd.f32 %v13866_v3, %v21895_v59  ;;  %v10138_v56 = vmul.bf16 %v16139_v5, %v13747_v13 }
 0x5d8   :  { %v16069_v0 = vpop.eup %16068  ;;  %v13869_v14 = vadd.f32 %v13868_v58, %v13867_v37  ;;  %v13908_v42 = vpop.f32.mrb[107].mxu1 }
 0x5d9   :  { %v16071_v28 = vpop.eup %16070  ;;  %v13754_v50 = vpack.c.bf16 %v16069_v0, %v16065_v45  ;;  %v13909_v34 = vadd.f32 %v13908_v42, %v13907_v55  ;;  %v21950_v52 = vadd.f32 %v13906_v17, %v11679_v47 }
 0x5da   :  { %v13755_v19 = vpack.c.bf16 %v16071_v28, %v16067_v1  ;;  %v11682_v20 = vadd.f32 %v13869_v14, %v21905_v7  ;;  %v13870_v31 = vpop.f32.mrb[108].mxu0 }
 0x5db   :  { %v10145_v59 = vmul.bf16 %v16138_v32, %v13754_v50  ;;  %v13910_v29 = vpop.f32.mrb[108].mxu1  ;;  %v13871_v22 = vpop.f32.mrb[109].mxu0 }
 0x5dc   :  { %v10146_v7 = vmul.bf16 %v16140_v40, %v13755_v19  ;;  %v21965_v44 = vadd.f32 %v13909_v34, %v11682_v20  ;;  %v13872_v53 = vadd.f32 %v13871_v22, %v13870_v31  ;;  %v13911_v41 = vpop.f32.mrb[109].mxu1  ;;  %v13873_v24 = vpop.f32.mrb[110].mxu0 }
 0x5dd   :  { %v13541_v46 = vcombine.high %v10137_v6, %v10145_v59  ;;  %v13540_v60 = vcombine.low %v10137_v6, %v10145_v59  ;;  %v13912_v39 = vadd.f32 %v13911_v41, %v13910_v29  ;;  %v13913_v36 = vpop.f32.mrb[110].mxu1  ;;  %v13874_v2 = vpop.f32.mrb[111].mxu0 }
 0x5de   :  { %v13543_v63 = vcombine.high %v10138_v56, %v10146_v7  ;;  %v13542_v33 = vcombine.low %v10138_v56, %v10146_v7  ;;  %v11687_v23 = vadd.f32 %v13872_v53, %v21920_v27  ;;  %v13875_v4 = vadd.f32 %v13874_v2, %v13873_v24  ;;  %v13914_v9 = vpop.f32.mrb[111].mxu1 }
 0x5df   :  { %11944 = vmatprep.mubr.bf16.mxu0 %v13541_v46  ;;  %v13915_v18 = vadd.f32 %v13914_v9, %v13913_v36  ;;  %v16141_v53 = vmov 0.0  }
 0x5e0   :  { %12009 = vmatprep.mubr.bf16.mxu1 %v13543_v63  ;;  %11945 = vmatmul.mubr.bf16.gmra.mrb[140].mxu0 %v13540_v60  ;;  %v21968_v49 = vadd.f32 %v13912_v39, %v11687_v23  ;;  %v11690_v43 = vadd.f32 %v13875_v4, %v21923_v30 }
 0x5e1   :  { %12010 = vmatmul.mubr.bf16.gmra.mrb[140].mxu1 %v13542_v33  ;;  %v15544_v33 = vld [vmem:[%s22092_s7] sm:$0xff]   ;;  %14114 = vmatprep.subr.bf16.mxu1 %v16141_v53 }
 0x5e2   :  { %v21971_v48 = vadd.f32 %v13915_v18, %v11690_v43  ;;  %14094 = vmatprep.subr.bf16.mxu0 %v16141_v53  ;;  %14115 = vmatpush3.bf16.msra.mxu1 %v15544_v33 }
 0x5e3   :  { %14116 = vmatprep.subr.bf16.mxu1 %v16141_v53  ;;  %14130 = vmatprep.mubr.msk.bf16.mxu1 %vm16142_vm0, %v16141_v53 }
 0x5e4   :  { %14110 = vmatprep.mubr.msk.bf16.mxu0 %vm16142_vm0, %v16141_v53 }
 0x5fb   :  { %v13932_v12 = vpop.f32.mrb[112].mxu0 }
 0x5fc   :  { %v13933_v11 = vpop.f32.mrb[113].mxu0  ;;  %v13972_v16 = vpop.f32.mrb[112].mxu1 }
 0x5fd   :  { %v13934_v15 = vadd.f32 %v13933_v11, %v13932_v12  ;;  %v13935_v57 = vpop.f32.mrb[114].mxu0  ;;  %v13973_v61 = vpop.f32.mrb[113].mxu1 }
 0x5fe   :  { %v13936_v38 = vpop.f32.mrb[115].mxu0  ;;  %v13974_v27 = vadd.f32 %v13973_v61, %v13972_v16  ;;  %v13975_v26 = vpop.f32.mrb[114].mxu1  ;;  %v15546_v16 = vld [vmem:[%s22092_s7 + $0x40] sm:$0xff]  }
 0x5ff   :  { %v11793_v35 = vadd.f32 %v13934_v15, %v21938_v25  ;;  %v13937_v54 = vadd.f32 %v13936_v38, %v13935_v57  ;;  %v13976_v45 = vpop.f32.mrb[115].mxu1  ;;  %v15547_v15 = vld [vmem:[%s22092_s7 + $0x10] sm:$0xff]   ;;  %14095 = vmatpush3.bf16.msra.mxu0 %v15546_v16  ;;  %v15548_v38 = vld [vmem:[%s22092_s7 + $0x48] sm:$0xff]  }
 0x600   :  { %v13977_v30 = vadd.f32 %v13976_v45, %v13975_v26  ;;  %14096 = vmatprep.subr.bf16.mxu0 %v16141_v53  ;;  %v15552_v26 = vld [vmem:[%s22092_s7 + $0x58] sm:$0xff]   ;;  %v15554_v45 = vld [vmem:[%s22092_s7 + $0x60] sm:$0xff]  }
 0x601   :  { %v21974_v13 = vadd.f32 %v13974_v27, %v11793_v35  ;;  %v11796_v3 = vadd.f32 %v13937_v54, %v21941_v21  ;;  %v15549_v35 = vld [vmem:[%s22092_s7 + $0x18] sm:$0xff]   ;;  %v15551_v27 = vld [vmem:[%s22092_s7 + $0x20] sm:$0xff]   ;;  %v15553_v54 = vld [vmem:[%s22092_s7 + $0x28] sm:$0xff]  }
 0x603   :  { %v21977_v10 = vadd.f32 %v13977_v30, %v11796_v3  ;;  %14097 = vmatpush3.bf16.msra.mxu0 %v15548_v38  ;;  %v15555_v3 = vld [vmem:[%s22092_s7 + $0x30] sm:$0xff]   ;;  %v15556_v30 = vld [vmem:[%s22092_s7 + $0x68] sm:$0xff]  }
 0x604   :  { %14098 = vmatprep.subr.bf16.mxu0 %v16141_v53 }
 0x610   :  { %v13938_v37 = vpop.f32.mrb[116].mxu0 }
 0x611   :  { %v13978_v1 = vpop.f32.mrb[116].mxu1  ;;  %v13939_v17 = vpop.f32.mrb[117].mxu0 }
 0x612   :  { %v13940_v55 = vadd.f32 %v13939_v17, %v13938_v37  ;;  %v13979_v58 = vpop.f32.mrb[117].mxu1  ;;  %v13941_v0 = vpop.f32.mrb[118].mxu0  ;;  %v15557_v37 = vld [vmem:[%s22092_s7 + $0x38] sm:$0xff]  }
 0x613   :  { %v13980_v47 = vadd.f32 %v13979_v58, %v13978_v1  ;;  %v13981_v14 = vpop.f32.mrb[118].mxu1  ;;  %v13942_v25 = vpop.f32.mrb[119].mxu0  ;;  %v15558_v1 = vld [vmem:[%s22092_s7 + $0x70] sm:$0xff]   ;;  %v15559_v17 = vld [vmem:[%s22092_s7 + $0x78] sm:$0xff]  }
 0x614   :  { %v11801_v42 = vadd.f32 %v13940_v55, %v21944_v8  ;;  %v13943_v28 = vadd.f32 %v13942_v25, %v13941_v0  ;;  %v13982_v50 = vpop.f32.mrb[119].mxu1 }
 0x615   :  { %v13983_v34 = vadd.f32 %v13982_v50, %v13981_v14 }
 0x616   :  { %v21980_v19 = vadd.f32 %v13980_v47, %v11801_v42  ;;  %v11804_v21 = vadd.f32 %v13943_v28, %v21947_v62 }
 0x618   :  { %v21983_v20 = vadd.f32 %v13983_v34, %v11804_v21  ;;  %v13944_v51 = vpop.f32.mrb[120].mxu0 }
 0x619   :  { %v13984_v6 = vpop.f32.mrb[120].mxu1  ;;  %v13945_v32 = vpop.f32.mrb[121].mxu0 }
 0x61a   :  { %v13946_v59 = vadd.f32 %v13945_v32, %v13944_v51  ;;  %v13985_v5 = vpop.f32.mrb[121].mxu1  ;;  %v13947_v56 = vpop.f32.mrb[122].mxu0 }
 0x61b   :  { %v13986_v40 = vadd.f32 %v13985_v5, %v13984_v6  ;;  %v13987_v7 = vpop.f32.mrb[122].mxu1  ;;  %v13948_v31 = vpop.f32.mrb[123].mxu0 }
 0x61c   :  { %v11809_v8 = vadd.f32 %v13946_v59, %v21950_v52  ;;  %v13949_v46 = vadd.f32 %v13948_v31, %v13947_v56  ;;  %v13988_v60 = vpop.f32.mrb[123].mxu1 }
 0x61d   :  { %v13989_v29 = vadd.f32 %v13988_v60, %v13987_v7 }
 0x61e   :  { %v21986_v22 = vadd.f32 %v13986_v40, %v11809_v8  ;;  %v11812_v62 = vadd.f32 %v13949_v46, %v21965_v44  ;;  %v15545_v44 = vld [vmem:[%s22092_s7 + $0x8] sm:$0xff]  }
 0x61f   :  { %14117 = vmatpush3.bf16.msra.mxu1 %v15545_v44 }
 0x620   :  { %v21989_v63 = vadd.f32 %v13989_v29, %v11812_v62  ;;  %14118 = vmatprep.subr.bf16.mxu1 %v16141_v53 }
 0x623   :  { %14119 = vmatpush3.bf16.msra.mxu1 %v15547_v15 }
 0x624   :  { %14120 = vmatprep.subr.bf16.mxu1 %v16141_v53 }
 0x627   :  { %14121 = vmatpush3.bf16.msra.mxu1 %v15549_v35 }
 0x628   :  { %14122 = vmatprep.subr.bf16.mxu1 %v16141_v53 }
 0x62b   :  { %v13950_v52 = vpop.f32.mrb[124].mxu0  ;;  %14123 = vmatpush3.bf16.msra.mxu1 %v15551_v27 }
 0x62c   :  { %v13990_v41 = vpop.f32.mrb[124].mxu1  ;;  %v13951_v24 = vpop.f32.mrb[125].mxu0  ;;  %14124 = vmatprep.subr.bf16.mxu1 %v16141_v53 }
 0x62d   :  { %v13952_v39 = vadd.f32 %v13951_v24, %v13950_v52  ;;  %v13991_v36 = vpop.f32.mrb[125].mxu1  ;;  %v13953_v2 = vpop.f32.mrb[126].mxu0 }
 0x62e   :  { %v13992_v23 = vadd.f32 %v13991_v36, %v13990_v41  ;;  %v13993_v4 = vpop.f32.mrb[126].mxu1  ;;  %v13954_v9 = vpop.f32.mrb[127].mxu0 }
 0x62f   :  { %v11817_v18 = vadd.f32 %v13952_v39, %v21968_v49  ;;  %v13955_v43 = vadd.f32 %v13954_v9, %v13953_v2  ;;  %v13994_v12 = vpop.f32.mrb[127].mxu1  ;;  %14125 = vmatpush3.bf16.msra.mxu1 %v15553_v54 }
 0x630   :  { %v13995_v11 = vadd.f32 %v13994_v12, %v13993_v4  ;;  %14126 = vmatprep.subr.bf16.mxu1 %v16141_v53 }
 0x631   :  { %v22008_v57 = vadd.f32 %v13992_v23, %v11817_v18  ;;  %v11820_v61 = vadd.f32 %v13955_v43, %v21971_v48  ;;  %v15550_v48 = vld [vmem:[%s22092_s7 + $0x50] sm:$0xff]  }
 0x632   :  { %14099 = vmatpush3.bf16.msra.mxu0 %v15550_v48 }
 0x633   :  { %v22011_v49 = vadd.f32 %v13995_v11, %v11820_v61  ;;  %14100 = vmatprep.subr.bf16.mxu0 %v16141_v53  ;;  %14127 = vmatpush3.bf16.msra.mxu1 %v15555_v3 }
 0x634   :  { %14128 = vmatprep.subr.bf16.mxu1 %v16141_v53 }
 0x636   :  { %14101 = vmatpush3.bf16.msra.mxu0 %v15552_v26 }
 0x637   :  { %14102 = vmatprep.subr.bf16.mxu0 %v16141_v53  ;;  %14129 = vmatpush3.bf16.msra.mxu1 %v15557_v37 }
 0x63a   :  { %14103 = vmatpush3.bf16.msra.mxu0 %v15554_v45 }
 0x63b   :  { %14104 = vmatprep.subr.bf16.mxu0 %v16141_v53 }
 0x63e   :  { %14105 = vmatpush3.bf16.msra.mxu0 %v15556_v30 }
 0x63f   :  { %14106 = vmatprep.subr.bf16.mxu0 %v16141_v53 }
 0x642   :  { %14107 = vmatpush3.bf16.msra.mxu0 %v15558_v1 }
 0x643   :  { %14108 = vmatprep.subr.bf16.mxu0 %v16141_v53 }
 0x646   :  { %14109 = vmatpush3.bf16.msra.mxu0 %v15559_v17 }
 0x681   :  { %v14012_v55 = vpop.f32.mrb[128].mxu0 }
 0x682   :  { %v14052_v58 = vpop.f32.mrb[128].mxu1  ;;  %v14013_v0 = vpop.f32.mrb[129].mxu0 }
 0x683   :  { %v14014_v47 = vadd.f32 %v14013_v0, %v14012_v55  ;;  %v14053_v14 = vpop.f32.mrb[129].mxu1  ;;  %v14015_v25 = vpop.f32.mrb[130].mxu0 }
 0x684   :  { %v14054_v42 = vadd.f32 %v14053_v14, %v14052_v58  ;;  %v14055_v28 = vpop.f32.mrb[130].mxu1  ;;  %v14016_v50 = vpop.f32.mrb[131].mxu0 }
 0x685   :  { %v11923_v34 = vadd.f32 %v14014_v47, %v21974_v13  ;;  %v14017_v21 = vadd.f32 %v14016_v50, %v14015_v25  ;;  %v14056_v51 = vpop.f32.mrb[131].mxu1 }
 0x686   :  { %v14057_v6 = vadd.f32 %v14056_v51, %v14055_v28 }
 0x687   :  { %v11988_v32 = vadd.f32 %v14054_v42, %v11923_v34  ;;  %v11926_v59 = vadd.f32 %v14017_v21, %v21977_v10 }
 0x689   :  { %v11991_v5 = vadd.f32 %v14057_v6, %v11926_v59  ;;  %v12018_v56 = vmax.f32 %v11988_v32, 0.0 }
 0x68b   :  { %v12019_v40 = vmax.f32 %v11991_v5, 0.0 }
 0x68d   :  { %v12026_v7 = vadd.f32 %v12019_v40, %v12018_v56 }
 0x68f   :  { %v12027_v39 = vrot.slane %v12026_v7, 4 }
 0x691   :  { %v12028_v18 = vadd.f32 %v12027_v39, %v12026_v7 }
 0x696   :  { %v14018_v31 = vpop.f32.mrb[132].mxu0 }
 0x697   :  { %v14058_v8 = vpop.f32.mrb[132].mxu1  ;;  %v14019_v46 = vpop.f32.mrb[133].mxu0 }
 0x698   :  { %v14020_v60 = vadd.f32 %v14019_v46, %v14018_v31  ;;  %v14059_v29 = vpop.f32.mrb[133].mxu1  ;;  %v14021_v62 = vpop.f32.mrb[134].mxu0 }
 0x699   :  { %v14060_v33 = vadd.f32 %v14059_v29, %v14058_v8  ;;  %v14061_v53 = vpop.f32.mrb[134].mxu1  ;;  %v14022_v52 = vpop.f32.mrb[135].mxu0 }
 0x69a   :  { %v11931_v13 = vadd.f32 %v14020_v60, %v21980_v19  ;;  %v14023_v41 = vadd.f32 %v14022_v52, %v14021_v62  ;;  %v14062_v24 = vpop.f32.mrb[135].mxu1 }
 0x69b   :  { %v14063_v44 = vadd.f32 %v14062_v24, %v14061_v53 }
 0x69c   :  { %v11996_v10 = vadd.f32 %v14060_v33, %v11931_v13  ;;  %v11934_v36 = vadd.f32 %v14023_v41, %v21983_v20  ;;  %v12029_v20 = vrot.slane %v12028_v18, 2 }
 0x69e   :  { %v11999_v2 = vadd.f32 %v14063_v44, %v11934_v36  ;;  %v14024_v23 = vpop.f32.mrb[136].mxu0  ;;  %v12020_v43 = vmax.f32 %v11996_v10, 0.0  ;;  %v12030_v37 = vadd.f32 %v12029_v20, %v12028_v18 }
 0x69f   :  { %v14064_v4 = vpop.f32.mrb[136].mxu1  ;;  %v14025_v9 = vpop.f32.mrb[137].mxu0 }
 0x6a0   :  { %v12021_v12 = vmax.f32 %v11999_v2, 0.0  ;;  %v14026_v11 = vadd.f32 %v14025_v9, %v14024_v23  ;;  %v14065_v16 = vpop.f32.mrb[137].mxu1  ;;  %v14027_v15 = vpop.f32.mrb[138].mxu0  ;;  %v12031_v58 = vrot.slane %v12030_v37, 1 }
 0x6a1   :  { %v14066_v61 = vadd.f32 %v14065_v16, %v14064_v4  ;;  %v14067_v38 = vpop.f32.mrb[138].mxu1  ;;  %v14028_v19 = vpop.f32.mrb[139].mxu0 }
 0x6a2   :  { %v12033_v35 = vadd.f32 %v12021_v12, %v12020_v43  ;;  %v11939_v48 = vadd.f32 %v14026_v11, %v21986_v22  ;;  %v14029_v27 = vadd.f32 %v14028_v19, %v14027_v15  ;;  %v14068_v26 = vpop.f32.mrb[139].mxu1  ;;  %v12032_v14 = vadd.f32 %v12031_v58, %v12030_v37 }
 0x6a3   :  { %v14069_v54 = vadd.f32 %v14068_v26, %v14067_v38 }
 0x6a4   :  { %v12004_v45 = vadd.f32 %v14066_v61, %v11939_v48  ;;  %v11942_v3 = vadd.f32 %v14029_v27, %v21989_v63  ;;  %v12034_v42 = vrot.slane %v12033_v35, 4  ;;  %v12055_v50 = vmul.f32 0.0625, %v12032_v14  ;;  %v13689_v14 = vld [vmem:[%s22095_s9] ss:$0 sm:$0xff] }
 0x6a6   :  { %v12007_v30 = vadd.f32 %v14069_v54, %v11942_v3  ;;  %v12022_v1 = vmax.f32 %v12004_v45, 0.0  ;;  %v12035_v6 = vadd.f32 %v12034_v42, %v12033_v35  ;;  %v12059_v60 = vpack.c.bf16 %v12055_v50, %v12055_v50 }
 0x6a7   :  { %v16_v54 = vstv %s22093_s10 }
 0x6a8   :  { %v12023_v17 = vmax.f32 %v12007_v30, 0.0  ;;  %v12036_v33 = vrot.slane %v12035_v6, 2  ;;  %v12193_v24 = vunpack.c.l.b16 %v12059_v60  ;;  %17 = vst [vmem:[#allocation2] sm:$0x1] %v16_v54 }
 0x6aa   :  { %v12040_v55 = vadd.f32 %v12023_v17, %v12022_v1  ;;  %v12037_v39 = vadd.f32 %v12036_v33, %v12035_v6  ;;  %v13688_v1 = vld [vmem:[%s22094_s8] ss:$0 sm:$0xff] }
 0x6ac   :  { %v12041_v0 = vrot.slane %v12040_v55, 4  ;;  %v12038_v4 = vrot.slane %v12037_v39, 1 }
 0x6ae   :  { %v12042_v47 = vadd.f32 %v12041_v0, %v12040_v55  ;;  %v12039_v43 = vadd.f32 %v12038_v4, %v12037_v39 }
 0x6b0   :  { %v12043_v25 = vrot.slane %v12042_v47, 2 }
 0x6b2   :  { %v12044_v28 = vadd.f32 %v12043_v25, %v12042_v47 }
 0x6b3   :  { %v14030_v22 = vpop.f32.mrb[140].mxu0 }
 0x6b4   :  { %v12045_v34 = vrot.slane %v12044_v28, 1  ;;  %v14070_v21 = vpop.f32.mrb[140].mxu1  ;;  %v14031_v51 = vpop.f32.mrb[141].mxu0 }
 0x6b5   :  { %v14032_v32 = vadd.f32 %v14031_v51, %v14030_v22  ;;  %v14071_v63 = vpop.f32.mrb[141].mxu1  ;;  %v14033_v59 = vpop.f32.mrb[142].mxu0  ;;  %v13690_v22 = vld [vmem:[#allocation2] ss:$0 sm:$0xff] }
 0x6b6   :  { %v12046_v5 = vadd.f32 %v12045_v34, %v12044_v28  ;;  %v14072_v56 = vadd.f32 %v14071_v63, %v14070_v21  ;;  %v14073_v40 = vpop.f32.mrb[142].mxu1  ;;  %v14034_v7 = vpop.f32.mrb[143].mxu0 }
 0x6b7   :  { %v11947_v31 = vadd.f32 %v14032_v32, %v22008_v57  ;;  %v14035_v8 = vadd.f32 %v14034_v7, %v14033_v59  ;;  %v14074_v46 = vpop.f32.mrb[143].mxu1 }
 0x6b8   :  { %v12057_v29 = vmul.f32 0.0625, %v12046_v5  ;;  %v14075_v62 = vadd.f32 %v14074_v46, %v14073_v40 }
 0x6b9   :  { %v12012_v53 = vadd.f32 %v14072_v56, %v11947_v31  ;;  %v11950_v52 = vadd.f32 %v14035_v8, %v22011_v49  ;;  %v12056_v49 = vmul.f32 0.0625, %v12039_v43 }
 0x6ba   :  { %v12060_v13 = vpack.c.bf16 %v12057_v29, %v12057_v29 }
 0x6bb   :  { %v12015_v41 = vadd.f32 %v14075_v62, %v11950_v52  ;;  %v12024_v10 = vmax.f32 %v12012_v53, 0.0  ;;  %v12077_v61 = vpack.c.bf16 %v12056_v49, %v12056_v49 }
 0x6bc   :  { %v12194_v44 = vunpack.c.l.b16 %v12060_v13 }
 0x6bd   :  { %v12025_v36 = vmax.f32 %v12015_v41, 0.0  ;;  %v12097_v35 = vunpack.c.l.b16 %v12077_v61 }
 0x6be   :  { %v12195_v2 = vsel %vm12099_vm1, %v12194_v44, %v12193_v24 }
 0x6bf   :  { %v12047_v57 = vadd.f32 %v12025_v36, %v12024_v10  ;;  %v12196_v23 = vpack.c.b16 %v12195_v2, %v12195_v2 }
 0x6c1   :  { %v12048_v9 = vrot.slane %v12047_v57, 4  ;;  %14131 = vmatmul.mubr.bf16.vlgmr.msra.gmra.mrb[144].mxu1 %v12196_v23 }
 0x6c3   :  { %v12049_v18 = vadd.f32 %v12048_v9, %v12047_v57 }
 0x6c5   :  { %v12050_v12 = vrot.slane %v12049_v18, 2 }
 0x6c7   :  { %v12051_v11 = vadd.f32 %v12050_v12, %v12049_v18 }
 0x6c9   :  { %v12052_v16 = vrot.slane %v12051_v11, 1 }
 0x6cb   :  { %v12053_v15 = vadd.f32 %v12052_v16, %v12051_v11 }
 0x6cd   :  { %v12058_v38 = vmul.f32 0.0625, %v12053_v15 }
 0x6cf   :  { %v12078_v19 = vpack.c.bf16 %v12058_v38, %v12058_v38 }
 0x6d1   :  { %v12098_v48 = vunpack.c.l.b16 %v12078_v19 }
 0x6d3   :  { %v12100_v27 = vsel %vm12099_vm1, %v12098_v48, %v12097_v35 }
 0x6d4   :  { %v12101_v26 = vpack.c.b16 %v12100_v27, %v12100_v27 }
 0x6d6   :  { %14111 = vmatmul.mubr.bf16.vlgmr.msra.gmra.mrb[144].mxu0 %v12101_v26 }
 0x794   :  { %v12280_v20 = vpop.f32.mrb[144].mxu1 }
 0x795   :  { %v14132_v45 = vpop.f32.mrb[145].mxu1 }
 0x796   :  { %v12283_v3 = vpop.f32.mrb[146].mxu1 }
 0x797   :  { %v14133_v30 = vpop.f32.mrb[147].mxu1 }
 0x7a9   :  { %v12185_v37 = vpop.f32.mrb[144].mxu0 }
 0x7aa   :  { %v12281_v17 = vadd.f32 %v12280_v20, %v12185_v37  ;;  %v14112_v55 = vpop.f32.mrb[145].mxu0 }
 0x7ab   :  { %v12188_v58 = vpop.f32.mrb[146].mxu0 }
 0x7ac   :  { %v12293_v0 = vadd.f32 %v13688_v1, %v12281_v17  ;;  %v14113_v47 = vpop.f32.mrb[147].mxu0 }
 0x7ae   :  { %v12294_v25 = vmax.f32 %v12293_v0, 0.0 }
 0x7b0   :  { %v12302_v42 = vmul.f32 %v13689_v14, %v12294_v25 }
 0x7b2   :  { %v12304_v28 = vsel %vm12303_vm2, %v12302_v42, 0.0 }
 0x7b3   :  { %12305 = vadd.xlane.f32.xlu0 %v12304_v28 }
 0x840   :  { %v12306_v50 = vpop.xlane.xlu0 %12305 }
 0x841   :  { %v12314_v34 = vadd.f32 %v13690_v22, %v12306_v50 }
 0x843   :  { %v13691_v21 = vmul.f32 -1.442695, %v12314_v34 }
 0x845   :  { %16072 = vpow2.f32 %v13691_v21 }
 0x84f   :  { %v16073_v51 = vpop.eup %16072 }
 0x850   :  { %v12318_v6 = vadd.f32 1.0, %v16073_v51 }
 0x852   :  { %16074 = vrcp.f32 %v12318_v6 }
 0x85c   :  { %v16075_v32 = vpop.eup %16074 }
 0x85d   :  { %12322 = vst.msk [vmem:[%s22096_s11] sm:$0x3] %vm12321_vm3, %v16075_v32 }

</bundles_post_ra>
